<compile_context>
chip_gen: v7x
topology: tpu7x:2x2x1
jax: 0.10.0
libtpu: 0.0.40
codegen_flags: <defaults>
</compile_context>

<pallas_src>
import functools

import numpy as np

import jax
import jax.numpy as jnp
from jax.experimental import pallas as pl
from jax.experimental.pallas import tpu as pltpu


# ---------------------------------------------------------------------------
# Host-side constant builders (trace-time only; depend on static shapes).
# ---------------------------------------------------------------------------
def _reflect_index(i, n):
    """PyTorch 'reflect' (edge-excluded) index fold into [0, n)."""
    i = np.where(i < 0, -i, i)
    return np.where(i > n - 1, 2 * (n - 1) - i, i)


def _gather_mats(h_in, w_in, h_out, w_out, k, upsample):
    """One-hot (K*K, h_in*w_in, h_out*w_out) gather matrices.

    G[kk, s_src, s_dst] = 1 where s_src is the reflect-padded, (kh,kw)-shifted
    (and, if `upsample`, nearest-2x down-mapped) source pixel that feeds output
    pixel s_dst.  A conv tap then becomes `(v @ G[kk])` on a (C, S) slab.
    """
    p = k // 2
    s_in, s_out = h_in * w_in, h_out * w_out
    ys, xs = np.meshgrid(np.arange(h_out), np.arange(w_out), indexing="ij")
    dst = (ys * w_out + xs).reshape(-1)
    g = np.zeros((k * k, s_in, s_out), np.float32)
    for kh in range(k):
        for kw in range(k):
            ry = _reflect_index(ys + kh - p, h_out)
            rx = _reflect_index(xs + kw - p, w_out)
            if upsample:                      # fused nearest-2x upsample
                ry, rx = ry // 2, rx // 2
            src = (ry * w_in + rx).reshape(-1)
            g[kh * k + kw, src, dst] = 1.0
    return jnp.asarray(g)


def _w_kkoi(w_hwio):
    """HWIO (K, K, Cin, Cout) -> (K*K, Cout, Cin)."""
    k1, k2, _, co = w_hwio.shape
    return jnp.transpose(w_hwio, (0, 1, 3, 2)).reshape(k1 * k2, co, -1)


# ---------------------------------------------------------------------------
# Fused DecoderBlock kernel (one batch element per grid step).
# ---------------------------------------------------------------------------
def _decoder_block_kernel(x_ref, skip_ref,
                          rb_w_ref, rb_b_ref,
                          up_w_ref, up_b_ref,
                          m1_wa_ref, m1_wb_ref, m1_b_ref,
                          m2_wa_ref, m2_wb_ref, m2_b_ref,
                          g1_ref, gu_ref, g2_ref,
                          o_ref, *, K, width, cout):
    KK = K * K

    def conv_relu(parts, bias, g_ref, co):
        """Reflect-padded KxK conv + bias + ReLU on lane-dense (C, S) slabs.

        parts : list of (w_ref (KK, co, ci), v (ci, S_in)) input-channel groups
        bias  : (co, 1) value (folded into the accumulator init)
        g_ref : (KK, S_in, S_out) one-hot shift/gather matrices
        """
        s_out = g_ref.shape[-1]
        acc = jnp.broadcast_to(bias, (co, s_out))
        for kk in range(KK):
            g_kk = g_ref[kk]                                    # (S_in, S_out)
            y = None
            for w_ref, v in parts:
                shifted = jnp.dot(v, g_kk,
                                  preferred_element_type=jnp.float32)
                t = jnp.dot(w_ref[kk], shifted,
                            preferred_element_type=jnp.float32)  # (co, S_out)
                y = t if y is None else y + t
            acc = acc + y
        return jnp.maximum(acc, 0.0)

    x = x_ref[0]              # (Cin,  S1) f32
    skip = skip_ref[0]        # (Cout, S2) f32
    cin = x.shape[0]

    # ResBlock(in_channels, n_convs=width): ONE shared conv applied `width`
    # times (torch `[Conv(...)] * n_convs`), then the residual add.
    h = x
    for _ in range(width):
        h = conv_relu([(rb_w_ref, h)], rb_b_ref[...], g1_ref, cin)
    x = x + h

    # Resampling 'up': nearest 2x upsample fused into the up-conv's gather
    # matrices (gu maps H*W -> (2H)*(2W)), then Conv(in->out) + ReLU.
    x = conv_relu([(up_w_ref, x)], up_b_ref[...], gu_ref, cout)     # (Cout, S2)

    # Merge: concat([skip, x], channels) realized by splitting the conv weights
    # by input-channel group (exact, no concatenate op needed).
    r = conv_relu([(m1_wa_ref, skip), (m1_wb_ref, x)],
                  m1_b_ref[...], g2_ref, 2 * cout)                  # (2Cout, S2)
    c_skip = skip + r[:cout, :]
    c_x = x + r[cout:, :]
    out = conv_relu([(m2_wa_ref, c_skip), (m2_wb_ref, c_x)],
                    m2_b_ref[...], g2_ref, cout)                    # (Cout, S2)

    o_ref[0] = out.astype(o_ref.dtype)


def decoder_block_forward(x_nchw, skip_nchw, params, width):
    """Exact DecoderBlock forward. Inputs/outputs are NCHW (like PyTorch)."""
    N, cin, H, W = x_nchw.shape
    _, cout, H2, W2 = skip_nchw.shape
    assert (H2, W2) == (2 * H, 2 * W), "skip must be 2x the spatial size of x"
    K = params["rb_w"].shape[0]
    KK = K * K
    S1, S2 = H * W, H2 * W2

    # Flatten spatial (free, row-major) so the lane dim carries H*W.
    x_flat = x_nchw.reshape(N, cin, S1)
    skip_flat = skip_nchw.reshape(N, cout, S2)

    # Gather (reflect-pad shift / fused-upsample) matrices -- compile-time
    # constants.
    g1 = _gather_mats(H, W, H, W, K, upsample=False)        # (KK, S1, S1)
    gu = _gather_mats(H, W, H2, W2, K, upsample=True)       # (KK, S1, S2)
    g2 = _gather_mats(H2, W2, H2, W2, K, upsample=False)    # (KK, S2, S2)

    # Pre-reshape weights once; split merge weights by input-channel group
    # ([skip, x] concat order).
    rb_w = _w_kkoi(params["rb_w"])                           # (KK, Cin,  Cin)
    up_w = _w_kkoi(params["up_w"])                           # (KK, Cout, Cin)
    m1_w = _w_kkoi(params["m1_w"])                           # (KK, 2Co, 2Co)
    m2_w = _w_kkoi(params["m2_w"])                           # (KK, Co,  2Co)
    m1_wa, m1_wb = m1_w[..., :cout], m1_w[..., cout:]
    m2_wa, m2_wb = m2_w[..., :cout], m2_w[..., cout:]
    rb_b = params["rb_b"].reshape(cin, 1)
    up_b = params["up_b"].reshape(cout, 1)
    m1_b = params["m1_b"].reshape(2 * cout, 1)
    m2_b = params["m2_b"].reshape(cout, 1)

    def full_spec(shape):
        zeros = (0,) * len(shape)
        return pl.BlockSpec(shape, lambda n, _z=zeros: _z)

    in_specs = [
        pl.BlockSpec((1, cin, S1), lambda n: (n, 0, 0)),     # x
        pl.BlockSpec((1, cout, S2), lambda n: (n, 0, 0)),    # skip
        full_spec((KK, cin, cin)),                           # rb_w
        full_spec((cin, 1)),                                 # rb_b
        full_spec((KK, cout, cin)),                          # up_w
        full_spec((cout, 1)),                                # up_b
        full_spec((KK, 2 * cout, cout)),                     # m1_wa
        full_spec((KK, 2 * cout, cout)),                     # m1_wb
        full_spec((2 * cout, 1)),                            # m1_b
        full_spec((KK, cout, cout)),                         # m2_wa
        full_spec((KK, cout, cout)),                         # m2_wb
        full_spec((cout, 1)),                                # m2_b
        full_spec((KK, S1, S1)),                             # g1
        full_spec((KK, S1, S2)),                             # gu
        full_spec((KK, S2, S2)),                             # g2
    ]

    operands = (x_flat, skip_flat, rb_w, rb_b, up_w, up_b,
                m1_wa, m1_wb, m1_b, m2_wa, m2_wb, m2_b, g1, gu, g2)

    macs = N * KK * (
        width * (cin * S1 * S1 + cin * cin * S1)             # ResBlock convs
        + (cin * S1 * S2 + cout * cin * S2)                  # upsample + up conv
        + (2 * cout * S2 * S2 + 4 * cout * cout * S2)        # merge res conv
        + (2 * cout * S2 * S2 + 2 * cout * cout * S2))       # merge out conv
    bytes_accessed = sum(int(a.size) * 4 for a in operands) + N * cout * S2 * 4
    cost = pl.CostEstimate(flops=2 * macs, transcendentals=0,
                           bytes_accessed=bytes_accessed)

    kernel = functools.partial(_decoder_block_kernel,
                               K=K, width=width, cout=cout)
    out_flat = pl.pallas_call(
        kernel,
        out_shape=jax.ShapeDtypeStruct((N, cout, S2), x_nchw.dtype),
        grid=(N,),
        in_specs=in_specs,
        out_specs=pl.BlockSpec((1, cout, S2), lambda n: (n, 0, 0)),
        compiler_params=pltpu.CompilerParams(
            dimension_semantics=("parallel",)),
        cost_estimate=cost,
    )(*operands)

    return out_flat.reshape(N, cout, H2, W2)


def init_params(key, in_channels, out_channels, kernel_size):
    """Deterministic synthetic parameters (HWIO layout for weights)."""
    K = kernel_size
    ks = jax.random.split(key, 8)
    s = 0.1
    return {
        "rb_w": jax.random.normal(ks[0], (K, K, in_channels, in_channels),
                                  jnp.float32) * s,
        "rb_b": jax.random.normal(ks[1], (in_channels,), jnp.float32) * s,
        "up_w": jax.random.normal(ks[2], (K, K, in_channels, out_channels),
                                  jnp.float32) * s,
        "up_b": jax.random.normal(ks[3], (out_channels,), jnp.float32) * s,
        "m1_w": jax.random.normal(ks[4], (K, K, 2 * out_channels,
                                          2 * out_channels), jnp.float32) * s,
        "m1_b": jax.random.normal(ks[5], (2 * out_channels,), jnp.float32) * s,
        "m2_w": jax.random.normal(ks[6], (K, K, 2 * out_channels,
                                          out_channels), jnp.float32) * s,
        "m2_b": jax.random.normal(ks[7], (out_channels,), jnp.float32) * s,
    }


# ---- pure-JAX reference (correctness check only) ---------------------------
def _conv_ref_nchw(x, w_hwio, b):
    p = w_hwio.shape[0] // 2
    xh = jnp.transpose(x, (0, 2, 3, 1))
    xp = jnp.pad(xh, ((0, 0), (p, p), (p, p), (0, 0)), mode="reflect")
    y = jax.lax.conv_general_dilated(
        xp, w_hwio, window_strides=(1, 1), padding="VALID",
        dimension_numbers=("NHWC", "HWIO", "NHWC"))
    y = jnp.maximum(y + b, 0.0)
    return jnp.transpose(y, (0, 3, 1, 2))


def _decoder_block_ref(x, skip, params, width):
    h = x
    for _ in range(width):
        h = _conv_ref_nchw(h, params["rb_w"], params["rb_b"])
    x = x + h
    x = jnp.repeat(jnp.repeat(x, 2, axis=2), 2, axis=3)   # nearest 2x, NCHW
    x = _conv_ref_nchw(x, params["up_w"], params["up_b"])
    c = jnp.concatenate([skip, x], axis=1)
    c = c + _conv_ref_nchw(c, params["m1_w"], params["m1_b"])
    return _conv_ref_nchw(c, params["m2_w"], params["m2_b"])


if __name__ == "__main__":
    # DecoderBlock(in=8, out=4, kernel_size=3, width=2):
    #   x:    (N, in_channels, H, W)     = (2, 8, 8, 8)
    #   skip: (N, out_channels, 2H, 2W)  = (2, 4, 16, 16)
    N, Cin, Cout, K, width = 2, 8, 4, 3, 2
    H = W = 8

    key = jax.random.PRNGKey(0)
    kx, kskip, kp = jax.random.split(key, 3)
    x = jax.random.normal(kx, (N, Cin, H, W), jnp.float32)
    skip = jax.random.normal(kskip, (N, Cout, 2 * H, 2 * W), jnp.float32)
    params = init_params(kp, Cin, Cout, K)

    fwd = jax.jit(functools.partial(decoder_block_forward, width=width))
    out = jax.block_until_ready(fwd(x, skip, params))

    ref = _decoder_block_ref(x, skip, params, width)
    assert out.shape == (N, Cout, 2 * H, 2 * W), out.shape
    assert jnp.allclose(out, ref, rtol=1e-2, atol=1e-2), \
        float(jnp.max(jnp.abs(out - ref)))

    print("KERNEL_OK")
</pallas_src>

<mosaic_0001>
module attributes {stable_mosaic.version = 11 : i64} {
  func.func @_decoder_block_kernel(%arg0: i32, %arg1: memref<1x8x64xf32, #tpu.memory_space<vmem>>, %arg2: memref<1x4x256xf32, #tpu.memory_space<vmem>>, %arg3: memref<9x8x8xf32, #tpu.memory_space<vmem>>, %arg4: memref<8x1xf32, #tpu.memory_space<vmem>>, %arg5: memref<9x4x8xf32, #tpu.memory_space<vmem>>, %arg6: memref<4x1xf32, #tpu.memory_space<vmem>>, %arg7: memref<9x8x4xf32, #tpu.memory_space<vmem>>, %arg8: memref<9x8x4xf32, #tpu.memory_space<vmem>>, %arg9: memref<8x1xf32, #tpu.memory_space<vmem>>, %arg10: memref<9x4x4xf32, #tpu.memory_space<vmem>>, %arg11: memref<9x4x4xf32, #tpu.memory_space<vmem>>, %arg12: memref<4x1xf32, #tpu.memory_space<vmem>>, %arg13: memref<9x64x64xf32, #tpu.memory_space<vmem>>, %arg14: memref<9x64x256xf32, #tpu.memory_space<vmem>>, %arg15: memref<9x256x256xf32, #tpu.memory_space<vmem>>, %arg16: memref<1x4x256xf32, #tpu.memory_space<vmem>>) attributes {dimension_semantics = [#tpu.dimension_semantics<parallel>], iteration_bounds = array<i64: 2>, scalar_prefetch = 0 : i64, scratch_operands = 0 : i64, tpu.core_type = #tpu.core_type<tc>, window_params = [{transform_indices = @transform_0, window_bounds = array<i64: 1, 8, 64>}, {transform_indices = @transform_1, window_bounds = array<i64: 1, 4, 256>}, {pipeline_mode = #tpu.pipeline_mode<synchronous>, transform_indices = @transform_2, window_bounds = array<i64: 9, 8, 8>}, {pipeline_mode = #tpu.pipeline_mode<synchronous>, transform_indices = @transform_3, window_bounds = array<i64: 8, 1>}, {pipeline_mode = #tpu.pipeline_mode<synchronous>, transform_indices = @transform_4, window_bounds = array<i64: 9, 4, 8>}, {pipeline_mode = #tpu.pipeline_mode<synchronous>, transform_indices = @transform_5, window_bounds = array<i64: 4, 1>}, {pipeline_mode = #tpu.pipeline_mode<synchronous>, transform_indices = @transform_6, window_bounds = array<i64: 9, 8, 4>}, {pipeline_mode = #tpu.pipeline_mode<synchronous>, transform_indices = @transform_7, window_bounds = array<i64: 9, 8, 4>}, {pipeline_mode = #tpu.pipeline_mode<synchronous>, transform_indices = @transform_8, window_bounds = array<i64: 8, 1>}, {pipeline_mode = #tpu.pipeline_mode<synchronous>, transform_indices = @transform_9, window_bounds = array<i64: 9, 4, 4>}, {pipeline_mode = #tpu.pipeline_mode<synchronous>, transform_indices = @transform_10, window_bounds = array<i64: 9, 4, 4>}, {pipeline_mode = #tpu.pipeline_mode<synchronous>, transform_indices = @transform_11, window_bounds = array<i64: 4, 1>}, {pipeline_mode = #tpu.pipeline_mode<synchronous>, transform_indices = @transform_12, window_bounds = array<i64: 9, 64, 64>}, {pipeline_mode = #tpu.pipeline_mode<synchronous>, transform_indices = @transform_13, window_bounds = array<i64: 9, 64, 256>}, {pipeline_mode = #tpu.pipeline_mode<synchronous>, transform_indices = @transform_14, window_bounds = array<i64: 9, 256, 256>}, {transform_indices = @transform_15, window_bounds = array<i64: 1, 4, 256>}]} {
    %c0 = arith.constant 0 : index
    %c0_0 = arith.constant 0 : index
    %c0_1 = arith.constant 0 : index
    %0 = vector.load %arg1[%c0, %c0_0, %c0_1] : memref<1x8x64xf32, #tpu.memory_space<vmem>>, vector<1x8x64xf32>
    %1 = vector.shape_cast %0 : vector<1x8x64xf32> to vector<8x64xf32>
    %c0_2 = arith.constant 0 : index
    %c0_3 = arith.constant 0 : index
    %c0_4 = arith.constant 0 : index
    %2 = vector.load %arg2[%c0_2, %c0_3, %c0_4] : memref<1x4x256xf32, #tpu.memory_space<vmem>>, vector<1x4x256xf32>
    %3 = vector.shape_cast %2 : vector<1x4x256xf32> to vector<4x256xf32>
    %c0_5 = arith.constant 0 : index
    %c0_6 = arith.constant 0 : index
    %4 = vector.load %arg4[%c0_5, %c0_6] : memref<8x1xf32, #tpu.memory_space<vmem>>, vector<8x1xf32>
    %5 = vector.shape_cast %4 : vector<8x1xf32> to vector<8x1xf32>
    %6 = vector.broadcast %5 : vector<8x1xf32> to vector<8x64xf32>
    %c0_7 = arith.constant 0 : index
    %c0_8 = arith.constant 0 : index
    %c0_9 = arith.constant 0 : index
    %7 = vector.load %arg13[%c0_7, %c0_8, %c0_9] : memref<9x64x64xf32, #tpu.memory_space<vmem>>, vector<1x64x64xf32>
    %8 = vector.shape_cast %7 : vector<1x64x64xf32> to vector<64x64xf32>
    %cst = arith.constant dense<0.000000e+00> : vector<8x64xf32>
    %9 = tpu.matmul %1, %8, %cst {dimension_numbers = #tpu.dot_dimension_numbers<[1], [0], [0], [1], [0, 0, 1, 1], [], []>} : vector<8x64xf32>, vector<64x64xf32>, vector<8x64xf32> -> vector<8x64xf32>
    %c0_10 = arith.constant 0 : index
    %c0_11 = arith.constant 0 : index
    %c0_12 = arith.constant 0 : index
    %10 = vector.load %arg3[%c0_10, %c0_11, %c0_12] : memref<9x8x8xf32, #tpu.memory_space<vmem>>, vector<1x8x8xf32>
    %11 = vector.shape_cast %10 : vector<1x8x8xf32> to vector<8x8xf32>
    %cst_13 = arith.constant dense<0.000000e+00> : vector<8x64xf32>
    %12 = tpu.matmul %11, %9, %cst_13 {dimension_numbers = #tpu.dot_dimension_numbers<[1], [0], [0], [1], [0, 0, 1, 1], [], []>} : vector<8x8xf32>, vector<8x64xf32>, vector<8x64xf32> -> vector<8x64xf32>
    %13 = arith.addf %6, %12 : vector<8x64xf32>
    %c1 = arith.constant 1 : index
    %c0_14 = arith.constant 0 : index
    %c0_15 = arith.constant 0 : index
    %14 = vector.load %arg13[%c1, %c0_14, %c0_15] : memref<9x64x64xf32, #tpu.memory_space<vmem>>, vector<1x64x64xf32>
    %15 = vector.shape_cast %14 : vector<1x64x64xf32> to vector<64x64xf32>
    %cst_16 = arith.constant dense<0.000000e+00> : vector<8x64xf32>
    %16 = tpu.matmul %1, %15, %cst_16 {dimension_numbers = #tpu.dot_dimension_numbers<[1], [0], [0], [1], [0, 0, 1, 1], [], []>} : vector<8x64xf32>, vector<64x64xf32>, vector<8x64xf32> -> vector<8x64xf32>
    %c1_17 = arith.constant 1 : index
    %c0_18 = arith.constant 0 : index
    %c0_19 = arith.constant 0 : index
    %17 = vector.load %arg3[%c1_17, %c0_18, %c0_19] : memref<9x8x8xf32, #tpu.memory_space<vmem>>, vector<1x8x8xf32>
    %18 = vector.shape_cast %17 : vector<1x8x8xf32> to vector<8x8xf32>
    %cst_20 = arith.constant dense<0.000000e+00> : vector<8x64xf32>
    %19 = tpu.matmul %18, %16, %cst_20 {dimension_numbers = #tpu.dot_dimension_numbers<[1], [0], [0], [1], [0, 0, 1, 1], [], []>} : vector<8x8xf32>, vector<8x64xf32>, vector<8x64xf32> -> vector<8x64xf32>
    %20 = arith.addf %13, %19 : vector<8x64xf32>
    %c2 = arith.constant 2 : index
    %c0_21 = arith.constant 0 : index
    %c0_22 = arith.constant 0 : index
    %21 = vector.load %arg13[%c2, %c0_21, %c0_22] : memref<9x64x64xf32, #tpu.memory_space<vmem>>, vector<1x64x64xf32>
    %22 = vector.shape_cast %21 : vector<1x64x64xf32> to vector<64x64xf32>
    %cst_23 = arith.constant dense<0.000000e+00> : vector<8x64xf32>
    %23 = tpu.matmul %1, %22, %cst_23 {dimension_numbers = #tpu.dot_dimension_numbers<[1], [0], [0], [1], [0, 0, 1, 1], [], []>} : vector<8x64xf32>, vector<64x64xf32>, vector<8x64xf32> -> vector<8x64xf32>
    %c2_24 = arith.constant 2 : index
    %c0_25 = arith.constant 0 : index
    %c0_26 = arith.constant 0 : index
    %24 = vector.load %arg3[%c2_24, %c0_25, %c0_26] : memref<9x8x8xf32, #tpu.memory_space<vmem>>, vector<1x8x8xf32>
    %25 = vector.shape_cast %24 : vector<1x8x8xf32> to vector<8x8xf32>
    %cst_27 = arith.constant dense<0.000000e+00> : vector<8x64xf32>
    %26 = tpu.matmul %25, %23, %cst_27 {dimension_numbers = #tpu.dot_dimension_numbers<[1], [0], [0], [1], [0, 0, 1, 1], [], []>} : vector<8x8xf32>, vector<8x64xf32>, vector<8x64xf32> -> vector<8x64xf32>
    %27 = arith.addf %20, %26 : vector<8x64xf32>
    %c3 = arith.constant 3 : index
    %c0_28 = arith.constant 0 : index
    %c0_29 = arith.constant 0 : index
    %28 = vector.load %arg13[%c3, %c0_28, %c0_29] : memref<9x64x64xf32, #tpu.memory_space<vmem>>, vector<1x64x64xf32>
    %29 = vector.shape_cast %28 : vector<1x64x64xf32> to vector<64x64xf32>
    %cst_30 = arith.constant dense<0.000000e+00> : vector<8x64xf32>
    %30 = tpu.matmul %1, %29, %cst_30 {dimension_numbers = #tpu.dot_dimension_numbers<[1], [0], [0], [1], [0, 0, 1, 1], [], []>} : vector<8x64xf32>, vector<64x64xf32>, vector<8x64xf32> -> vector<8x64xf32>
    %c3_31 = arith.constant 3 : index
    %c0_32 = arith.constant 0 : index
    %c0_33 = arith.constant 0 : index
    %31 = vector.load %arg3[%c3_31, %c0_32, %c0_33] : memref<9x8x8xf32, #tpu.memory_space<vmem>>, vector<1x8x8xf32>
    %32 = vector.shape_cast %31 : vector<1x8x8xf32> to vector<8x8xf32>
    %cst_34 = arith.constant dense<0.000000e+00> : vector<8x64xf32>
    %33 = tpu.matmul %32, %30, %cst_34 {dimension_numbers = #tpu.dot_dimension_numbers<[1], [0], [0], [1], [0, 0, 1, 1], [], []>} : vector<8x8xf32>, vector<8x64xf32>, vector<8x64xf32> -> vector<8x64xf32>
    %34 = arith.addf %27, %33 : vector<8x64xf32>
    %c4 = arith.constant 4 : index
    %c0_35 = arith.constant 0 : index
    %c0_36 = arith.constant 0 : index
    %35 = vector.load %arg13[%c4, %c0_35, %c0_36] : memref<9x64x64xf32, #tpu.memory_space<vmem>>, vector<1x64x64xf32>
    %36 = vector.shape_cast %35 : vector<1x64x64xf32> to vector<64x64xf32>
    %cst_37 = arith.constant dense<0.000000e+00> : vector<8x64xf32>
    %37 = tpu.matmul %1, %36, %cst_37 {dimension_numbers = #tpu.dot_dimension_numbers<[1], [0], [0], [1], [0, 0, 1, 1], [], []>} : vector<8x64xf32>, vector<64x64xf32>, vector<8x64xf32> -> vector<8x64xf32>
    %c4_38 = arith.constant 4 : index
    %c0_39 = arith.constant 0 : index
    %c0_40 = arith.constant 0 : index
    %38 = vector.load %arg3[%c4_38, %c0_39, %c0_40] : memref<9x8x8xf32, #tpu.memory_space<vmem>>, vector<1x8x8xf32>
    %39 = vector.shape_cast %38 : vector<1x8x8xf32> to vector<8x8xf32>
    %cst_41 = arith.constant dense<0.000000e+00> : vector<8x64xf32>
    %40 = tpu.matmul %39, %37, %cst_41 {dimension_numbers = #tpu.dot_dimension_numbers<[1], [0], [0], [1], [0, 0, 1, 1], [], []>} : vector<8x8xf32>, vector<8x64xf32>, vector<8x64xf32> -> vector<8x64xf32>
    %41 = arith.addf %34, %40 : vector<8x64xf32>
    %c5 = arith.constant 5 : index
    %c0_42 = arith.constant 0 : index
    %c0_43 = arith.constant 0 : index
    %42 = vector.load %arg13[%c5, %c0_42, %c0_43] : memref<9x64x64xf32, #tpu.memory_space<vmem>>, vector<1x64x64xf32>
    %43 = vector.shape_cast %42 : vector<1x64x64xf32> to vector<64x64xf32>
    %cst_44 = arith.constant dense<0.000000e+00> : vector<8x64xf32>
    %44 = tpu.matmul %1, %43, %cst_44 {dimension_numbers = #tpu.dot_dimension_numbers<[1], [0], [0], [1], [0, 0, 1, 1], [], []>} : vector<8x64xf32>, vector<64x64xf32>, vector<8x64xf32> -> vector<8x64xf32>
    %c5_45 = arith.constant 5 : index
    %c0_46 = arith.constant 0 : index
    %c0_47 = arith.constant 0 : index
    %45 = vector.load %arg3[%c5_45, %c0_46, %c0_47] : memref<9x8x8xf32, #tpu.memory_space<vmem>>, vector<1x8x8xf32>
    %46 = vector.shape_cast %45 : vector<1x8x8xf32> to vector<8x8xf32>
    %cst_48 = arith.constant dense<0.000000e+00> : vector<8x64xf32>
    %47 = tpu.matmul %46, %44, %cst_48 {dimension_numbers = #tpu.dot_dimension_numbers<[1], [0], [0], [1], [0, 0, 1, 1], [], []>} : vector<8x8xf32>, vector<8x64xf32>, vector<8x64xf32> -> vector<8x64xf32>
    %48 = arith.addf %41, %47 : vector<8x64xf32>
    %c6 = arith.constant 6 : index
    %c0_49 = arith.constant 0 : index
    %c0_50 = arith.constant 0 : index
    %49 = vector.load %arg13[%c6, %c0_49, %c0_50] : memref<9x64x64xf32, #tpu.memory_space<vmem>>, vector<1x64x64xf32>
    %50 = vector.shape_cast %49 : vector<1x64x64xf32> to vector<64x64xf32>
    %cst_51 = arith.constant dense<0.000000e+00> : vector<8x64xf32>
    %51 = tpu.matmul %1, %50, %cst_51 {dimension_numbers = #tpu.dot_dimension_numbers<[1], [0], [0], [1], [0, 0, 1, 1], [], []>} : vector<8x64xf32>, vector<64x64xf32>, vector<8x64xf32> -> vector<8x64xf32>
    %c6_52 = arith.constant 6 : index
    %c0_53 = arith.constant 0 : index
    %c0_54 = arith.constant 0 : index
    %52 = vector.load %arg3[%c6_52, %c0_53, %c0_54] : memref<9x8x8xf32, #tpu.memory_space<vmem>>, vector<1x8x8xf32>
    %53 = vector.shape_cast %52 : vector<1x8x8xf32> to vector<8x8xf32>
    %cst_55 = arith.constant dense<0.000000e+00> : vector<8x64xf32>
    %54 = tpu.matmul %53, %51, %cst_55 {dimension_numbers = #tpu.dot_dimension_numbers<[1], [0], [0], [1], [0, 0, 1, 1], [], []>} : vector<8x8xf32>, vector<8x64xf32>, vector<8x64xf32> -> vector<8x64xf32>
    %55 = arith.addf %48, %54 : vector<8x64xf32>
    %c7 = arith.constant 7 : index
    %c0_56 = arith.constant 0 : index
    %c0_57 = arith.constant 0 : index
    %56 = vector.load %arg13[%c7, %c0_56, %c0_57] : memref<9x64x64xf32, #tpu.memory_space<vmem>>, vector<1x64x64xf32>
    %57 = vector.shape_cast %56 : vector<1x64x64xf32> to vector<64x64xf32>
    %cst_58 = arith.constant dense<0.000000e+00> : vector<8x64xf32>
    %58 = tpu.matmul %1, %57, %cst_58 {dimension_numbers = #tpu.dot_dimension_numbers<[1], [0], [0], [1], [0, 0, 1, 1], [], []>} : vector<8x64xf32>, vector<64x64xf32>, vector<8x64xf32> -> vector<8x64xf32>
    %c7_59 = arith.constant 7 : index
    %c0_60 = arith.constant 0 : index
    %c0_61 = arith.constant 0 : index
    %59 = vector.load %arg3[%c7_59, %c0_60, %c0_61] : memref<9x8x8xf32, #tpu.memory_space<vmem>>, vector<1x8x8xf32>
    %60 = vector.shape_cast %59 : vector<1x8x8xf32> to vector<8x8xf32>
    %cst_62 = arith.constant dense<0.000000e+00> : vector<8x64xf32>
    %61 = tpu.matmul %60, %58, %cst_62 {dimension_numbers = #tpu.dot_dimension_numbers<[1], [0], [0], [1], [0, 0, 1, 1], [], []>} : vector<8x8xf32>, vector<8x64xf32>, vector<8x64xf32> -> vector<8x64xf32>
    %62 = arith.addf %55, %61 : vector<8x64xf32>
    %c8 = arith.constant 8 : index
    %c0_63 = arith.constant 0 : index
    %c0_64 = arith.constant 0 : index
    %63 = vector.load %arg13[%c8, %c0_63, %c0_64] : memref<9x64x64xf32, #tpu.memory_space<vmem>>, vector<1x64x64xf32>
    %64 = vector.shape_cast %63 : vector<1x64x64xf32> to vector<64x64xf32>
    %cst_65 = arith.constant dense<0.000000e+00> : vector<8x64xf32>
    %65 = tpu.matmul %1, %64, %cst_65 {dimension_numbers = #tpu.dot_dimension_numbers<[1], [0], [0], [1], [0, 0, 1, 1], [], []>} : vector<8x64xf32>, vector<64x64xf32>, vector<8x64xf32> -> vector<8x64xf32>
    %c8_66 = arith.constant 8 : index
    %c0_67 = arith.constant 0 : index
    %c0_68 = arith.constant 0 : index
    %66 = vector.load %arg3[%c8_66, %c0_67, %c0_68] : memref<9x8x8xf32, #tpu.memory_space<vmem>>, vector<1x8x8xf32>
    %67 = vector.shape_cast %66 : vector<1x8x8xf32> to vector<8x8xf32>
    %cst_69 = arith.constant dense<0.000000e+00> : vector<8x64xf32>
    %68 = tpu.matmul %67, %65, %cst_69 {dimension_numbers = #tpu.dot_dimension_numbers<[1], [0], [0], [1], [0, 0, 1, 1], [], []>} : vector<8x8xf32>, vector<8x64xf32>, vector<8x64xf32> -> vector<8x64xf32>
    %69 = arith.addf %62, %68 : vector<8x64xf32>
    %cst_70 = arith.constant 0.000000e+00 : f32
    %70 = vector.broadcast %cst_70 : f32 to vector<8x64xf32>
    %71 = arith.maximumf %69, %70 : vector<8x64xf32>
    %c0_71 = arith.constant 0 : index
    %c0_72 = arith.constant 0 : index
    %72 = vector.load %arg4[%c0_71, %c0_72] : memref<8x1xf32, #tpu.memory_space<vmem>>, vector<8x1xf32>
    %73 = vector.shape_cast %72 : vector<8x1xf32> to vector<8x1xf32>
    %74 = vector.broadcast %73 : vector<8x1xf32> to vector<8x64xf32>
    %c0_73 = arith.constant 0 : index
    %c0_74 = arith.constant 0 : index
    %c0_75 = arith.constant 0 : index
    %75 = vector.load %arg13[%c0_73, %c0_74, %c0_75] : memref<9x64x64xf32, #tpu.memory_space<vmem>>, vector<1x64x64xf32>
    %76 = vector.shape_cast %75 : vector<1x64x64xf32> to vector<64x64xf32>
    %cst_76 = arith.constant dense<0.000000e+00> : vector<8x64xf32>
    %77 = tpu.matmul %71, %76, %cst_76 {dimension_numbers = #tpu.dot_dimension_numbers<[1], [0], [0], [1], [0, 0, 1, 1], [], []>} : vector<8x64xf32>, vector<64x64xf32>, vector<8x64xf32> -> vector<8x64xf32>
    %c0_77 = arith.constant 0 : index
    %c0_78 = arith.constant 0 : index
    %c0_79 = arith.constant 0 : index
    %78 = vector.load %arg3[%c0_77, %c0_78, %c0_79] : memref<9x8x8xf32, #tpu.memory_space<vmem>>, vector<1x8x8xf32>
    %79 = vector.shape_cast %78 : vector<1x8x8xf32> to vector<8x8xf32>
    %cst_80 = arith.constant dense<0.000000e+00> : vector<8x64xf32>
    %80 = tpu.matmul %79, %77, %cst_80 {dimension_numbers = #tpu.dot_dimension_numbers<[1], [0], [0], [1], [0, 0, 1, 1], [], []>} : vector<8x8xf32>, vector<8x64xf32>, vector<8x64xf32> -> vector<8x64xf32>
    %81 = arith.addf %74, %80 : vector<8x64xf32>
    %c1_81 = arith.constant 1 : index
    %c0_82 = arith.constant 0 : index
    %c0_83 = arith.constant 0 : index
    %82 = vector.load %arg13[%c1_81, %c0_82, %c0_83] : memref<9x64x64xf32, #tpu.memory_space<vmem>>, vector<1x64x64xf32>
    %83 = vector.shape_cast %82 : vector<1x64x64xf32> to vector<64x64xf32>
    %cst_84 = arith.constant dense<0.000000e+00> : vector<8x64xf32>
    %84 = tpu.matmul %71, %83, %cst_84 {dimension_numbers = #tpu.dot_dimension_numbers<[1], [0], [0], [1], [0, 0, 1, 1], [], []>} : vector<8x64xf32>, vector<64x64xf32>, vector<8x64xf32> -> vector<8x64xf32>
    %c1_85 = arith.constant 1 : index
    %c0_86 = arith.constant 0 : index
    %c0_87 = arith.constant 0 : index
    %85 = vector.load %arg3[%c1_85, %c0_86, %c0_87] : memref<9x8x8xf32, #tpu.memory_space<vmem>>, vector<1x8x8xf32>
    %86 = vector.shape_cast %85 : vector<1x8x8xf32> to vector<8x8xf32>
    %cst_88 = arith.constant dense<0.000000e+00> : vector<8x64xf32>
    %87 = tpu.matmul %86, %84, %cst_88 {dimension_numbers = #tpu.dot_dimension_numbers<[1], [0], [0], [1], [0, 0, 1, 1], [], []>} : vector<8x8xf32>, vector<8x64xf32>, vector<8x64xf32> -> vector<8x64xf32>
    %88 = arith.addf %81, %87 : vector<8x64xf32>
    %c2_89 = arith.constant 2 : index
    %c0_90 = arith.constant 0 : index
    %c0_91 = arith.constant 0 : index
    %89 = vector.load %arg13[%c2_89, %c0_90, %c0_91] : memref<9x64x64xf32, #tpu.memory_space<vmem>>, vector<1x64x64xf32>
    %90 = vector.shape_cast %89 : vector<1x64x64xf32> to vector<64x64xf32>
    %cst_92 = arith.constant dense<0.000000e+00> : vector<8x64xf32>
    %91 = tpu.matmul %71, %90, %cst_92 {dimension_numbers = #tpu.dot_dimension_numbers<[1], [0], [0], [1], [0, 0, 1, 1], [], []>} : vector<8x64xf32>, vector<64x64xf32>, vector<8x64xf32> -> vector<8x64xf32>
    %c2_93 = arith.constant 2 : index
    %c0_94 = arith.constant 0 : index
    %c0_95 = arith.constant 0 : index
    %92 = vector.load %arg3[%c2_93, %c0_94, %c0_95] : memref<9x8x8xf32, #tpu.memory_space<vmem>>, vector<1x8x8xf32>
    %93 = vector.shape_cast %92 : vector<1x8x8xf32> to vector<8x8xf32>
    %cst_96 = arith.constant dense<0.000000e+00> : vector<8x64xf32>
    %94 = tpu.matmul %93, %91, %cst_96 {dimension_numbers = #tpu.dot_dimension_numbers<[1], [0], [0], [1], [0, 0, 1, 1], [], []>} : vector<8x8xf32>, vector<8x64xf32>, vector<8x64xf32> -> vector<8x64xf32>
    %95 = arith.addf %88, %94 : vector<8x64xf32>
    %c3_97 = arith.constant 3 : index
    %c0_98 = arith.constant 0 : index
    %c0_99 = arith.constant 0 : index
    %96 = vector.load %arg13[%c3_97, %c0_98, %c0_99] : memref<9x64x64xf32, #tpu.memory_space<vmem>>, vector<1x64x64xf32>
    %97 = vector.shape_cast %96 : vector<1x64x64xf32> to vector<64x64xf32>
    %cst_100 = arith.constant dense<0.000000e+00> : vector<8x64xf32>
    %98 = tpu.matmul %71, %97, %cst_100 {dimension_numbers = #tpu.dot_dimension_numbers<[1], [0], [0], [1], [0, 0, 1, 1], [], []>} : vector<8x64xf32>, vector<64x64xf32>, vector<8x64xf32> -> vector<8x64xf32>
    %c3_101 = arith.constant 3 : index
    %c0_102 = arith.constant 0 : index
    %c0_103 = arith.constant 0 : index
    %99 = vector.load %arg3[%c3_101, %c0_102, %c0_103] : memref<9x8x8xf32, #tpu.memory_space<vmem>>, vector<1x8x8xf32>
    %100 = vector.shape_cast %99 : vector<1x8x8xf32> to vector<8x8xf32>
    %cst_104 = arith.constant dense<0.000000e+00> : vector<8x64xf32>
    %101 = tpu.matmul %100, %98, %cst_104 {dimension_numbers = #tpu.dot_dimension_numbers<[1], [0], [0], [1], [0, 0, 1, 1], [], []>} : vector<8x8xf32>, vector<8x64xf32>, vector<8x64xf32> -> vector<8x64xf32>
    %102 = arith.addf %95, %101 : vector<8x64xf32>
    %c4_105 = arith.constant 4 : index
    %c0_106 = arith.constant 0 : index
    %c0_107 = arith.constant 0 : index
    %103 = vector.load %arg13[%c4_105, %c0_106, %c0_107] : memref<9x64x64xf32, #tpu.memory_space<vmem>>, vector<1x64x64xf32>
    %104 = vector.shape_cast %103 : vector<1x64x64xf32> to vector<64x64xf32>
    %cst_108 = arith.constant dense<0.000000e+00> : vector<8x64xf32>
    %105 = tpu.matmul %71, %104, %cst_108 {dimension_numbers = #tpu.dot_dimension_numbers<[1], [0], [0], [1], [0, 0, 1, 1], [], []>} : vector<8x64xf32>, vector<64x64xf32>, vector<8x64xf32> -> vector<8x64xf32>
    %c4_109 = arith.constant 4 : index
    %c0_110 = arith.constant 0 : index
    %c0_111 = arith.constant 0 : index
    %106 = vector.load %arg3[%c4_109, %c0_110, %c0_111] : memref<9x8x8xf32, #tpu.memory_space<vmem>>, vector<1x8x8xf32>
    %107 = vector.shape_cast %106 : vector<1x8x8xf32> to vector<8x8xf32>
    %cst_112 = arith.constant dense<0.000000e+00> : vector<8x64xf32>
    %108 = tpu.matmul %107, %105, %cst_112 {dimension_numbers = #tpu.dot_dimension_numbers<[1], [0], [0], [1], [0, 0, 1, 1], [], []>} : vector<8x8xf32>, vector<8x64xf32>, vector<8x64xf32> -> vector<8x64xf32>
    %109 = arith.addf %102, %108 : vector<8x64xf32>
    %c5_113 = arith.constant 5 : index
    %c0_114 = arith.constant 0 : index
    %c0_115 = arith.constant 0 : index
    %110 = vector.load %arg13[%c5_113, %c0_114, %c0_115] : memref<9x64x64xf32, #tpu.memory_space<vmem>>, vector<1x64x64xf32>
    %111 = vector.shape_cast %110 : vector<1x64x64xf32> to vector<64x64xf32>
    %cst_116 = arith.constant dense<0.000000e+00> : vector<8x64xf32>
    %112 = tpu.matmul %71, %111, %cst_116 {dimension_numbers = #tpu.dot_dimension_numbers<[1], [0], [0], [1], [0, 0, 1, 1], [], []>} : vector<8x64xf32>, vector<64x64xf32>, vector<8x64xf32> -> vector<8x64xf32>
    %c5_117 = arith.constant 5 : index
    %c0_118 = arith.constant 0 : index
    %c0_119 = arith.constant 0 : index
    %113 = vector.load %arg3[%c5_117, %c0_118, %c0_119] : memref<9x8x8xf32, #tpu.memory_space<vmem>>, vector<1x8x8xf32>
    %114 = vector.shape_cast %113 : vector<1x8x8xf32> to vector<8x8xf32>
    %cst_120 = arith.constant dense<0.000000e+00> : vector<8x64xf32>
    %115 = tpu.matmul %114, %112, %cst_120 {dimension_numbers = #tpu.dot_dimension_numbers<[1], [0], [0], [1], [0, 0, 1, 1], [], []>} : vector<8x8xf32>, vector<8x64xf32>, vector<8x64xf32> -> vector<8x64xf32>
    %116 = arith.addf %109, %115 : vector<8x64xf32>
    %c6_121 = arith.constant 6 : index
    %c0_122 = arith.constant 0 : index
    %c0_123 = arith.constant 0 : index
    %117 = vector.load %arg13[%c6_121, %c0_122, %c0_123] : memref<9x64x64xf32, #tpu.memory_space<vmem>>, vector<1x64x64xf32>
    %118 = vector.shape_cast %117 : vector<1x64x64xf32> to vector<64x64xf32>
    %cst_124 = arith.constant dense<0.000000e+00> : vector<8x64xf32>
    %119 = tpu.matmul %71, %118, %cst_124 {dimension_numbers = #tpu.dot_dimension_numbers<[1], [0], [0], [1], [0, 0, 1, 1], [], []>} : vector<8x64xf32>, vector<64x64xf32>, vector<8x64xf32> -> vector<8x64xf32>
    %c6_125 = arith.constant 6 : index
    %c0_126 = arith.constant 0 : index
    %c0_127 = arith.constant 0 : index
    %120 = vector.load %arg3[%c6_125, %c0_126, %c0_127] : memref<9x8x8xf32, #tpu.memory_space<vmem>>, vector<1x8x8xf32>
    %121 = vector.shape_cast %120 : vector<1x8x8xf32> to vector<8x8xf32>
    %cst_128 = arith.constant dense<0.000000e+00> : vector<8x64xf32>
    %122 = tpu.matmul %121, %119, %cst_128 {dimension_numbers = #tpu.dot_dimension_numbers<[1], [0], [0], [1], [0, 0, 1, 1], [], []>} : vector<8x8xf32>, vector<8x64xf32>, vector<8x64xf32> -> vector<8x64xf32>
    %123 = arith.addf %116, %122 : vector<8x64xf32>
    %c7_129 = arith.constant 7 : index
    %c0_130 = arith.constant 0 : index
    %c0_131 = arith.constant 0 : index
    %124 = vector.load %arg13[%c7_129, %c0_130, %c0_131] : memref<9x64x64xf32, #tpu.memory_space<vmem>>, vector<1x64x64xf32>
    %125 = vector.shape_cast %124 : vector<1x64x64xf32> to vector<64x64xf32>
    %cst_132 = arith.constant dense<0.000000e+00> : vector<8x64xf32>
    %126 = tpu.matmul %71, %125, %cst_132 {dimension_numbers = #tpu.dot_dimension_numbers<[1], [0], [0], [1], [0, 0, 1, 1], [], []>} : vector<8x64xf32>, vector<64x64xf32>, vector<8x64xf32> -> vector<8x64xf32>
    %c7_133 = arith.constant 7 : index
    %c0_134 = arith.constant 0 : index
    %c0_135 = arith.constant 0 : index
    %127 = vector.load %arg3[%c7_133, %c0_134, %c0_135] : memref<9x8x8xf32, #tpu.memory_space<vmem>>, vector<1x8x8xf32>
    %128 = vector.shape_cast %127 : vector<1x8x8xf32> to vector<8x8xf32>
    %cst_136 = arith.constant dense<0.000000e+00> : vector<8x64xf32>
    %129 = tpu.matmul %128, %126, %cst_136 {dimension_numbers = #tpu.dot_dimension_numbers<[1], [0], [0], [1], [0, 0, 1, 1], [], []>} : vector<8x8xf32>, vector<8x64xf32>, vector<8x64xf32> -> vector<8x64xf32>
    %130 = arith.addf %123, %129 : vector<8x64xf32>
    %c8_137 = arith.constant 8 : index
    %c0_138 = arith.constant 0 : index
    %c0_139 = arith.constant 0 : index
    %131 = vector.load %arg13[%c8_137, %c0_138, %c0_139] : memref<9x64x64xf32, #tpu.memory_space<vmem>>, vector<1x64x64xf32>
    %132 = vector.shape_cast %131 : vector<1x64x64xf32> to vector<64x64xf32>
    %cst_140 = arith.constant dense<0.000000e+00> : vector<8x64xf32>
    %133 = tpu.matmul %71, %132, %cst_140 {dimension_numbers = #tpu.dot_dimension_numbers<[1], [0], [0], [1], [0, 0, 1, 1], [], []>} : vector<8x64xf32>, vector<64x64xf32>, vector<8x64xf32> -> vector<8x64xf32>
    %c8_141 = arith.constant 8 : index
    %c0_142 = arith.constant 0 : index
    %c0_143 = arith.constant 0 : index
    %134 = vector.load %arg3[%c8_141, %c0_142, %c0_143] : memref<9x8x8xf32, #tpu.memory_space<vmem>>, vector<1x8x8xf32>
    %135 = vector.shape_cast %134 : vector<1x8x8xf32> to vector<8x8xf32>
    %cst_144 = arith.constant dense<0.000000e+00> : vector<8x64xf32>
    %136 = tpu.matmul %135, %133, %cst_144 {dimension_numbers = #tpu.dot_dimension_numbers<[1], [0], [0], [1], [0, 0, 1, 1], [], []>} : vector<8x8xf32>, vector<8x64xf32>, vector<8x64xf32> -> vector<8x64xf32>
    %137 = arith.addf %130, %136 : vector<8x64xf32>
    %cst_145 = arith.constant 0.000000e+00 : f32
    %138 = vector.broadcast %cst_145 : f32 to vector<8x64xf32>
    %139 = arith.maximumf %137, %138 : vector<8x64xf32>
    %140 = arith.addf %1, %139 : vector<8x64xf32>
    %c0_146 = arith.constant 0 : index
    %c0_147 = arith.constant 0 : index
    %141 = vector.load %arg6[%c0_146, %c0_147] : memref<4x1xf32, #tpu.memory_space<vmem>>, vector<4x1xf32>
    %142 = vector.shape_cast %141 : vector<4x1xf32> to vector<4x1xf32>
    %143 = vector.broadcast %142 : vector<4x1xf32> to vector<4x256xf32>
    %c0_148 = arith.constant 0 : index
    %c0_149 = arith.constant 0 : index
    %c0_150 = arith.constant 0 : index
    %144 = vector.load %arg14[%c0_148, %c0_149, %c0_150] : memref<9x64x256xf32, #tpu.memory_space<vmem>>, vector<1x64x256xf32>
    %145 = vector.shape_cast %144 : vector<1x64x256xf32> to vector<64x256xf32>
    %cst_151 = arith.constant dense<0.000000e+00> : vector<8x256xf32>
    %146 = tpu.matmul %140, %145, %cst_151 {dimension_numbers = #tpu.dot_dimension_numbers<[1], [0], [0], [1], [0, 0, 1, 1], [], []>} : vector<8x64xf32>, vector<64x256xf32>, vector<8x256xf32> -> vector<8x256xf32>
    %c0_152 = arith.constant 0 : index
    %c0_153 = arith.constant 0 : index
    %c0_154 = arith.constant 0 : index
    %147 = vector.load %arg5[%c0_152, %c0_153, %c0_154] : memref<9x4x8xf32, #tpu.memory_space<vmem>>, vector<1x4x8xf32>
    %148 = vector.shape_cast %147 : vector<1x4x8xf32> to vector<4x8xf32>
    %cst_155 = arith.constant dense<0.000000e+00> : vector<4x256xf32>
    %149 = tpu.matmul %148, %146, %cst_155 {dimension_numbers = #tpu.dot_dimension_numbers<[1], [0], [0], [1], [0, 0, 1, 1], [], []>} : vector<4x8xf32>, vector<8x256xf32>, vector<4x256xf32> -> vector<4x256xf32>
    %150 = arith.addf %143, %149 : vector<4x256xf32>
    %c1_156 = arith.constant 1 : index
    %c0_157 = arith.constant 0 : index
    %c0_158 = arith.constant 0 : index
    %151 = vector.load %arg14[%c1_156, %c0_157, %c0_158] : memref<9x64x256xf32, #tpu.memory_space<vmem>>, vector<1x64x256xf32>
    %152 = vector.shape_cast %151 : vector<1x64x256xf32> to vector<64x256xf32>
    %cst_159 = arith.constant dense<0.000000e+00> : vector<8x256xf32>
    %153 = tpu.matmul %140, %152, %cst_159 {dimension_numbers = #tpu.dot_dimension_numbers<[1], [0], [0], [1], [0, 0, 1, 1], [], []>} : vector<8x64xf32>, vector<64x256xf32>, vector<8x256xf32> -> vector<8x256xf32>
    %c1_160 = arith.constant 1 : index
    %c0_161 = arith.constant 0 : index
    %c0_162 = arith.constant 0 : index
    %154 = vector.load %arg5[%c1_160, %c0_161, %c0_162] : memref<9x4x8xf32, #tpu.memory_space<vmem>>, vector<1x4x8xf32>
    %155 = vector.shape_cast %154 : vector<1x4x8xf32> to vector<4x8xf32>
    %cst_163 = arith.constant dense<0.000000e+00> : vector<4x256xf32>
    %156 = tpu.matmul %155, %153, %cst_163 {dimension_numbers = #tpu.dot_dimension_numbers<[1], [0], [0], [1], [0, 0, 1, 1], [], []>} : vector<4x8xf32>, vector<8x256xf32>, vector<4x256xf32> -> vector<4x256xf32>
    %157 = arith.addf %150, %156 : vector<4x256xf32>
    %c2_164 = arith.constant 2 : index
    %c0_165 = arith.constant 0 : index
    %c0_166 = arith.constant 0 : index
    %158 = vector.load %arg14[%c2_164, %c0_165, %c0_166] : memref<9x64x256xf32, #tpu.memory_space<vmem>>, vector<1x64x256xf32>
    %159 = vector.shape_cast %158 : vector<1x64x256xf32> to vector<64x256xf32>
    %cst_167 = arith.constant dense<0.000000e+00> : vector<8x256xf32>
    %160 = tpu.matmul %140, %159, %cst_167 {dimension_numbers = #tpu.dot_dimension_numbers<[1], [0], [0], [1], [0, 0, 1, 1], [], []>} : vector<8x64xf32>, vector<64x256xf32>, vector<8x256xf32> -> vector<8x256xf32>
    %c2_168 = arith.constant 2 : index
    %c0_169 = arith.constant 0 : index
    %c0_170 = arith.constant 0 : index
    %161 = vector.load %arg5[%c2_168, %c0_169, %c0_170] : memref<9x4x8xf32, #tpu.memory_space<vmem>>, vector<1x4x8xf32>
    %162 = vector.shape_cast %161 : vector<1x4x8xf32> to vector<4x8xf32>
    %cst_171 = arith.constant dense<0.000000e+00> : vector<4x256xf32>
    %163 = tpu.matmul %162, %160, %cst_171 {dimension_numbers = #tpu.dot_dimension_numbers<[1], [0], [0], [1], [0, 0, 1, 1], [], []>} : vector<4x8xf32>, vector<8x256xf32>, vector<4x256xf32> -> vector<4x256xf32>
    %164 = arith.addf %157, %163 : vector<4x256xf32>
    %c3_172 = arith.constant 3 : index
    %c0_173 = arith.constant 0 : index
    %c0_174 = arith.constant 0 : index
    %165 = vector.load %arg14[%c3_172, %c0_173, %c0_174] : memref<9x64x256xf32, #tpu.memory_space<vmem>>, vector<1x64x256xf32>
    %166 = vector.shape_cast %165 : vector<1x64x256xf32> to vector<64x256xf32>
    %cst_175 = arith.constant dense<0.000000e+00> : vector<8x256xf32>
    %167 = tpu.matmul %140, %166, %cst_175 {dimension_numbers = #tpu.dot_dimension_numbers<[1], [0], [0], [1], [0, 0, 1, 1], [], []>} : vector<8x64xf32>, vector<64x256xf32>, vector<8x256xf32> -> vector<8x256xf32>
    %c3_176 = arith.constant 3 : index
    %c0_177 = arith.constant 0 : index
    %c0_178 = arith.constant 0 : index
    %168 = vector.load %arg5[%c3_176, %c0_177, %c0_178] : memref<9x4x8xf32, #tpu.memory_space<vmem>>, vector<1x4x8xf32>
    %169 = vector.shape_cast %168 : vector<1x4x8xf32> to vector<4x8xf32>
    %cst_179 = arith.constant dense<0.000000e+00> : vector<4x256xf32>
    %170 = tpu.matmul %169, %167, %cst_179 {dimension_numbers = #tpu.dot_dimension_numbers<[1], [0], [0], [1], [0, 0, 1, 1], [], []>} : vector<4x8xf32>, vector<8x256xf32>, vector<4x256xf32> -> vector<4x256xf32>
    %171 = arith.addf %164, %170 : vector<4x256xf32>
    %c4_180 = arith.constant 4 : index
    %c0_181 = arith.constant 0 : index
    %c0_182 = arith.constant 0 : index
    %172 = vector.load %arg14[%c4_180, %c0_181, %c0_182] : memref<9x64x256xf32, #tpu.memory_space<vmem>>, vector<1x64x256xf32>
    %173 = vector.shape_cast %172 : vector<1x64x256xf32> to vector<64x256xf32>
    %cst_183 = arith.constant dense<0.000000e+00> : vector<8x256xf32>
    %174 = tpu.matmul %140, %173, %cst_183 {dimension_numbers = #tpu.dot_dimension_numbers<[1], [0], [0], [1], [0, 0, 1, 1], [], []>} : vector<8x64xf32>, vector<64x256xf32>, vector<8x256xf32> -> vector<8x256xf32>
    %c4_184 = arith.constant 4 : index
    %c0_185 = arith.constant 0 : index
    %c0_186 = arith.constant 0 : index
    %175 = vector.load %arg5[%c4_184, %c0_185, %c0_186] : memref<9x4x8xf32, #tpu.memory_space<vmem>>, vector<1x4x8xf32>
    %176 = vector.shape_cast %175 : vector<1x4x8xf32> to vector<4x8xf32>
    %cst_187 = arith.constant dense<0.000000e+00> : vector<4x256xf32>
    %177 = tpu.matmul %176, %174, %cst_187 {dimension_numbers = #tpu.dot_dimension_numbers<[1], [0], [0], [1], [0, 0, 1, 1], [], []>} : vector<4x8xf32>, vector<8x256xf32>, vector<4x256xf32> -> vector<4x256xf32>
    %178 = arith.addf %171, %177 : vector<4x256xf32>
    %c5_188 = arith.constant 5 : index
    %c0_189 = arith.constant 0 : index
    %c0_190 = arith.constant 0 : index
    %179 = vector.load %arg14[%c5_188, %c0_189, %c0_190] : memref<9x64x256xf32, #tpu.memory_space<vmem>>, vector<1x64x256xf32>
    %180 = vector.shape_cast %179 : vector<1x64x256xf32> to vector<64x256xf32>
    %cst_191 = arith.constant dense<0.000000e+00> : vector<8x256xf32>
    %181 = tpu.matmul %140, %180, %cst_191 {dimension_numbers = #tpu.dot_dimension_numbers<[1], [0], [0], [1], [0, 0, 1, 1], [], []>} : vector<8x64xf32>, vector<64x256xf32>, vector<8x256xf32> -> vector<8x256xf32>
    %c5_192 = arith.constant 5 : index
    %c0_193 = arith.constant 0 : index
    %c0_194 = arith.constant 0 : index
    %182 = vector.load %arg5[%c5_192, %c0_193, %c0_194] : memref<9x4x8xf32, #tpu.memory_space<vmem>>, vector<1x4x8xf32>
    %183 = vector.shape_cast %182 : vector<1x4x8xf32> to vector<4x8xf32>
    %cst_195 = arith.constant dense<0.000000e+00> : vector<4x256xf32>
    %184 = tpu.matmul %183, %181, %cst_195 {dimension_numbers = #tpu.dot_dimension_numbers<[1], [0], [0], [1], [0, 0, 1, 1], [], []>} : vector<4x8xf32>, vector<8x256xf32>, vector<4x256xf32> -> vector<4x256xf32>
    %185 = arith.addf %178, %184 : vector<4x256xf32>
    %c6_196 = arith.constant 6 : index
    %c0_197 = arith.constant 0 : index
    %c0_198 = arith.constant 0 : index
    %186 = vector.load %arg14[%c6_196, %c0_197, %c0_198] : memref<9x64x256xf32, #tpu.memory_space<vmem>>, vector<1x64x256xf32>
    %187 = vector.shape_cast %186 : vector<1x64x256xf32> to vector<64x256xf32>
    %cst_199 = arith.constant dense<0.000000e+00> : vector<8x256xf32>
    %188 = tpu.matmul %140, %187, %cst_199 {dimension_numbers = #tpu.dot_dimension_numbers<[1], [0], [0], [1], [0, 0, 1, 1], [], []>} : vector<8x64xf32>, vector<64x256xf32>, vector<8x256xf32> -> vector<8x256xf32>
    %c6_200 = arith.constant 6 : index
    %c0_201 = arith.constant 0 : index
    %c0_202 = arith.constant 0 : index
    %189 = vector.load %arg5[%c6_200, %c0_201, %c0_202] : memref<9x4x8xf32, #tpu.memory_space<vmem>>, vector<1x4x8xf32>
    %190 = vector.shape_cast %189 : vector<1x4x8xf32> to vector<4x8xf32>
    %cst_203 = arith.constant dense<0.000000e+00> : vector<4x256xf32>
    %191 = tpu.matmul %190, %188, %cst_203 {dimension_numbers = #tpu.dot_dimension_numbers<[1], [0], [0], [1], [0, 0, 1, 1], [], []>} : vector<4x8xf32>, vector<8x256xf32>, vector<4x256xf32> -> vector<4x256xf32>
    %192 = arith.addf %185, %191 : vector<4x256xf32>
    %c7_204 = arith.constant 7 : index
    %c0_205 = arith.constant 0 : index
    %c0_206 = arith.constant 0 : index
    %193 = vector.load %arg14[%c7_204, %c0_205, %c0_206] : memref<9x64x256xf32, #tpu.memory_space<vmem>>, vector<1x64x256xf32>
    %194 = vector.shape_cast %193 : vector<1x64x256xf32> to vector<64x256xf32>
    %cst_207 = arith.constant dense<0.000000e+00> : vector<8x256xf32>
    %195 = tpu.matmul %140, %194, %cst_207 {dimension_numbers = #tpu.dot_dimension_numbers<[1], [0], [0], [1], [0, 0, 1, 1], [], []>} : vector<8x64xf32>, vector<64x256xf32>, vector<8x256xf32> -> vector<8x256xf32>
    %c7_208 = arith.constant 7 : index
    %c0_209 = arith.constant 0 : index
    %c0_210 = arith.constant 0 : index
    %196 = vector.load %arg5[%c7_208, %c0_209, %c0_210] : memref<9x4x8xf32, #tpu.memory_space<vmem>>, vector<1x4x8xf32>
    %197 = vector.shape_cast %196 : vector<1x4x8xf32> to vector<4x8xf32>
    %cst_211 = arith.constant dense<0.000000e+00> : vector<4x256xf32>
    %198 = tpu.matmul %197, %195, %cst_211 {dimension_numbers = #tpu.dot_dimension_numbers<[1], [0], [0], [1], [0, 0, 1, 1], [], []>} : vector<4x8xf32>, vector<8x256xf32>, vector<4x256xf32> -> vector<4x256xf32>
    %199 = arith.addf %192, %198 : vector<4x256xf32>
    %c8_212 = arith.constant 8 : index
    %c0_213 = arith.constant 0 : index
    %c0_214 = arith.constant 0 : index
    %200 = vector.load %arg14[%c8_212, %c0_213, %c0_214] : memref<9x64x256xf32, #tpu.memory_space<vmem>>, vector<1x64x256xf32>
    %201 = vector.shape_cast %200 : vector<1x64x256xf32> to vector<64x256xf32>
    %cst_215 = arith.constant dense<0.000000e+00> : vector<8x256xf32>
    %202 = tpu.matmul %140, %201, %cst_215 {dimension_numbers = #tpu.dot_dimension_numbers<[1], [0], [0], [1], [0, 0, 1, 1], [], []>} : vector<8x64xf32>, vector<64x256xf32>, vector<8x256xf32> -> vector<8x256xf32>
    %c8_216 = arith.constant 8 : index
    %c0_217 = arith.constant 0 : index
    %c0_218 = arith.constant 0 : index
    %203 = vector.load %arg5[%c8_216, %c0_217, %c0_218] : memref<9x4x8xf32, #tpu.memory_space<vmem>>, vector<1x4x8xf32>
    %204 = vector.shape_cast %203 : vector<1x4x8xf32> to vector<4x8xf32>
    %cst_219 = arith.constant dense<0.000000e+00> : vector<4x256xf32>
    %205 = tpu.matmul %204, %202, %cst_219 {dimension_numbers = #tpu.dot_dimension_numbers<[1], [0], [0], [1], [0, 0, 1, 1], [], []>} : vector<4x8xf32>, vector<8x256xf32>, vector<4x256xf32> -> vector<4x256xf32>
    %206 = arith.addf %199, %205 : vector<4x256xf32>
    %cst_220 = arith.constant 0.000000e+00 : f32
    %207 = vector.broadcast %cst_220 : f32 to vector<4x256xf32>
    %208 = arith.maximumf %206, %207 : vector<4x256xf32>
    %c0_221 = arith.constant 0 : index
    %c0_222 = arith.constant 0 : index
    %209 = vector.load %arg9[%c0_221, %c0_222] : memref<8x1xf32, #tpu.memory_space<vmem>>, vector<8x1xf32>
    %210 = vector.shape_cast %209 : vector<8x1xf32> to vector<8x1xf32>
    %211 = vector.broadcast %210 : vector<8x1xf32> to vector<8x256xf32>
    %c0_223 = arith.constant 0 : index
    %c0_224 = arith.constant 0 : index
    %c0_225 = arith.constant 0 : index
    %212 = vector.load %arg15[%c0_223, %c0_224, %c0_225] : memref<9x256x256xf32, #tpu.memory_space<vmem>>, vector<1x256x256xf32>
    %213 = vector.shape_cast %212 : vector<1x256x256xf32> to vector<256x256xf32>
    %cst_226 = arith.constant dense<0.000000e+00> : vector<4x256xf32>
    %214 = tpu.matmul %3, %213, %cst_226 {dimension_numbers = #tpu.dot_dimension_numbers<[1], [0], [0], [1], [0, 0, 1, 1], [], []>} : vector<4x256xf32>, vector<256x256xf32>, vector<4x256xf32> -> vector<4x256xf32>
    %c0_227 = arith.constant 0 : index
    %c0_228 = arith.constant 0 : index
    %c0_229 = arith.constant 0 : index
    %215 = vector.load %arg7[%c0_227, %c0_228, %c0_229] : memref<9x8x4xf32, #tpu.memory_space<vmem>>, vector<1x8x4xf32>
    %216 = vector.shape_cast %215 : vector<1x8x4xf32> to vector<8x4xf32>
    %cst_230 = arith.constant dense<0.000000e+00> : vector<8x256xf32>
    %217 = tpu.matmul %216, %214, %cst_230 {dimension_numbers = #tpu.dot_dimension_numbers<[1], [0], [0], [1], [0, 0, 1, 1], [], []>} : vector<8x4xf32>, vector<4x256xf32>, vector<8x256xf32> -> vector<8x256xf32>
    %cst_231 = arith.constant dense<0.000000e+00> : vector<4x256xf32>
    %218 = tpu.matmul %208, %213, %cst_231 {dimension_numbers = #tpu.dot_dimension_numbers<[1], [0], [0], [1], [0, 0, 1, 1], [], []>} : vector<4x256xf32>, vector<256x256xf32>, vector<4x256xf32> -> vector<4x256xf32>
    %c0_232 = arith.constant 0 : index
    %c0_233 = arith.constant 0 : index
    %c0_234 = arith.constant 0 : index
    %219 = vector.load %arg8[%c0_232, %c0_233, %c0_234] : memref<9x8x4xf32, #tpu.memory_space<vmem>>, vector<1x8x4xf32>
    %220 = vector.shape_cast %219 : vector<1x8x4xf32> to vector<8x4xf32>
    %cst_235 = arith.constant dense<0.000000e+00> : vector<8x256xf32>
    %221 = tpu.matmul %220, %218, %cst_235 {dimension_numbers = #tpu.dot_dimension_numbers<[1], [0], [0], [1], [0, 0, 1, 1], [], []>} : vector<8x4xf32>, vector<4x256xf32>, vector<8x256xf32> -> vector<8x256xf32>
    %222 = arith.addf %217, %221 : vector<8x256xf32>
    %223 = arith.addf %211, %222 : vector<8x256xf32>
    %c1_236 = arith.constant 1 : index
    %c0_237 = arith.constant 0 : index
    %c0_238 = arith.constant 0 : index
    %224 = vector.load %arg15[%c1_236, %c0_237, %c0_238] : memref<9x256x256xf32, #tpu.memory_space<vmem>>, vector<1x256x256xf32>
    %225 = vector.shape_cast %224 : vector<1x256x256xf32> to vector<256x256xf32>
    %cst_239 = arith.constant dense<0.000000e+00> : vector<4x256xf32>
    %226 = tpu.matmul %3, %225, %cst_239 {dimension_numbers = #tpu.dot_dimension_numbers<[1], [0], [0], [1], [0, 0, 1, 1], [], []>} : vector<4x256xf32>, vector<256x256xf32>, vector<4x256xf32> -> vector<4x256xf32>
    %c1_240 = arith.constant 1 : index
    %c0_241 = arith.constant 0 : index
    %c0_242 = arith.constant 0 : index
    %227 = vector.load %arg7[%c1_240, %c0_241, %c0_242] : memref<9x8x4xf32, #tpu.memory_space<vmem>>, vector<1x8x4xf32>
    %228 = vector.shape_cast %227 : vector<1x8x4xf32> to vector<8x4xf32>
    %cst_243 = arith.constant dense<0.000000e+00> : vector<8x256xf32>
    %229 = tpu.matmul %228, %226, %cst_243 {dimension_numbers = #tpu.dot_dimension_numbers<[1], [0], [0], [1], [0, 0, 1, 1], [], []>} : vector<8x4xf32>, vector<4x256xf32>, vector<8x256xf32> -> vector<8x256xf32>
    %cst_244 = arith.constant dense<0.000000e+00> : vector<4x256xf32>
    %230 = tpu.matmul %208, %225, %cst_244 {dimension_numbers = #tpu.dot_dimension_numbers<[1], [0], [0], [1], [0, 0, 1, 1], [], []>} : vector<4x256xf32>, vector<256x256xf32>, vector<4x256xf32> -> vector<4x256xf32>
    %c1_245 = arith.constant 1 : index
    %c0_246 = arith.constant 0 : index
    %c0_247 = arith.constant 0 : index
    %231 = vector.load %arg8[%c1_245, %c0_246, %c0_247] : memref<9x8x4xf32, #tpu.memory_space<vmem>>, vector<1x8x4xf32>
    %232 = vector.shape_cast %231 : vector<1x8x4xf32> to vector<8x4xf32>
    %cst_248 = arith.constant dense<0.000000e+00> : vector<8x256xf32>
    %233 = tpu.matmul %232, %230, %cst_248 {dimension_numbers = #tpu.dot_dimension_numbers<[1], [0], [0], [1], [0, 0, 1, 1], [], []>} : vector<8x4xf32>, vector<4x256xf32>, vector<8x256xf32> -> vector<8x256xf32>
    %234 = arith.addf %229, %233 : vector<8x256xf32>
    %235 = arith.addf %223, %234 : vector<8x256xf32>
    %c2_249 = arith.constant 2 : index
    %c0_250 = arith.constant 0 : index
    %c0_251 = arith.constant 0 : index
    %236 = vector.load %arg15[%c2_249, %c0_250, %c0_251] : memref<9x256x256xf32, #tpu.memory_space<vmem>>, vector<1x256x256xf32>
    %237 = vector.shape_cast %236 : vector<1x256x256xf32> to vector<256x256xf32>
    %cst_252 = arith.constant dense<0.000000e+00> : vector<4x256xf32>
    %238 = tpu.matmul %3, %237, %cst_252 {dimension_numbers = #tpu.dot_dimension_numbers<[1], [0], [0], [1], [0, 0, 1, 1], [], []>} : vector<4x256xf32>, vector<256x256xf32>, vector<4x256xf32> -> vector<4x256xf32>
    %c2_253 = arith.constant 2 : index
    %c0_254 = arith.constant 0 : index
    %c0_255 = arith.constant 0 : index
    %239 = vector.load %arg7[%c2_253, %c0_254, %c0_255] : memref<9x8x4xf32, #tpu.memory_space<vmem>>, vector<1x8x4xf32>
    %240 = vector.shape_cast %239 : vector<1x8x4xf32> to vector<8x4xf32>
    %cst_256 = arith.constant dense<0.000000e+00> : vector<8x256xf32>
    %241 = tpu.matmul %240, %238, %cst_256 {dimension_numbers = #tpu.dot_dimension_numbers<[1], [0], [0], [1], [0, 0, 1, 1], [], []>} : vector<8x4xf32>, vector<4x256xf32>, vector<8x256xf32> -> vector<8x256xf32>
    %cst_257 = arith.constant dense<0.000000e+00> : vector<4x256xf32>
    %242 = tpu.matmul %208, %237, %cst_257 {dimension_numbers = #tpu.dot_dimension_numbers<[1], [0], [0], [1], [0, 0, 1, 1], [], []>} : vector<4x256xf32>, vector<256x256xf32>, vector<4x256xf32> -> vector<4x256xf32>
    %c2_258 = arith.constant 2 : index
    %c0_259 = arith.constant 0 : index
    %c0_260 = arith.constant 0 : index
    %243 = vector.load %arg8[%c2_258, %c0_259, %c0_260] : memref<9x8x4xf32, #tpu.memory_space<vmem>>, vector<1x8x4xf32>
    %244 = vector.shape_cast %243 : vector<1x8x4xf32> to vector<8x4xf32>
    %cst_261 = arith.constant dense<0.000000e+00> : vector<8x256xf32>
    %245 = tpu.matmul %244, %242, %cst_261 {dimension_numbers = #tpu.dot_dimension_numbers<[1], [0], [0], [1], [0, 0, 1, 1], [], []>} : vector<8x4xf32>, vector<4x256xf32>, vector<8x256xf32> -> vector<8x256xf32>
    %246 = arith.addf %241, %245 : vector<8x256xf32>
    %247 = arith.addf %235, %246 : vector<8x256xf32>
    %c3_262 = arith.constant 3 : index
    %c0_263 = arith.constant 0 : index
    %c0_264 = arith.constant 0 : index
    %248 = vector.load %arg15[%c3_262, %c0_263, %c0_264] : memref<9x256x256xf32, #tpu.memory_space<vmem>>, vector<1x256x256xf32>
    %249 = vector.shape_cast %248 : vector<1x256x256xf32> to vector<256x256xf32>
    %cst_265 = arith.constant dense<0.000000e+00> : vector<4x256xf32>
    %250 = tpu.matmul %3, %249, %cst_265 {dimension_numbers = #tpu.dot_dimension_numbers<[1], [0], [0], [1], [0, 0, 1, 1], [], []>} : vector<4x256xf32>, vector<256x256xf32>, vector<4x256xf32> -> vector<4x256xf32>
    %c3_266 = arith.constant 3 : index
    %c0_267 = arith.constant 0 : index
    %c0_268 = arith.constant 0 : index
    %251 = vector.load %arg7[%c3_266, %c0_267, %c0_268] : memref<9x8x4xf32, #tpu.memory_space<vmem>>, vector<1x8x4xf32>
    %252 = vector.shape_cast %251 : vector<1x8x4xf32> to vector<8x4xf32>
    %cst_269 = arith.constant dense<0.000000e+00> : vector<8x256xf32>
    %253 = tpu.matmul %252, %250, %cst_269 {dimension_numbers = #tpu.dot_dimension_numbers<[1], [0], [0], [1], [0, 0, 1, 1], [], []>} : vector<8x4xf32>, vector<4x256xf32>, vector<8x256xf32> -> vector<8x256xf32>
    %cst_270 = arith.constant dense<0.000000e+00> : vector<4x256xf32>
    %254 = tpu.matmul %208, %249, %cst_270 {dimension_numbers = #tpu.dot_dimension_numbers<[1], [0], [0], [1], [0, 0, 1, 1], [], []>} : vector<4x256xf32>, vector<256x256xf32>, vector<4x256xf32> -> vector<4x256xf32>
    %c3_271 = arith.constant 3 : index
    %c0_272 = arith.constant 0 : index
    %c0_273 = arith.constant 0 : index
    %255 = vector.load %arg8[%c3_271, %c0_272, %c0_273] : memref<9x8x4xf32, #tpu.memory_space<vmem>>, vector<1x8x4xf32>
    %256 = vector.shape_cast %255 : vector<1x8x4xf32> to vector<8x4xf32>
    %cst_274 = arith.constant dense<0.000000e+00> : vector<8x256xf32>
    %257 = tpu.matmul %256, %254, %cst_274 {dimension_numbers = #tpu.dot_dimension_numbers<[1], [0], [0], [1], [0, 0, 1, 1], [], []>} : vector<8x4xf32>, vector<4x256xf32>, vector<8x256xf32> -> vector<8x256xf32>
    %258 = arith.addf %253, %257 : vector<8x256xf32>
    %259 = arith.addf %247, %258 : vector<8x256xf32>
    %c4_275 = arith.constant 4 : index
    %c0_276 = arith.constant 0 : index
    %c0_277 = arith.constant 0 : index
    %260 = vector.load %arg15[%c4_275, %c0_276, %c0_277] : memref<9x256x256xf32, #tpu.memory_space<vmem>>, vector<1x256x256xf32>
    %261 = vector.shape_cast %260 : vector<1x256x256xf32> to vector<256x256xf32>
    %cst_278 = arith.constant dense<0.000000e+00> : vector<4x256xf32>
    %262 = tpu.matmul %3, %261, %cst_278 {dimension_numbers = #tpu.dot_dimension_numbers<[1], [0], [0], [1], [0, 0, 1, 1], [], []>} : vector<4x256xf32>, vector<256x256xf32>, vector<4x256xf32> -> vector<4x256xf32>
    %c4_279 = arith.constant 4 : index
    %c0_280 = arith.constant 0 : index
    %c0_281 = arith.constant 0 : index
    %263 = vector.load %arg7[%c4_279, %c0_280, %c0_281] : memref<9x8x4xf32, #tpu.memory_space<vmem>>, vector<1x8x4xf32>
    %264 = vector.shape_cast %263 : vector<1x8x4xf32> to vector<8x4xf32>
    %cst_282 = arith.constant dense<0.000000e+00> : vector<8x256xf32>
    %265 = tpu.matmul %264, %262, %cst_282 {dimension_numbers = #tpu.dot_dimension_numbers<[1], [0], [0], [1], [0, 0, 1, 1], [], []>} : vector<8x4xf32>, vector<4x256xf32>, vector<8x256xf32> -> vector<8x256xf32>
    %cst_283 = arith.constant dense<0.000000e+00> : vector<4x256xf32>
    %266 = tpu.matmul %208, %261, %cst_283 {dimension_numbers = #tpu.dot_dimension_numbers<[1], [0], [0], [1], [0, 0, 1, 1], [], []>} : vector<4x256xf32>, vector<256x256xf32>, vector<4x256xf32> -> vector<4x256xf32>
    %c4_284 = arith.constant 4 : index
    %c0_285 = arith.constant 0 : index
    %c0_286 = arith.constant 0 : index
    %267 = vector.load %arg8[%c4_284, %c0_285, %c0_286] : memref<9x8x4xf32, #tpu.memory_space<vmem>>, vector<1x8x4xf32>
    %268 = vector.shape_cast %267 : vector<1x8x4xf32> to vector<8x4xf32>
    %cst_287 = arith.constant dense<0.000000e+00> : vector<8x256xf32>
    %269 = tpu.matmul %268, %266, %cst_287 {dimension_numbers = #tpu.dot_dimension_numbers<[1], [0], [0], [1], [0, 0, 1, 1], [], []>} : vector<8x4xf32>, vector<4x256xf32>, vector<8x256xf32> -> vector<8x256xf32>
    %270 = arith.addf %265, %269 : vector<8x256xf32>
    %271 = arith.addf %259, %270 : vector<8x256xf32>
    %c5_288 = arith.constant 5 : index
    %c0_289 = arith.constant 0 : index
    %c0_290 = arith.constant 0 : index
    %272 = vector.load %arg15[%c5_288, %c0_289, %c0_290] : memref<9x256x256xf32, #tpu.memory_space<vmem>>, vector<1x256x256xf32>
    %273 = vector.shape_cast %272 : vector<1x256x256xf32> to vector<256x256xf32>
    %cst_291 = arith.constant dense<0.000000e+00> : vector<4x256xf32>
    %274 = tpu.matmul %3, %273, %cst_291 {dimension_numbers = #tpu.dot_dimension_numbers<[1], [0], [0], [1], [0, 0, 1, 1], [], []>} : vector<4x256xf32>, vector<256x256xf32>, vector<4x256xf32> -> vector<4x256xf32>
    %c5_292 = arith.constant 5 : index
    %c0_293 = arith.constant 0 : index
    %c0_294 = arith.constant 0 : index
    %275 = vector.load %arg7[%c5_292, %c0_293, %c0_294] : memref<9x8x4xf32, #tpu.memory_space<vmem>>, vector<1x8x4xf32>
    %276 = vector.shape_cast %275 : vector<1x8x4xf32> to vector<8x4xf32>
    %cst_295 = arith.constant dense<0.000000e+00> : vector<8x256xf32>
    %277 = tpu.matmul %276, %274, %cst_295 {dimension_numbers = #tpu.dot_dimension_numbers<[1], [0], [0], [1], [0, 0, 1, 1], [], []>} : vector<8x4xf32>, vector<4x256xf32>, vector<8x256xf32> -> vector<8x256xf32>
    %cst_296 = arith.constant dense<0.000000e+00> : vector<4x256xf32>
    %278 = tpu.matmul %208, %273, %cst_296 {dimension_numbers = #tpu.dot_dimension_numbers<[1], [0], [0], [1], [0, 0, 1, 1], [], []>} : vector<4x256xf32>, vector<256x256xf32>, vector<4x256xf32> -> vector<4x256xf32>
    %c5_297 = arith.constant 5 : index
    %c0_298 = arith.constant 0 : index
    %c0_299 = arith.constant 0 : index
    %279 = vector.load %arg8[%c5_297, %c0_298, %c0_299] : memref<9x8x4xf32, #tpu.memory_space<vmem>>, vector<1x8x4xf32>
    %280 = vector.shape_cast %279 : vector<1x8x4xf32> to vector<8x4xf32>
    %cst_300 = arith.constant dense<0.000000e+00> : vector<8x256xf32>
    %281 = tpu.matmul %280, %278, %cst_300 {dimension_numbers = #tpu.dot_dimension_numbers<[1], [0], [0], [1], [0, 0, 1, 1], [], []>} : vector<8x4xf32>, vector<4x256xf32>, vector<8x256xf32> -> vector<8x256xf32>
    %282 = arith.addf %277, %281 : vector<8x256xf32>
    %283 = arith.addf %271, %282 : vector<8x256xf32>
    %c6_301 = arith.constant 6 : index
    %c0_302 = arith.constant 0 : index
    %c0_303 = arith.constant 0 : index
    %284 = vector.load %arg15[%c6_301, %c0_302, %c0_303] : memref<9x256x256xf32, #tpu.memory_space<vmem>>, vector<1x256x256xf32>
    %285 = vector.shape_cast %284 : vector<1x256x256xf32> to vector<256x256xf32>
    %cst_304 = arith.constant dense<0.000000e+00> : vector<4x256xf32>
    %286 = tpu.matmul %3, %285, %cst_304 {dimension_numbers = #tpu.dot_dimension_numbers<[1], [0], [0], [1], [0, 0, 1, 1], [], []>} : vector<4x256xf32>, vector<256x256xf32>, vector<4x256xf32> -> vector<4x256xf32>
    %c6_305 = arith.constant 6 : index
    %c0_306 = arith.constant 0 : index
    %c0_307 = arith.constant 0 : index
    %287 = vector.load %arg7[%c6_305, %c0_306, %c0_307] : memref<9x8x4xf32, #tpu.memory_space<vmem>>, vector<1x8x4xf32>
    %288 = vector.shape_cast %287 : vector<1x8x4xf32> to vector<8x4xf32>
    %cst_308 = arith.constant dense<0.000000e+00> : vector<8x256xf32>
    %289 = tpu.matmul %288, %286, %cst_308 {dimension_numbers = #tpu.dot_dimension_numbers<[1], [0], [0], [1], [0, 0, 1, 1], [], []>} : vector<8x4xf32>, vector<4x256xf32>, vector<8x256xf32> -> vector<8x256xf32>
    %cst_309 = arith.constant dense<0.000000e+00> : vector<4x256xf32>
    %290 = tpu.matmul %208, %285, %cst_309 {dimension_numbers = #tpu.dot_dimension_numbers<[1], [0], [0], [1], [0, 0, 1, 1], [], []>} : vector<4x256xf32>, vector<256x256xf32>, vector<4x256xf32> -> vector<4x256xf32>
    %c6_310 = arith.constant 6 : index
    %c0_311 = arith.constant 0 : index
    %c0_312 = arith.constant 0 : index
    %291 = vector.load %arg8[%c6_310, %c0_311, %c0_312] : memref<9x8x4xf32, #tpu.memory_space<vmem>>, vector<1x8x4xf32>
    %292 = vector.shape_cast %291 : vector<1x8x4xf32> to vector<8x4xf32>
    %cst_313 = arith.constant dense<0.000000e+00> : vector<8x256xf32>
    %293 = tpu.matmul %292, %290, %cst_313 {dimension_numbers = #tpu.dot_dimension_numbers<[1], [0], [0], [1], [0, 0, 1, 1], [], []>} : vector<8x4xf32>, vector<4x256xf32>, vector<8x256xf32> -> vector<8x256xf32>
    %294 = arith.addf %289, %293 : vector<8x256xf32>
    %295 = arith.addf %283, %294 : vector<8x256xf32>
    %c7_314 = arith.constant 7 : index
    %c0_315 = arith.constant 0 : index
    %c0_316 = arith.constant 0 : index
    %296 = vector.load %arg15[%c7_314, %c0_315, %c0_316] : memref<9x256x256xf32, #tpu.memory_space<vmem>>, vector<1x256x256xf32>
    %297 = vector.shape_cast %296 : vector<1x256x256xf32> to vector<256x256xf32>
    %cst_317 = arith.constant dense<0.000000e+00> : vector<4x256xf32>
    %298 = tpu.matmul %3, %297, %cst_317 {dimension_numbers = #tpu.dot_dimension_numbers<[1], [0], [0], [1], [0, 0, 1, 1], [], []>} : vector<4x256xf32>, vector<256x256xf32>, vector<4x256xf32> -> vector<4x256xf32>
    %c7_318 = arith.constant 7 : index
    %c0_319 = arith.constant 0 : index
    %c0_320 = arith.constant 0 : index
    %299 = vector.load %arg7[%c7_318, %c0_319, %c0_320] : memref<9x8x4xf32, #tpu.memory_space<vmem>>, vector<1x8x4xf32>
    %300 = vector.shape_cast %299 : vector<1x8x4xf32> to vector<8x4xf32>
    %cst_321 = arith.constant dense<0.000000e+00> : vector<8x256xf32>
    %301 = tpu.matmul %300, %298, %cst_321 {dimension_numbers = #tpu.dot_dimension_numbers<[1], [0], [0], [1], [0, 0, 1, 1], [], []>} : vector<8x4xf32>, vector<4x256xf32>, vector<8x256xf32> -> vector<8x256xf32>
    %cst_322 = arith.constant dense<0.000000e+00> : vector<4x256xf32>
    %302 = tpu.matmul %208, %297, %cst_322 {dimension_numbers = #tpu.dot_dimension_numbers<[1], [0], [0], [1], [0, 0, 1, 1], [], []>} : vector<4x256xf32>, vector<256x256xf32>, vector<4x256xf32> -> vector<4x256xf32>
    %c7_323 = arith.constant 7 : index
    %c0_324 = arith.constant 0 : index
    %c0_325 = arith.constant 0 : index
    %303 = vector.load %arg8[%c7_323, %c0_324, %c0_325] : memref<9x8x4xf32, #tpu.memory_space<vmem>>, vector<1x8x4xf32>
    %304 = vector.shape_cast %303 : vector<1x8x4xf32> to vector<8x4xf32>
    %cst_326 = arith.constant dense<0.000000e+00> : vector<8x256xf32>
    %305 = tpu.matmul %304, %302, %cst_326 {dimension_numbers = #tpu.dot_dimension_numbers<[1], [0], [0], [1], [0, 0, 1, 1], [], []>} : vector<8x4xf32>, vector<4x256xf32>, vector<8x256xf32> -> vector<8x256xf32>
    %306 = arith.addf %301, %305 : vector<8x256xf32>
    %307 = arith.addf %295, %306 : vector<8x256xf32>
    %c8_327 = arith.constant 8 : index
    %c0_328 = arith.constant 0 : index
    %c0_329 = arith.constant 0 : index
    %308 = vector.load %arg15[%c8_327, %c0_328, %c0_329] : memref<9x256x256xf32, #tpu.memory_space<vmem>>, vector<1x256x256xf32>
    %309 = vector.shape_cast %308 : vector<1x256x256xf32> to vector<256x256xf32>
    %cst_330 = arith.constant dense<0.000000e+00> : vector<4x256xf32>
    %310 = tpu.matmul %3, %309, %cst_330 {dimension_numbers = #tpu.dot_dimension_numbers<[1], [0], [0], [1], [0, 0, 1, 1], [], []>} : vector<4x256xf32>, vector<256x256xf32>, vector<4x256xf32> -> vector<4x256xf32>
    %c8_331 = arith.constant 8 : index
    %c0_332 = arith.constant 0 : index
    %c0_333 = arith.constant 0 : index
    %311 = vector.load %arg7[%c8_331, %c0_332, %c0_333] : memref<9x8x4xf32, #tpu.memory_space<vmem>>, vector<1x8x4xf32>
    %312 = vector.shape_cast %311 : vector<1x8x4xf32> to vector<8x4xf32>
    %cst_334 = arith.constant dense<0.000000e+00> : vector<8x256xf32>
    %313 = tpu.matmul %312, %310, %cst_334 {dimension_numbers = #tpu.dot_dimension_numbers<[1], [0], [0], [1], [0, 0, 1, 1], [], []>} : vector<8x4xf32>, vector<4x256xf32>, vector<8x256xf32> -> vector<8x256xf32>
    %cst_335 = arith.constant dense<0.000000e+00> : vector<4x256xf32>
    %314 = tpu.matmul %208, %309, %cst_335 {dimension_numbers = #tpu.dot_dimension_numbers<[1], [0], [0], [1], [0, 0, 1, 1], [], []>} : vector<4x256xf32>, vector<256x256xf32>, vector<4x256xf32> -> vector<4x256xf32>
    %c8_336 = arith.constant 8 : index
    %c0_337 = arith.constant 0 : index
    %c0_338 = arith.constant 0 : index
    %315 = vector.load %arg8[%c8_336, %c0_337, %c0_338] : memref<9x8x4xf32, #tpu.memory_space<vmem>>, vector<1x8x4xf32>
    %316 = vector.shape_cast %315 : vector<1x8x4xf32> to vector<8x4xf32>
    %cst_339 = arith.constant dense<0.000000e+00> : vector<8x256xf32>
    %317 = tpu.matmul %316, %314, %cst_339 {dimension_numbers = #tpu.dot_dimension_numbers<[1], [0], [0], [1], [0, 0, 1, 1], [], []>} : vector<8x4xf32>, vector<4x256xf32>, vector<8x256xf32> -> vector<8x256xf32>
    %318 = arith.addf %313, %317 : vector<8x256xf32>
    %319 = arith.addf %307, %318 : vector<8x256xf32>
    %cst_340 = arith.constant 0.000000e+00 : f32
    %320 = vector.broadcast %cst_340 : f32 to vector<8x256xf32>
    %321 = arith.maximumf %319, %320 : vector<8x256xf32>
    %322 = vector.extract_strided_slice %321 {offsets = [0, 0], sizes = [4, 256], strides = [1, 1]} : vector<8x256xf32> to vector<4x256xf32>
    %323 = arith.addf %3, %322 : vector<4x256xf32>
    %324 = vector.extract_strided_slice %321 {offsets = [4, 0], sizes = [4, 256], strides = [1, 1]} : vector<8x256xf32> to vector<4x256xf32>
    %325 = arith.addf %208, %324 : vector<4x256xf32>
    %c0_341 = arith.constant 0 : index
    %c0_342 = arith.constant 0 : index
    %326 = vector.load %arg12[%c0_341, %c0_342] : memref<4x1xf32, #tpu.memory_space<vmem>>, vector<4x1xf32>
    %327 = vector.shape_cast %326 : vector<4x1xf32> to vector<4x1xf32>
    %328 = vector.broadcast %327 : vector<4x1xf32> to vector<4x256xf32>
    %c0_343 = arith.constant 0 : index
    %c0_344 = arith.constant 0 : index
    %c0_345 = arith.constant 0 : index
    %329 = vector.load %arg15[%c0_343, %c0_344, %c0_345] : memref<9x256x256xf32, #tpu.memory_space<vmem>>, vector<1x256x256xf32>
    %330 = vector.shape_cast %329 : vector<1x256x256xf32> to vector<256x256xf32>
    %cst_346 = arith.constant dense<0.000000e+00> : vector<4x256xf32>
    %331 = tpu.matmul %323, %330, %cst_346 {dimension_numbers = #tpu.dot_dimension_numbers<[1], [0], [0], [1], [0, 0, 1, 1], [], []>} : vector<4x256xf32>, vector<256x256xf32>, vector<4x256xf32> -> vector<4x256xf32>
    %c0_347 = arith.constant 0 : index
    %c0_348 = arith.constant 0 : index
    %c0_349 = arith.constant 0 : index
    %332 = vector.load %arg10[%c0_347, %c0_348, %c0_349] : memref<9x4x4xf32, #tpu.memory_space<vmem>>, vector<1x4x4xf32>
    %333 = vector.shape_cast %332 : vector<1x4x4xf32> to vector<4x4xf32>
    %cst_350 = arith.constant dense<0.000000e+00> : vector<4x256xf32>
    %334 = tpu.matmul %333, %331, %cst_350 {dimension_numbers = #tpu.dot_dimension_numbers<[1], [0], [0], [1], [0, 0, 1, 1], [], []>} : vector<4x4xf32>, vector<4x256xf32>, vector<4x256xf32> -> vector<4x256xf32>
    %cst_351 = arith.constant dense<0.000000e+00> : vector<4x256xf32>
    %335 = tpu.matmul %325, %330, %cst_351 {dimension_numbers = #tpu.dot_dimension_numbers<[1], [0], [0], [1], [0, 0, 1, 1], [], []>} : vector<4x256xf32>, vector<256x256xf32>, vector<4x256xf32> -> vector<4x256xf32>
    %c0_352 = arith.constant 0 : index
    %c0_353 = arith.constant 0 : index
    %c0_354 = arith.constant 0 : index
    %336 = vector.load %arg11[%c0_352, %c0_353, %c0_354] : memref<9x4x4xf32, #tpu.memory_space<vmem>>, vector<1x4x4xf32>
    %337 = vector.shape_cast %336 : vector<1x4x4xf32> to vector<4x4xf32>
    %cst_355 = arith.constant dense<0.000000e+00> : vector<4x256xf32>
    %338 = tpu.matmul %337, %335, %cst_355 {dimension_numbers = #tpu.dot_dimension_numbers<[1], [0], [0], [1], [0, 0, 1, 1], [], []>} : vector<4x4xf32>, vector<4x256xf32>, vector<4x256xf32> -> vector<4x256xf32>
    %339 = arith.addf %334, %338 : vector<4x256xf32>
    %340 = arith.addf %328, %339 : vector<4x256xf32>
    %c1_356 = arith.constant 1 : index
    %c0_357 = arith.constant 0 : index
    %c0_358 = arith.constant 0 : index
    %341 = vector.load %arg15[%c1_356, %c0_357, %c0_358] : memref<9x256x256xf32, #tpu.memory_space<vmem>>, vector<1x256x256xf32>
    %342 = vector.shape_cast %341 : vector<1x256x256xf32> to vector<256x256xf32>
    %cst_359 = arith.constant dense<0.000000e+00> : vector<4x256xf32>
    %343 = tpu.matmul %323, %342, %cst_359 {dimension_numbers = #tpu.dot_dimension_numbers<[1], [0], [0], [1], [0, 0, 1, 1], [], []>} : vector<4x256xf32>, vector<256x256xf32>, vector<4x256xf32> -> vector<4x256xf32>
    %c1_360 = arith.constant 1 : index
    %c0_361 = arith.constant 0 : index
    %c0_362 = arith.constant 0 : index
    %344 = vector.load %arg10[%c1_360, %c0_361, %c0_362] : memref<9x4x4xf32, #tpu.memory_space<vmem>>, vector<1x4x4xf32>
    %345 = vector.shape_cast %344 : vector<1x4x4xf32> to vector<4x4xf32>
    %cst_363 = arith.constant dense<0.000000e+00> : vector<4x256xf32>
    %346 = tpu.matmul %345, %343, %cst_363 {dimension_numbers = #tpu.dot_dimension_numbers<[1], [0], [0], [1], [0, 0, 1, 1], [], []>} : vector<4x4xf32>, vector<4x256xf32>, vector<4x256xf32> -> vector<4x256xf32>
    %cst_364 = arith.constant dense<0.000000e+00> : vector<4x256xf32>
    %347 = tpu.matmul %325, %342, %cst_364 {dimension_numbers = #tpu.dot_dimension_numbers<[1], [0], [0], [1], [0, 0, 1, 1], [], []>} : vector<4x256xf32>, vector<256x256xf32>, vector<4x256xf32> -> vector<4x256xf32>
    %c1_365 = arith.constant 1 : index
    %c0_366 = arith.constant 0 : index
    %c0_367 = arith.constant 0 : index
    %348 = vector.load %arg11[%c1_365, %c0_366, %c0_367] : memref<9x4x4xf32, #tpu.memory_space<vmem>>, vector<1x4x4xf32>
    %349 = vector.shape_cast %348 : vector<1x4x4xf32> to vector<4x4xf32>
    %cst_368 = arith.constant dense<0.000000e+00> : vector<4x256xf32>
    %350 = tpu.matmul %349, %347, %cst_368 {dimension_numbers = #tpu.dot_dimension_numbers<[1], [0], [0], [1], [0, 0, 1, 1], [], []>} : vector<4x4xf32>, vector<4x256xf32>, vector<4x256xf32> -> vector<4x256xf32>
    %351 = arith.addf %346, %350 : vector<4x256xf32>
    %352 = arith.addf %340, %351 : vector<4x256xf32>
    %c2_369 = arith.constant 2 : index
    %c0_370 = arith.constant 0 : index
    %c0_371 = arith.constant 0 : index
    %353 = vector.load %arg15[%c2_369, %c0_370, %c0_371] : memref<9x256x256xf32, #tpu.memory_space<vmem>>, vector<1x256x256xf32>
    %354 = vector.shape_cast %353 : vector<1x256x256xf32> to vector<256x256xf32>
    %cst_372 = arith.constant dense<0.000000e+00> : vector<4x256xf32>
    %355 = tpu.matmul %323, %354, %cst_372 {dimension_numbers = #tpu.dot_dimension_numbers<[1], [0], [0], [1], [0, 0, 1, 1], [], []>} : vector<4x256xf32>, vector<256x256xf32>, vector<4x256xf32> -> vector<4x256xf32>
    %c2_373 = arith.constant 2 : index
    %c0_374 = arith.constant 0 : index
    %c0_375 = arith.constant 0 : index
    %356 = vector.load %arg10[%c2_373, %c0_374, %c0_375] : memref<9x4x4xf32, #tpu.memory_space<vmem>>, vector<1x4x4xf32>
    %357 = vector.shape_cast %356 : vector<1x4x4xf32> to vector<4x4xf32>
    %cst_376 = arith.constant dense<0.000000e+00> : vector<4x256xf32>
    %358 = tpu.matmul %357, %355, %cst_376 {dimension_numbers = #tpu.dot_dimension_numbers<[1], [0], [0], [1], [0, 0, 1, 1], [], []>} : vector<4x4xf32>, vector<4x256xf32>, vector<4x256xf32> -> vector<4x256xf32>
    %cst_377 = arith.constant dense<0.000000e+00> : vector<4x256xf32>
    %359 = tpu.matmul %325, %354, %cst_377 {dimension_numbers = #tpu.dot_dimension_numbers<[1], [0], [0], [1], [0, 0, 1, 1], [], []>} : vector<4x256xf32>, vector<256x256xf32>, vector<4x256xf32> -> vector<4x256xf32>
    %c2_378 = arith.constant 2 : index
    %c0_379 = arith.constant 0 : index
    %c0_380 = arith.constant 0 : index
    %360 = vector.load %arg11[%c2_378, %c0_379, %c0_380] : memref<9x4x4xf32, #tpu.memory_space<vmem>>, vector<1x4x4xf32>
    %361 = vector.shape_cast %360 : vector<1x4x4xf32> to vector<4x4xf32>
    %cst_381 = arith.constant dense<0.000000e+00> : vector<4x256xf32>
    %362 = tpu.matmul %361, %359, %cst_381 {dimension_numbers = #tpu.dot_dimension_numbers<[1], [0], [0], [1], [0, 0, 1, 1], [], []>} : vector<4x4xf32>, vector<4x256xf32>, vector<4x256xf32> -> vector<4x256xf32>
    %363 = arith.addf %358, %362 : vector<4x256xf32>
    %364 = arith.addf %352, %363 : vector<4x256xf32>
    %c3_382 = arith.constant 3 : index
    %c0_383 = arith.constant 0 : index
    %c0_384 = arith.constant 0 : index
    %365 = vector.load %arg15[%c3_382, %c0_383, %c0_384] : memref<9x256x256xf32, #tpu.memory_space<vmem>>, vector<1x256x256xf32>
    %366 = vector.shape_cast %365 : vector<1x256x256xf32> to vector<256x256xf32>
    %cst_385 = arith.constant dense<0.000000e+00> : vector<4x256xf32>
    %367 = tpu.matmul %323, %366, %cst_385 {dimension_numbers = #tpu.dot_dimension_numbers<[1], [0], [0], [1], [0, 0, 1, 1], [], []>} : vector<4x256xf32>, vector<256x256xf32>, vector<4x256xf32> -> vector<4x256xf32>
    %c3_386 = arith.constant 3 : index
    %c0_387 = arith.constant 0 : index
    %c0_388 = arith.constant 0 : index
    %368 = vector.load %arg10[%c3_386, %c0_387, %c0_388] : memref<9x4x4xf32, #tpu.memory_space<vmem>>, vector<1x4x4xf32>
    %369 = vector.shape_cast %368 : vector<1x4x4xf32> to vector<4x4xf32>
    %cst_389 = arith.constant dense<0.000000e+00> : vector<4x256xf32>
    %370 = tpu.matmul %369, %367, %cst_389 {dimension_numbers = #tpu.dot_dimension_numbers<[1], [0], [0], [1], [0, 0, 1, 1], [], []>} : vector<4x4xf32>, vector<4x256xf32>, vector<4x256xf32> -> vector<4x256xf32>
    %cst_390 = arith.constant dense<0.000000e+00> : vector<4x256xf32>
    %371 = tpu.matmul %325, %366, %cst_390 {dimension_numbers = #tpu.dot_dimension_numbers<[1], [0], [0], [1], [0, 0, 1, 1], [], []>} : vector<4x256xf32>, vector<256x256xf32>, vector<4x256xf32> -> vector<4x256xf32>
    %c3_391 = arith.constant 3 : index
    %c0_392 = arith.constant 0 : index
    %c0_393 = arith.constant 0 : index
    %372 = vector.load %arg11[%c3_391, %c0_392, %c0_393] : memref<9x4x4xf32, #tpu.memory_space<vmem>>, vector<1x4x4xf32>
    %373 = vector.shape_cast %372 : vector<1x4x4xf32> to vector<4x4xf32>
    %cst_394 = arith.constant dense<0.000000e+00> : vector<4x256xf32>
    %374 = tpu.matmul %373, %371, %cst_394 {dimension_numbers = #tpu.dot_dimension_numbers<[1], [0], [0], [1], [0, 0, 1, 1], [], []>} : vector<4x4xf32>, vector<4x256xf32>, vector<4x256xf32> -> vector<4x256xf32>
    %375 = arith.addf %370, %374 : vector<4x256xf32>
    %376 = arith.addf %364, %375 : vector<4x256xf32>
    %c4_395 = arith.constant 4 : index
    %c0_396 = arith.constant 0 : index
    %c0_397 = arith.constant 0 : index
    %377 = vector.load %arg15[%c4_395, %c0_396, %c0_397] : memref<9x256x256xf32, #tpu.memory_space<vmem>>, vector<1x256x256xf32>
    %378 = vector.shape_cast %377 : vector<1x256x256xf32> to vector<256x256xf32>
    %cst_398 = arith.constant dense<0.000000e+00> : vector<4x256xf32>
    %379 = tpu.matmul %323, %378, %cst_398 {dimension_numbers = #tpu.dot_dimension_numbers<[1], [0], [0], [1], [0, 0, 1, 1], [], []>} : vector<4x256xf32>, vector<256x256xf32>, vector<4x256xf32> -> vector<4x256xf32>
    %c4_399 = arith.constant 4 : index
    %c0_400 = arith.constant 0 : index
    %c0_401 = arith.constant 0 : index
    %380 = vector.load %arg10[%c4_399, %c0_400, %c0_401] : memref<9x4x4xf32, #tpu.memory_space<vmem>>, vector<1x4x4xf32>
    %381 = vector.shape_cast %380 : vector<1x4x4xf32> to vector<4x4xf32>
    %cst_402 = arith.constant dense<0.000000e+00> : vector<4x256xf32>
    %382 = tpu.matmul %381, %379, %cst_402 {dimension_numbers = #tpu.dot_dimension_numbers<[1], [0], [0], [1], [0, 0, 1, 1], [], []>} : vector<4x4xf32>, vector<4x256xf32>, vector<4x256xf32> -> vector<4x256xf32>
    %cst_403 = arith.constant dense<0.000000e+00> : vector<4x256xf32>
    %383 = tpu.matmul %325, %378, %cst_403 {dimension_numbers = #tpu.dot_dimension_numbers<[1], [0], [0], [1], [0, 0, 1, 1], [], []>} : vector<4x256xf32>, vector<256x256xf32>, vector<4x256xf32> -> vector<4x256xf32>
    %c4_404 = arith.constant 4 : index
    %c0_405 = arith.constant 0 : index
    %c0_406 = arith.constant 0 : index
    %384 = vector.load %arg11[%c4_404, %c0_405, %c0_406] : memref<9x4x4xf32, #tpu.memory_space<vmem>>, vector<1x4x4xf32>
    %385 = vector.shape_cast %384 : vector<1x4x4xf32> to vector<4x4xf32>
    %cst_407 = arith.constant dense<0.000000e+00> : vector<4x256xf32>
    %386 = tpu.matmul %385, %383, %cst_407 {dimension_numbers = #tpu.dot_dimension_numbers<[1], [0], [0], [1], [0, 0, 1, 1], [], []>} : vector<4x4xf32>, vector<4x256xf32>, vector<4x256xf32> -> vector<4x256xf32>
    %387 = arith.addf %382, %386 : vector<4x256xf32>
    %388 = arith.addf %376, %387 : vector<4x256xf32>
    %c5_408 = arith.constant 5 : index
    %c0_409 = arith.constant 0 : index
    %c0_410 = arith.constant 0 : index
    %389 = vector.load %arg15[%c5_408, %c0_409, %c0_410] : memref<9x256x256xf32, #tpu.memory_space<vmem>>, vector<1x256x256xf32>
    %390 = vector.shape_cast %389 : vector<1x256x256xf32> to vector<256x256xf32>
    %cst_411 = arith.constant dense<0.000000e+00> : vector<4x256xf32>
    %391 = tpu.matmul %323, %390, %cst_411 {dimension_numbers = #tpu.dot_dimension_numbers<[1], [0], [0], [1], [0, 0, 1, 1], [], []>} : vector<4x256xf32>, vector<256x256xf32>, vector<4x256xf32> -> vector<4x256xf32>
    %c5_412 = arith.constant 5 : index
    %c0_413 = arith.constant 0 : index
    %c0_414 = arith.constant 0 : index
    %392 = vector.load %arg10[%c5_412, %c0_413, %c0_414] : memref<9x4x4xf32, #tpu.memory_space<vmem>>, vector<1x4x4xf32>
    %393 = vector.shape_cast %392 : vector<1x4x4xf32> to vector<4x4xf32>
    %cst_415 = arith.constant dense<0.000000e+00> : vector<4x256xf32>
    %394 = tpu.matmul %393, %391, %cst_415 {dimension_numbers = #tpu.dot_dimension_numbers<[1], [0], [0], [1], [0, 0, 1, 1], [], []>} : vector<4x4xf32>, vector<4x256xf32>, vector<4x256xf32> -> vector<4x256xf32>
    %cst_416 = arith.constant dense<0.000000e+00> : vector<4x256xf32>
    %395 = tpu.matmul %325, %390, %cst_416 {dimension_numbers = #tpu.dot_dimension_numbers<[1], [0], [0], [1], [0, 0, 1, 1], [], []>} : vector<4x256xf32>, vector<256x256xf32>, vector<4x256xf32> -> vector<4x256xf32>
    %c5_417 = arith.constant 5 : index
    %c0_418 = arith.constant 0 : index
    %c0_419 = arith.constant 0 : index
    %396 = vector.load %arg11[%c5_417, %c0_418, %c0_419] : memref<9x4x4xf32, #tpu.memory_space<vmem>>, vector<1x4x4xf32>
    %397 = vector.shape_cast %396 : vector<1x4x4xf32> to vector<4x4xf32>
    %cst_420 = arith.constant dense<0.000000e+00> : vector<4x256xf32>
    %398 = tpu.matmul %397, %395, %cst_420 {dimension_numbers = #tpu.dot_dimension_numbers<[1], [0], [0], [1], [0, 0, 1, 1], [], []>} : vector<4x4xf32>, vector<4x256xf32>, vector<4x256xf32> -> vector<4x256xf32>
    %399 = arith.addf %394, %398 : vector<4x256xf32>
    %400 = arith.addf %388, %399 : vector<4x256xf32>
    %c6_421 = arith.constant 6 : index
    %c0_422 = arith.constant 0 : index
    %c0_423 = arith.constant 0 : index
    %401 = vector.load %arg15[%c6_421, %c0_422, %c0_423] : memref<9x256x256xf32, #tpu.memory_space<vmem>>, vector<1x256x256xf32>
    %402 = vector.shape_cast %401 : vector<1x256x256xf32> to vector<256x256xf32>
    %cst_424 = arith.constant dense<0.000000e+00> : vector<4x256xf32>
    %403 = tpu.matmul %323, %402, %cst_424 {dimension_numbers = #tpu.dot_dimension_numbers<[1], [0], [0], [1], [0, 0, 1, 1], [], []>} : vector<4x256xf32>, vector<256x256xf32>, vector<4x256xf32> -> vector<4x256xf32>
    %c6_425 = arith.constant 6 : index
    %c0_426 = arith.constant 0 : index
    %c0_427 = arith.constant 0 : index
    %404 = vector.load %arg10[%c6_425, %c0_426, %c0_427] : memref<9x4x4xf32, #tpu.memory_space<vmem>>, vector<1x4x4xf32>
    %405 = vector.shape_cast %404 : vector<1x4x4xf32> to vector<4x4xf32>
    %cst_428 = arith.constant dense<0.000000e+00> : vector<4x256xf32>
    %406 = tpu.matmul %405, %403, %cst_428 {dimension_numbers = #tpu.dot_dimension_numbers<[1], [0], [0], [1], [0, 0, 1, 1], [], []>} : vector<4x4xf32>, vector<4x256xf32>, vector<4x256xf32> -> vector<4x256xf32>
    %cst_429 = arith.constant dense<0.000000e+00> : vector<4x256xf32>
    %407 = tpu.matmul %325, %402, %cst_429 {dimension_numbers = #tpu.dot_dimension_numbers<[1], [0], [0], [1], [0, 0, 1, 1], [], []>} : vector<4x256xf32>, vector<256x256xf32>, vector<4x256xf32> -> vector<4x256xf32>
    %c6_430 = arith.constant 6 : index
    %c0_431 = arith.constant 0 : index
    %c0_432 = arith.constant 0 : index
    %408 = vector.load %arg11[%c6_430, %c0_431, %c0_432] : memref<9x4x4xf32, #tpu.memory_space<vmem>>, vector<1x4x4xf32>
    %409 = vector.shape_cast %408 : vector<1x4x4xf32> to vector<4x4xf32>
    %cst_433 = arith.constant dense<0.000000e+00> : vector<4x256xf32>
    %410 = tpu.matmul %409, %407, %cst_433 {dimension_numbers = #tpu.dot_dimension_numbers<[1], [0], [0], [1], [0, 0, 1, 1], [], []>} : vector<4x4xf32>, vector<4x256xf32>, vector<4x256xf32> -> vector<4x256xf32>
    %411 = arith.addf %406, %410 : vector<4x256xf32>
    %412 = arith.addf %400, %411 : vector<4x256xf32>
    %c7_434 = arith.constant 7 : index
    %c0_435 = arith.constant 0 : index
    %c0_436 = arith.constant 0 : index
    %413 = vector.load %arg15[%c7_434, %c0_435, %c0_436] : memref<9x256x256xf32, #tpu.memory_space<vmem>>, vector<1x256x256xf32>
    %414 = vector.shape_cast %413 : vector<1x256x256xf32> to vector<256x256xf32>
    %cst_437 = arith.constant dense<0.000000e+00> : vector<4x256xf32>
    %415 = tpu.matmul %323, %414, %cst_437 {dimension_numbers = #tpu.dot_dimension_numbers<[1], [0], [0], [1], [0, 0, 1, 1], [], []>} : vector<4x256xf32>, vector<256x256xf32>, vector<4x256xf32> -> vector<4x256xf32>
    %c7_438 = arith.constant 7 : index
    %c0_439 = arith.constant 0 : index
    %c0_440 = arith.constant 0 : index
    %416 = vector.load %arg10[%c7_438, %c0_439, %c0_440] : memref<9x4x4xf32, #tpu.memory_space<vmem>>, vector<1x4x4xf32>
    %417 = vector.shape_cast %416 : vector<1x4x4xf32> to vector<4x4xf32>
    %cst_441 = arith.constant dense<0.000000e+00> : vector<4x256xf32>
    %418 = tpu.matmul %417, %415, %cst_441 {dimension_numbers = #tpu.dot_dimension_numbers<[1], [0], [0], [1], [0, 0, 1, 1], [], []>} : vector<4x4xf32>, vector<4x256xf32>, vector<4x256xf32> -> vector<4x256xf32>
    %cst_442 = arith.constant dense<0.000000e+00> : vector<4x256xf32>
    %419 = tpu.matmul %325, %414, %cst_442 {dimension_numbers = #tpu.dot_dimension_numbers<[1], [0], [0], [1], [0, 0, 1, 1], [], []>} : vector<4x256xf32>, vector<256x256xf32>, vector<4x256xf32> -> vector<4x256xf32>
    %c7_443 = arith.constant 7 : index
    %c0_444 = arith.constant 0 : index
    %c0_445 = arith.constant 0 : index
    %420 = vector.load %arg11[%c7_443, %c0_444, %c0_445] : memref<9x4x4xf32, #tpu.memory_space<vmem>>, vector<1x4x4xf32>
    %421 = vector.shape_cast %420 : vector<1x4x4xf32> to vector<4x4xf32>
    %cst_446 = arith.constant dense<0.000000e+00> : vector<4x256xf32>
    %422 = tpu.matmul %421, %419, %cst_446 {dimension_numbers = #tpu.dot_dimension_numbers<[1], [0], [0], [1], [0, 0, 1, 1], [], []>} : vector<4x4xf32>, vector<4x256xf32>, vector<4x256xf32> -> vector<4x256xf32>
    %423 = arith.addf %418, %422 : vector<4x256xf32>
    %424 = arith.addf %412, %423 : vector<4x256xf32>
    %c8_447 = arith.constant 8 : index
    %c0_448 = arith.constant 0 : index
    %c0_449 = arith.constant 0 : index
    %425 = vector.load %arg15[%c8_447, %c0_448, %c0_449] : memref<9x256x256xf32, #tpu.memory_space<vmem>>, vector<1x256x256xf32>
    %426 = vector.shape_cast %425 : vector<1x256x256xf32> to vector<256x256xf32>
    %cst_450 = arith.constant dense<0.000000e+00> : vector<4x256xf32>
    %427 = tpu.matmul %323, %426, %cst_450 {dimension_numbers = #tpu.dot_dimension_numbers<[1], [0], [0], [1], [0, 0, 1, 1], [], []>} : vector<4x256xf32>, vector<256x256xf32>, vector<4x256xf32> -> vector<4x256xf32>
    %c8_451 = arith.constant 8 : index
    %c0_452 = arith.constant 0 : index
    %c0_453 = arith.constant 0 : index
    %428 = vector.load %arg10[%c8_451, %c0_452, %c0_453] : memref<9x4x4xf32, #tpu.memory_space<vmem>>, vector<1x4x4xf32>
    %429 = vector.shape_cast %428 : vector<1x4x4xf32> to vector<4x4xf32>
    %cst_454 = arith.constant dense<0.000000e+00> : vector<4x256xf32>
    %430 = tpu.matmul %429, %427, %cst_454 {dimension_numbers = #tpu.dot_dimension_numbers<[1], [0], [0], [1], [0, 0, 1, 1], [], []>} : vector<4x4xf32>, vector<4x256xf32>, vector<4x256xf32> -> vector<4x256xf32>
    %cst_455 = arith.constant dense<0.000000e+00> : vector<4x256xf32>
    %431 = tpu.matmul %325, %426, %cst_455 {dimension_numbers = #tpu.dot_dimension_numbers<[1], [0], [0], [1], [0, 0, 1, 1], [], []>} : vector<4x256xf32>, vector<256x256xf32>, vector<4x256xf32> -> vector<4x256xf32>
    %c8_456 = arith.constant 8 : index
    %c0_457 = arith.constant 0 : index
    %c0_458 = arith.constant 0 : index
    %432 = vector.load %arg11[%c8_456, %c0_457, %c0_458] : memref<9x4x4xf32, #tpu.memory_space<vmem>>, vector<1x4x4xf32>
    %433 = vector.shape_cast %432 : vector<1x4x4xf32> to vector<4x4xf32>
    %cst_459 = arith.constant dense<0.000000e+00> : vector<4x256xf32>
    %434 = tpu.matmul %433, %431, %cst_459 {dimension_numbers = #tpu.dot_dimension_numbers<[1], [0], [0], [1], [0, 0, 1, 1], [], []>} : vector<4x4xf32>, vector<4x256xf32>, vector<4x256xf32> -> vector<4x256xf32>
    %435 = arith.addf %430, %434 : vector<4x256xf32>
    %436 = arith.addf %424, %435 : vector<4x256xf32>
    %cst_460 = arith.constant 0.000000e+00 : f32
    %437 = vector.broadcast %cst_460 : f32 to vector<4x256xf32>
    %438 = arith.maximumf %436, %437 : vector<4x256xf32>
    %c0_461 = arith.constant 0 : index
    %c0_462 = arith.constant 0 : index
    %c0_463 = arith.constant 0 : index
    %439 = vector.load %arg16[%c0_461, %c0_462, %c0_463] : memref<1x4x256xf32, #tpu.memory_space<vmem>>, vector<1x4x256xf32>
    %440 = vector.shape_cast %439 : vector<1x4x256xf32> to vector<4x256xf32>
    %441 = vector.shape_cast %438 : vector<4x256xf32> to vector<1x4x256xf32>
    tpu.vector_store %arg16[%c0_461, %c0_462, %c0_463], %441 {strides = array<i32>} : memref<1x4x256xf32, #tpu.memory_space<vmem>>, vector<1x4x256xf32>,
    return
  }
  func.func @transform_0(%arg0: i32) -> (i32, i32, i32) {
    %c0_i32 = arith.constant 0 : i32
    %c0_i32_0 = arith.constant 0 : i32
    %c0_i32_1 = arith.constant 0 : i32
    return %arg0, %c0_i32, %c0_i32_0 : i32, i32, i32
  }
  func.func @transform_1(%arg0: i32) -> (i32, i32, i32) {
    %c0_i32 = arith.constant 0 : i32
    %c0_i32_0 = arith.constant 0 : i32
    %c0_i32_1 = arith.constant 0 : i32
    return %arg0, %c0_i32, %c0_i32_0 : i32, i32, i32
  }
  func.func @transform_2(%arg0: i32) -> (i32, i32, i32) {
    %c0_i32 = arith.constant 0 : i32
    %c0_i32_0 = arith.constant 0 : i32
    %c0_i32_1 = arith.constant 0 : i32
    %c0_i32_2 = arith.constant 0 : i32
    return %c0_i32, %c0_i32_0, %c0_i32_1 : i32, i32, i32
  }
  func.func @transform_3(%arg0: i32) -> (i32, i32) {
    %c0_i32 = arith.constant 0 : i32
    %c0_i32_0 = arith.constant 0 : i32
    %c0_i32_1 = arith.constant 0 : i32
    return %c0_i32, %c0_i32_0 : i32, i32
  }
  func.func @transform_4(%arg0: i32) -> (i32, i32, i32) {
    %c0_i32 = arith.constant 0 : i32
    %c0_i32_0 = arith.constant 0 : i32
    %c0_i32_1 = arith.constant 0 : i32
    %c0_i32_2 = arith.constant 0 : i32
    return %c0_i32, %c0_i32_0, %c0_i32_1 : i32, i32, i32
  }
  func.func @transform_5(%arg0: i32) -> (i32, i32) {
    %c0_i32 = arith.constant 0 : i32
    %c0_i32_0 = arith.constant 0 : i32
    %c0_i32_1 = arith.constant 0 : i32
    return %c0_i32, %c0_i32_0 : i32, i32
  }
  func.func @transform_6(%arg0: i32) -> (i32, i32, i32) {
    %c0_i32 = arith.constant 0 : i32
    %c0_i32_0 = arith.constant 0 : i32
    %c0_i32_1 = arith.constant 0 : i32
    %c0_i32_2 = arith.constant 0 : i32
    return %c0_i32, %c0_i32_0, %c0_i32_1 : i32, i32, i32
  }
  func.func @transform_7(%arg0: i32) -> (i32, i32, i32) {
    %c0_i32 = arith.constant 0 : i32
    %c0_i32_0 = arith.constant 0 : i32
    %c0_i32_1 = arith.constant 0 : i32
    %c0_i32_2 = arith.constant 0 : i32
    return %c0_i32, %c0_i32_0, %c0_i32_1 : i32, i32, i32
  }
  func.func @transform_8(%arg0: i32) -> (i32, i32) {
    %c0_i32 = arith.constant 0 : i32
    %c0_i32_0 = arith.constant 0 : i32
    %c0_i32_1 = arith.constant 0 : i32
    return %c0_i32, %c0_i32_0 : i32, i32
  }
  func.func @transform_9(%arg0: i32) -> (i32, i32, i32) {
    %c0_i32 = arith.constant 0 : i32
    %c0_i32_0 = arith.constant 0 : i32
    %c0_i32_1 = arith.constant 0 : i32
    %c0_i32_2 = arith.constant 0 : i32
    return %c0_i32, %c0_i32_0, %c0_i32_1 : i32, i32, i32
  }
  func.func @transform_10(%arg0: i32) -> (i32, i32, i32) {
    %c0_i32 = arith.constant 0 : i32
    %c0_i32_0 = arith.constant 0 : i32
    %c0_i32_1 = arith.constant 0 : i32
    %c0_i32_2 = arith.constant 0 : i32
    return %c0_i32, %c0_i32_0, %c0_i32_1 : i32, i32, i32
  }
  func.func @transform_11(%arg0: i32) -> (i32, i32) {
    %c0_i32 = arith.constant 0 : i32
    %c0_i32_0 = arith.constant 0 : i32
    %c0_i32_1 = arith.constant 0 : i32
    return %c0_i32, %c0_i32_0 : i32, i32
  }
  func.func @transform_12(%arg0: i32) -> (i32, i32, i32) {
    %c0_i32 = arith.constant 0 : i32
    %c0_i32_0 = arith.constant 0 : i32
    %c0_i32_1 = arith.constant 0 : i32
    %c0_i32_2 = arith.constant 0 : i32
    return %c0_i32, %c0_i32_0, %c0_i32_1 : i32, i32, i32
  }
  func.func @transform_13(%arg0: i32) -> (i32, i32, i32) {
    %c0_i32 = arith.constant 0 : i32
    %c0_i32_0 = arith.constant 0 : i32
    %c0_i32_1 = arith.constant 0 : i32
    %c0_i32_2 = arith.constant 0 : i32
    return %c0_i32, %c0_i32_0, %c0_i32_1 : i32, i32, i32
  }
  func.func @transform_14(%arg0: i32) -> (i32, i32, i32) {
    %c0_i32 = arith.constant 0 : i32
    %c0_i32_0 = arith.constant 0 : i32
    %c0_i32_1 = arith.constant 0 : i32
    %c0_i32_2 = arith.constant 0 : i32
    return %c0_i32, %c0_i32_0, %c0_i32_1 : i32, i32, i32
  }
  func.func @transform_15(%arg0: i32) -> (i32, i32, i32) {
    %c0_i32 = arith.constant 0 : i32
    %c0_i32_0 = arith.constant 0 : i32
    %c0_i32_1 = arith.constant 0 : i32
    return %arg0, %c0_i32, %c0_i32_0 : i32, i32, i32
  }
}

</mosaic_0001>

<bundles_post_ra>
// kernel: decoder_block_forward.1
= control target key start
LH: loop header
LB: loop body
LE: loop exit
PB: predicated region body
PF: predicated region fallthrough
CT: control target
= control target key end

     0   :  { %s17785_s0 = inlined_call_operand.vmem [shape: f32[2,8,64], index: 0, kind: input, shape index: {}]   ;;  %s17786_s1 = inlined_call_operand.vmem [shape: f32[2,4,256], index: 1, kind: input, shape index: {}]   ;;  %s17787_s2 = inlined_call_operand.vmem [shape: f32[9,8,8], index: 2, kind: input, shape index: {}]   ;;  %s17788_s3 = inlined_call_operand.vmem [shape: f32[8,1], index: 3, kind: input, shape index: {}]   ;;  %s17789_s4 = inlined_call_operand.hbm [shape: f32[9,4,8], index: 4, kind: input, shape index: {}]   ;;  %s17790_s5 = inlined_call_operand.vmem [shape: f32[4,1], index: 5, kind: input, shape index: {}]   ;;  %s17791_s6 = inlined_call_operand.vmem [shape: f32[9,8,4], index: 6, kind: input, shape index: {}]   ;;  %s17792_s7 = inlined_call_operand.vmem [shape: f32[9,8,4], index: 7, kind: input, shape index: {}]   ;;  %s17793_s8 = inlined_call_operand.vmem [shape: f32[8,1], index: 8, kind: input, shape index: {}]   ;;  %s17794_s9 = inlined_call_operand.vmem [shape: f32[9,4,4], index: 9, kind: input, shape index: {}]   ;;  %s17795_s10 = inlined_call_operand.vmem [shape: f32[9,4,4], index: 10, kind: input, shape index: {}]   ;;  %s17796_s11 = inlined_call_operand.vmem [shape: f32[4,1], index: 11, kind: input, shape index: {}]   ;;  %s17797_s12 = inlined_call_operand.hbm [shape: f32[9,64,64], index: 12, kind: input, shape index: {}]   ;;  %s17798_s13 = inlined_call_operand.hbm [shape: f32[9,64,256], index: 13, kind: input, shape index: {}]   ;;  %s17799_s14 = inlined_call_operand.hbm [shape: f32[9,256,256], index: 14, kind: input, shape index: {}]   ;;  %s17800_s15 = inlined_call_operand.vmem [shape: f32[2,4,256], index: 15, kind: output, shape index: {}]  }
   0x1   :  { %18338 = sst [smem:[#allocation286_spill]] %s17794_s9 }
   0x2   :  { %18339 = sst [smem:[#allocation287_spill]] %s17795_s10 }
   0x3   :  { %18340 = sst [smem:[#allocation288_spill]] %s17800_s15 }
   0x4   :  { %20 = vsyncpa [#allocation3], 0 }
   0x5   :  { %21 = vsyncpa [#allocation5], 0 }
   0x6   :  { %22 = vsyncpa [#allocation8], 0  ;;  %s14957_s18 = smov 0  }
   0x7 LB: > { %18341 = sst [smem:[#allocation12_spill]] %s14861_s18  ;;  %s14863_s19 = smov [#allocation4]   ;;  %s14861_s18 = sphi %s14957_s18, %s28_s18  }
   0x8   : > { %s436_s20 = sshll.u32 %s14863_s19, 4  ;;  %s14963_s21 = sadd.s32 4294967295, %s14861_s18   ;;  %s14968_s20 = int_to_ptr.vmem [resolvable:$true] %s436_s20 }
   0x9   : > { %p11029_p0 = scmp.ge.s32.totalorder %s14861_s18, 1  ;;  %p384_p1 = scmp.lt.s32.totalorder %s14861_s18, 3 }
   0xa   : > { %p17804_p2 = scmp.eq.s32.totalorder %s14963_s21, 0  ;;  %s14864_s23 = smov [#allocation2]  }
   0xb   : > { %p14970_p3 = pnand %p11029_p0, %p384_p1  ;;  %s402_s24 = sshll.u32 %s14864_s23, 4  ;;  %s14976_s24 = int_to_ptr.vmem [resolvable:$true] %s402_s24 }
   0xc   : > { %s14865_s26 = smov [#allocation6]   ;;  %s14731_s30 = scalar_lea.hbm %s17797_s12, 9216 }
   0xd   : > { %s18342_s22 = scalar_select %p14970_p3, 1, 0 }
   0xe   : > { %p14683_p4 = pneg %p14970_p3  ;;  %s14984_s27 = sshll.u32 %s14865_s26, 4  ;;  %s450_s27 = int_to_ptr.vmem [resolvable:$true] %s14984_s27 }
   0xf   : > { %p14732_p6 = scmp.ne.s32.totalorder %s17797_s12, %s14731_s30  ;;  %p14738_p10 = scmp.lt.u32.totalorder %s14731_s30, %s17797_s12 }
  0x10   : > { %p14980_p5 = pnand %p17804_p2, %p14683_p4 }
  0x12   : > { %p14994_p7 = pneg %p14980_p5 }
  0x14   : > { %p14734_p8 = pnand %p14994_p7, %p14732_p6 }
  0x16   : > { %p14735_p9 = pneg %p14734_p8 }
  0x18   : > { %p14740_p11 = pnand %p14738_p10, %p14735_p9 }
  0x1a   : > { %14743 = shalt.err (!%p14740_p11)
}
  0x1b   : > { %s14744_s28 = scalar_lea.vmem %s14968_s20, 9216  ;;  %p14752_p1 = scmp.lt.s32.totalorder %s14968_s20, %s14968_s20 }
  0x1c   : > { %p14745_p12 = scmp.ne.s32.totalorder %s14968_s20, %s14744_s28  ;;  %p14753_p4 = scmp.lt.s32.totalorder %s14744_s28, %s14744_s28 }
  0x1e   : > { %p14747_p13 = pnand %p14745_p12, %p14994_p7  ;;  %p14754_p6 = por %p14753_p4, %p14752_p1 }
  0x20   : > { %p14748_p0 = pneg %p14747_p13 }
  0x22   : > { %p14755_p8 = pnand %p14754_p6, %p14748_p0 }
  0x24   : > { %14758 = shalt.err (!%p14755_p8)
}
  0x25   : > { %s14866_s29 = smov 128   ;;  %s14867_s30 = smov 8  }
  0x26   : > { %14689 = dma.hbm_to_vmem [thread:$0]  (!%p14980_p5), %s17797_s12, 9216, %s14968_s20, [#allocation5], %s14866_s29, %s14866_s29, %s14867_s30  }
  0x27   : > { %s14759_s18 = scalar_lea.hbm %s17789_s4, 576 }
  0x28   : > { %p14760_p9 = scmp.ne.s32.totalorder %s17789_s4, %s14759_s18  ;;  %p14766_p12 = scmp.lt.u32.totalorder %s14759_s18, %s17789_s4 }
  0x2a   : > { %p14762_p10 = pnand %p14760_p9, %p14994_p7 }
  0x2c   : > { %p14763_p11 = pneg %p14762_p10 }
  0x2e   : > { %p14768_p13 = pnand %p14766_p12, %p14763_p11 }
  0x30   : > { %14771 = shalt.err (!%p14768_p13)
}
  0x31   : > { %s14772_s20 = scalar_lea.vmem %s14976_s24, 576  ;;  %p14780_p6 = scmp.lt.s32.totalorder %s14976_s24, %s14976_s24 }
  0x32   : > { %p14773_p0 = scmp.ne.s32.totalorder %s14976_s24, %s14772_s20  ;;  %p14781_p8 = scmp.lt.s32.totalorder %s14772_s20, %s14772_s20 }
  0x34   : > { %p14775_p1 = pnand %p14773_p0, %p14994_p7  ;;  %p14782_p9 = por %p14781_p8, %p14780_p6 }
  0x36   : > { %p14776_p4 = pneg %p14775_p1 }
  0x38   : > { %p14783_p10 = pnand %p14782_p9, %p14776_p4 }
  0x3a   : > { %14786 = shalt.err (!%p14783_p10)
}
  0x3b   : > { %s14868_s9 = smov 64   ;;  %s14869_s10 = smov 4  }
  0x3c   : > { %14686 = dma.hbm_to_vmem [thread:$0]  (!%p14980_p5), %s17789_s4, 576, %s14976_s24, [#allocation3], %s14868_s9, %s14868_s9, %s14869_s10  }
  0x3d   : > { %s14787_s16 = scalar_lea.hbm %s17798_s13, 18432 }
  0x3e   : > { %p14788_p11 = scmp.ne.s32.totalorder %s17798_s13, %s14787_s16  ;;  %p14794_p0 = scmp.lt.u32.totalorder %s14787_s16, %s17798_s13 }
  0x40   : > { %p14790_p12 = pnand %p14788_p11, %p14994_p7 }
  0x42   : > { %p14791_p13 = pneg %p14790_p12 }
  0x44   : > { %p14796_p1 = pnand %p14794_p0, %p14791_p13 }
  0x46   : > { %14799 = shalt.err (!%p14796_p1)
}
  0x47   : > { %s14800_s20 = scalar_lea.vmem %s450_s27, 18432  ;;  %p14808_p9 = scmp.lt.s32.totalorder %s450_s27, %s450_s27 }
  0x48   : > { %p14801_p4 = scmp.ne.s32.totalorder %s450_s27, %s14800_s20  ;;  %p14809_p10 = scmp.lt.s32.totalorder %s14800_s20, %s14800_s20 }
  0x4a   : > { %p14803_p6 = pnand %p14801_p4, %p14994_p7  ;;  %p14810_p2 = por %p14809_p10, %p14808_p9 }
  0x4c   : > { %p14804_p8 = pneg %p14803_p6 }
  0x4e   : > { %p14811_p3 = pnand %p14810_p2, %p14804_p8 }
  0x50   : > { %14814 = shalt.err (!%p14811_p3)
}
  0x51   : > { %s14870_s24 = smov 256   ;;  %s14871_s9 = smov 16  }
  0x52   : > { %14692 = dma.hbm_to_vmem [thread:$0]  (!%p14980_p5), %s17798_s13, 18432, %s450_s27, [#allocation5], %s14870_s24, %s14870_s24, %s14871_s9  }
  0x53   : > { %s14872_s18 = smov [#allocation7]   ;;  %s14815_s17 = scalar_lea.hbm %s17799_s14, 73728 }
  0x54   : > { %s462_s29 = sshll.u32 %s14872_s18, 4  ;;  %p14816_p2 = scmp.ne.s32.totalorder %s17799_s14, %s14815_s17  ;;  %s463_s29 = int_to_ptr.vmem [resolvable:$true] %s462_s29 }
  0x55   : > { %p14822_p12 = scmp.lt.u32.totalorder %s14815_s17, %s17799_s14 }
  0x56   : > { %p14818_p3 = pnand %p14816_p2, %p14994_p7 }
  0x58   : > { %p14819_p11 = pneg %p14818_p3 }
  0x5a   : > { %p14824_p13 = pnand %p14822_p12, %p14819_p11 }
  0x5c   : > { %14827 = shalt.err (!%p14824_p13)
}
  0x5d   : > { %s14828_s27 = scalar_lea.vmem %s463_s29, 73728  ;;  %p14836_p6 = scmp.lt.s32.totalorder %s463_s29, %s463_s29 }
  0x5e   : > { %p14829_p0 = scmp.ne.s32.totalorder %s463_s29, %s14828_s27  ;;  %p14837_p8 = scmp.lt.s32.totalorder %s14828_s27, %s14828_s27 }
  0x60   : > { %p14831_p1 = pnand %p14829_p0, %p14994_p7  ;;  %p14838_p9 = por %p14837_p8, %p14836_p6 }
  0x62   : > { %p14832_p4 = pneg %p14831_p1 }
  0x64   : > { %p14839_p10 = pnand %p14838_p9, %p14832_p4 }
  0x66   : > { %14842 = shalt.err (!%p14839_p10)
}
  0x67   : > { %14695 = dma.hbm_to_vmem [thread:$0]  (!%p14980_p5), %s17799_s14, 73728, %s463_s29, [#allocation8], %s14870_s24, %s14870_s24, %s14871_s9  }
  0x68   : > { %p18345_p2 = scmp.ne.s32.totalorder %s18342_s22, 0 }
  0x6a   : > { %493 = sbr.rel (%p18345_p2) target bundleno = 9478 (0x2506), region = 80 }
  0x71   : > { %p18346_p3 = scmp.eq.s32.totalorder %s14963_s21, 0 }
  0x73   : > { %14848 = dma.done.wait (%p18346_p3), [#allocation3], 576   ;;  %p18347_p7 = pmov %p18346_p3 }
  0x74   : > { %p18348_p11 = pmov %p18346_p3 }
  0x75   : > { %14850 = vsyncadd (%p18347_p7), [#allocation3], 4294966720 }
  0x76   : > { %14852 = dma.done.wait (%p18348_p11), [#allocation5], 27648   ;;  %p18349_p12 = pmov %p18346_p3 }
  0x77   : > { %p18350_p13 = pmov %p18346_p3 }
  0x78   : > { %14854 = vsyncadd (%p18349_p12), [#allocation5], 4294939648 }
  0x79   : > { %14856 = dma.done.wait (%p18350_p13), [#allocation8], 73728   ;;  %p18351_p5 = pmov %p18346_p3 }
  0x7a   : > { %v14873_v0 = vmov 0.0|0.0   ;;  %vm14874_vm0 = vmmov 0   ;;  %v17806_v1 = vmov 0.0   ;;  %v579_v2 = vld [vmem:[#allocation4] sm:$0xff]  ;;  %v580_v3 = vld [vmem:[#allocation4 + $0x8] sm:$0xff]  ;;  %v581_v4 = vld [vmem:[#allocation4 + $0x10] sm:$0xff] }
  0x7b   : > { %14858 = vsyncadd (%p18351_p5), [#allocation8], 4294893568  ;;  %11881 = vmatprep.subr.bf16.mxu0 %v14873_v0  ;;  %11465 = vmatprep.mubr.msk.f32.mxu0 %vm14874_vm0, %v17806_v1  ;;  %v15095_v5 = vpack.c.bf16 %v580_v3, %v579_v2  ;;  %v582_v6 = vld [vmem:[#allocation4 + $0x18] sm:$0xff]  ;;  %p557_p0 = scmp.lt.s32.totalorder %s14963_s21, 1  ;;  %v583_v8 = vld [vmem:[#allocation4 + $0x20] sm:$0xff]  ;;  %vm587_vm1 = vcmask 523264  }
  0x7c   : > { %11468 = vmatprep.subr.mxu1 %v17806_v1  ;;  %11470 = vmatprep.mubr.msk.f32.mxu1 %vm14874_vm0, %v17806_v1  ;;  %v15099_v7 = vpack.c.bf16 %v582_v6, %v581_v4  ;;  %v584_v9 = vld [vmem:[#allocation4 + $0x28] sm:$0xff]  ;;  %v585_v11 = vld [vmem:[#allocation4 + $0x30] sm:$0xff]  ;;  %v586_v12 = vld [vmem:[#allocation4 + $0x38] sm:$0xff]  ;;  %v14876_v16 = vmov 0   ;;  %vm662_vm2 = vcmask 64512   ;;  %vm4976_vm3 = vcmask 1043456  }
  0x7d   : > { %11883 = vmatpush3.bf16.msra.mxu0 %v15095_v5  ;;  %s19087_s21 = smov (!%p557_p0, %s14963_s21), 1  ;;  %v15104_v10 = vpack.c.bf16 %v584_v9, %v583_v8  ;;  %v15110_v13 = vpack.c.bf16 %v586_v12, %v585_v11  ;;  %v573_v15 = vld [vmem:[%s17788_s3] sm:$0xff]  ;;  %14726 = vset.pattern.permute.xlu0 %v14876_v16  ;;  %v739_v18 = vld [vmem:[#allocation4 + $0x48] sm:$0xff]  ;;  %v740_v22 = vld [vmem:[#allocation4 + $0x50] sm:$0xff]  ;;  %vm4972_vm4 = vcmask 31744   ;;  %s18763_s18 = sld [smem:[#allocation286_spill]] }
  0x7e   : > { %11884 = vmatprep.subr.bf16.mxu0 %v14873_v0  ;;  %s15107_s22 = sshll.u32 %s19087_s21, 3  ;;  %14727 = vset.pattern.permute.xlu1 %v14876_v16  ;;  %v738_v17 = vld [vmem:[#allocation4 + $0x40] sm:$0xff]  ;;  %v741_v23 = vld [vmem:[#allocation4 + $0x58] sm:$0xff]  ;;  %v743_v27 = vld [vmem:[#allocation4 + $0x68] sm:$0xff]  ;;  %s18758_s21 = sld [smem:[#allocation287_spill]] }
  0x7f   : > { %s560_s24 = scalar_lea.vmem %s17785_s0, %s15107_s22  ;;  %576 = vperm.xlu0 %14726, %v573_v15   ;;  %v15131_v19 = vld [vmem:[%s17787_s2] sm:$0xff]  ;;  %v15133_v20 = vpack.c.bf16 %v739_v18, %v738_v17  ;;  %v15139_v25 = vpack.c.bf16 %v741_v23, %v740_v22  ;;  %v744_v29 = vld [vmem:[#allocation4 + $0x70] sm:$0xff]  ;;  %v894_v35 = vld [vmem:[#allocation4 + $0x88] sm:$0xff]  ;;  %s15734_s23 = scalar_lea.vmem %s17786_s1, %s15107_s22 }
  0x80   : > { %v15118_v14 = vld [vmem:[%s560_s24] sm:$0xff]  ;;  %v15163_v36 = vld [vmem:[%s17787_s2 + $0x8] sm:$0xff]  ;;  %v895_v39 = vld [vmem:[#allocation4 + $0x90] sm:$0xff]  ;;  %s19084_s28 = sld [smem:[#allocation288_spill]] }
  0x81   : > { %11886 = vmatpush3.bf16.msra.mxu0 %v15099_v7  ;;  %v742_v26 = vld [vmem:[#allocation4 + $0x60] sm:$0xff]  ;;  %v745_v30 = vld [vmem:[#allocation4 + $0x78] sm:$0xff]  ;;  %v898_v44 = vld [vmem:[#allocation4 + $0xa8] sm:$0xff] }
  0x82   : > { %11887 = vmatprep.subr.bf16.mxu0 %v14873_v0  ;;  %v15145_v28 = vpack.c.bf16 %v743_v27, %v742_v26  ;;  %v15149_v31 = vpack.c.bf16 %v745_v30, %v744_v29  ;;  %v893_v34 = vld [vmem:[#allocation4 + $0x80] sm:$0xff]  ;;  %v896_v40 = vld [vmem:[#allocation4 + $0x98] sm:$0xff]  ;;  %v899_v46 = vld [vmem:[#allocation4 + $0xb0] sm:$0xff] }
  0x83   : > { %v15165_v37 = vpack.c.bf16 %v894_v35, %v893_v34  ;;  %v15171_v42 = vpack.c.bf16 %v896_v40, %v895_v39  ;;  %v897_v43 = vld [vmem:[#allocation4 + $0xa0] sm:$0xff]  ;;  %v900_v47 = vld [vmem:[#allocation4 + $0xb8] sm:$0xff]  ;;  %v1204_v50 = vld [vmem:[#allocation4 + $0x108] sm:$0xff]  ;;  %s18764_s29 = smov %s18763_s18 }
  0x84   : > { %v15177_v45 = vpack.c.bf16 %v898_v44, %v897_v43  ;;  %v15181_v48 = vpack.c.bf16 %v900_v47, %v899_v46  ;;  %v1203_v49 = vld [vmem:[#allocation4 + $0x100] sm:$0xff]  ;;  %v1205_v52 = vld [vmem:[#allocation4 + $0x110] sm:$0xff]  ;;  %v1206_v53 = vld [vmem:[#allocation4 + $0x118] sm:$0xff] }
  0x85   : > { %11889 = vmatpush3.bf16.msra.mxu0 %v15104_v10  ;;  %v15190_v51 = vpack.c.bf16 %v1204_v50, %v1203_v49  ;;  %v15194_v54 = vpack.c.bf16 %v1206_v53, %v1205_v52  ;;  %v1207_v55 = vld [vmem:[#allocation4 + $0x120] sm:$0xff]  ;;  %v1208_v56 = vld [vmem:[#allocation4 + $0x128] sm:$0xff]  ;;  %v1209_v58 = vld [vmem:[#allocation4 + $0x130] sm:$0xff] }
  0x86   : > { %11890 = vmatprep.subr.bf16.mxu0 %v14873_v0  ;;  %v15198_v57 = vpack.c.bf16 %v1208_v56, %v1207_v55  ;;  %v1210_v59 = vld [vmem:[#allocation4 + $0x138] sm:$0xff]  ;;  %v1358_v61 = vld [vmem:[#allocation4 + $0x140] sm:$0xff]  ;;  %v1359_v62 = vld [vmem:[#allocation4 + $0x148] sm:$0xff]  ;;  %s570_s20 = scalar_lea.vmem %s19084_s28, %s15107_s22 }
  0x87   : > { %v15202_v60 = vpack.c.bf16 %v1210_v59, %v1209_v58  ;;  %v15206_v63 = vpack.c.bf16 %v1359_v62, %v1358_v61  ;;  %v1360_v2 = vld [vmem:[#allocation4 + $0x150] sm:$0xff]  ;;  %v1361_v3 = vld [vmem:[#allocation4 + $0x158] sm:$0xff]  ;;  %v1362_v4 = vld [vmem:[#allocation4 + $0x160] sm:$0xff] }
  0x88   : > { %v15214_v6 = vpack.c.bf16 %v1361_v3, %v1360_v2  ;;  %v1363_v8 = vld [vmem:[#allocation4 + $0x168] sm:$0xff]  ;;  %v1364_v11 = vld [vmem:[#allocation4 + $0x170] sm:$0xff]  ;;  %v1365_v12 = vld [vmem:[#allocation4 + $0x178] sm:$0xff] }
  0x89   : > { %11892 = vmatpush3.bf16.msra.mxu0 %v15110_v13  ;;  %v15217_v9 = vpack.c.bf16 %v1363_v8, %v1362_v4  ;;  %v15221_v15 = vpack.c.bf16 %v1365_v12, %v1364_v11  ;;  %v1048_v23 = vld [vmem:[#allocation4 + $0xc0] sm:$0xff]  ;;  %v15239_v26 = vld [vmem:[%s17787_s2 + $0x10] sm:$0xff]  ;;  %v1671_v56 = vld [vmem:[#allocation4 + $0x1d8] sm:$0xff] }
  0x8a   : > { %11492 = vmatprep.subr.mxu0 %v17806_v1  ;;  %v1050_v30 = vld [vmem:[#allocation4 + $0xd0] sm:$0xff]  ;;  %v1052_v35 = vld [vmem:[#allocation4 + $0xe0] sm:$0xff]  ;;  %v1669_v52 = vld [vmem:[#allocation4 + $0x1c8] sm:$0xff] }
  0x8b   : > { %v1054_v40 = vld [vmem:[#allocation4 + $0xf0] sm:$0xff]  ;;  %v1668_v50 = vld [vmem:[#allocation4 + $0x1c0] sm:$0xff]  ;;  %v1673_v61 = vld [vmem:[#allocation4 + $0x1e8] sm:$0xff] }
  0x8c   : > { %11466 = vmatmul.mubr.msk.f32.vlgmr.msra.gmra.mrb[0].mxu0 %vm587_vm1, %v15118_v14  ;;  %v15266_v53 = vpack.c.bf16 %v1669_v52, %v1668_v50  ;;  %v1670_v55 = vld [vmem:[#allocation4 + $0x1d0] sm:$0xff]  ;;  %v1672_v59 = vld [vmem:[#allocation4 + $0x1e0] sm:$0xff]  ;;  %v1675_v3 = vld [vmem:[#allocation4 + $0x1f8] sm:$0xff] }
  0x8d   : > { %11494 = vmatprep.mubr.msk.f32.mxu0 %vm14874_vm0, %v17806_v1  ;;  %v15270_v58 = vpack.c.bf16 %v1671_v56, %v1670_v55  ;;  %v15274_v62 = vpack.c.bf16 %v1673_v61, %v1672_v59  ;;  %v1674_v2 = vld [vmem:[#allocation4 + $0x1f0] sm:$0xff]  ;;  %v15318_v12 = vld [vmem:[%s17787_s2 + $0x28] sm:$0xff]  ;;  %v1826_v56 = vld [vmem:[#allocation4 + $0x218] sm:$0xff] }
  0x8e   : > { %v15278_v4 = vpack.c.bf16 %v1675_v3, %v1674_v2  ;;  %v15358_v50 = vld [vmem:[%s17787_s2 + $0x38] sm:$0xff]  ;;  %v1827_v61 = vld [vmem:[#allocation4 + $0x220] sm:$0xff]  ;;  %v1828_v2 = vld [vmem:[#allocation4 + $0x228] sm:$0xff] }
  0x8f   : > { %v1825_v55 = vld [vmem:[#allocation4 + $0x210] sm:$0xff]  ;;  %v15371_v3 = vpack.c.bf16 %v1828_v2, %v1827_v61  ;;  %v3592_v2 = vld [vmem:[#allocation6 + $0x100] sm:$0xff] }
  0x90   : > { %v15365_v59 = vpack.c.bf16 %v1826_v56, %v1825_v55 }
  0xfe   : > { %v15230_v16 = vpop.permute.xlu0 %576 }
 0x15f   : > { %v657_v21 = vpop.f32.mrb[0].mxu0 }
 0x160   : > { %v11467_v24 = vpop.f32.mrb[1].mxu0  ;;  %11469 = vmatpush3.msra.mxu1 %v657_v21 }
 0x161   : > { %11471 = vmatmul.mubr.msk.f32.vlgmr.msra.gmra.mrb[0].mxu1 %vm662_vm2, %v15131_v19  ;;  %11893 = vmatprep.subr.bf16.mxu1 %v14873_v0  ;;  %v1049_v24 = vld [vmem:[#allocation4 + $0xc8] sm:$0xff] }
 0x162   : > { %11895 = vmatpush3.bf16.msra.mxu1 %v15133_v20  ;;  %11489 = vmatprep.mubr.msk.f32.mxu1 %vm14874_vm0, %v17806_v1  ;;  %v15241_v27 = vpack.c.bf16 %v1049_v24, %v1048_v23  ;;  %v1517_v24 = vld [vmem:[#allocation4 + $0x1a0] sm:$0xff] }
 0x163   : > { %11896 = vmatprep.subr.bf16.mxu1 %v14873_v0 }
 0x166   : > { %11898 = vmatpush3.bf16.msra.mxu1 %v15139_v25 }
 0x167   : > { %11899 = vmatprep.subr.bf16.mxu1 %v14873_v0 }
 0x16a   : > { %11901 = vmatpush3.bf16.msra.mxu1 %v15145_v28 }
 0x16b   : > { %11902 = vmatprep.subr.bf16.mxu1 %v14873_v0 }
 0x16e   : > { %11904 = vmatpush3.bf16.msra.mxu1 %v15149_v31 }
 0x16f   : > { %11516 = vmatprep.subr.mxu1 %v17806_v1 }
 0x171   : > { %11490 = vmatmul.mubr.msk.f32.vlgmr.msra.gmra.mrb[2].mxu1 %vm587_vm1, %v15118_v14 }
 0x172   : > { %11518 = vmatprep.mubr.msk.f32.mxu1 %vm14874_vm0, %v17806_v1 }
 0x234   : > { %v15158_v32 = vpop.f32.mrb[0].mxu1 }
 0x235   : > { %v11472_v33 = vpop.f32.mrb[1].mxu1  ;;  %v736_v17 = vadd.f32 %v15158_v32, %v15230_v16 }
 0x236   : > { %v1051_v33 = vld [vmem:[#allocation4 + $0xd8] sm:$0xff] }
 0x237   : > { %v15247_v32 = vpack.c.bf16 %v1051_v33, %v1050_v30  ;;  %v1519_v33 = vld [vmem:[#allocation4 + $0x1b0] sm:$0xff] }
 0x244   : > { %v812_v38 = vpop.f32.mrb[2].mxu1 }
 0x245   : > { %v11491_v41 = vpop.f32.mrb[3].mxu1  ;;  %11493 = vmatpush3.msra.mxu0 %v812_v38  ;;  %v1053_v38 = vld [vmem:[#allocation4 + $0xe8] sm:$0xff] }
 0x246   : > { %11495 = vmatmul.mubr.msk.f32.vlgmr.msra.gmra.mrb[2].mxu0 %vm662_vm2, %v15163_v36  ;;  %11905 = vmatprep.subr.bf16.mxu0 %v14873_v0  ;;  %v15253_v39 = vpack.c.bf16 %v1053_v38, %v1052_v35  ;;  %v1055_v41 = vld [vmem:[#allocation4 + $0xf8] sm:$0xff] }
 0x247   : > { %11907 = vmatpush3.bf16.msra.mxu0 %v15165_v37  ;;  %11513 = vmatprep.mubr.msk.f32.mxu0 %vm14874_vm0, %v17806_v1  ;;  %v15257_v43 = vpack.c.bf16 %v1055_v41, %v1054_v40  ;;  %v15347_v41 = vld [vmem:[%s17787_s2 + $0x30] sm:$0xff] }
 0x248   : > { %11908 = vmatprep.subr.bf16.mxu0 %v14873_v0 }
 0x24b   : > { %11910 = vmatpush3.bf16.msra.mxu0 %v15171_v42 }
 0x24c   : > { %11911 = vmatprep.subr.bf16.mxu0 %v14873_v0 }
 0x24f   : > { %11913 = vmatpush3.bf16.msra.mxu0 %v15177_v45 }
 0x250   : > { %11914 = vmatprep.subr.bf16.mxu0 %v14873_v0 }
 0x253   : > { %11916 = vmatpush3.bf16.msra.mxu0 %v15181_v48 }
 0x254   : > { %11929 = vmatprep.subr.bf16.mxu0 %v14873_v0 }
 0x256   : > { %11514 = vmatmul.mubr.msk.f32.vlgmr.msra.gmra.mrb[4].mxu0 %vm587_vm1, %v15118_v14 }
 0x257   : > { %11561 = vmatprep.mubr.msk.f32.mxu0 %vm14874_vm0, %v17806_v1  ;;  %11931 = vmatpush3.bf16.msra.mxu0 %v15190_v51 }
 0x258   : > { %11932 = vmatprep.subr.bf16.mxu0 %v14873_v0 }
 0x25b   : > { %11934 = vmatpush3.bf16.msra.mxu0 %v15194_v54 }
 0x25c   : > { %11935 = vmatprep.subr.bf16.mxu0 %v14873_v0 }
 0x25f   : > { %11937 = vmatpush3.bf16.msra.mxu0 %v15198_v57 }
 0x260   : > { %11938 = vmatprep.subr.bf16.mxu0 %v14873_v0 }
 0x263   : > { %11940 = vmatpush3.bf16.msra.mxu0 %v15202_v60 }
 0x264   : > { %11941 = vmatprep.subr.bf16.mxu0 %v14873_v0 }
 0x266   : > { %11562 = vmatmul.mubr.msk.f32.vlgmr.msra.gmra.mrb[6].mxu0 %vm587_vm1, %v15118_v14 }
 0x267   : > { %11943 = vmatpush3.bf16.msra.mxu0 %v15206_v63  ;;  %11585 = vmatprep.mubr.msk.f32.mxu0 %vm14874_vm0, %v17806_v1 }
 0x268   : > { %11944 = vmatprep.subr.bf16.mxu0 %v14873_v0 }
 0x26b   : > { %11946 = vmatpush3.bf16.msra.mxu0 %v15214_v6 }
 0x26c   : > { %11947 = vmatprep.subr.bf16.mxu0 %v14873_v0 }
 0x26f   : > { %11949 = vmatpush3.bf16.msra.mxu0 %v15217_v9 }
 0x270   : > { %11950 = vmatprep.subr.bf16.mxu0 %v14873_v0 }
 0x273   : > { %11952 = vmatpush3.bf16.msra.mxu0 %v15221_v15 }
 0x274   : > { %11965 = vmatprep.subr.bf16.mxu0 %v14873_v0 }
 0x276   : > { %11586 = vmatmul.mubr.msk.f32.vlgmr.msra.gmra.mrb[8].mxu0 %vm587_vm1, %v15118_v14 }
 0x277   : > { %11633 = vmatprep.mubr.msk.f32.mxu0 %vm14874_vm0, %v17806_v1  ;;  %11967 = vmatpush3.bf16.msra.mxu0 %v15266_v53 }
 0x278   : > { %11968 = vmatprep.subr.bf16.mxu0 %v14873_v0 }
 0x27b   : > { %11970 = vmatpush3.bf16.msra.mxu0 %v15270_v58 }
 0x27c   : > { %11971 = vmatprep.subr.bf16.mxu0 %v14873_v0 }
 0x27f   : > { %11973 = vmatpush3.bf16.msra.mxu0 %v15274_v62 }
 0x280   : > { %11974 = vmatprep.subr.bf16.mxu0 %v14873_v0 }
 0x283   : > { %11976 = vmatpush3.bf16.msra.mxu0 %v15278_v4 }
 0x284   : > { %11989 = vmatprep.subr.bf16.mxu0 %v14873_v0 }
 0x286   : > { %11634 = vmatmul.mubr.msk.f32.vlgmr.msra.gmra.mrb[10].mxu0 %vm587_vm1, %v15118_v14 }
 0x287   : > { %11991 = vmatpush3.bf16.msra.mxu0 %v15095_v5  ;;  %11681 = vmatprep.mubr.msk.f32.mxu0 %vm14874_vm0, %v17806_v1  ;;  %v15297_v5 = vld [vmem:[%s17787_s2 + $0x18] sm:$0xff] }
 0x288   : > { %11992 = vmatprep.subr.bf16.mxu0 %v14873_v0 }
 0x28b   : > { %11994 = vmatpush3.bf16.msra.mxu0 %v15099_v7  ;;  %v15308_v7 = vld [vmem:[%s17787_s2 + $0x20] sm:$0xff] }
 0x28c   : > { %11995 = vmatprep.subr.bf16.mxu0 %v14873_v0 }
 0x28f   : > { %11997 = vmatpush3.bf16.msra.mxu0 %v15104_v10  ;;  %v1513_v10 = vld [vmem:[#allocation4 + $0x180] sm:$0xff] }
 0x290   : > { %11998 = vmatprep.subr.bf16.mxu0 %v14873_v0 }
 0x293   : > { %12000 = vmatpush3.bf16.msra.mxu0 %v15110_v13  ;;  %v1514_v13 = vld [vmem:[#allocation4 + $0x188] sm:$0xff] }
 0x294   : > { %11684 = vmatprep.subr.mxu0 %v17806_v1 }
 0x319   : > { %v887_v18 = vpop.f32.mrb[2].mxu0 }
 0x31a   : > { %v15234_v21 = vadd.f32 %v887_v18, %v736_v17  ;;  %v11496_v22 = vpop.f32.mrb[3].mxu0  ;;  %v15320_v17 = vpack.c.bf16 %v1514_v13, %v1513_v10  ;;  %v1515_v18 = vld [vmem:[#allocation4 + $0x190] sm:$0xff]  ;;  %v3252_v13 = vld [vmem:[%s17790_s5] sm:$0xf] }
 0x31b   : > { %v1516_v22 = vld [vmem:[#allocation4 + $0x198] sm:$0xff]  ;;  %3255 = vperm.xlu0 %14726, %v3252_v13  }
 0x31c   : > { %v15325_v23 = vpack.c.bf16 %v1516_v22, %v1515_v18  ;;  %v15390_v18 = vld [vmem:[%s17787_s2 + $0x40] sm:$0xff] }
 0x329   : > { %v967_v29 = vpop.f32.mrb[4].mxu0 }
 0x32a   : > { %v11515_v34 = vpop.f32.mrb[5].mxu0  ;;  %11517 = vmatpush3.msra.mxu1 %v967_v29  ;;  %v1518_v29 = vld [vmem:[#allocation4 + $0x1a8] sm:$0xff] }
 0x32b   : > { %11917 = vmatprep.subr.bf16.mxu1 %v14873_v0  ;;  %11519 = vmatmul.mubr.msk.f32.vlgmr.msra.gmra.mrb[4].mxu1 %vm662_vm2, %v15239_v26  ;;  %v15331_v30 = vpack.c.bf16 %v1518_v29, %v1517_v24  ;;  %v1520_v34 = vld [vmem:[#allocation4 + $0x1b8] sm:$0xff] }
 0x32c   : > { %11919 = vmatpush3.bf16.msra.mxu1 %v15241_v27  ;;  %11537 = vmatprep.mubr.msk.f32.mxu1 %vm14874_vm0, %v17806_v1  ;;  %v15335_v35 = vpack.c.bf16 %v1520_v34, %v1519_v33 }
 0x32d   : > { %11920 = vmatprep.subr.bf16.mxu1 %v14873_v0 }
 0x330   : > { %11922 = vmatpush3.bf16.msra.mxu1 %v15247_v32 }
 0x331   : > { %11923 = vmatprep.subr.bf16.mxu1 %v14873_v0 }
 0x334   : > { %11925 = vmatpush3.bf16.msra.mxu1 %v15253_v39 }
 0x335   : > { %11926 = vmatprep.subr.bf16.mxu1 %v14873_v0 }
 0x338   : > { %11928 = vmatpush3.bf16.msra.mxu1 %v15257_v43 }
 0x339   : > { %11540 = vmatprep.subr.mxu1 %v17806_v1  ;;  %v1277_v44 = vpop.f32.mrb[6].mxu0 }
 0x33a   : > { %v11563_v46 = vpop.f32.mrb[7].mxu0 }
 0x33b   : > { %11538 = vmatmul.mubr.msk.f32.vlgmr.msra.gmra.mrb[6].mxu1 %vm587_vm1, %v15118_v14 }
 0x33c   : > { %11542 = vmatprep.mubr.msk.f32.mxu1 %vm14874_vm0, %v17806_v1 }
 0x349   : > { %v1432_v47 = vpop.f32.mrb[8].mxu0 }
 0x34a   : > { %v11587_v49 = vpop.f32.mrb[9].mxu0 }
 0x34b   : > { %v1824_v49 = vld [vmem:[#allocation4 + $0x208] sm:$0xff] }
 0x359   : > { %v1742_v38 = vpop.f32.mrb[10].mxu0 }
 0x35a   : > { %v11635_v40 = vpop.f32.mrb[11].mxu0 }
 0x35b   : > { %v3271_v40 = vld [vmem:[#allocation6 + $0x68] sm:$0xff] }
 0x40e   : > { %v1122_v8 = vpop.f32.mrb[6].mxu1 }
 0x40f   : > { %v11539_v11 = vpop.f32.mrb[7].mxu1  ;;  %11541 = vmatpush3.msra.mxu1 %v1122_v8  ;;  %v1829_v8 = vld [vmem:[#allocation4 + $0x230] sm:$0xff] }
 0x410   : > { %11543 = vmatmul.mubr.msk.f32.vlgmr.msra.gmra.mrb[4].mxu1 %vm662_vm2, %v15297_v5  ;;  %11564 = vmatprep.subr.mxu1 %v17806_v1  ;;  %v1830_v11 = vld [vmem:[#allocation4 + $0x238] sm:$0xff] }
 0x411   : > { %11565 = vmatpush3.msra.mxu1 %v1277_v44  ;;  %11566 = vmatprep.mubr.msk.f32.mxu1 %vm14874_vm0, %v17806_v1  ;;  %v15375_v10 = vpack.c.bf16 %v1830_v11, %v1829_v8  ;;  %v3597_v8 = vld [vmem:[#allocation6 + $0x128] sm:$0xff]  ;;  %v3599_v11 = vld [vmem:[#allocation6 + $0x138] sm:$0xff] }
 0x412   : > { %11588 = vmatprep.subr.mxu1 %v17806_v1 }
 0x418   : > { %11567 = vmatmul.mubr.msk.f32.vlgmr.msra.gmra.mrb[4].mxu1 %vm662_vm2, %v15308_v7 }
 0x419   : > { %11589 = vmatpush3.msra.mxu1 %v1432_v47  ;;  %11590 = vmatprep.mubr.msk.f32.mxu1 %vm14874_vm0, %v17806_v1  ;;  %v1823_v47 = vld [vmem:[#allocation4 + $0x200] sm:$0xff] }
 0x41a   : > { %11953 = vmatprep.subr.bf16.mxu1 %v14873_v0  ;;  %v15360_v52 = vpack.c.bf16 %v1824_v49, %v1823_v47  ;;  %v3272_v47 = vld [vmem:[#allocation6 + $0x70] sm:$0xff] }
 0x420   : > { %11591 = vmatmul.mubr.msk.f32.vlgmr.msra.gmra.mrb[4].mxu1 %vm662_vm2, %v15318_v12 }
 0x421   : > { %11955 = vmatpush3.bf16.msra.mxu1 %v15320_v17  ;;  %11609 = vmatprep.mubr.msk.f32.mxu1 %vm14874_vm0, %v17806_v1 }
 0x422   : > { %11956 = vmatprep.subr.bf16.mxu1 %v14873_v0 }
 0x425   : > { %11958 = vmatpush3.bf16.msra.mxu1 %v15325_v23 }
 0x426   : > { %11959 = vmatprep.subr.bf16.mxu1 %v14873_v0 }
 0x429   : > { %11961 = vmatpush3.bf16.msra.mxu1 %v15331_v30 }
 0x42a   : > { %11962 = vmatprep.subr.bf16.mxu1 %v14873_v0 }
 0x42d   : > { %11964 = vmatpush3.bf16.msra.mxu1 %v15335_v35 }
 0x42e   : > { %11612 = vmatprep.subr.mxu1 %v17806_v1 }
 0x430   : > { %11610 = vmatmul.mubr.msk.f32.vlgmr.msra.gmra.mrb[8].mxu1 %vm587_vm1, %v15118_v14 }
 0x431   : > { %11614 = vmatprep.mubr.msk.f32.mxu1 %vm14874_vm0, %v17806_v1 }
 0x503   : > { %v1587_v44 = vpop.f32.mrb[8].mxu1 }
 0x504   : > { %v11611_v46 = vpop.f32.mrb[9].mxu1  ;;  %11613 = vmatpush3.msra.mxu1 %v1587_v44 }
 0x505   : > { %11615 = vmatmul.mubr.msk.f32.vlgmr.msra.gmra.mrb[4].mxu1 %vm662_vm2, %v15347_v41  ;;  %11636 = vmatprep.subr.mxu1 %v17806_v1  ;;  %v3270_v46 = vld [vmem:[#allocation6 + $0x60] sm:$0xff] }
 0x506   : > { %11637 = vmatpush3.msra.mxu1 %v1742_v38  ;;  %11638 = vmatprep.mubr.msk.f32.mxu1 %vm14874_vm0, %v17806_v1  ;;  %v12111_v49 = vpack.c.bf16 %v3272_v47, %v3270_v46 }
 0x507   : > { %11977 = vmatprep.subr.bf16.mxu1 %v14873_v0 }
 0x50d   : > { %11639 = vmatmul.mubr.msk.f32.vlgmr.msra.gmra.mrb[4].mxu1 %vm662_vm2, %v15358_v50 }
 0x50e   : > { %11979 = vmatpush3.bf16.msra.mxu1 %v15360_v52  ;;  %11657 = vmatprep.mubr.msk.f32.mxu1 %vm14874_vm0, %v17806_v1 }
 0x50f   : > { %11980 = vmatprep.subr.bf16.mxu1 %v14873_v0 }
 0x512   : > { %11982 = vmatpush3.bf16.msra.mxu1 %v15365_v59 }
 0x513   : > { %11983 = vmatprep.subr.bf16.mxu1 %v14873_v0 }
 0x516   : > { %11985 = vmatpush3.bf16.msra.mxu1 %v15371_v3 }
 0x517   : > { %11986 = vmatprep.subr.bf16.mxu1 %v14873_v0 }
 0x51a   : > { %11988 = vmatpush3.bf16.msra.mxu1 %v15375_v10 }
 0x51b   : > { %11660 = vmatprep.subr.mxu1 %v17806_v1 }
 0x51d   : > { %11658 = vmatmul.mubr.msk.f32.vlgmr.msra.gmra.mrb[10].mxu1 %vm587_vm1, %v15118_v14 }
 0x51e   : > { %11662 = vmatprep.mubr.msk.f32.mxu1 %vm14874_vm0, %v17806_v1 }
 0x5f0   : > { %v1897_v22 = vpop.f32.mrb[10].mxu1 }
 0x5f1   : > { %v11659_v24 = vpop.f32.mrb[11].mxu1  ;;  %11661 = vmatpush3.msra.mxu1 %v1897_v22  ;;  %v12133_v22 = vpack.c.bf16 %v3599_v11, %v3597_v8  ;;  %v4105_v8 = vld [vmem:[#allocation6 + $0x2f8] sm:$0xff] }
 0x5f2   : > { %11663 = vmatmul.mubr.msk.f32.vlgmr.msra.gmra.mrb[4].mxu1 %vm662_vm2, %v15390_v18  ;;  %12001 = vmatprep.subr.bf16.mxu1 %v14873_v0  ;;  %v3596_v24 = vld [vmem:[#allocation6 + $0x120] sm:$0xff] }
 0x5f3   : > { %12003 = vmatpush3.bf16.msra.mxu1 %v15133_v20  ;;  %11705 = vmatprep.mubr.msk.f32.mxu1 %vm14874_vm0, %v17806_v1 }
 0x5f4   : > { %12004 = vmatprep.subr.bf16.mxu1 %v14873_v0 }
 0x5f7   : > { %12006 = vmatpush3.bf16.msra.mxu1 %v15139_v25 }
 0x5f8   : > { %12007 = vmatprep.subr.bf16.mxu1 %v14873_v0 }
 0x5fb   : > { %12009 = vmatpush3.bf16.msra.mxu1 %v15145_v28 }
 0x5fc   : > { %12010 = vmatprep.subr.bf16.mxu1 %v14873_v0 }
 0x5ff   : > { %12012 = vmatpush3.bf16.msra.mxu1 %v15149_v31 }
 0x600   : > { %12025 = vmatprep.subr.bf16.mxu1 %v14873_v0 }
 0x6c5   : > { %v1972_v29 = vpop.f32.mrb[4].mxu1 }
 0x6c6   : > { %v14547_v20 = vadd.f32 %v1972_v29, %v15234_v21  ;;  %v11664_v33 = vpop.f32.mrb[5].mxu1  ;;  %v3598_v29 = vld [vmem:[#allocation6 + $0x130] sm:$0xff] }
 0x6c7   : > { %v3603_v33 = vld [vmem:[#allocation6 + $0x158] sm:$0xff] }
 0x6c8   : > { %v15406_v34 = vmax.f32 %v14547_v20, 0.0  ;;  %v3601_v20 = vld [vmem:[#allocation6 + $0x148] sm:$0xff] }
 0x6ca   : > { %11682 = vmatmul.mubr.msk.f32.vlgmr.msra.gmra.mrb[12].mxu0 %vm587_vm1, %v15406_v34  ;;  %11706 = vmatmul.mubr.msk.f32.vlgmr.msra.gmra.mrb[12].mxu1 %vm587_vm1, %v15406_v34 }
 0x6cb   : > { %12027 = vmatpush3.bf16.msra.mxu1 %v15241_v27  ;;  %11753 = vmatprep.mubr.msk.f32.mxu1 %vm14874_vm0, %v17806_v1 }
 0x6cc   : > { %12028 = vmatprep.subr.bf16.mxu1 %v14873_v0  ;;  %11686 = vmatprep.mubr.msk.f32.mxu0 %vm14874_vm0, %v17806_v1 }
 0x6cf   : > { %12030 = vmatpush3.bf16.msra.mxu1 %v15247_v32  ;;  %v3260_v32 = vld [vmem:[#allocation6 + $0x10] sm:$0xff] }
 0x6d0   : > { %12031 = vmatprep.subr.bf16.mxu1 %v14873_v0 }
 0x6d3   : > { %12033 = vmatpush3.bf16.msra.mxu1 %v15253_v39  ;;  %v3263_v39 = vld [vmem:[#allocation6 + $0x28] sm:$0xff] }
 0x6d4   : > { %12034 = vmatprep.subr.bf16.mxu1 %v14873_v0 }
 0x6d7   : > { %12036 = vmatpush3.bf16.msra.mxu1 %v15257_v43  ;;  %v3265_v43 = vld [vmem:[#allocation6 + $0x38] sm:$0xff] }
 0x6d8   : > { %12049 = vmatprep.subr.bf16.mxu1 %v14873_v0 }
 0x6da   : > { %11754 = vmatmul.mubr.msk.f32.vlgmr.msra.gmra.mrb[14].mxu1 %vm587_vm1, %v15406_v34 }
 0x6db   : > { %12051 = vmatpush3.bf16.msra.mxu1 %v15206_v63  ;;  %11801 = vmatprep.mubr.msk.f32.mxu1 %vm14874_vm0, %v17806_v1 }
 0x6dc   : > { %12052 = vmatprep.subr.bf16.mxu1 %v14873_v0 }
 0x6df   : > { %12054 = vmatpush3.bf16.msra.mxu1 %v15214_v6 }
 0x6e0   : > { %12055 = vmatprep.subr.bf16.mxu1 %v14873_v0 }
 0x6e3   : > { %12057 = vmatpush3.bf16.msra.mxu1 %v15217_v9 }
 0x6e4   : > { %12058 = vmatprep.subr.bf16.mxu1 %v14873_v0 }
 0x6e7   : > { %12060 = vmatpush3.bf16.msra.mxu1 %v15221_v15 }
 0x6e8   : > { %12061 = vmatprep.subr.bf16.mxu1 %v14873_v0 }
 0x6ea   : > { %11802 = vmatmul.mubr.msk.f32.vlgmr.msra.gmra.mrb[16].mxu1 %vm587_vm1, %v15406_v34 }
 0x6eb   : > { %12063 = vmatpush3.bf16.msra.mxu1 %v15320_v17  ;;  %11825 = vmatprep.mubr.msk.f32.mxu1 %vm14874_vm0, %v17806_v1  ;;  %v3266_v17 = vld [vmem:[#allocation6 + $0x40] sm:$0xff] }
 0x6ec   : > { %12064 = vmatprep.subr.bf16.mxu1 %v14873_v0 }
 0x6ef   : > { %12066 = vmatpush3.bf16.msra.mxu1 %v15325_v23  ;;  %v3268_v23 = vld [vmem:[#allocation6 + $0x50] sm:$0xff] }
 0x6f0   : > { %12067 = vmatprep.subr.bf16.mxu1 %v14873_v0 }
 0x6f3   : > { %12069 = vmatpush3.bf16.msra.mxu1 %v15331_v30  ;;  %v12107_v30 = vpack.c.bf16 %v3268_v23, %v3266_v17  ;;  %v4091_v17 = vld [vmem:[#allocation6 + $0x288] sm:$0xff]  ;;  %v4093_v23 = vld [vmem:[#allocation6 + $0x298] sm:$0xff] }
 0x6f4   : > { %12070 = vmatprep.subr.bf16.mxu1 %v14873_v0 }
 0x6f7   : > { %12072 = vmatpush3.bf16.msra.mxu1 %v15335_v35 }
 0x6f8   : > { %12085 = vmatprep.subr.bf16.mxu1 %v14873_v0 }
 0x6fa   : > { %11826 = vmatmul.mubr.msk.f32.vlgmr.msra.gmra.mrb[18].mxu1 %vm587_vm1, %v15406_v34 }
 0x6fb   : > { %12087 = vmatpush3.bf16.msra.mxu1 %v15360_v52  ;;  %11873 = vmatprep.mubr.msk.f32.mxu1 %vm14874_vm0, %v17806_v1  ;;  %v3595_v52 = vld [vmem:[#allocation6 + $0x118] sm:$0xff] }
 0x6fc   : > { %12088 = vmatprep.subr.bf16.mxu1 %v14873_v0 }
 0x6ff   : > { %12090 = vmatpush3.bf16.msra.mxu1 %v15365_v59 }
 0x700   : > { %12091 = vmatprep.subr.bf16.mxu1 %v14873_v0 }
 0x703   : > { %12093 = vmatpush3.bf16.msra.mxu1 %v15371_v3  ;;  %v3594_v3 = vld [vmem:[#allocation6 + $0x110] sm:$0xff] }
 0x704   : > { %12094 = vmatprep.subr.bf16.mxu1 %v14873_v0  ;;  %v12131_v13 = vpack.c.bf16 %v3594_v3, %v3592_v2  ;;  %v4100_v2 = vld [vmem:[#allocation6 + $0x2d0] sm:$0xff]  ;;  %v4103_v3 = vld [vmem:[#allocation6 + $0x2e8] sm:$0xff] }
 0x707   : > { %12096 = vmatpush3.bf16.msra.mxu1 %v15375_v10 }
 0x70a   : > { %11874 = vmatmul.mubr.msk.f32.vlgmr.msra.gmra.mrb[20].mxu1 %vm587_vm1, %v15406_v34 }
 0x70b   : > { %3341 = vmatprep.mubr.f32.mxu1 %v17806_v1 }
 0x79d   : > { %v2047_v25 = vpop.f32.mrb[12].mxu0  ;;  %v2188_v28 = vpop.f32.mrb[12].mxu1 }
 0x79e   : > { %v11683_v31 = vpop.f32.mrb[13].mxu0  ;;  %11685 = vmatpush3.msra.mxu0 %v2047_v25  ;;  %v11707_v63 = vpop.f32.mrb[13].mxu1  ;;  %v3600_v25 = vld [vmem:[#allocation6 + $0x140] sm:$0xff] }
 0x79f   : > { %11687 = vmatmul.mubr.msk.f32.vlgmr.msra.gmra.mrb[14].mxu0 %vm662_vm2, %v15131_v19  ;;  %11708 = vmatprep.subr.mxu0 %v17806_v1  ;;  %v3605_v31 = vld [vmem:[#allocation6 + $0x168] sm:$0xff]  ;;  %v3607_v63 = vld [vmem:[#allocation6 + $0x178] sm:$0xff] }
 0x7a0   : > { %11709 = vmatpush3.msra.mxu0 %v2188_v28  ;;  %11710 = vmatprep.mubr.msk.f32.mxu0 %vm14874_vm0, %v17806_v1  ;;  %v3602_v28 = vld [vmem:[#allocation6 + $0x150] sm:$0xff] }
 0x7a1   : > { %12013 = vmatprep.subr.bf16.mxu0 %v14873_v0 }
 0x7a7   : > { %11711 = vmatmul.mubr.msk.f32.vlgmr.msra.gmra.mrb[14].mxu0 %vm662_vm2, %v15163_v36 }
 0x7a8   : > { %12015 = vmatpush3.bf16.msra.mxu0 %v15165_v37  ;;  %11729 = vmatprep.mubr.msk.f32.mxu0 %vm14874_vm0, %v17806_v1 }
 0x7a9   : > { %12016 = vmatprep.subr.bf16.mxu0 %v14873_v0 }
 0x7ac   : > { %12018 = vmatpush3.bf16.msra.mxu0 %v15171_v42 }
 0x7ad   : > { %v2470_v19 = vpop.f32.mrb[14].mxu1  ;;  %12019 = vmatprep.subr.bf16.mxu0 %v14873_v0 }
 0x7ae   : > { %v11755_v6 = vpop.f32.mrb[15].mxu1 }
 0x7af   : > { %v3604_v6 = vld [vmem:[#allocation6 + $0x160] sm:$0xff] }
 0x7b0   : > { %12021 = vmatpush3.bf16.msra.mxu0 %v15177_v45 }
 0x7b1   : > { %12022 = vmatprep.subr.bf16.mxu0 %v14873_v0 }
 0x7b4   : > { %12024 = vmatpush3.bf16.msra.mxu0 %v15181_v48 }
 0x7b5   : > { %11732 = vmatprep.subr.mxu0 %v17806_v1 }
 0x7b7   : > { %11730 = vmatmul.mubr.msk.f32.vlgmr.msra.gmra.mrb[16].mxu0 %vm587_vm1, %v15406_v34 }
 0x7b8   : > { %11734 = vmatprep.mubr.msk.f32.mxu0 %vm14874_vm0, %v17806_v1 }
 0x7bd   : > { %v2752_v36 = vpop.f32.mrb[16].mxu1 }
 0x7be   : > { %v11803_v37 = vpop.f32.mrb[17].mxu1 }
 0x7bf   : > { %v3925_v37 = vld [vmem:[#allocation6 + $0x208] sm:$0xff] }
 0x7cd   : > { %v2893_v42 = vpop.f32.mrb[18].mxu1 }
 0x7ce   : > { %v11827_v9 = vpop.f32.mrb[19].mxu1 }
 0x7dd   : > { %v15484_v15 = vpop.f32.mrb[20].mxu1 }
 0x7de   : > { %v11875_v21 = vpop.f32.mrb[21].mxu1 }
 0x7df   : > { %v3924_v21 = vld [vmem:[#allocation6 + $0x200] sm:$0xff] }
 0x88a   : > { %v2329_v45 = vpop.f32.mrb[16].mxu0 }
 0x88b   : > { %v11731_v27 = vpop.f32.mrb[17].mxu0  ;;  %11733 = vmatpush3.msra.mxu0 %v2329_v45  ;;  %v3926_v45 = vld [vmem:[#allocation6 + $0x210] sm:$0xff] }
 0x88c   : > { %11735 = vmatmul.mubr.msk.f32.vlgmr.msra.gmra.mrb[14].mxu0 %vm662_vm2, %v15239_v26  ;;  %11756 = vmatprep.subr.mxu0 %v17806_v1  ;;  %v3929_v27 = vld [vmem:[#allocation6 + $0x228] sm:$0xff] }
 0x88d   : > { %11757 = vmatpush3.msra.mxu0 %v2470_v19  ;;  %11758 = vmatprep.mubr.msk.f32.mxu0 %vm14874_vm0, %v17806_v1  ;;  %v12141_v19 = vpack.c.bf16 %v3607_v63, %v3605_v31 }
 0x88e   : > { %12037 = vmatprep.subr.bf16.mxu0 %v14873_v0 }
 0x894   : > { %11759 = vmatmul.mubr.msk.f32.vlgmr.msra.gmra.mrb[14].mxu0 %vm662_vm2, %v15297_v5  ;;  %v3269_v5 = vld [vmem:[#allocation6 + $0x58] sm:$0xff] }
 0x895   : > { %12039 = vmatpush3.bf16.msra.mxu0 %v15190_v51  ;;  %11777 = vmatprep.mubr.msk.f32.mxu0 %vm14874_vm0, %v17806_v1 }
 0x896   : > { %12040 = vmatprep.subr.bf16.mxu0 %v14873_v0 }
 0x899   : > { %12042 = vmatpush3.bf16.msra.mxu0 %v15194_v54  ;;  %v3259_v54 = vld [vmem:[#allocation6 + $0x8] sm:$0xff] }
 0x89a   : > { %12043 = vmatprep.subr.bf16.mxu0 %v14873_v0 }
 0x89d   : > { %12045 = vmatpush3.bf16.msra.mxu0 %v15198_v57  ;;  %v3261_v57 = vld [vmem:[#allocation6 + $0x18] sm:$0xff] }
 0x89e   : > { %12046 = vmatprep.subr.bf16.mxu0 %v14873_v0  ;;  %v12097_v26 = vpack.c.bf16 %v3261_v57, %v3259_v54  ;;  %v3928_v57 = vld [vmem:[#allocation6 + $0x220] sm:$0xff] }
 0x8a0   : > { %12098 = vmatprep.subr.bf16.mxu1 %v12097_v26  ;;  %v3933_v26 = vld [vmem:[#allocation6 + $0x248] sm:$0xff] }
 0x8a1   : > { %12048 = vmatpush3.bf16.msra.mxu0 %v15202_v60  ;;  %v3258_v60 = vld [vmem:[#allocation6] sm:$0xff] }
 0x8a2   : > { %11780 = vmatprep.subr.mxu0 %v17806_v1 }
 0x8a4   : > { %11778 = vmatmul.mubr.msk.f32.vlgmr.msra.gmra.mrb[18].mxu0 %vm587_vm1, %v15406_v34 }
 0x8a5   : > { %11782 = vmatprep.mubr.msk.f32.mxu0 %vm14874_vm0, %v17806_v1 }
 0x977   : > { %v2611_v48 = vpop.f32.mrb[18].mxu0 }
 0x978   : > { %v11779_v51 = vpop.f32.mrb[19].mxu0  ;;  %11781 = vmatpush3.msra.mxu0 %v2611_v48  ;;  %v3931_v48 = vld [vmem:[#allocation6 + $0x238] sm:$0xff] }
 0x979   : > { %11783 = vmatmul.mubr.msk.f32.vlgmr.msra.gmra.mrb[14].mxu0 %vm662_vm2, %v15308_v7  ;;  %11804 = vmatprep.subr.mxu0 %v17806_v1  ;;  %v12163_v51 = vpack.c.bf16 %v3926_v45, %v3924_v21  ;;  %v12165_v54 = vpack.c.bf16 %v3931_v48, %v3929_v27  ;;  %v4435_v21 = vld [vmem:[#allocation6 + $0x3e8] sm:$0xff]  ;;  %v4437_v45 = vld [vmem:[#allocation6 + $0x3f8] sm:$0xff] }
 0x97a   : > { %11805 = vmatpush3.msra.mxu0 %v2752_v36  ;;  %11806 = vmatprep.mubr.msk.f32.mxu0 %vm14874_vm0, %v17806_v1  ;;  %v3606_v36 = vld [vmem:[#allocation6 + $0x170] sm:$0xff]  ;;  %v12221_v48 = vpack.c.bf16 %v4437_v45, %v4435_v21 }
 0x97b   : > { %11828 = vmatprep.subr.mxu0 %v17806_v1  ;;  %v12143_v9 = vpack.c.bf16 %v3606_v36, %v3604_v6  ;;  %v4431_v6 = vld [vmem:[#allocation6 + $0x3c8] sm:$0xff]  ;;  %v4433_v36 = vld [vmem:[#allocation6 + $0x3d8] sm:$0xff] }
 0x981   : > { %11807 = vmatmul.mubr.msk.f32.vlgmr.msra.gmra.mrb[14].mxu0 %vm662_vm2, %v15318_v12 }
 0x982   : > { %11829 = vmatpush3.msra.mxu0 %v2893_v42  ;;  %11830 = vmatprep.mubr.msk.f32.mxu0 %vm14874_vm0, %v17806_v1  ;;  %v3927_v42 = vld [vmem:[#allocation6 + $0x218] sm:$0xff] }
 0x983   : > { %12073 = vmatprep.subr.bf16.mxu0 %v14873_v0 }
 0x989   : > { %11831 = vmatmul.mubr.msk.f32.vlgmr.msra.gmra.mrb[14].mxu0 %vm662_vm2, %v15347_v41  ;;  %v3273_v41 = vld [vmem:[#allocation6 + $0x78] sm:$0xff] }
 0x98a   : > { %12075 = vmatpush3.bf16.msra.mxu0 %v15266_v53  ;;  %11849 = vmatprep.mubr.msk.f32.mxu0 %vm14874_vm0, %v17806_v1  ;;  %v12099_v53 = vpack.c.bf16 %v3260_v32, %v3258_v60  ;;  %v12109_v44 = vpack.c.bf16 %v3273_v41, %v3271_v40  ;;  %v3930_v60 = vld [vmem:[#allocation6 + $0x230] sm:$0xff]  ;;  %v3935_v32 = vld [vmem:[#allocation6 + $0x258] sm:$0xff]  ;;  %v4095_v41 = vld [vmem:[#allocation6 + $0x2a8] sm:$0xff] }
 0x98b   : > { %12076 = vmatprep.subr.bf16.mxu0 %v14873_v0  ;;  %v4092_v40 = vld [vmem:[#allocation6 + $0x290] sm:$0xff] }
 0x98c   : > { %12100 = vmatpush1.bf16.msra.mxu1 %v12099_v53  ;;  %v3932_v53 = vld [vmem:[#allocation6 + $0x240] sm:$0xff] }
 0x98e   : > { %12078 = vmatpush3.bf16.msra.mxu0 %v15270_v58  ;;  %v12101_v58 = vpack.c.bf16 %v3265_v43, %v3263_v39  ;;  %v12167_v39 = vpack.c.bf16 %v3930_v60, %v3928_v57  ;;  %v12169_v43 = vpack.c.bf16 %v3935_v32, %v3933_v26  ;;  %v4589_v57 = vld [vmem:[#allocation6 + $0x408] sm:$0xff]  ;;  %v4591_v60 = vld [vmem:[#allocation6 + $0x418] sm:$0xff] }
 0x98f   : > { %12079 = vmatprep.subr.bf16.mxu0 %v14873_v0  ;;  %v12225_v32 = vpack.c.bf16 %v4591_v60, %v4589_v57  ;;  %v3759_v57 = vld [vmem:[#allocation6 + $0x188] sm:$0xff]  ;;  %v3761_v60 = vld [vmem:[#allocation6 + $0x198] sm:$0xff] }
 0x990   : > { %12102 = vmatprep.subr.bf16.mxu1 %v12101_v58  ;;  %v3934_v58 = vld [vmem:[#allocation6 + $0x250] sm:$0xff] }
 0x992   : > { %12081 = vmatpush3.bf16.msra.mxu0 %v15274_v62  ;;  %v3264_v62 = vld [vmem:[#allocation6 + $0x30] sm:$0xff] }
 0x993   : > { %12082 = vmatprep.subr.bf16.mxu0 %v14873_v0  ;;  %v3262_v0 = vld [vmem:[#allocation6 + $0x20] sm:$0xff] }
 0x994   : > { %v12103_v7 = vpack.c.bf16 %v3264_v62, %v3262_v0  ;;  %v3937_v0 = vld [vmem:[#allocation6 + $0x268] sm:$0xff]  ;;  %v3939_v62 = vld [vmem:[#allocation6 + $0x278] sm:$0xff] }
 0x996   : > { %12084 = vmatpush3.bf16.msra.mxu0 %v15278_v4  ;;  %v3267_v4 = vld [vmem:[#allocation6 + $0x48] sm:$0xff]  ;;  %12104 = vmatpush1.bf16.msra.mxu1 %v12103_v7  ;;  %v3936_v7 = vld [vmem:[#allocation6 + $0x260] sm:$0xff] }
 0x997   : > { %11852 = vmatprep.subr.mxu0 %v17806_v1  ;;  %v12105_v12 = vpack.c.bf16 %v3269_v5, %v3267_v4  ;;  %v12171_v4 = vpack.c.bf16 %v3934_v58, %v3932_v53  ;;  %v12173_v5 = vpack.c.bf16 %v3939_v62, %v3937_v0  ;;  %v4593_v53 = vld [vmem:[#allocation6 + $0x428] sm:$0xff]  ;;  %v4595_v58 = vld [vmem:[#allocation6 + $0x438] sm:$0xff] }
 0x998   : > { %v12229_v62 = vpack.c.bf16 %v4595_v58, %v4593_v53  ;;  %v3758_v53 = vld [vmem:[#allocation6 + $0x180] sm:$0xff]  ;;  %v3760_v58 = vld [vmem:[#allocation6 + $0x190] sm:$0xff] }
 0x999   : > { %11850 = vmatmul.mubr.msk.f32.vlgmr.msra.gmra.mrb[20].mxu0 %vm587_vm1, %v15406_v34  ;;  %12106 = vmatprep.subr.bf16.mxu1 %v12105_v12  ;;  %v12137_v34 = vpack.c.bf16 %v3603_v33, %v3601_v20  ;;  %v3938_v12 = vld [vmem:[#allocation6 + $0x270] sm:$0xff] }
 0x99a   : > { %11854 = vmatprep.mubr.msk.f32.mxu0 %vm14874_vm0, %v17806_v1  ;;  %12108 = vmatpush1.bf16.msra.mxu1 %v12107_v30  ;;  %v12175_v30 = vpack.c.bf16 %v3938_v12, %v3936_v7  ;;  %v4597_v7 = vld [vmem:[#allocation6 + $0x448] sm:$0xff]  ;;  %v4599_v12 = vld [vmem:[#allocation6 + $0x458] sm:$0xff] }
 0x99b   : > { %12110 = vmatprep.subr.bf16.mxu1 %v12109_v44  ;;  %v4097_v44 = vld [vmem:[#allocation6 + $0x2b8] sm:$0xff] }
 0x99c   : > { %v12181_v47 = vpack.c.bf16 %v4097_v44, %v4095_v41 }
 0x99e   : > { %12112 = vmatpush1.bf16.msra.mxu1 %v12111_v49  ;;  %v4094_v49 = vld [vmem:[#allocation6 + $0x2a0] sm:$0xff] }
 0xa6c   : > { %v3034_v35 = vpop.f32.mrb[20].mxu0 }
 0xa6d   : > { %v11851_v38 = vpop.f32.mrb[21].mxu0  ;;  %11853 = vmatpush3.msra.mxu0 %v3034_v35  ;;  %v12177_v35 = vpack.c.bf16 %v4093_v23, %v4091_v17  ;;  %v12233_v23 = vpack.c.bf16 %v4599_v12, %v4597_v7  ;;  %v3762_v12 = vld [vmem:[#allocation6 + $0x1a0] sm:$0xff] }
 0xa6e   : > { %11855 = vmatmul.mubr.msk.f32.vlgmr.msra.gmra.mrb[14].mxu0 %vm662_vm2, %v15358_v50  ;;  %11876 = vmatprep.subr.mxu0 %v17806_v1  ;;  %v3593_v50 = vld [vmem:[#allocation6 + $0x108] sm:$0xff]  ;;  %v4090_v38 = vld [vmem:[#allocation6 + $0x280] sm:$0xff] }
 0xa6f   : > { %11877 = vmatpush3.msra.mxu0 %v15484_v15  ;;  %11878 = vmatprep.mubr.msk.f32.mxu0 %vm14874_vm0, %v17806_v1  ;;  %v12129_v55 = vpack.c.bf16 %v3595_v52, %v3593_v50  ;;  %v12161_v15 = vpack.c.bf16 %v3927_v42, %v3925_v37  ;;  %v12179_v46 = vpack.c.bf16 %v4092_v40, %v4090_v38  ;;  %v4096_v50 = vld [vmem:[#allocation6 + $0x2b0] sm:$0xff]  ;;  %v4099_v52 = vld [vmem:[#allocation6 + $0x2c8] sm:$0xff]  ;;  %v4603_v40 = vld [vmem:[#allocation6 + $0x478] sm:$0xff] }
 0xa70   : > { %v12217_v42 = vpack.c.bf16 %v4433_v36, %v4431_v6  ;;  %v4601_v38 = vld [vmem:[#allocation6 + $0x468] sm:$0xff]  ;;  %v3440_v6 = vld [vmem:[#allocation6 + $0xf0] sm:$0xff] }
 0xa71   : > { %12130 = vmatprep.subr.bf16.mxu1 %v12129_v55  ;;  %v4101_v55 = vld [vmem:[#allocation6 + $0x2d8] sm:$0xff]  ;;  %v12237_v44 = vpack.c.bf16 %v4603_v40, %v4601_v38  ;;  %v3766_v40 = vld [vmem:[#allocation6 + $0x1c0] sm:$0xff] }
 0xa76   : > { %11879 = vmatmul.mubr.msk.f32.vlgmr.msra.gmra.mrb[14].mxu0 %vm662_vm2, %v15390_v18 }
 0xa77   : > { %3416 = vmatprep.mubr.f32.mxu0 %v17806_v1 }
 0xb49   : > { %v3245_v56 = vpop.f32.mrb[14].mxu0 }
 0xb4a   : > { %v14548_v59 = vadd.f32 %v3245_v56, %v15230_v16  ;;  %v11880_v61 = vpop.f32.mrb[15].mxu0  ;;  %v12135_v16 = vpack.c.bf16 %v3598_v29, %v3596_v24  ;;  %v12183_v56 = vpack.c.bf16 %v4096_v50, %v4094_v49  ;;  %v4423_v24 = vld [vmem:[#allocation6 + $0x388] sm:$0xff]  ;;  %v4425_v29 = vld [vmem:[#allocation6 + $0x398] sm:$0xff] }
 0xb4b   : > { %v4098_v61 = vld [vmem:[#allocation6 + $0x2c0] sm:$0xff]  ;;  %v12209_v33 = vpack.c.bf16 %v4425_v29, %v4423_v24  ;;  %v3427_v50 = vld [vmem:[#allocation6 + $0x88] sm:$0xff]  ;;  %v3432_v24 = vld [vmem:[#allocation6 + $0xb0] sm:$0xff] }
 0xb4c   : > { %v3250_v10 = vmax.f32 %v14548_v59, 0.0  ;;  %v12185_v59 = vpack.c.bf16 %v4101_v55, %v4099_v52  ;;  %v12187_v11 = vpack.c.bf16 %v4100_v2, %v4098_v61  ;;  %v3429_v52 = vld [vmem:[#allocation6 + $0x98] sm:$0xff]  ;;  %v3426_v55 = vld [vmem:[#allocation6 + $0x80] sm:$0xff]  ;;  %v3435_v29 = vld [vmem:[#allocation6 + $0xc8] sm:$0xff] }
 0xb4d   : > { %v3433_v61 = vld [vmem:[#allocation6 + $0xb8] sm:$0xff] }
 0xb4e   : > { %v15546_v18 = vadd.f32 %v3250_v10, %v15118_v14  ;;  %v12139_v14 = vpack.c.bf16 %v3602_v28, %v3600_v25  ;;  %v12189_v10 = vpack.c.bf16 %v4105_v8, %v4103_v3  ;;  %v4427_v25 = vld [vmem:[#allocation6 + $0x3a8] sm:$0xff]  ;;  %v4429_v28 = vld [vmem:[#allocation6 + $0x3b8] sm:$0xff]  ;;  %v12113_v3 = vpack.c.bf16 %v3429_v52, %v3427_v50  ;;  %v3770_v50 = vld [vmem:[#allocation6 + $0x1e0] sm:$0xff] }
 0xb4f   : > { %v12213_v63 = vpack.c.bf16 %v4429_v28, %v4427_v25  ;;  %v3436_v25 = vld [vmem:[#allocation6 + $0xd0] sm:$0xff]  ;;  %v3439_v28 = vld [vmem:[#allocation6 + $0xe8] sm:$0xff] }
 0xb50   : > { %11089 = vmatmul.mubr.msk.f32.vlgmr.msra.gmra.mrb[22].mxu1 %vm587_vm1, %v15546_v18  ;;  %v3772_v52 = vld [vmem:[#allocation6 + $0x1f0] sm:$0xff] }
 0xb51   : > { %12132 = vmatpush1.bf16.msra.mxu1 %v12131_v13  ;;  %3672 = vmatprep.mubr.f32.mxu1 %v17806_v1  ;;  %v4102_v13 = vld [vmem:[#allocation6 + $0x2e0] sm:$0xff] }
 0xb52   : > { %12134 = vmatprep.subr.bf16.mxu1 %v12133_v22  ;;  %v4104_v22 = vld [vmem:[#allocation6 + $0x2f0] sm:$0xff] }
 0xb53   : > { %v12191_v20 = vpack.c.bf16 %v4104_v22, %v4102_v13  ;;  %v3430_v22 = vld [vmem:[#allocation6 + $0xa0] sm:$0xff] }
 0xb55   : > { %12136 = vmatpush1.bf16.msra.mxu1 %v12135_v16  ;;  %v4422_v16 = vld [vmem:[#allocation6 + $0x380] sm:$0xff] }
 0xb56   : > { %12138 = vmatprep.subr.bf16.mxu1 %v12137_v34  ;;  %v4424_v34 = vld [vmem:[#allocation6 + $0x390] sm:$0xff] }
 0xb57   : > { %v12211_v31 = vpack.c.bf16 %v4424_v34, %v4422_v16  ;;  %v3434_v34 = vld [vmem:[#allocation6 + $0xc0] sm:$0xff] }
 0xb59   : > { %12140 = vmatpush1.bf16.msra.mxu1 %v12139_v14  ;;  %v4426_v14 = vld [vmem:[#allocation6 + $0x3a0] sm:$0xff] }
 0xb5a   : > { %12142 = vmatprep.subr.bf16.mxu1 %v12141_v19  ;;  %v4428_v19 = vld [vmem:[#allocation6 + $0x3b0] sm:$0xff] }
 0xb5b   : > { %v12215_v37 = vpack.c.bf16 %v4428_v19, %v4426_v14  ;;  %v3438_v19 = vld [vmem:[#allocation6 + $0xe0] sm:$0xff] }
 0xb5c   : > { %v12127_v36 = vpack.c.bf16 %v3440_v6, %v3438_v19  ;;  %v4266_v19 = vld [vmem:[#allocation6 + $0x350] sm:$0xff]  ;;  %v4269_v6 = vld [vmem:[#allocation6 + $0x368] sm:$0xff] }
 0xb5d   : > { %12144 = vmatpush1.bf16.msra.mxu1 %v12143_v9  ;;  %v4430_v9 = vld [vmem:[#allocation6 + $0x3c0] sm:$0xff] }
 0xb5e   : > { %12162 = vmatprep.subr.bf16.mxu1 %v12161_v15  ;;  %v4432_v15 = vld [vmem:[#allocation6 + $0x3d0] sm:$0xff] }
 0xb5f   : > { %v12219_v27 = vpack.c.bf16 %v4432_v15, %v4430_v9 }
 0xb60   : > { %11093 = vmatmul.mubr.msk.f32.vlgmr.msra.gmra.mrb[24].mxu1 %vm587_vm1, %v15546_v18 }
 0xb61   : > { %12164 = vmatpush1.bf16.msra.mxu1 %v12163_v51  ;;  %4004 = vmatprep.mubr.f32.mxu1 %v17806_v1  ;;  %v4434_v51 = vld [vmem:[#allocation6 + $0x3e0] sm:$0xff] }
 0xb62   : > { %12166 = vmatprep.subr.bf16.mxu1 %v12165_v54  ;;  %v4436_v54 = vld [vmem:[#allocation6 + $0x3f0] sm:$0xff] }
 0xb63   : > { %v12223_v26 = vpack.c.bf16 %v4436_v54, %v4434_v51 }
 0xb65   : > { %12168 = vmatpush1.bf16.msra.mxu1 %v12167_v39  ;;  %v4588_v39 = vld [vmem:[#allocation6 + $0x400] sm:$0xff] }
 0xb66   : > { %12170 = vmatprep.subr.bf16.mxu1 %v12169_v43  ;;  %v4590_v43 = vld [vmem:[#allocation6 + $0x410] sm:$0xff] }
 0xb67   : > { %v12227_v0 = vpack.c.bf16 %v4590_v43, %v4588_v39  ;;  %v3514_v39 = vld [vmem:[#allocation2 + $0x4] sm:$0xf]  ;;  %v12145_v43 = vpack.c.bf16 %v3761_v60, %v3759_v57  ;;  %v4764_v57 = vld [vmem:[#allocation7 + $0x18] sm:$0xff] }
 0xb68   : > { %v4761_v60 = vld [vmem:[#allocation7] sm:$0xff] }
 0xb69   : > { %12172 = vmatpush1.bf16.msra.mxu1 %v12171_v4  ;;  %v4592_v4 = vld [vmem:[#allocation6 + $0x420] sm:$0xff] }
 0xb6a   : > { %12174 = vmatprep.subr.bf16.mxu1 %v12173_v5  ;;  %v4594_v5 = vld [vmem:[#allocation6 + $0x430] sm:$0xff] }
 0xb6b   : > { %v12231_v17 = vpack.c.bf16 %v4594_v5, %v4592_v4  ;;  %v3680_v4 = vld [vmem:[#allocation2 + $0x8] sm:$0xf]  ;;  %v12147_v5 = vpack.c.bf16 %v3760_v58, %v3758_v53 }
 0xb6d   : > { %12176 = vmatpush1.bf16.msra.mxu1 %v12175_v30  ;;  %v4596_v30 = vld [vmem:[#allocation6 + $0x440] sm:$0xff] }
 0xb6e   : > { %12178 = vmatprep.subr.bf16.mxu1 %v12177_v35  ;;  %v4598_v35 = vld [vmem:[#allocation6 + $0x450] sm:$0xff] }
 0xb6f   : > { %v12235_v41 = vpack.c.bf16 %v4598_v35, %v4596_v30  ;;  %v3769_v30 = vld [vmem:[#allocation6 + $0x1d8] sm:$0xff] }
 0xb70   : > { %11097 = vmatmul.mubr.msk.f32.vlgmr.msra.gmra.mrb[26].mxu1 %vm587_vm1, %v15546_v18 }
 0xb71   : > { %12180 = vmatpush1.bf16.msra.mxu1 %v12179_v46  ;;  %4170 = vmatprep.mubr.f32.mxu1 %v17806_v1  ;;  %v4600_v46 = vld [vmem:[#allocation6 + $0x460] sm:$0xff] }
 0xb72   : > { %12182 = vmatprep.subr.bf16.mxu1 %v12181_v47  ;;  %v4602_v47 = vld [vmem:[#allocation6 + $0x470] sm:$0xff] }
 0xb73   : > { %v12239_v49 = vpack.c.bf16 %v4602_v47, %v4600_v46  ;;  %v3773_v46 = vld [vmem:[#allocation6 + $0x1f8] sm:$0xff] }
 0xb75   : > { %12184 = vmatpush1.bf16.msra.mxu1 %v12183_v56  ;;  %v3428_v56 = vld [vmem:[#allocation6 + $0x90] sm:$0xff] }
 0xb76   : > { %12186 = vmatprep.subr.bf16.mxu1 %v12185_v59  ;;  %v3431_v59 = vld [vmem:[#allocation6 + $0xa8] sm:$0xff] }
 0xb77   : > { %v12117_v13 = vpack.c.bf16 %v3433_v61, %v3431_v59  ;;  %v3846_v61 = vld [vmem:[#allocation2 + $0xc] sm:$0xf] }
 0xb79   : > { %12188 = vmatpush1.bf16.msra.mxu1 %v12187_v11  ;;  %v3348_v11 = vld [vmem:[#allocation2] sm:$0xf] }
 0xb7a   : > { %12190 = vmatprep.subr.bf16.mxu1 %v12189_v10  ;;  %v12115_v10 = vpack.c.bf16 %v3428_v56, %v3426_v55  ;;  %v12159_v55 = vpack.c.bf16 %v3772_v52, %v3770_v50  ;;  %v4777_v50 = vld [vmem:[#allocation7 + $0x80] sm:$0xff]  ;;  %v4779_v52 = vld [vmem:[#allocation7 + $0x90] sm:$0xff] }
 0xb7d   : > { %12192 = vmatpush1.bf16.msra.mxu1 %v12191_v20  ;;  %v3437_v20 = vld [vmem:[#allocation6 + $0xd8] sm:$0xff] }
 0xb7e   : > { %12210 = vmatprep.subr.bf16.mxu1 %v12209_v33  ;;  %v12119_v33 = vpack.c.bf16 %v3432_v24, %v3430_v22  ;;  %v12121_v16 = vpack.c.bf16 %v3437_v20, %v3435_v29  ;;  %v4261_v22 = vld [vmem:[#allocation6 + $0x328] sm:$0xff]  ;;  %v4263_v24 = vld [vmem:[#allocation6 + $0x338] sm:$0xff]  ;;  %v4178_v29 = vld [vmem:[#allocation2 + $0x14] sm:$0xf] }
 0xb80   : > { %11099 = vmatmul.mubr.msk.f32.vlgmr.msra.gmra.mrb[28].mxu1 %vm587_vm1, %v15546_v18 }
 0xb81   : > { %12212 = vmatpush1.bf16.msra.mxu1 %v12211_v31  ;;  %4502 = vmatprep.mubr.f32.mxu1 %v17806_v1  ;;  %v3441_v31 = vld [vmem:[#allocation6 + $0xf8] sm:$0xff] }
 0xb82   : > { %12214 = vmatprep.subr.bf16.mxu1 %v12213_v63  ;;  %v12123_v63 = vpack.c.bf16 %v3436_v25, %v3434_v34  ;;  %v12125_v14 = vpack.c.bf16 %v3441_v31, %v3439_v28  ;;  %v4262_v34 = vld [vmem:[#allocation6 + $0x330] sm:$0xff]  ;;  %v4265_v25 = vld [vmem:[#allocation6 + $0x348] sm:$0xff]  ;;  %v4267_v28 = vld [vmem:[#allocation6 + $0x358] sm:$0xff] }
 0xb85   : > { %12216 = vmatpush1.bf16.msra.mxu1 %v12215_v37 }
 0xb86   : > { %12218 = vmatprep.subr.bf16.mxu1 %v12217_v42 }
 0xb89   : > { %12220 = vmatpush1.bf16.msra.mxu1 %v12219_v27 }
 0xb8a   : > { %12222 = vmatprep.subr.bf16.mxu1 %v12221_v48 }
 0xb8d   : > { %12224 = vmatpush1.bf16.msra.mxu1 %v12223_v26 }
 0xb8e   : > { %12226 = vmatprep.subr.bf16.mxu1 %v12225_v32 }
 0xb90   : > { %11103 = vmatmul.mubr.msk.f32.vlgmr.msra.gmra.mrb[30].mxu1 %vm587_vm1, %v15546_v18 }
 0xb91   : > { %12228 = vmatpush1.bf16.msra.mxu1 %v12227_v0  ;;  %4668 = vmatprep.mubr.f32.mxu1 %v17806_v1  ;;  %v3763_v0 = vld [vmem:[#allocation6 + $0x1a8] sm:$0xff] }
 0xb92   : > { %12230 = vmatprep.subr.bf16.mxu1 %v12229_v62  ;;  %v3765_v62 = vld [vmem:[#allocation6 + $0x1b8] sm:$0xff] }
 0xb93   : > { %v12149_v7 = vpack.c.bf16 %v3765_v62, %v3763_v0  ;;  %v4765_v0 = vld [vmem:[#allocation7 + $0x20] sm:$0xff]  ;;  %v4767_v62 = vld [vmem:[#allocation7 + $0x30] sm:$0xff] }
 0xb95   : > { %12232 = vmatpush1.bf16.msra.mxu1 %v12231_v17  ;;  %v3764_v17 = vld [vmem:[#allocation6 + $0x1b0] sm:$0xff] }
 0xb96   : > { %12234 = vmatprep.subr.bf16.mxu1 %v12233_v23  ;;  %v3767_v23 = vld [vmem:[#allocation6 + $0x1c8] sm:$0xff]  ;;  %v12151_v35 = vpack.c.bf16 %v3764_v17, %v3762_v12  ;;  %v4769_v12 = vld [vmem:[#allocation7 + $0x40] sm:$0xff]  ;;  %v4771_v17 = vld [vmem:[#allocation7 + $0x50] sm:$0xff] }
 0xb97   : > { %v12153_v38 = vpack.c.bf16 %v3769_v30, %v3767_v23  ;;  %v4774_v23 = vld [vmem:[#allocation7 + $0x68] sm:$0xff]  ;;  %v4776_v30 = vld [vmem:[#allocation7 + $0x78] sm:$0xff] }
 0xb99   : > { %12236 = vmatpush1.bf16.msra.mxu1 %v12235_v41  ;;  %v3768_v41 = vld [vmem:[#allocation6 + $0x1d0] sm:$0xff] }
 0xb9a   : > { %12238 = vmatprep.subr.bf16.mxu1 %v12237_v44  ;;  %v3771_v44 = vld [vmem:[#allocation6 + $0x1e8] sm:$0xff]  ;;  %v12155_v47 = vpack.c.bf16 %v3768_v41, %v3766_v40  ;;  %v4773_v40 = vld [vmem:[#allocation7 + $0x60] sm:$0xff]  ;;  %v4775_v41 = vld [vmem:[#allocation7 + $0x70] sm:$0xff] }
 0xb9d   : > { %12240 = vmatpush1.bf16.msra.mxu1 %v12239_v49  ;;  %v12157_v49 = vpack.c.bf16 %v3773_v46, %v3771_v44  ;;  %v4778_v44 = vld [vmem:[#allocation7 + $0x88] sm:$0xff]  ;;  %v4780_v46 = vld [vmem:[#allocation7 + $0x98] sm:$0xff] }
 0xba0   : > { %11105 = vmatmul.mubr.msk.f32.vlgmr.msra.gmra.mrb[32].mxu1 %vm587_vm1, %v15546_v18 }
 0xc23   : > { %v3343_v2 = vpop.f32.mrb[22].mxu1 }
 0xc24   : > { %v3345_v8 = vpop.f32.mrb[23].mxu1 }
 0xc25   : > { %3352 = vmatprep.subr.mxu0 %v3345_v8  ;;  %v4012_v8 = vld [vmem:[#allocation2 + $0x10] sm:$0xf] }
 0xc26   : > { %3353 = vmatpush1.msra.mxu0 %v3343_v2  ;;  %v4257_v2 = vld [vmem:[#allocation6 + $0x308] sm:$0xff] }
 0xc27   : > { %12114 = vmatprep.subr.bf16.mxu0 %v12113_v3  ;;  %11090 = vmatmul.mubr.msk.f32.vlgmr.msra.gmra.mrb[22].mxu0 %vm662_vm2, %v3348_v11  ;;  %v4259_v3 = vld [vmem:[#allocation6 + $0x318] sm:$0xff] }
 0xc28   : > { %12116 = vmatpush1.bf16.msra.mxu0 %v12115_v10  ;;  %3506 = vmatprep.mubr.f32.mxu0 %v17806_v1  ;;  %v12193_v11 = vpack.c.bf16 %v4259_v3, %v4257_v2  ;;  %v4256_v10 = vld [vmem:[#allocation6 + $0x300] sm:$0xff]  ;;  %v4783_v3 = vld [vmem:[#allocation7 + $0xb0] sm:$0xff] }
 0xc29   : > { %12118 = vmatprep.subr.bf16.mxu0 %v12117_v13  ;;  %v4258_v13 = vld [vmem:[#allocation6 + $0x310] sm:$0xff]  ;;  %v4781_v2 = vld [vmem:[#allocation7 + $0xa0] sm:$0xff] }
 0xc2a   : > { %v12195_v20 = vpack.c.bf16 %v4258_v13, %v4256_v10  ;;  %v15629_v10 = vpack.c.bf16 %v4783_v3, %v4781_v2  ;;  %v4813_v2 = vld [vmem:[#allocation7 + $0x1a0] sm:$0xff]  ;;  %v4815_v3 = vld [vmem:[#allocation7 + $0x1b0] sm:$0xff] }
 0xc2c   : > { %12120 = vmatpush1.bf16.msra.mxu0 %v12119_v33  ;;  %v12197_v33 = vpack.c.bf16 %v4263_v24, %v4261_v22  ;;  %v4785_v22 = vld [vmem:[#allocation7 + $0xc0] sm:$0xff]  ;;  %v4787_v24 = vld [vmem:[#allocation7 + $0xd0] sm:$0xff] }
 0xc2d   : > { %12122 = vmatprep.subr.bf16.mxu0 %v12121_v16  ;;  %v4260_v16 = vld [vmem:[#allocation6 + $0x320] sm:$0xff] }
 0xc2e   : > { %v12199_v31 = vpack.c.bf16 %v4262_v34, %v4260_v16  ;;  %v4789_v34 = vld [vmem:[#allocation7 + $0xe0] sm:$0xff] }
 0xc30   : > { %12124 = vmatpush1.bf16.msra.mxu0 %v12123_v63  ;;  %v12201_v63 = vpack.c.bf16 %v4267_v28, %v4265_v25  ;;  %v4791_v25 = vld [vmem:[#allocation7 + $0xf0] sm:$0xff]  ;;  %v4794_v28 = vld [vmem:[#allocation7 + $0x108] sm:$0xff] }
 0xc31   : > { %12126 = vmatprep.subr.bf16.mxu0 %v12125_v14  ;;  %v4264_v14 = vld [vmem:[#allocation6 + $0x340] sm:$0xff] }
 0xc33   : > { %v3674_v37 = vpop.f32.mrb[24].mxu1 }
 0xc34   : > { %v3676_v42 = vpop.f32.mrb[25].mxu1  ;;  %12128 = vmatpush1.bf16.msra.mxu0 %v12127_v36  ;;  %v4271_v36 = vld [vmem:[#allocation6 + $0x378] sm:$0xff] }
 0xc37   : > { %11091 = vmatmul.mubr.msk.f32.vlgmr.msra.gmra.mrb[24].mxu0 %vm587_vm1, %v15546_v18 }
 0xc38   : > { %3582 = vmatprep.mubr.f32.mxu0 %v17806_v1 }
 0xc43   : > { %v4006_v9 = vpop.f32.mrb[26].mxu1 }
 0xc44   : > { %v4008_v15 = vpop.f32.mrb[27].mxu1 }
 0xc53   : > { %v15570_v21 = vpop.f32.mrb[28].mxu1 }
 0xc54   : > { %v4174_v45 = vpop.f32.mrb[29].mxu1 }
 0xc63   : > { %v15572_v27 = vpop.f32.mrb[30].mxu1 }
 0xc64   : > { %v15574_v48 = vpop.f32.mrb[31].mxu1 }
 0xc73   : > { %v15576_v51 = vpop.f32.mrb[32].mxu1 }
 0xc74   : > { %v15578_v54 = vpop.f32.mrb[33].mxu1 }
 0xd0a   : > { %v3508_v26 = vpop.f32.mrb[24].mxu0 }
 0xd0b   : > { %v3510_v32 = vpop.f32.mrb[25].mxu0 }
 0xd0c   : > { %3518 = vmatprep.subr.mxu0 %v3510_v32  ;;  %v4763_v32 = vld [vmem:[#allocation7 + $0x10] sm:$0xff] }
 0xd0d   : > { %3519 = vmatpush1.msra.mxu0 %v3508_v26  ;;  %v15599_v53 = vpack.c.bf16 %v4763_v32, %v4761_v60 }
 0xd0e   : > { %11092 = vmatmul.mubr.msk.f32.vlgmr.msra.gmra.mrb[22].mxu0 %vm662_vm2, %v3514_v39  ;;  %3684 = vmatprep.subr.mxu0 %v3676_v42  ;;  %v12205_v42 = vpack.c.bf16 %v4271_v36, %v4269_v6  ;;  %v4766_v39 = vld [vmem:[#allocation7 + $0x28] sm:$0xff]  ;;  %v4795_v6 = vld [vmem:[#allocation7 + $0x110] sm:$0xff] }
 0xd0f   : > { %3685 = vmatpush1.msra.mxu0 %v3674_v37  ;;  %3748 = vmatprep.mubr.f32.mxu0 %v17806_v1  ;;  %v12203_v37 = vpack.c.bf16 %v4266_v19, %v4264_v14  ;;  %v4793_v19 = vld [vmem:[#allocation7 + $0x100] sm:$0xff]  ;;  %v4798_v36 = vld [vmem:[#allocation7 + $0x128] sm:$0xff] }
 0xd10   : > { %12146 = vmatprep.subr.bf16.mxu0 %v12145_v43  ;;  %v4768_v43 = vld [vmem:[#allocation7 + $0x38] sm:$0xff] }
 0xd11   : > { %v15601_v58 = vpack.c.bf16 %v4768_v43, %v4766_v39  ;;  %v4801_v39 = vld [vmem:[#allocation7 + $0x140] sm:$0xff]  ;;  %v4803_v43 = vld [vmem:[#allocation7 + $0x150] sm:$0xff] }
 0xd16   : > { %11094 = vmatmul.mubr.msk.f32.vlgmr.msra.gmra.mrb[22].mxu0 %vm662_vm2, %v3680_v4  ;;  %v4770_v4 = vld [vmem:[#allocation7 + $0x48] sm:$0xff] }
 0xd17   : > { %12148 = vmatpush1.bf16.msra.mxu0 %v12147_v5  ;;  %3838 = vmatprep.mubr.f32.mxu0 %v17806_v1  ;;  %v15605_v5 = vpack.c.bf16 %v4767_v62, %v4765_v0  ;;  %v4806_v0 = vld [vmem:[#allocation7 + $0x168] sm:$0xff]  ;;  %v4808_v62 = vld [vmem:[#allocation7 + $0x178] sm:$0xff] }
 0xd18   : > { %12150 = vmatprep.subr.bf16.mxu0 %v12149_v7 }
 0xd1b   : > { %12152 = vmatpush1.bf16.msra.mxu0 %v12151_v35  ;;  %v15611_v35 = vpack.c.bf16 %v4771_v17, %v4769_v12  ;;  %v4805_v12 = vld [vmem:[#allocation7 + $0x160] sm:$0xff]  ;;  %v4807_v17 = vld [vmem:[#allocation7 + $0x170] sm:$0xff] }
 0xd1c   : > { %12154 = vmatprep.subr.bf16.mxu0 %v12153_v38  ;;  %v15614_v38 = vpack.c.bf16 %v4776_v30, %v4774_v23  ;;  %v4810_v23 = vld [vmem:[#allocation7 + $0x188] sm:$0xff]  ;;  %v4812_v30 = vld [vmem:[#allocation7 + $0x198] sm:$0xff] }
 0xd1f   : > { %12156 = vmatpush1.bf16.msra.mxu0 %v12155_v47  ;;  %v15617_v47 = vpack.c.bf16 %v4775_v41, %v4773_v40  ;;  %v15665_v40 = vpack.c.bf16 %v4807_v17, %v4805_v12  ;;  %v15668_v41 = vpack.c.bf16 %v4812_v30, %v4810_v23  ;;  %v5137_v17 = vld [vmem:[#allocation7 + $0x200] sm:$0xff]  ;;  %v5139_v23 = vld [vmem:[#allocation7 + $0x210] sm:$0xff] }
 0xd20   : > { %12158 = vmatprep.subr.bf16.mxu0 %v12157_v49  ;;  %v15620_v49 = vpack.c.bf16 %v4780_v46, %v4778_v44  ;;  %v4809_v44 = vld [vmem:[#allocation7 + $0x180] sm:$0xff]  ;;  %v4811_v46 = vld [vmem:[#allocation7 + $0x190] sm:$0xff] }
 0xd21   : > { %18359 = vst [vmem:[#allocation20_spill] sm:$0xff] %v15665_v40  ;;  %18360 = vst [vmem:[#allocation21_spill] sm:$0xff] %v15668_v41 }
 0xd23   : > { %12160 = vmatpush1.bf16.msra.mxu0 %v12159_v55  ;;  %v4782_v55 = vld [vmem:[#allocation7 + $0xa8] sm:$0xff] }
 0xd26   : > { %11095 = vmatmul.mubr.msk.f32.vlgmr.msra.gmra.mrb[26].mxu0 %vm587_vm1, %v15546_v18 }
 0xd27   : > { %3914 = vmatprep.mubr.f32.mxu0 %v17806_v1 }
 0xdf9   : > { %v3840_v56 = vpop.f32.mrb[26].mxu0 }
 0xdfa   : > { %v3842_v59 = vpop.f32.mrb[27].mxu0 }
 0xdfb   : > { %3850 = vmatprep.subr.mxu0 %v3842_v59  ;;  %v15623_v59 = vpack.c.bf16 %v4779_v52, %v4777_v50  ;;  %v4814_v50 = vld [vmem:[#allocation7 + $0x1a8] sm:$0xff]  ;;  %v4816_v52 = vld [vmem:[#allocation7 + $0x1b8] sm:$0xff] }
 0xdfc   : > { %3851 = vmatpush1.msra.mxu0 %v3840_v56  ;;  %v4784_v56 = vld [vmem:[#allocation7 + $0xb8] sm:$0xff] }
 0xdfd   : > { %11096 = vmatmul.mubr.msk.f32.vlgmr.msra.gmra.mrb[22].mxu0 %vm662_vm2, %v3846_v61  ;;  %4016 = vmatprep.subr.mxu0 %v4008_v15  ;;  %v4270_v15 = vld [vmem:[#allocation6 + $0x370] sm:$0xff]  ;;  %v15626_v61 = vpack.c.bf16 %v4784_v56, %v4782_v55  ;;  %v15671_v55 = vpack.c.bf16 %v4811_v46, %v4809_v44  ;;  %v15674_v56 = vpack.c.bf16 %v4816_v52, %v4814_v50  ;;  %v5142_v44 = vld [vmem:[#allocation7 + $0x228] sm:$0xff]  ;;  %v5144_v46 = vld [vmem:[#allocation7 + $0x238] sm:$0xff] }
 0xdfe   : > { %4017 = vmatpush1.msra.mxu0 %v4006_v9  ;;  %4080 = vmatprep.mubr.f32.mxu0 %v17806_v1  ;;  %v4268_v9 = vld [vmem:[#allocation6 + $0x360] sm:$0xff]  ;;  %v15755_v52 = vpack.c.bf16 %v5139_v23, %v5137_v17  ;;  %v5155_v17 = vld [vmem:[#allocation7 + $0x290] sm:$0xff]  ;;  %v5158_v23 = vld [vmem:[#allocation7 + $0x2a8] sm:$0xff] }
 0xdff   : > { %4182 = vmatprep.subr.mxu0 %v4174_v45  ;;  %v4762_v45 = vld [vmem:[#allocation7 + $0x8] sm:$0xff]  ;;  %18361 = vst [vmem:[#allocation22_spill] sm:$0xff] %v15671_v55  ;;  %18362 = vst [vmem:[#allocation23_spill] sm:$0xff] %v15674_v56 }
 0xe00   : > { %v15597_v26 = vpack.c.bf16 %v4764_v57, %v4762_v45  ;;  %v4802_v45 = vld [vmem:[#allocation7 + $0x148] sm:$0xff]  ;;  %v4804_v57 = vld [vmem:[#allocation7 + $0x158] sm:$0xff]  ;;  %18369 = vst [vmem:[#allocation30_spill] sm:$0xff] %v15755_v52 }
 0xe01   : > { %v15656_v32 = vpack.c.bf16 %v4804_v57, %v4802_v45  ;;  %v15743_v57 = vld [vmem:[%s15734_s23] sm:$0xff] }
 0xe02   : > { %12306 = vmatprep.subr.bf16.mxu1 %v15597_v26 }
 0xe03   : > { %12308 = vmatpush1.bf16.msra.mxu1 %v15599_v53  ;;  %18356 = vst [vmem:[#allocation17_spill] sm:$0xff] %v15656_v32 }
 0xe04   : > { %12310 = vmatprep.subr.bf16.mxu1 %v15601_v58 }
 0xe05   : > { %11098 = vmatmul.mubr.msk.f32.vlgmr.msra.gmra.mrb[22].mxu0 %vm662_vm2, %v4012_v8  ;;  %v4786_v8 = vld [vmem:[#allocation7 + $0xc8] sm:$0xff] }
 0xe06   : > { %4183 = vmatpush1.msra.mxu0 %v15570_v21  ;;  %4246 = vmatprep.mubr.f32.mxu0 %v17806_v1  ;;  %v12207_v21 = vpack.c.bf16 %v4270_v15, %v4268_v9  ;;  %v4797_v15 = vld [vmem:[#allocation7 + $0x120] sm:$0xff] }
 0xe07   : > { %12194 = vmatprep.subr.bf16.mxu0 %v12193_v11  ;;  %12312 = vmatpush1.bf16.msra.mxu1 %v15605_v5  ;;  %v4788_v11 = vld [vmem:[#allocation7 + $0xd8] sm:$0xff] }
 0xe08   : > { %v15632_v13 = vpack.c.bf16 %v4788_v11, %v4786_v8  ;;  %v4818_v8 = vld [vmem:[#allocation7 + $0x1c8] sm:$0xff]  ;;  %v4820_v11 = vld [vmem:[#allocation7 + $0x1d8] sm:$0xff] }
 0xe0d   : > { %11100 = vmatmul.mubr.msk.f32.vlgmr.msra.gmra.mrb[22].mxu0 %vm662_vm2, %v4178_v29  ;;  %v4790_v29 = vld [vmem:[#allocation7 + $0xe8] sm:$0xff] }
 0xe0e   : > { %12196 = vmatpush1.bf16.msra.mxu0 %v12195_v20  ;;  %4336 = vmatprep.mubr.f32.mxu0 %v17806_v1  ;;  %v4792_v20 = vld [vmem:[#allocation7 + $0xf8] sm:$0xff] }
 0xe0f   : > { %12198 = vmatprep.subr.bf16.mxu0 %v12197_v33  ;;  %v15635_v33 = vpack.c.bf16 %v4787_v24, %v4785_v22  ;;  %v15638_v16 = vpack.c.bf16 %v4792_v20, %v4790_v29  ;;  %v15677_v22 = vpack.c.bf16 %v4815_v3, %v4813_v2  ;;  %v15680_v24 = vpack.c.bf16 %v4820_v11, %v4818_v8  ;;  %v4817_v29 = vld [vmem:[#allocation7 + $0x1c0] sm:$0xff]  ;;  %v4819_v20 = vld [vmem:[#allocation7 + $0x1d0] sm:$0xff] }
 0xe10   : > { %v15759_v3 = vpack.c.bf16 %v5144_v46, %v5142_v44  ;;  %v5141_v8 = vld [vmem:[#allocation7 + $0x220] sm:$0xff]  ;;  %v5143_v11 = vld [vmem:[#allocation7 + $0x230] sm:$0xff] }
 0xe11   : > { %18363 = vst [vmem:[#allocation24_spill] sm:$0xff] %v15677_v22  ;;  %18364 = vst [vmem:[#allocation25_spill] sm:$0xff] %v15680_v24 }
 0xe12   : > { %12200 = vmatpush1.bf16.msra.mxu0 %v12199_v31  ;;  %v4796_v31 = vld [vmem:[#allocation7 + $0x118] sm:$0xff]  ;;  %18370 = vst [vmem:[#allocation31_spill] sm:$0xff] %v15759_v3 }
 0xe13   : > { %12202 = vmatprep.subr.bf16.mxu0 %v12201_v63  ;;  %v15641_v63 = vpack.c.bf16 %v4791_v25, %v4789_v34  ;;  %v15644_v14 = vpack.c.bf16 %v4796_v31, %v4794_v28  ;;  %v15683_v34 = vpack.c.bf16 %v4819_v20, %v4817_v29  ;;  %v4344_v31 = vld [vmem:[#allocation2 + $0x18] sm:$0xf]  ;;  %v5146_v29 = vld [vmem:[#allocation7 + $0x248] sm:$0xff]  ;;  %v5148_v20 = vld [vmem:[#allocation7 + $0x258] sm:$0xff] }
 0xe15   : > { %18352 = vst [vmem:[#allocation13_spill] sm:$0xff] %v15644_v14  ;;  %18365 = vst [vmem:[#allocation26_spill] sm:$0xff] %v15683_v34 }
 0xe16   : > { %12204 = vmatpush1.bf16.msra.mxu0 %v12203_v37  ;;  %v4800_v37 = vld [vmem:[#allocation7 + $0x138] sm:$0xff] }
 0xe17   : > { %12206 = vmatprep.subr.bf16.mxu0 %v12205_v42  ;;  %v15647_v42 = vpack.c.bf16 %v4795_v6, %v4793_v19  ;;  %v15650_v9 = vpack.c.bf16 %v4800_v37, %v4798_v36  ;;  %v4510_v19 = vld [vmem:[#allocation2 + $0x1c] sm:$0xf]  ;;  %v4676_v6 = vld [vmem:[#allocation2 + $0x20] sm:$0xf]  ;;  %v4823_v36 = vld [vmem:[#allocation7 + $0x1f0] sm:$0xff] }
 0xe19   : > { %18353 = vst [vmem:[#allocation14_spill] sm:$0xff] %v15647_v42  ;;  %18354 = vst [vmem:[#allocation15_spill] sm:$0xff] %v15650_v9 }
 0xe1a   : > { %12208 = vmatpush1.bf16.msra.mxu0 %v12207_v21  ;;  %v4799_v21 = vld [vmem:[#allocation7 + $0x130] sm:$0xff] }
 0xe1b   : > { %v15653_v60 = vpack.c.bf16 %v4799_v21, %v4797_v15  ;;  %v5138_v15 = vld [vmem:[#allocation7 + $0x208] sm:$0xff]  ;;  %v5140_v21 = vld [vmem:[#allocation7 + $0x218] sm:$0xff] }
 0xe1c   : > { %v15740_v45 = vpack.c.bf16 %v5140_v21, %v5138_v15  ;;  %v5151_v15 = vld [vmem:[#allocation7 + $0x270] sm:$0xff]  ;;  %v5154_v21 = vld [vmem:[#allocation7 + $0x288] sm:$0xff] }
 0xe1d   : > { %11101 = vmatmul.mubr.msk.f32.vlgmr.msra.gmra.mrb[28].mxu0 %vm587_vm1, %v15546_v18  ;;  %v4772_v18 = vld [vmem:[#allocation7 + $0x58] sm:$0xff]  ;;  %18355 = vst [vmem:[#allocation16_spill] sm:$0xff] %v15653_v60 }
 0xe1e   : > { %4412 = vmatprep.mubr.f32.mxu0 %v17806_v1  ;;  %v15608_v7 = vpack.c.bf16 %v4772_v18, %v4770_v4  ;;  %v15659_v4 = vpack.c.bf16 %v4803_v43, %v4801_v39  ;;  %v15662_v18 = vpack.c.bf16 %v4808_v62, %v4806_v0  ;;  %18368 = vst [vmem:[#allocation29_spill] sm:$0xff] %v15740_v45  ;;  %v3256_v43 = vpop.permute.xlu0 %3255 }
 0xe1f   : > { %v15748_v39 = vcombine.high %v15743_v57, %v15743_v57 }
 0xe20   : > { %12314 = vmatprep.subr.bf16.mxu1 %v15608_v7  ;;  %18357 = vst [vmem:[#allocation18_spill] sm:$0xff] %v15659_v4  ;;  %18358 = vst [vmem:[#allocation19_spill] sm:$0xff] %v15662_v18 }
 0xe21   : > { %12316 = vmatpush1.bf16.msra.mxu1 %v15611_v35 }
 0xe22   : > { %12318 = vmatprep.subr.bf16.mxu1 %v15614_v38 }
 0xe25   : > { %12320 = vmatpush1.bf16.msra.mxu1 %v15617_v47 }
 0xe26   : > { %12322 = vmatprep.subr.bf16.mxu1 %v15620_v49 }
 0xe29   : > { %12324 = vmatpush1.bf16.msra.mxu1 %v15623_v59 }
 0xe2a   : > { %12326 = vmatprep.subr.bf16.mxu1 %v15626_v61 }
 0xe2d   : > { %12328 = vmatpush1.bf16.msra.mxu1 %v15629_v10 }
 0xe2e   : > { %12330 = vmatprep.subr.bf16.mxu1 %v15632_v13 }
 0xe31   : > { %12332 = vmatpush1.bf16.msra.mxu1 %v15635_v33 }
 0xe32   : > { %12334 = vmatprep.subr.bf16.mxu1 %v15638_v16 }
 0xe35   : > { %12336 = vmatpush1.bf16.msra.mxu1 %v15641_v63 }
 0xe36   : > { %12338 = vmatprep.subr.bf16.mxu1 %v15644_v14 }
 0xe39   : > { %12340 = vmatpush1.bf16.msra.mxu1 %v15647_v42 }
 0xe3a   : > { %12342 = vmatprep.subr.bf16.mxu1 %v15650_v9 }
 0xe3d   : > { %12344 = vmatpush1.bf16.msra.mxu1 %v15653_v60 }
 0xe3e   : > { %12346 = vmatprep.subr.bf16.mxu1 %v15656_v32 }
 0xe41   : > { %12348 = vmatpush1.bf16.msra.mxu1 %v15659_v4 }
 0xe42   : > { %12350 = vmatprep.subr.bf16.mxu1 %v15662_v18 }
 0xe45   : > { %12352 = vmatpush1.bf16.msra.mxu1 %v15665_v40 }
 0xe46   : > { %12354 = vmatprep.subr.bf16.mxu1 %v15668_v41 }
 0xe49   : > { %12356 = vmatpush1.bf16.msra.mxu1 %v15671_v55 }
 0xe4a   : > { %12358 = vmatprep.subr.bf16.mxu1 %v15674_v56 }
 0xe4d   : > { %12360 = vmatpush1.bf16.msra.mxu1 %v15677_v22 }
 0xe4e   : > { %12362 = vmatprep.subr.bf16.mxu1 %v15680_v24 }
 0xe51   : > { %12364 = vmatpush1.bf16.msra.mxu1 %v15683_v34 }
 0xef0   : > { %v4338_v25 = vpop.f32.mrb[28].mxu0 }
 0xef1   : > { %v4340_v28 = vpop.f32.mrb[29].mxu0 }
 0xef2   : > { %4348 = vmatprep.subr.mxu0 %v4340_v28  ;;  %v15768_v28 = vpack.c.bf16 %v5148_v20, %v5146_v29  ;;  %v5162_v29 = vld [vmem:[#allocation7 + $0x2c8] sm:$0xff]  ;;  %v5164_v20 = vld [vmem:[#allocation7 + $0x2d8] sm:$0xff] }
 0xef3   : > { %4349 = vmatpush1.msra.mxu0 %v4338_v25  ;;  %v15765_v25 = vpack.c.bf16 %v5143_v11, %v5141_v8  ;;  %v5157_v8 = vld [vmem:[#allocation7 + $0x2a0] sm:$0xff]  ;;  %v5159_v11 = vld [vmem:[#allocation7 + $0x2b0] sm:$0xff] }
 0xef4   : > { %11102 = vmatmul.mubr.msk.f32.vlgmr.msra.gmra.mrb[22].mxu0 %vm662_vm2, %v4344_v31  ;;  %4514 = vmatprep.subr.mxu0 %v15574_v48  ;;  %v4824_v48 = vld [vmem:[#allocation7 + $0x1f8] sm:$0xff]  ;;  %18372 = vst [vmem:[#allocation33_spill] sm:$0xff] %v15768_v28  ;;  %v5145_v31 = vld [vmem:[#allocation7 + $0x240] sm:$0xff] }
 0xef5   : > { %4515 = vmatpush1.msra.mxu0 %v15572_v27  ;;  %4578 = vmatprep.mubr.f32.mxu0 %v17806_v1  ;;  %v4822_v27 = vld [vmem:[#allocation7 + $0x1e8] sm:$0xff]  ;;  %18371 = vst [vmem:[#allocation32_spill] sm:$0xff] %v15765_v25 }
 0xef6   : > { %4680 = vmatprep.subr.mxu0 %v15578_v54  ;;  %v4821_v54 = vld [vmem:[#allocation7 + $0x1e0] sm:$0xff] }
 0xef7   : > { %v15728_v37 = vpack.c.bf16 %v4823_v36, %v4821_v54  ;;  %v5149_v36 = vld [vmem:[#allocation7 + $0x260] sm:$0xff] }
 0xef9   : > { %18367 = vst [vmem:[#allocation28_spill] sm:$0xff] %v15728_v37 }
 0xefc   : > { %11104 = vmatmul.mubr.msk.f32.vlgmr.msra.gmra.mrb[22].mxu0 %vm662_vm2, %v4510_v19  ;;  %v5147_v19 = vld [vmem:[#allocation7 + $0x250] sm:$0xff] }
 0xefd   : > { %4681 = vmatpush1.msra.mxu0 %v15576_v51  ;;  %4744 = vmatprep.mubr.f32.mxu0 %v17806_v1  ;;  %v15726_v51 = vpack.c.bf16 %v4824_v48, %v4822_v27  ;;  %v5152_v27 = vld [vmem:[#allocation7 + $0x278] sm:$0xff]  ;;  %v15771_v48 = vpack.c.bf16 %v5147_v19, %v5145_v31  ;;  %v15789_v31 = vpack.c.bf16 %v5159_v11, %v5157_v8 }
 0xefe   : > { %12242 = vmatprep.subr.bf16.mxu0 %v15597_v26  ;;  %v15792_v19 = vpack.c.bf16 %v5164_v20, %v5162_v29  ;;  %v5169_v29 = vld [vmem:[#allocation7 + $0x300] sm:$0xff]  ;;  %v5171_v20 = vld [vmem:[#allocation7 + $0x310] sm:$0xff] }
 0xeff   : > { %18366 = vst [vmem:[#allocation27_spill] sm:$0xff] %v15726_v51  ;;  %12366 = vmatprep.subr.bf16.mxu1 %v15726_v51  ;;  %18373 = vst [vmem:[#allocation34_spill] sm:$0xff] %v15771_v48 }
 0xf00   : > { %12368 = vmatpush1.bf16.msra.mxu1 %v15728_v37  ;;  %18379 = vst [vmem:[#allocation40_spill] sm:$0xff] %v15789_v31  ;;  %18380 = vst [vmem:[#allocation41_spill] sm:$0xff] %v15792_v19 }
 0xf01   : > { %12434 = vmatprep.subr.bf16.mxu1 %v15740_v45 }
 0xf04   : > { %11106 = vmatmul.mubr.msk.f32.vlgmr.msra.gmra.mrb[22].mxu0 %vm662_vm2, %v4676_v6  ;;  %v5150_v6 = vld [vmem:[#allocation7 + $0x268] sm:$0xff] }
 0xf05   : > { %12244 = vmatpush1.bf16.msra.mxu0 %v15599_v53  ;;  %4892 = vmatprep.mubr.f32.mxu0 %v15748_v39  ;;  %v15774_v54 = vpack.c.bf16 %v5152_v27, %v5150_v6  ;;  %v5161_v6 = vld [vmem:[#allocation7 + $0x2c0] sm:$0xff]  ;;  %v5163_v27 = vld [vmem:[#allocation7 + $0x2d0] sm:$0xff] }
 0xf06   : > { %12246 = vmatprep.subr.bf16.mxu0 %v15601_v58 }
 0xf07   : > { %18374 = vst [vmem:[#allocation35_spill] sm:$0xff] %v15774_v54 }
 0xf09   : > { %12248 = vmatpush1.bf16.msra.mxu0 %v15605_v5 }
 0xf0a   : > { %12250 = vmatprep.subr.bf16.mxu0 %v15608_v7 }
 0xf0d   : > { %12252 = vmatpush1.bf16.msra.mxu0 %v15611_v35 }
 0xf0e   : > { %12254 = vmatprep.subr.bf16.mxu0 %v15614_v38 }
 0xf11   : > { %12256 = vmatpush1.bf16.msra.mxu0 %v15617_v47 }
 0xf12   : > { %12258 = vmatprep.subr.bf16.mxu0 %v15620_v49 }
 0xf15   : > { %12260 = vmatpush1.bf16.msra.mxu0 %v15623_v59 }
 0xf16   : > { %12262 = vmatprep.subr.bf16.mxu0 %v15626_v61 }
 0xf19   : > { %12264 = vmatpush1.bf16.msra.mxu0 %v15629_v10 }
 0xf1a   : > { %12266 = vmatprep.subr.bf16.mxu0 %v15632_v13 }
 0xf1d   : > { %12268 = vmatpush1.bf16.msra.mxu0 %v15635_v33 }
 0xf1e   : > { %12270 = vmatprep.subr.bf16.mxu0 %v15638_v16 }
 0xf21   : > { %12272 = vmatpush1.bf16.msra.mxu0 %v15641_v63 }
 0xf22   : > { %12274 = vmatprep.subr.bf16.mxu0 %v15644_v14 }
 0xf25   : > { %12276 = vmatpush1.bf16.msra.mxu0 %v15647_v42 }
 0xf26   : > { %12278 = vmatprep.subr.bf16.mxu0 %v15650_v9  ;;  %v5945_v9 = vld [vmem:[#allocation7 + $0x7f0] sm:$0xff] }
 0xf29   : > { %12280 = vmatpush1.bf16.msra.mxu0 %v15653_v60  ;;  %v5199_v60 = vld [vmem:[#allocation7 + $0x3f0] sm:$0xff] }
 0xf2a   : > { %12282 = vmatprep.subr.bf16.mxu0 %v15656_v32  ;;  %v5197_v32 = vld [vmem:[#allocation7 + $0x3e0] sm:$0xff] }
 0xf2d   : > { %12284 = vmatpush1.bf16.msra.mxu0 %v15659_v4  ;;  %v5195_v4 = vld [vmem:[#allocation7 + $0x3d0] sm:$0xff] }
 0xf2e   : > { %12286 = vmatprep.subr.bf16.mxu0 %v15662_v18  ;;  %v5193_v18 = vld [vmem:[#allocation7 + $0x3c0] sm:$0xff] }
 0xf31   : > { %12288 = vmatpush1.bf16.msra.mxu0 %v15665_v40  ;;  %v5191_v40 = vld [vmem:[#allocation7 + $0x3b0] sm:$0xff] }
 0xf32   : > { %12290 = vmatprep.subr.bf16.mxu0 %v15668_v41  ;;  %v5189_v41 = vld [vmem:[#allocation7 + $0x3a0] sm:$0xff] }
 0xf35   : > { %12292 = vmatpush1.bf16.msra.mxu0 %v15671_v55  ;;  %v5187_v55 = vld [vmem:[#allocation7 + $0x390] sm:$0xff] }
 0xf36   : > { %12294 = vmatprep.subr.bf16.mxu0 %v15674_v56  ;;  %v5185_v56 = vld [vmem:[#allocation7 + $0x380] sm:$0xff] }
 0xf39   : > { %12296 = vmatpush1.bf16.msra.mxu0 %v15677_v22  ;;  %v5183_v22 = vld [vmem:[#allocation7 + $0x370] sm:$0xff] }
 0xf3a   : > { %12298 = vmatprep.subr.bf16.mxu0 %v15680_v24  ;;  %v5181_v24 = vld [vmem:[#allocation7 + $0x360] sm:$0xff] }
 0xf3d   : > { %12300 = vmatpush1.bf16.msra.mxu0 %v15683_v34  ;;  %v5179_v34 = vld [vmem:[#allocation7 + $0x350] sm:$0xff] }
 0xf3e   : > { %12302 = vmatprep.subr.bf16.mxu0 %v15726_v51  ;;  %v5177_v51 = vld [vmem:[#allocation7 + $0x340] sm:$0xff] }
 0xf41   : > { %12304 = vmatpush1.bf16.msra.mxu0 %v15728_v37  ;;  %v5175_v37 = vld [vmem:[#allocation7 + $0x330] sm:$0xff] }
 0xf44   : > { %4893 = vmatmul.mubr.f32.vlgmr.msra.gmra.mrb[30].mxu0 %v15743_v57 }
 0xf45   : > { %5047 = vmatprep.mubr.f32.mxu0 %v17806_v1  ;;  %v5173_v1 = vld [vmem:[#allocation7 + $0x320] sm:$0xff] }
 0xfd7   : > { %v4746_v0 = vpop.f32.mrb[22].mxu0 }
 0xfd8   : > { %v14549_v62 = vadd.f32 %v4746_v0, %v3256_v43  ;;  %v4748_v12 = vpop.f32.mrb[23].mxu0  ;;  %v15777_v0 = vpack.c.bf16 %v5151_v15, %v5149_v36  ;;  %v5166_v36 = vld [vmem:[#allocation7 + $0x2e8] sm:$0xff]  ;;  %v5168_v15 = vld [vmem:[#allocation7 + $0x2f8] sm:$0xff] }
 0xfd9   : > { %v14550_v30 = vadd.f32 %v4748_v12, %v3256_v43  ;;  %v5156_v43 = vld [vmem:[#allocation7 + $0x298] sm:$0xff]  ;;  %v5153_v12 = vld [vmem:[#allocation7 + $0x280] sm:$0xff] }
 0xfda   : > { %v15757_v2 = vmax.f32 %v14549_v62, 0.0  ;;  %18375 = vst [vmem:[#allocation36_spill] sm:$0xff] %v15777_v0  ;;  %v15780_v62 = vpack.c.bf16 %v5156_v43, %v5154_v21  ;;  %v15783_v44 = vpack.c.bf16 %v5155_v17, %v5153_v12  ;;  %v15795_v21 = vpack.c.bf16 %v5163_v27, %v5161_v6  ;;  %v5165_v12 = vld [vmem:[#allocation7 + $0x2e0] sm:$0xff]  ;;  %v5167_v17 = vld [vmem:[#allocation7 + $0x2f0] sm:$0xff]  ;;  %v5174_v6 = vld [vmem:[#allocation7 + $0x328] sm:$0xff] }
 0xfdb   : > { %v15753_v50 = vmax.f32 %v14550_v30, 0.0  ;;  %v5160_v30 = vld [vmem:[#allocation7 + $0x2b8] sm:$0xff]  ;;  %v15798_v43 = vpack.c.bf16 %v5168_v15, %v5166_v36  ;;  %v15801_v8 = vpack.c.bf16 %v5167_v17, %v5165_v12  ;;  %v15807_v36 = vpack.c.bf16 %v5171_v20, %v5169_v29  ;;  %v5178_v12 = vld [vmem:[#allocation7 + $0x348] sm:$0xff] }
 0xfdc   : > { %18376 = vst [vmem:[#allocation37_spill] sm:$0xff] %v15780_v62  ;;  %18377 = vst [vmem:[#allocation38_spill] sm:$0xff] %v15783_v44  ;;  %v15786_v46 = vpack.c.bf16 %v5160_v30, %v5158_v23  ;;  %v5170_v23 = vld [vmem:[#allocation7 + $0x308] sm:$0xff]  ;;  %v5172_v30 = vld [vmem:[#allocation7 + $0x318] sm:$0xff] }
 0xfdd   : > { %4964 = vmatprep.mubr.f32.mxu1 %v15753_v50  ;;  %18381 = vst [vmem:[#allocation42_spill] sm:$0xff] %v15795_v21  ;;  %18382 = vst [vmem:[#allocation43_spill] sm:$0xff] %v15798_v43  ;;  %v15804_v11 = vpack.c.bf16 %v5172_v30, %v5170_v23  ;;  %v5176_v27 = vld [vmem:[#allocation7 + $0x338] sm:$0xff]  ;;  %v15813_v23 = vpack.c.bf16 %v5175_v37, %v5173_v1  ;;  %v5182_v29 = vld [vmem:[#allocation7 + $0x368] sm:$0xff] }
 0xfde   : > { %4965 = vmatmul.mubr.f32.vlgmr.msra.gmra.mrb[34].mxu1 %v15757_v2  ;;  %18378 = vst [vmem:[#allocation39_spill] sm:$0xff] %v15786_v46  ;;  %18383 = vst [vmem:[#allocation44_spill] sm:$0xff] %v15801_v8  ;;  %v15810_v15 = vpack.c.bf16 %v5176_v27, %v5174_v6  ;;  %v5180_v17 = vld [vmem:[#allocation7 + $0x358] sm:$0xff]  ;;  %v15819_v6 = vpack.c.bf16 %v5179_v34, %v5177_v51  ;;  %v5186_v1 = vld [vmem:[#allocation7 + $0x388] sm:$0xff] }
 0xfdf   : > { %12436 = vmatpush1.bf16.msra.mxu1 %v15755_v52  ;;  %5338 = vmatprep.mubr.f32.mxu1 %v15753_v50  ;;  %18384 = vst [vmem:[#allocation45_spill] sm:$0xff] %v15804_v11  ;;  %18385 = vst [vmem:[#allocation46_spill] sm:$0xff] %v15807_v36  ;;  %v15816_v30 = vpack.c.bf16 %v5180_v17, %v5178_v12  ;;  %v5184_v20 = vld [vmem:[#allocation7 + $0x378] sm:$0xff]  ;;  %v15825_v12 = vpack.c.bf16 %v5183_v22, %v5181_v24  ;;  %v5190_v34 = vld [vmem:[#allocation7 + $0x3a8] sm:$0xff] }
 0xfe0   : > { %12438 = vmatprep.subr.bf16.mxu1 %v15759_v3  ;;  %18386 = vst [vmem:[#allocation47_spill] sm:$0xff] %v15810_v15  ;;  %18387 = vst [vmem:[#allocation48_spill] sm:$0xff] %v15813_v23  ;;  %v15822_v27 = vpack.c.bf16 %v5184_v20, %v5182_v29  ;;  %v5188_v37 = vld [vmem:[#allocation7 + $0x398] sm:$0xff]  ;;  %v15831_v29 = vpack.c.bf16 %v5187_v55, %v5185_v56  ;;  %v5194_v22 = vld [vmem:[#allocation7 + $0x3c8] sm:$0xff] }
 0xfe1   : > { %18388 = vst [vmem:[#allocation49_spill] sm:$0xff] %v15816_v30  ;;  %18389 = vst [vmem:[#allocation50_spill] sm:$0xff] %v15819_v6  ;;  %v15828_v17 = vpack.c.bf16 %v5188_v37, %v5186_v1  ;;  %v5192_v51 = vld [vmem:[#allocation7 + $0x3b8] sm:$0xff]  ;;  %v15837_v1 = vpack.c.bf16 %v5191_v40, %v5189_v41  ;;  %v5198_v55 = vld [vmem:[#allocation7 + $0x3e8] sm:$0xff]  ;;  %v15849_v40 = vpack.c.bf16 %v5199_v60, %v5197_v32  ;;  %v18400_v60 = vmov 0.0  }
 0xfe2   : > { %18390 = vst [vmem:[#allocation51_spill] sm:$0xff] %v15822_v27  ;;  %18391 = vst [vmem:[#allocation52_spill] sm:$0xff] %v15825_v12  ;;  %v15834_v20 = vpack.c.bf16 %v5192_v51, %v5190_v34  ;;  %v5196_v24 = vld [vmem:[#allocation7 + $0x3d8] sm:$0xff]  ;;  %v15843_v34 = vpack.c.bf16 %v5195_v4, %v5193_v18 }
 0xfe3   : > { %12440 = vmatpush1.bf16.msra.mxu1 %v15765_v25  ;;  %18392 = vst [vmem:[#allocation53_spill] sm:$0xff] %v15828_v17  ;;  %18393 = vst [vmem:[#allocation54_spill] sm:$0xff] %v15831_v29  ;;  %v15840_v37 = vpack.c.bf16 %v5196_v24, %v5194_v22  ;;  %v5200_v56 = vld [vmem:[#allocation7 + $0x3f8] sm:$0xff] }
 0xfe4   : > { %12442 = vmatprep.subr.bf16.mxu1 %v15768_v28  ;;  %18394 = vst [vmem:[#allocation55_spill] sm:$0xff] %v15834_v20  ;;  %18395 = vst [vmem:[#allocation56_spill] sm:$0xff] %v15837_v1  ;;  %v15846_v51 = vpack.c.bf16 %v5200_v56, %v5198_v55  ;;  %v4971_v24 = vld [vmem:[%s17792_s7] sm:$0xff] }
 0xfe5   : > { %18396 = vst [vmem:[#allocation57_spill] sm:$0xff] %v15840_v37  ;;  %18397 = vst [vmem:[#allocation58_spill] sm:$0xff] %v15843_v34  ;;  %v4899_v32 = vld [vmem:[%s17791_s6] sm:$0xff] }
 0xfe6   : > { %18398 = vst [vmem:[#allocation59_spill] sm:$0xff] %v15846_v51  ;;  %18399 = vst [vmem:[#allocation60_spill] sm:$0xff] %v15849_v40 }
 0xfe7   : > { %12444 = vmatpush1.bf16.msra.mxu1 %v15771_v48 }
 0xfe8   : > { %12446 = vmatprep.subr.bf16.mxu1 %v15774_v54 }
 0xfeb   : > { %12448 = vmatpush1.bf16.msra.mxu1 %v15777_v0 }
 0xfec   : > { %12450 = vmatprep.subr.bf16.mxu1 %v15780_v62 }
 0xfef   : > { %12452 = vmatpush1.bf16.msra.mxu1 %v15783_v44 }
 0xff0   : > { %12454 = vmatprep.subr.bf16.mxu1 %v15786_v46 }
 0xff3   : > { %12456 = vmatpush1.bf16.msra.mxu1 %v15789_v31 }
 0xff4   : > { %12458 = vmatprep.subr.bf16.mxu1 %v15792_v19 }
 0xff7   : > { %12460 = vmatpush1.bf16.msra.mxu1 %v15795_v21 }
 0xff8   : > { %12462 = vmatprep.subr.bf16.mxu1 %v15798_v43 }
 0xffb   : > { %12464 = vmatpush1.bf16.msra.mxu1 %v15801_v8 }
 0xffc   : > { %12466 = vmatprep.subr.bf16.mxu1 %v15804_v11 }
 0xfff   : > { %12468 = vmatpush1.bf16.msra.mxu1 %v15807_v36 }
0x1000   : > { %12470 = vmatprep.subr.bf16.mxu1 %v15810_v15 }
0x1003   : > { %12472 = vmatpush1.bf16.msra.mxu1 %v15813_v23 }
0x1004   : > { %12474 = vmatprep.subr.bf16.mxu1 %v15816_v30 }
0x1007   : > { %12476 = vmatpush1.bf16.msra.mxu1 %v15819_v6 }
0x1008   : > { %12478 = vmatprep.subr.bf16.mxu1 %v15822_v27 }
0x100b   : > { %12480 = vmatpush1.bf16.msra.mxu1 %v15825_v12 }
0x100c   : > { %12482 = vmatprep.subr.bf16.mxu1 %v15828_v17 }
0x100f   : > { %12484 = vmatpush1.bf16.msra.mxu1 %v15831_v29 }
0x1010   : > { %12486 = vmatprep.subr.bf16.mxu1 %v15834_v20 }
0x1013   : > { %12488 = vmatpush1.bf16.msra.mxu1 %v15837_v1 }
0x1014   : > { %12490 = vmatprep.subr.bf16.mxu1 %v15840_v37 }
0x1017   : > { %12492 = vmatpush1.bf16.msra.mxu1 %v15843_v34  ;;  %v4894_v4 = vpop.f32.mrb[30].mxu0 }
0x1018   : > { %12494 = vmatprep.subr.bf16.mxu1 %v15846_v51  ;;  %v4896_v18 = vpop.f32.mrb[31].mxu0 }
0x101b   : > { %12496 = vmatpush1.bf16.msra.mxu1 %v15849_v40 }
0x101e   : > { %5339 = vmatmul.mubr.f32.vlgmr.msra.gmra.mrb[36].mxu1 %v15757_v2 }
0x101f   : > { %5638 = vmatprep.mubr.f32.mxu1 %v15748_v39 }
0x10b1   : > { %v4966_v41 = vpop.f32.mrb[34].mxu1 }
0x10b2   : > { %v4968_v22 = vpop.f32.mrb[35].mxu1 }
0x10b3   : > { %11107 = vmatprep.subr.msk.mxu0 %vm4976_vm3, %v4968_v22 }
0x10b4   : > { %11108 = vmatpush1.msk.msra.mxu0 %vm4976_vm3, %v4966_v41  ;;  %v5513_v41 = vld [vmem:[#allocation7 + $0x418] sm:$0xff] }
0x10b5   : > { %11109 = vmatmul.mubr.msk.f32.vlgmr.msra.gmra.mrb[32].mxu0 %vm4972_vm4, %v4971_v24  ;;  %11110 = vmatprep.subr.msk.mxu0 %vm4976_vm3, %v4896_v18  ;;  %v5511_v18 = vld [vmem:[#allocation7 + $0x408] sm:$0xff]  ;;  %v5510_v24 = vld [vmem:[#allocation7 + $0x400] sm:$0xff] }
0x10b6   : > { %11111 = vmatpush1.msk.msra.mxu0 %vm4976_vm3, %v4894_v4  ;;  %5127 = vmatprep.mubr.f32.mxu0 %v18400_v60  ;;  %v11114_v4 = vld [vmem:[%s17792_s7 + $0x8] sm:$0xff]  ;;  %v15910_v22 = vpack.c.bf16 %v5513_v41, %v5511_v18  ;;  %v5521_v41 = vld [vmem:[#allocation7 + $0x458] sm:$0xff] }
0x10b7   : > { %12370 = vmatprep.subr.bf16.mxu0 %v15740_v45  ;;  %v5519_v18 = vld [vmem:[#allocation7 + $0x448] sm:$0xff] }
0x10b8   : > { %18401 = vst [vmem:[#allocation61_spill] sm:$0xff] %v15910_v22  ;;  %12498 = vmatprep.subr.bf16.mxu1 %v15910_v22 }
0x10bd   : > { %11112 = vmatmul.mubr.msk.f32.vlgmr.msra.gmra.mrb[32].mxu0 %vm4972_vm4, %v4899_v32  ;;  %v5512_v32 = vld [vmem:[#allocation7 + $0x410] sm:$0xff] }
0x10be   : > { %12372 = vmatpush1.bf16.msra.mxu0 %v15755_v52  ;;  %5265 = vmatprep.mubr.f32.mxu0 %v15748_v39  ;;  %v5572_v52 = vld [vmem:[#allocation7 + $0x5f0] sm:$0xff] }
0x10bf   : > { %12374 = vmatprep.subr.bf16.mxu0 %v15759_v3 }
0x10c2   : > { %12376 = vmatpush1.bf16.msra.mxu0 %v15765_v25  ;;  %v5568_v25 = vld [vmem:[#allocation7 + $0x5d0] sm:$0xff] }
0x10c3   : > { %12378 = vmatprep.subr.bf16.mxu0 %v15768_v28 }
0x10c6   : > { %12380 = vmatpush1.bf16.msra.mxu0 %v15771_v48  ;;  %v5564_v48 = vld [vmem:[#allocation7 + $0x5b0] sm:$0xff] }
0x10c7   : > { %12382 = vmatprep.subr.bf16.mxu0 %v15774_v54 }
0x10ca   : > { %12384 = vmatpush1.bf16.msra.mxu0 %v15777_v0  ;;  %v5560_v0 = vld [vmem:[#allocation7 + $0x590] sm:$0xff] }
0x10cb   : > { %12386 = vmatprep.subr.bf16.mxu0 %v15780_v62 }
0x10ce   : > { %12388 = vmatpush1.bf16.msra.mxu0 %v15783_v44  ;;  %v5556_v44 = vld [vmem:[#allocation7 + $0x570] sm:$0xff] }
0x10cf   : > { %12390 = vmatprep.subr.bf16.mxu0 %v15786_v46 }
0x10d2   : > { %12392 = vmatpush1.bf16.msra.mxu0 %v15789_v31  ;;  %v5552_v31 = vld [vmem:[#allocation7 + $0x550] sm:$0xff] }
0x10d3   : > { %12394 = vmatprep.subr.bf16.mxu0 %v15792_v19 }
0x10d6   : > { %12396 = vmatpush1.bf16.msra.mxu0 %v15795_v21  ;;  %v5548_v21 = vld [vmem:[#allocation7 + $0x530] sm:$0xff] }
0x10d7   : > { %12398 = vmatprep.subr.bf16.mxu0 %v15798_v43 }
0x10da   : > { %12400 = vmatpush1.bf16.msra.mxu0 %v15801_v8  ;;  %v5544_v8 = vld [vmem:[#allocation7 + $0x510] sm:$0xff] }
0x10db   : > { %12402 = vmatprep.subr.bf16.mxu0 %v15804_v11 }
0x10de   : > { %12404 = vmatpush1.bf16.msra.mxu0 %v15807_v36  ;;  %v5540_v36 = vld [vmem:[#allocation7 + $0x4f0] sm:$0xff] }
0x10df   : > { %12406 = vmatprep.subr.bf16.mxu0 %v15810_v15 }
0x10e2   : > { %12408 = vmatpush1.bf16.msra.mxu0 %v15813_v23  ;;  %v5536_v23 = vld [vmem:[#allocation7 + $0x4d0] sm:$0xff] }
0x10e3   : > { %12410 = vmatprep.subr.bf16.mxu0 %v15816_v30 }
0x10e6   : > { %12412 = vmatpush1.bf16.msra.mxu0 %v15819_v6  ;;  %v5532_v6 = vld [vmem:[#allocation7 + $0x4b0] sm:$0xff] }
0x10e7   : > { %12414 = vmatprep.subr.bf16.mxu0 %v15822_v27 }
0x10ea   : > { %12416 = vmatpush1.bf16.msra.mxu0 %v15825_v12  ;;  %v5528_v12 = vld [vmem:[#allocation7 + $0x490] sm:$0xff] }
0x10eb   : > { %12418 = vmatprep.subr.bf16.mxu0 %v15828_v17 }
0x10ee   : > { %12420 = vmatpush1.bf16.msra.mxu0 %v15831_v29  ;;  %v5524_v29 = vld [vmem:[#allocation7 + $0x470] sm:$0xff] }
0x10ef   : > { %12422 = vmatprep.subr.bf16.mxu0 %v15834_v20 }
0x10f1   : > { %v5340_v55 = vpop.f32.mrb[36].mxu1 }
0x10f2   : > { %12424 = vmatpush1.bf16.msra.mxu0 %v15837_v1  ;;  %v5342_v56 = vpop.f32.mrb[37].mxu1  ;;  %v5520_v1 = vld [vmem:[#allocation7 + $0x450] sm:$0xff] }
0x10f3   : > { %12426 = vmatprep.subr.bf16.mxu0 %v15840_v37 }
0x10f6   : > { %12428 = vmatpush1.bf16.msra.mxu0 %v15843_v34  ;;  %v5514_v34 = vld [vmem:[#allocation7 + $0x420] sm:$0xff] }
0x10f7   : > { %12430 = vmatprep.subr.bf16.mxu0 %v15846_v51 }
0x10fa   : > { %12432 = vmatpush1.bf16.msra.mxu0 %v15849_v40  ;;  %v5517_v40 = vld [vmem:[#allocation7 + $0x438] sm:$0xff] }
0x10fb   : > { %11115 = vmatprep.subr.msk.mxu0 %vm4976_vm3, %v5342_v56  ;;  %v15912_v56 = vpack.c.bf16 %v5512_v32, %v5510_v24  ;;  %v15922_v24 = vpack.c.bf16 %v5521_v41, %v5519_v18  ;;  %v5518_v32 = vld [vmem:[#allocation7 + $0x440] sm:$0xff]  ;;  %v5527_v18 = vld [vmem:[#allocation7 + $0x488] sm:$0xff]  ;;  %v5529_v41 = vld [vmem:[#allocation7 + $0x498] sm:$0xff] }
0x10fc   : > { %v15924_v20 = vpack.c.bf16 %v5520_v1, %v5518_v32  ;;  %v15934_v1 = vpack.c.bf16 %v5529_v41, %v5527_v18  ;;  %v5526_v32 = vld [vmem:[#allocation7 + $0x480] sm:$0xff]  ;;  %v5535_v18 = vld [vmem:[#allocation7 + $0x4c8] sm:$0xff]  ;;  %v5537_v41 = vld [vmem:[#allocation7 + $0x4d8] sm:$0xff] }
0x10fd   : > { %5266 = vmatmul.mubr.f32.vlgmr.msra.gmra.mrb[34].mxu0 %v15743_v57  ;;  %18402 = vst [vmem:[#allocation62_spill] sm:$0xff] %v15912_v56  ;;  %12500 = vmatpush1.bf16.msra.mxu1 %v15912_v56  ;;  %18405 = vst [vmem:[#allocation65_spill] sm:$0xff] %v15922_v24  ;;  %v15936_v27 = vpack.c.bf16 %v5528_v12, %v5526_v32  ;;  %v15946_v12 = vpack.c.bf16 %v5537_v41, %v5535_v18  ;;  %v5534_v32 = vld [vmem:[#allocation7 + $0x4c0] sm:$0xff]  ;;  %v5543_v18 = vld [vmem:[#allocation7 + $0x508] sm:$0xff] }
0x10fe   : > { %11116 = vmatpush1.msk.msra.mxu0 %vm4976_vm3, %v5340_v55  ;;  %5420 = vmatprep.mubr.f32.mxu0 %v18400_v60  ;;  %v5515_v55 = vld [vmem:[#allocation7 + $0x428] sm:$0xff]  ;;  %18406 = vst [vmem:[#allocation66_spill] sm:$0xff] %v15924_v20  ;;  %18409 = vst [vmem:[#allocation69_spill] sm:$0xff] %v15934_v1  ;;  %v15948_v15 = vpack.c.bf16 %v5536_v23, %v5534_v32  ;;  %v5545_v41 = vld [vmem:[#allocation7 + $0x518] sm:$0xff] }
0x10ff   : > { %v15916_v51 = vpack.c.bf16 %v5517_v40, %v5515_v55  ;;  %v5523_v40 = vld [vmem:[#allocation7 + $0x468] sm:$0xff]  ;;  %v5525_v55 = vld [vmem:[#allocation7 + $0x478] sm:$0xff]  ;;  %18410 = vst [vmem:[#allocation70_spill] sm:$0xff] %v15936_v27  ;;  %18413 = vst [vmem:[#allocation73_spill] sm:$0xff] %v15946_v12  ;;  %v15958_v23 = vpack.c.bf16 %v5545_v41, %v5543_v18 }
0x1100   : > { %18414 = vst [vmem:[#allocation74_spill] sm:$0xff] %v15948_v15  ;;  %v5542_v32 = vld [vmem:[#allocation7 + $0x500] sm:$0xff]  ;;  %v5551_v18 = vld [vmem:[#allocation7 + $0x548] sm:$0xff]  ;;  %v5553_v41 = vld [vmem:[#allocation7 + $0x558] sm:$0xff] }
0x1101   : > { %11117 = vmatmul.mubr.msk.f32.vlgmr.msra.gmra.mrb[32].mxu0 %vm4972_vm4, %v11114_v4  ;;  %18403 = vst [vmem:[#allocation63_spill] sm:$0xff] %v15916_v51  ;;  %v5516_v4 = vld [vmem:[#allocation7 + $0x430] sm:$0xff]  ;;  %12502 = vmatprep.subr.bf16.mxu1 %v15916_v51  ;;  %18417 = vst [vmem:[#allocation77_spill] sm:$0xff] %v15958_v23  ;;  %v15960_v43 = vpack.c.bf16 %v5544_v8, %v5542_v32  ;;  %v15970_v8 = vpack.c.bf16 %v5553_v41, %v5551_v18  ;;  %v5550_v32 = vld [vmem:[#allocation7 + $0x540] sm:$0xff] }
0x1102   : > { %5500 = vmatprep.mubr.f32.mxu0 %v18400_v60  ;;  %v15918_v37 = vpack.c.bf16 %v5516_v4, %v5514_v34  ;;  %v15928_v34 = vpack.c.bf16 %v5525_v55, %v5523_v40  ;;  %v5522_v4 = vld [vmem:[#allocation7 + $0x460] sm:$0xff]  ;;  %v5531_v40 = vld [vmem:[#allocation7 + $0x4a8] sm:$0xff]  ;;  %v5533_v55 = vld [vmem:[#allocation7 + $0x4b8] sm:$0xff]  ;;  %v15972_v46 = vpack.c.bf16 %v5552_v31, %v5550_v32 }
0x1103   : > { %v15930_v17 = vpack.c.bf16 %v5524_v29, %v5522_v4  ;;  %v15940_v29 = vpack.c.bf16 %v5533_v55, %v5531_v40  ;;  %v5530_v4 = vld [vmem:[#allocation7 + $0x4a0] sm:$0xff]  ;;  %v5539_v40 = vld [vmem:[#allocation7 + $0x4e8] sm:$0xff]  ;;  %v5541_v55 = vld [vmem:[#allocation7 + $0x4f8] sm:$0xff]  ;;  %18418 = vst [vmem:[#allocation78_spill] sm:$0xff] %v15960_v43 }
0x1104   : > { %18404 = vst [vmem:[#allocation64_spill] sm:$0xff] %v15918_v37  ;;  %12504 = vmatpush1.bf16.msra.mxu1 %v15918_v37  ;;  %18407 = vst [vmem:[#allocation67_spill] sm:$0xff] %v15928_v34  ;;  %v15942_v30 = vpack.c.bf16 %v5532_v6, %v5530_v4  ;;  %v15952_v6 = vpack.c.bf16 %v5541_v55, %v5539_v40  ;;  %v5538_v4 = vld [vmem:[#allocation7 + $0x4e0] sm:$0xff]  ;;  %v5547_v40 = vld [vmem:[#allocation7 + $0x528] sm:$0xff] }
0x1105   : > { %12506 = vmatprep.subr.bf16.mxu1 %v15922_v24  ;;  %18408 = vst [vmem:[#allocation68_spill] sm:$0xff] %v15930_v17  ;;  %18411 = vst [vmem:[#allocation71_spill] sm:$0xff] %v15940_v29  ;;  %v15954_v11 = vpack.c.bf16 %v5540_v36, %v5538_v4  ;;  %v5549_v55 = vld [vmem:[#allocation7 + $0x538] sm:$0xff]  ;;  %v5546_v4 = vld [vmem:[#allocation7 + $0x520] sm:$0xff] }
0x1106   : > { %18412 = vst [vmem:[#allocation72_spill] sm:$0xff] %v15942_v30  ;;  %18415 = vst [vmem:[#allocation75_spill] sm:$0xff] %v15952_v6  ;;  %v15964_v36 = vpack.c.bf16 %v5549_v55, %v5547_v40  ;;  %v15966_v19 = vpack.c.bf16 %v5548_v21, %v5546_v4  ;;  %v5555_v40 = vld [vmem:[#allocation7 + $0x568] sm:$0xff]  ;;  %v5557_v55 = vld [vmem:[#allocation7 + $0x578] sm:$0xff] }
0x1107   : > { %18416 = vst [vmem:[#allocation76_spill] sm:$0xff] %v15954_v11  ;;  %18421 = vst [vmem:[#allocation81_spill] sm:$0xff] %v15970_v8  ;;  %v15976_v21 = vpack.c.bf16 %v5557_v55, %v5555_v40  ;;  %v5554_v4 = vld [vmem:[#allocation7 + $0x560] sm:$0xff]  ;;  %v5559_v18 = vld [vmem:[#allocation7 + $0x588] sm:$0xff] }
0x1108   : > { %12508 = vmatpush1.bf16.msra.mxu1 %v15924_v20  ;;  %18419 = vst [vmem:[#allocation79_spill] sm:$0xff] %v15964_v36  ;;  %18420 = vst [vmem:[#allocation80_spill] sm:$0xff] %v15966_v19  ;;  %v15978_v62 = vpack.c.bf16 %v5556_v44, %v5554_v4  ;;  %v5561_v41 = vld [vmem:[#allocation7 + $0x598] sm:$0xff]  ;;  %v5558_v32 = vld [vmem:[#allocation7 + $0x580] sm:$0xff] }
0x1109   : > { %12510 = vmatprep.subr.bf16.mxu1 %v15928_v34  ;;  %18422 = vst [vmem:[#allocation82_spill] sm:$0xff] %v15972_v46  ;;  %18423 = vst [vmem:[#allocation83_spill] sm:$0xff] %v15976_v21  ;;  %v15982_v31 = vpack.c.bf16 %v5561_v41, %v5559_v18  ;;  %v15984_v54 = vpack.c.bf16 %v5560_v0, %v5558_v32  ;;  %v5563_v40 = vld [vmem:[#allocation7 + $0x5a8] sm:$0xff]  ;;  %v5565_v55 = vld [vmem:[#allocation7 + $0x5b8] sm:$0xff] }
0x110a   : > { %18424 = vst [vmem:[#allocation84_spill] sm:$0xff] %v15978_v62  ;;  %v15988_v44 = vpack.c.bf16 %v5565_v55, %v5563_v40  ;;  %v5562_v4 = vld [vmem:[#allocation7 + $0x5a0] sm:$0xff]  ;;  %v5567_v18 = vld [vmem:[#allocation7 + $0x5c8] sm:$0xff]  ;;  %v5569_v41 = vld [vmem:[#allocation7 + $0x5d8] sm:$0xff] }
0x110b   : > { %18425 = vst [vmem:[#allocation85_spill] sm:$0xff] %v15982_v31  ;;  %18426 = vst [vmem:[#allocation86_spill] sm:$0xff] %v15984_v54  ;;  %v15990_v28 = vpack.c.bf16 %v5564_v48, %v5562_v4  ;;  %v15994_v0 = vpack.c.bf16 %v5569_v41, %v5567_v18  ;;  %v5566_v32 = vld [vmem:[#allocation7 + $0x5c0] sm:$0xff]  ;;  %v5571_v40 = vld [vmem:[#allocation7 + $0x5e8] sm:$0xff] }
0x110c   : > { %12512 = vmatpush1.bf16.msra.mxu1 %v15930_v17  ;;  %18427 = vst [vmem:[#allocation87_spill] sm:$0xff] %v15988_v44  ;;  %v15996_v3 = vpack.c.bf16 %v5568_v25, %v5566_v32  ;;  %v5573_v55 = vld [vmem:[#allocation7 + $0x5f8] sm:$0xff]  ;;  %v5570_v4 = vld [vmem:[#allocation7 + $0x5e0] sm:$0xff] }
0x110d   : > { %12514 = vmatprep.subr.bf16.mxu1 %v15934_v1  ;;  %18428 = vst [vmem:[#allocation88_spill] sm:$0xff] %v15990_v28  ;;  %18429 = vst [vmem:[#allocation89_spill] sm:$0xff] %v15994_v0  ;;  %v16000_v48 = vpack.c.bf16 %v5573_v55, %v5571_v40  ;;  %v16002_v45 = vpack.c.bf16 %v5572_v52, %v5570_v4  ;;  %v11113_v41 = vld [vmem:[%s17791_s6 + $0x8] sm:$0xff]  ;;  %v5886_v55 = vld [vmem:[#allocation7 + $0x618] sm:$0xff] }
0x110e   : > { %18430 = vst [vmem:[#allocation90_spill] sm:$0xff] %v15996_v3  ;;  %v5884_v40 = vld [vmem:[#allocation7 + $0x608] sm:$0xff] }
0x110f   : > { %18431 = vst [vmem:[#allocation91_spill] sm:$0xff] %v16000_v48  ;;  %18432 = vst [vmem:[#allocation92_spill] sm:$0xff] %v16002_v45  ;;  %v16053_v4 = vpack.c.bf16 %v5886_v55, %v5884_v40  ;;  %v5892_v40 = vld [vmem:[#allocation7 + $0x648] sm:$0xff]  ;;  %v5894_v55 = vld [vmem:[#allocation7 + $0x658] sm:$0xff] }
0x1110   : > { %12516 = vmatpush1.bf16.msra.mxu1 %v15936_v27 }
0x1111   : > { %12518 = vmatprep.subr.bf16.mxu1 %v15940_v29  ;;  %18433 = vst [vmem:[#allocation93_spill] sm:$0xff] %v16053_v4 }
0x1114   : > { %12520 = vmatpush1.bf16.msra.mxu1 %v15942_v30 }
0x1115   : > { %12522 = vmatprep.subr.bf16.mxu1 %v15946_v12 }
0x1118   : > { %12524 = vmatpush1.bf16.msra.mxu1 %v15948_v15 }
0x1119   : > { %12526 = vmatprep.subr.bf16.mxu1 %v15952_v6 }
0x111c   : > { %12528 = vmatpush1.bf16.msra.mxu1 %v15954_v11 }
0x111d   : > { %12530 = vmatprep.subr.bf16.mxu1 %v15958_v23 }
0x1120   : > { %12532 = vmatpush1.bf16.msra.mxu1 %v15960_v43 }
0x1121   : > { %12534 = vmatprep.subr.bf16.mxu1 %v15964_v36 }
0x1124   : > { %12536 = vmatpush1.bf16.msra.mxu1 %v15966_v19 }
0x1125   : > { %12538 = vmatprep.subr.bf16.mxu1 %v15970_v8 }
0x1128   : > { %12540 = vmatpush1.bf16.msra.mxu1 %v15972_v46 }
0x1129   : > { %12542 = vmatprep.subr.bf16.mxu1 %v15976_v21 }
0x112c   : > { %12544 = vmatpush1.bf16.msra.mxu1 %v15978_v62 }
0x112d   : > { %12546 = vmatprep.subr.bf16.mxu1 %v15982_v31 }
0x1130   : > { %12548 = vmatpush1.bf16.msra.mxu1 %v15984_v54 }
0x1131   : > { %12550 = vmatprep.subr.bf16.mxu1 %v15988_v44 }
0x1134   : > { %12552 = vmatpush1.bf16.msra.mxu1 %v15990_v28 }
0x1135   : > { %12554 = vmatprep.subr.bf16.mxu1 %v15994_v0 }
0x1138   : > { %12556 = vmatpush1.bf16.msra.mxu1 %v15996_v3 }
0x1139   : > { %12558 = vmatprep.subr.bf16.mxu1 %v16000_v48 }
0x113c   : > { %12560 = vmatpush1.bf16.msra.mxu1 %v16002_v45 }
0x113d   : > { %12626 = vmatprep.subr.bf16.mxu1 %v16053_v4 }
0x113f   : > { %5639 = vmatmul.mubr.f32.vlgmr.msra.gmra.mrb[38].mxu1 %v15743_v57 }
0x1140   : > { %6011 = vmatprep.mubr.f32.mxu1 %v15748_v39 }
0x11d0   : > { %v5267_v25 = vpop.f32.mrb[34].mxu0 }
0x11d1   : > { %v5269_v18 = vpop.f32.mrb[35].mxu0 }
0x11d2   : > { %11118 = vmatprep.subr.msk.mxu0 %vm4976_vm3, %v5269_v18  ;;  %v5885_v18 = vld [vmem:[#allocation7 + $0x610] sm:$0xff] }
0x11d3   : > { %11119 = vmatpush1.msk.msra.mxu0 %vm4976_vm3, %v5267_v25  ;;  %v5883_v25 = vld [vmem:[#allocation7 + $0x600] sm:$0xff] }
0x11d4   : > { %11120 = vmatmul.mubr.msk.f32.vlgmr.msra.gmra.mrb[32].mxu0 %vm4972_vm4, %v11113_v41  ;;  %12562 = vmatprep.subr.bf16.mxu0 %v15910_v22  ;;  %v16056_v41 = vpack.c.bf16 %v5885_v18, %v5883_v25  ;;  %v5891_v25 = vld [vmem:[#allocation7 + $0x640] sm:$0xff]  ;;  %v5893_v18 = vld [vmem:[#allocation7 + $0x650] sm:$0xff] }
0x11d5   : > { %12564 = vmatpush1.bf16.msra.mxu0 %v15912_v56  ;;  %5711 = vmatprep.mubr.f32.mxu0 %v15753_v50  ;;  %v5941_v56 = vld [vmem:[#allocation7 + $0x7d0] sm:$0xff] }
0x11d6   : > { %12566 = vmatprep.subr.bf16.mxu0 %v15916_v51  ;;  %18434 = vst [vmem:[#allocation94_spill] sm:$0xff] %v16056_v41  ;;  %12628 = vmatpush1.bf16.msra.mxu1 %v16056_v41 }
0x11d9   : > { %12568 = vmatpush1.bf16.msra.mxu0 %v15918_v37  ;;  %v5937_v37 = vld [vmem:[#allocation7 + $0x7b0] sm:$0xff] }
0x11da   : > { %12570 = vmatprep.subr.bf16.mxu0 %v15922_v24 }
0x11dd   : > { %12572 = vmatpush1.bf16.msra.mxu0 %v15924_v20  ;;  %v5933_v20 = vld [vmem:[#allocation7 + $0x790] sm:$0xff] }
0x11de   : > { %12574 = vmatprep.subr.bf16.mxu0 %v15928_v34 }
0x11e1   : > { %12576 = vmatpush1.bf16.msra.mxu0 %v15930_v17  ;;  %v5929_v17 = vld [vmem:[#allocation7 + $0x770] sm:$0xff] }
0x11e2   : > { %12578 = vmatprep.subr.bf16.mxu0 %v15934_v1 }
0x11e5   : > { %12580 = vmatpush1.bf16.msra.mxu0 %v15936_v27  ;;  %v5925_v27 = vld [vmem:[#allocation7 + $0x750] sm:$0xff] }
0x11e6   : > { %12582 = vmatprep.subr.bf16.mxu0 %v15940_v29 }
0x11e9   : > { %12584 = vmatpush1.bf16.msra.mxu0 %v15942_v30  ;;  %v5921_v30 = vld [vmem:[#allocation7 + $0x730] sm:$0xff] }
0x11ea   : > { %12586 = vmatprep.subr.bf16.mxu0 %v15946_v12 }
0x11ed   : > { %12588 = vmatpush1.bf16.msra.mxu0 %v15948_v15  ;;  %v5917_v15 = vld [vmem:[#allocation7 + $0x710] sm:$0xff] }
0x11ee   : > { %12590 = vmatprep.subr.bf16.mxu0 %v15952_v6 }
0x11f1   : > { %12592 = vmatpush1.bf16.msra.mxu0 %v15954_v11  ;;  %v5913_v11 = vld [vmem:[#allocation7 + $0x6f0] sm:$0xff] }
0x11f2   : > { %12594 = vmatprep.subr.bf16.mxu0 %v15958_v23 }
0x11f5   : > { %12596 = vmatpush1.bf16.msra.mxu0 %v15960_v43  ;;  %v5909_v43 = vld [vmem:[#allocation7 + $0x6d0] sm:$0xff] }
0x11f6   : > { %12598 = vmatprep.subr.bf16.mxu0 %v15964_v36 }
0x11f9   : > { %12600 = vmatpush1.bf16.msra.mxu0 %v15966_v19  ;;  %v5905_v19 = vld [vmem:[#allocation7 + $0x6b0] sm:$0xff] }
0x11fa   : > { %12602 = vmatprep.subr.bf16.mxu0 %v15970_v8 }
0x11fd   : > { %12604 = vmatpush1.bf16.msra.mxu0 %v15972_v46  ;;  %v5901_v46 = vld [vmem:[#allocation7 + $0x690] sm:$0xff] }
0x11fe   : > { %12606 = vmatprep.subr.bf16.mxu0 %v15976_v21 }
0x1201   : > { %12608 = vmatpush1.bf16.msra.mxu0 %v15978_v62  ;;  %v5897_v62 = vld [vmem:[#allocation7 + $0x670] sm:$0xff] }
0x1202   : > { %12610 = vmatprep.subr.bf16.mxu0 %v15982_v31  ;;  %v16067_v31 = vpack.c.bf16 %v5893_v18, %v5891_v25  ;;  %v5899_v18 = vld [vmem:[#allocation7 + $0x680] sm:$0xff] }
0x1203   : > { %v16079_v8 = vpack.c.bf16 %v5901_v46, %v5899_v18  ;;  %v5907_v18 = vld [vmem:[#allocation7 + $0x6c0] sm:$0xff] }
0x1204   : > { %18438 = vst [vmem:[#allocation98_spill] sm:$0xff] %v16067_v31  ;;  %v16091_v23 = vpack.c.bf16 %v5909_v43, %v5907_v18  ;;  %v5915_v18 = vld [vmem:[#allocation7 + $0x700] sm:$0xff] }
0x1205   : > { %12612 = vmatpush1.bf16.msra.mxu0 %v15984_v54  ;;  %v16065_v54 = vpack.c.bf16 %v5894_v55, %v5892_v40  ;;  %v5900_v40 = vld [vmem:[#allocation7 + $0x688] sm:$0xff]  ;;  %v5902_v55 = vld [vmem:[#allocation7 + $0x698] sm:$0xff]  ;;  %18442 = vst [vmem:[#allocation102_spill] sm:$0xff] %v16079_v8  ;;  %v16103_v12 = vpack.c.bf16 %v5917_v15, %v5915_v18  ;;  %v5923_v18 = vld [vmem:[#allocation7 + $0x740] sm:$0xff] }
0x1206   : > { %12614 = vmatprep.subr.bf16.mxu0 %v15988_v44  ;;  %v16077_v25 = vpack.c.bf16 %v5902_v55, %v5900_v40  ;;  %v5908_v40 = vld [vmem:[#allocation7 + $0x6c8] sm:$0xff]  ;;  %v5910_v55 = vld [vmem:[#allocation7 + $0x6d8] sm:$0xff]  ;;  %18446 = vst [vmem:[#allocation106_spill] sm:$0xff] %v16091_v23  ;;  %v16115_v1 = vpack.c.bf16 %v5925_v27, %v5923_v18  ;;  %v5931_v18 = vld [vmem:[#allocation7 + $0x780] sm:$0xff] }
0x1207   : > { %18437 = vst [vmem:[#allocation97_spill] sm:$0xff] %v16065_v54  ;;  %v16089_v46 = vpack.c.bf16 %v5910_v55, %v5908_v40  ;;  %v5916_v40 = vld [vmem:[#allocation7 + $0x708] sm:$0xff]  ;;  %v5918_v55 = vld [vmem:[#allocation7 + $0x718] sm:$0xff]  ;;  %18450 = vst [vmem:[#allocation110_spill] sm:$0xff] %v16103_v12  ;;  %v16127_v24 = vpack.c.bf16 %v5933_v20, %v5931_v18 }
0x1208   : > { %18441 = vst [vmem:[#allocation101_spill] sm:$0xff] %v16077_v25  ;;  %v16101_v43 = vpack.c.bf16 %v5918_v55, %v5916_v40  ;;  %v5924_v40 = vld [vmem:[#allocation7 + $0x748] sm:$0xff]  ;;  %v5926_v55 = vld [vmem:[#allocation7 + $0x758] sm:$0xff]  ;;  %18454 = vst [vmem:[#allocation114_spill] sm:$0xff] %v16115_v1 }
0x1209   : > { %12616 = vmatpush1.bf16.msra.mxu0 %v15990_v28  ;;  %v5889_v28 = vld [vmem:[#allocation7 + $0x630] sm:$0xff]  ;;  %18445 = vst [vmem:[#allocation105_spill] sm:$0xff] %v16089_v46  ;;  %v16113_v15 = vpack.c.bf16 %v5926_v55, %v5924_v40  ;;  %v5932_v40 = vld [vmem:[#allocation7 + $0x788] sm:$0xff]  ;;  %v5934_v55 = vld [vmem:[#allocation7 + $0x798] sm:$0xff] }
0x120a   : > { %12618 = vmatprep.subr.bf16.mxu0 %v15994_v0  ;;  %v5887_v0 = vld [vmem:[#allocation7 + $0x620] sm:$0xff]  ;;  %18449 = vst [vmem:[#allocation109_spill] sm:$0xff] %v16101_v43  ;;  %v16125_v27 = vpack.c.bf16 %v5934_v55, %v5932_v40  ;;  %18458 = vst [vmem:[#allocation118_spill] sm:$0xff] %v16127_v24  ;;  %v5940_v40 = vld [vmem:[#allocation7 + $0x7c8] sm:$0xff] }
0x120b   : > { %v16061_v44 = vpack.c.bf16 %v5889_v28, %v5887_v0  ;;  %v5895_v0 = vld [vmem:[#allocation7 + $0x660] sm:$0xff]  ;;  %18453 = vst [vmem:[#allocation113_spill] sm:$0xff] %v16113_v15  ;;  %v5942_v55 = vld [vmem:[#allocation7 + $0x7d8] sm:$0xff] }
0x120c   : > { %v16073_v21 = vpack.c.bf16 %v5897_v62, %v5895_v0  ;;  %v5903_v0 = vld [vmem:[#allocation7 + $0x6a0] sm:$0xff]  ;;  %18457 = vst [vmem:[#allocation117_spill] sm:$0xff] %v16125_v27  ;;  %v16137_v20 = vpack.c.bf16 %v5942_v55, %v5940_v40  ;;  %v11122_v55 = vld [vmem:[%s17792_s7 + $0x10] sm:$0xff] }
0x120d   : > { %12620 = vmatpush1.bf16.msra.mxu0 %v15996_v3  ;;  %18436 = vst [vmem:[#allocation96_spill] sm:$0xff] %v16061_v44  ;;  %v16085_v36 = vpack.c.bf16 %v5905_v19, %v5903_v0  ;;  %v5911_v0 = vld [vmem:[#allocation7 + $0x6e0] sm:$0xff] }
0x120e   : > { %12622 = vmatprep.subr.bf16.mxu0 %v16000_v48  ;;  %v5890_v48 = vld [vmem:[#allocation7 + $0x638] sm:$0xff]  ;;  %18440 = vst [vmem:[#allocation100_spill] sm:$0xff] %v16073_v21  ;;  %v16097_v6 = vpack.c.bf16 %v5913_v11, %v5911_v0  ;;  %v5919_v0 = vld [vmem:[#allocation7 + $0x720] sm:$0xff]  ;;  %18461 = vst [vmem:[#allocation121_spill] sm:$0xff] %v16137_v20 }
0x120f   : > { %18444 = vst [vmem:[#allocation104_spill] sm:$0xff] %v16085_v36  ;;  %v16109_v29 = vpack.c.bf16 %v5921_v30, %v5919_v0  ;;  %v5927_v0 = vld [vmem:[#allocation7 + $0x760] sm:$0xff] }
0x1210   : > { %18448 = vst [vmem:[#allocation108_spill] sm:$0xff] %v16097_v6  ;;  %v16121_v34 = vpack.c.bf16 %v5929_v17, %v5927_v0  ;;  %v5935_v0 = vld [vmem:[#allocation7 + $0x7a0] sm:$0xff] }
0x1211   : > { %12624 = vmatpush1.bf16.msra.mxu0 %v16002_v45  ;;  %v5888_v45 = vld [vmem:[#allocation7 + $0x628] sm:$0xff]  ;;  %18452 = vst [vmem:[#allocation112_spill] sm:$0xff] %v16109_v29  ;;  %v16133_v51 = vpack.c.bf16 %v5937_v37, %v5935_v0  ;;  %v5939_v18 = vld [vmem:[#allocation7 + $0x7c0] sm:$0xff] }
0x1212   : > { %v16049_v52 = vpop.f32.mrb[38].mxu1  ;;  %v16059_v3 = vpack.c.bf16 %v5890_v48, %v5888_v45  ;;  %v5896_v45 = vld [vmem:[#allocation7 + $0x668] sm:$0xff]  ;;  %v5898_v48 = vld [vmem:[#allocation7 + $0x678] sm:$0xff]  ;;  %18456 = vst [vmem:[#allocation116_spill] sm:$0xff] %v16121_v34  ;;  %v16139_v22 = vpack.c.bf16 %v5941_v56, %v5939_v18  ;;  %v5943_v0 = vld [vmem:[#allocation7 + $0x7e0] sm:$0xff] }
0x1213   : > { %v16051_v32 = vpop.f32.mrb[39].mxu1  ;;  %v16071_v28 = vpack.c.bf16 %v5898_v48, %v5896_v45  ;;  %v5904_v45 = vld [vmem:[#allocation7 + $0x6a8] sm:$0xff]  ;;  %v5906_v48 = vld [vmem:[#allocation7 + $0x6b8] sm:$0xff]  ;;  %18460 = vst [vmem:[#allocation120_spill] sm:$0xff] %v16133_v51  ;;  %v16145_v42 = vpack.c.bf16 %v5945_v9, %v5943_v0  ;;  %v6258_v0 = vld [vmem:[#allocation7 + $0x810] sm:$0xff] }
0x1214   : > { %5712 = vmatmul.mubr.f32.vlgmr.msra.gmra.mrb[36].mxu0 %v15757_v2  ;;  %18435 = vst [vmem:[#allocation95_spill] sm:$0xff] %v16059_v3  ;;  %12630 = vmatprep.subr.bf16.mxu1 %v16059_v3  ;;  %v16083_v62 = vpack.c.bf16 %v5906_v48, %v5904_v45  ;;  %v5912_v45 = vld [vmem:[#allocation7 + $0x6e8] sm:$0xff]  ;;  %v5914_v48 = vld [vmem:[#allocation7 + $0x6f8] sm:$0xff]  ;;  %18462 = vst [vmem:[#allocation122_spill] sm:$0xff] %v16139_v22 }
0x1215   : > { %5793 = vmatprep.mubr.f32.mxu0 %v18400_v60  ;;  %12632 = vmatpush1.bf16.msra.mxu1 %v16061_v44  ;;  %18439 = vst [vmem:[#allocation99_spill] sm:$0xff] %v16071_v28  ;;  %v16095_v19 = vpack.c.bf16 %v5914_v48, %v5912_v45  ;;  %v5920_v45 = vld [vmem:[#allocation7 + $0x728] sm:$0xff]  ;;  %v5922_v48 = vld [vmem:[#allocation7 + $0x738] sm:$0xff]  ;;  %18464 = vst [vmem:[#allocation124_spill] sm:$0xff] %v16145_v42 }
0x1216   : > { %12634 = vmatprep.subr.bf16.mxu1 %v16065_v54  ;;  %18443 = vst [vmem:[#allocation103_spill] sm:$0xff] %v16083_v62  ;;  %v16107_v11 = vpack.c.bf16 %v5922_v48, %v5920_v45  ;;  %v5928_v45 = vld [vmem:[#allocation7 + $0x768] sm:$0xff]  ;;  %v5930_v48 = vld [vmem:[#allocation7 + $0x778] sm:$0xff] }
0x1217   : > { %18447 = vst [vmem:[#allocation107_spill] sm:$0xff] %v16095_v19  ;;  %v16119_v30 = vpack.c.bf16 %v5930_v48, %v5928_v45  ;;  %v5936_v45 = vld [vmem:[#allocation7 + $0x7a8] sm:$0xff]  ;;  %v5938_v48 = vld [vmem:[#allocation7 + $0x7b8] sm:$0xff] }
0x1218   : > { %18451 = vst [vmem:[#allocation111_spill] sm:$0xff] %v16107_v11  ;;  %v16131_v17 = vpack.c.bf16 %v5938_v48, %v5936_v45  ;;  %v5944_v45 = vld [vmem:[#allocation7 + $0x7e8] sm:$0xff]  ;;  %v5946_v48 = vld [vmem:[#allocation7 + $0x7f8] sm:$0xff] }
0x1219   : > { %12636 = vmatpush1.bf16.msra.mxu1 %v16067_v31  ;;  %18455 = vst [vmem:[#allocation115_spill] sm:$0xff] %v16119_v30  ;;  %v16143_v37 = vpack.c.bf16 %v5946_v48, %v5944_v45  ;;  %v11121_v9 = vld [vmem:[%s17791_s6 + $0x10] sm:$0xff]  ;;  %v6259_v18 = vld [vmem:[#allocation7 + $0x818] sm:$0xff]  ;;  %v6256_v48 = vld [vmem:[#allocation7 + $0x800] sm:$0xff] }
0x121a   : > { %12638 = vmatprep.subr.bf16.mxu1 %v16071_v28  ;;  %18459 = vst [vmem:[#allocation119_spill] sm:$0xff] %v16131_v17 }
0x121b   : > { %18463 = vst [vmem:[#allocation123_spill] sm:$0xff] %v16143_v37 }
0x121d   : > { %12640 = vmatpush1.bf16.msra.mxu1 %v16073_v21 }
0x121e   : > { %12642 = vmatprep.subr.bf16.mxu1 %v16077_v25 }
0x1221   : > { %12644 = vmatpush1.bf16.msra.mxu1 %v16079_v8 }
0x1222   : > { %12646 = vmatprep.subr.bf16.mxu1 %v16083_v62 }
0x1225   : > { %12648 = vmatpush1.bf16.msra.mxu1 %v16085_v36 }
0x1226   : > { %12650 = vmatprep.subr.bf16.mxu1 %v16089_v46 }
0x1229   : > { %12652 = vmatpush1.bf16.msra.mxu1 %v16091_v23 }
0x122a   : > { %12654 = vmatprep.subr.bf16.mxu1 %v16095_v19 }
0x122d   : > { %12656 = vmatpush1.bf16.msra.mxu1 %v16097_v6 }
0x122e   : > { %12658 = vmatprep.subr.bf16.mxu1 %v16101_v43 }
0x1231   : > { %12660 = vmatpush1.bf16.msra.mxu1 %v16103_v12 }
0x1232   : > { %12662 = vmatprep.subr.bf16.mxu1 %v16107_v11 }
0x1235   : > { %12664 = vmatpush1.bf16.msra.mxu1 %v16109_v29 }
0x1236   : > { %12666 = vmatprep.subr.bf16.mxu1 %v16113_v15 }
0x1239   : > { %12668 = vmatpush1.bf16.msra.mxu1 %v16115_v1 }
0x123a   : > { %12670 = vmatprep.subr.bf16.mxu1 %v16119_v30 }
0x123d   : > { %12672 = vmatpush1.bf16.msra.mxu1 %v16121_v34 }
0x123e   : > { %12674 = vmatprep.subr.bf16.mxu1 %v16125_v27 }
0x1241   : > { %12676 = vmatpush1.bf16.msra.mxu1 %v16127_v24 }
0x1242   : > { %12678 = vmatprep.subr.bf16.mxu1 %v16131_v17 }
0x1245   : > { %12680 = vmatpush1.bf16.msra.mxu1 %v16133_v51 }
0x1246   : > { %12682 = vmatprep.subr.bf16.mxu1 %v16137_v20 }
0x1249   : > { %12684 = vmatpush1.bf16.msra.mxu1 %v16139_v22 }
0x124a   : > { %12686 = vmatprep.subr.bf16.mxu1 %v16143_v37 }
0x124d   : > { %12688 = vmatpush1.bf16.msra.mxu1 %v16145_v42 }
0x1250   : > { %6012 = vmatmul.mubr.f32.vlgmr.msra.gmra.mrb[40].mxu1 %v15743_v57 }
0x1251   : > { %6384 = vmatprep.mubr.f32.mxu1 %v15748_v39 }
0x12e7   : > { %v5713_v56 = vpop.f32.mrb[36].mxu0 }
0x12e8   : > { %v5715_v40 = vpop.f32.mrb[37].mxu0 }
0x12e9   : > { %11123 = vmatprep.subr.msk.mxu0 %vm4976_vm3, %v5715_v40  ;;  %v6261_v40 = vld [vmem:[#allocation7 + $0x828] sm:$0xff] }
0x12ea   : > { %11124 = vmatpush1.msk.msra.mxu0 %vm4976_vm3, %v5713_v56  ;;  %v16208_v56 = vpack.c.bf16 %v6258_v0, %v6256_v48  ;;  %v6264_v48 = vld [vmem:[#allocation7 + $0x840] sm:$0xff]  ;;  %v6266_v0 = vld [vmem:[#allocation7 + $0x850] sm:$0xff] }
0x12eb   : > { %11125 = vmatmul.mubr.msk.f32.vlgmr.msra.gmra.mrb[32].mxu0 %vm4972_vm4, %v11122_v55  ;;  %11126 = vmatprep.subr.msk.mxu0 %vm4976_vm3, %v16051_v32  ;;  %v6257_v32 = vld [vmem:[#allocation7 + $0x808] sm:$0xff]  ;;  %v6263_v55 = vld [vmem:[#allocation7 + $0x838] sm:$0xff] }
0x12ec   : > { %11127 = vmatpush1.msk.msra.mxu0 %vm4976_vm3, %v16049_v52  ;;  %5873 = vmatprep.mubr.f32.mxu0 %v18400_v60  ;;  %v16205_v45 = vpack.c.bf16 %v6259_v18, %v6257_v32  ;;  %18466 = vst [vmem:[#allocation126_spill] sm:$0xff] %v16208_v56  ;;  %v6265_v32 = vld [vmem:[#allocation7 + $0x848] sm:$0xff]  ;;  %v6267_v18 = vld [vmem:[#allocation7 + $0x858] sm:$0xff] }
0x12ed   : > { %12690 = vmatprep.subr.bf16.mxu0 %v16053_v4 }
0x12ee   : > { %18465 = vst [vmem:[#allocation125_spill] sm:$0xff] %v16205_v45  ;;  %12754 = vmatprep.subr.bf16.mxu1 %v16205_v45 }
0x12ef   : > { %12756 = vmatpush1.bf16.msra.mxu1 %v16208_v56 }
0x12f3   : > { %11128 = vmatmul.mubr.msk.f32.vlgmr.msra.gmra.mrb[32].mxu0 %vm4972_vm4, %v11121_v9  ;;  %v16211_v9 = vpack.c.bf16 %v6263_v55, %v6261_v40  ;;  %v6269_v40 = vld [vmem:[#allocation7 + $0x868] sm:$0xff]  ;;  %v6271_v55 = vld [vmem:[#allocation7 + $0x878] sm:$0xff] }
0x12f4   : > { %12692 = vmatpush1.bf16.msra.mxu0 %v16056_v41  ;;  %6084 = vmatprep.mubr.f32.mxu0 %v15753_v50 }
0x12f5   : > { %12694 = vmatprep.subr.bf16.mxu0 %v16059_v3  ;;  %18467 = vst [vmem:[#allocation127_spill] sm:$0xff] %v16211_v9  ;;  %12758 = vmatprep.subr.bf16.mxu1 %v16211_v9  ;;  %v6318_v3 = vld [vmem:[#allocation7 + $0x9f0] sm:$0xff] }
0x12f8   : > { %12696 = vmatpush1.bf16.msra.mxu0 %v16061_v44 }
0x12f9   : > { %12698 = vmatprep.subr.bf16.mxu0 %v16065_v54  ;;  %v6314_v54 = vld [vmem:[#allocation7 + $0x9d0] sm:$0xff] }
0x12fc   : > { %12700 = vmatpush1.bf16.msra.mxu0 %v16067_v31 }
0x12fd   : > { %12702 = vmatprep.subr.bf16.mxu0 %v16071_v28  ;;  %v6310_v28 = vld [vmem:[#allocation7 + $0x9b0] sm:$0xff] }
0x1300   : > { %12704 = vmatpush1.bf16.msra.mxu0 %v16073_v21 }
0x1301   : > { %12706 = vmatprep.subr.bf16.mxu0 %v16077_v25  ;;  %v6306_v25 = vld [vmem:[#allocation7 + $0x990] sm:$0xff] }
0x1304   : > { %12708 = vmatpush1.bf16.msra.mxu0 %v16079_v8 }
0x1305   : > { %12710 = vmatprep.subr.bf16.mxu0 %v16083_v62  ;;  %v6302_v62 = vld [vmem:[#allocation7 + $0x970] sm:$0xff] }
0x1308   : > { %12712 = vmatpush1.bf16.msra.mxu0 %v16085_v36 }
0x1309   : > { %12714 = vmatprep.subr.bf16.mxu0 %v16089_v46  ;;  %v6298_v46 = vld [vmem:[#allocation7 + $0x950] sm:$0xff] }
0x130c   : > { %12716 = vmatpush1.bf16.msra.mxu0 %v16091_v23 }
0x130d   : > { %12718 = vmatprep.subr.bf16.mxu0 %v16095_v19  ;;  %v6294_v19 = vld [vmem:[#allocation7 + $0x930] sm:$0xff] }
0x1310   : > { %12720 = vmatpush1.bf16.msra.mxu0 %v16097_v6 }
0x1311   : > { %12722 = vmatprep.subr.bf16.mxu0 %v16101_v43  ;;  %v6290_v43 = vld [vmem:[#allocation7 + $0x910] sm:$0xff] }
0x1314   : > { %12724 = vmatpush1.bf16.msra.mxu0 %v16103_v12 }
0x1315   : > { %12726 = vmatprep.subr.bf16.mxu0 %v16107_v11  ;;  %v6286_v11 = vld [vmem:[#allocation7 + $0x8f0] sm:$0xff] }
0x1318   : > { %12728 = vmatpush1.bf16.msra.mxu0 %v16109_v29 }
0x1319   : > { %12730 = vmatprep.subr.bf16.mxu0 %v16113_v15  ;;  %v6282_v15 = vld [vmem:[#allocation7 + $0x8d0] sm:$0xff] }
0x131c   : > { %12732 = vmatpush1.bf16.msra.mxu0 %v16115_v1 }
0x131d   : > { %12734 = vmatprep.subr.bf16.mxu0 %v16119_v30  ;;  %v6278_v30 = vld [vmem:[#allocation7 + $0x8b0] sm:$0xff] }
0x1320   : > { %12736 = vmatpush1.bf16.msra.mxu0 %v16121_v34 }
0x1321   : > { %12738 = vmatprep.subr.bf16.mxu0 %v16125_v27  ;;  %v6274_v27 = vld [vmem:[#allocation7 + $0x890] sm:$0xff] }
0x1323   : > { %v16201_v57 = vpop.f32.mrb[40].mxu1 }
0x1324   : > { %12740 = vmatpush1.bf16.msra.mxu0 %v16127_v24  ;;  %v16203_v52 = vpop.f32.mrb[41].mxu1 }
0x1325   : > { %12742 = vmatprep.subr.bf16.mxu0 %v16131_v17  ;;  %v6270_v17 = vld [vmem:[#allocation7 + $0x870] sm:$0xff] }
0x1328   : > { %12744 = vmatpush1.bf16.msra.mxu0 %v16133_v51  ;;  %v16219_v51 = vpack.c.bf16 %v6266_v0, %v6264_v48  ;;  %v6272_v0 = vld [vmem:[#allocation7 + $0x880] sm:$0xff] }
0x1329   : > { %12746 = vmatprep.subr.bf16.mxu0 %v16137_v20  ;;  %v16217_v20 = vpack.c.bf16 %v6267_v18, %v6265_v32  ;;  %v6273_v32 = vld [vmem:[#allocation7 + $0x888] sm:$0xff]  ;;  %v6275_v18 = vld [vmem:[#allocation7 + $0x898] sm:$0xff]  ;;  %v16231_v34 = vpack.c.bf16 %v6274_v27, %v6272_v0  ;;  %v6280_v0 = vld [vmem:[#allocation7 + $0x8c0] sm:$0xff] }
0x132a   : > { %18470 = vst [vmem:[#allocation130_spill] sm:$0xff] %v16219_v51  ;;  %v16229_v48 = vpack.c.bf16 %v6275_v18, %v6273_v32  ;;  %v6281_v32 = vld [vmem:[#allocation7 + $0x8c8] sm:$0xff]  ;;  %v6283_v18 = vld [vmem:[#allocation7 + $0x8d8] sm:$0xff]  ;;  %v16243_v29 = vpack.c.bf16 %v6282_v15, %v6280_v0  ;;  %v6288_v0 = vld [vmem:[#allocation7 + $0x900] sm:$0xff] }
0x132b   : > { %18469 = vst [vmem:[#allocation129_spill] sm:$0xff] %v16217_v20  ;;  %18474 = vst [vmem:[#allocation134_spill] sm:$0xff] %v16231_v34  ;;  %v16241_v27 = vpack.c.bf16 %v6283_v18, %v6281_v32  ;;  %v6289_v32 = vld [vmem:[#allocation7 + $0x908] sm:$0xff]  ;;  %v6291_v18 = vld [vmem:[#allocation7 + $0x918] sm:$0xff]  ;;  %v16255_v6 = vpack.c.bf16 %v6290_v43, %v6288_v0 }
0x132c   : > { %12748 = vmatpush1.bf16.msra.mxu0 %v16139_v22  ;;  %18473 = vst [vmem:[#allocation133_spill] sm:$0xff] %v16229_v48  ;;  %18478 = vst [vmem:[#allocation138_spill] sm:$0xff] %v16243_v29  ;;  %v16253_v15 = vpack.c.bf16 %v6291_v18, %v6289_v32  ;;  %v6297_v32 = vld [vmem:[#allocation7 + $0x948] sm:$0xff]  ;;  %v6299_v18 = vld [vmem:[#allocation7 + $0x958] sm:$0xff] }
0x132d   : > { %12750 = vmatprep.subr.bf16.mxu0 %v16143_v37  ;;  %v6262_v37 = vld [vmem:[#allocation7 + $0x830] sm:$0xff]  ;;  %18477 = vst [vmem:[#allocation137_spill] sm:$0xff] %v16241_v27  ;;  %18482 = vst [vmem:[#allocation142_spill] sm:$0xff] %v16255_v6  ;;  %v16265_v43 = vpack.c.bf16 %v6299_v18, %v6297_v32  ;;  %v6296_v0 = vld [vmem:[#allocation7 + $0x940] sm:$0xff] }
0x132e   : > { %18481 = vst [vmem:[#allocation141_spill] sm:$0xff] %v16253_v15  ;;  %v16267_v36 = vpack.c.bf16 %v6298_v46, %v6296_v0  ;;  %v6305_v32 = vld [vmem:[#allocation7 + $0x988] sm:$0xff]  ;;  %v6307_v18 = vld [vmem:[#allocation7 + $0x998] sm:$0xff]  ;;  %v6304_v0 = vld [vmem:[#allocation7 + $0x980] sm:$0xff] }
0x132f   : > { %18485 = vst [vmem:[#allocation145_spill] sm:$0xff] %v16265_v43  ;;  %v16277_v46 = vpack.c.bf16 %v6307_v18, %v6305_v32  ;;  %v16279_v21 = vpack.c.bf16 %v6306_v25, %v6304_v0  ;;  %v6313_v32 = vld [vmem:[#allocation7 + $0x9c8] sm:$0xff]  ;;  %v6315_v18 = vld [vmem:[#allocation7 + $0x9d8] sm:$0xff]  ;;  %v6312_v0 = vld [vmem:[#allocation7 + $0x9c0] sm:$0xff] }
0x1330   : > { %12752 = vmatpush1.bf16.msra.mxu0 %v16145_v42  ;;  %v6260_v42 = vld [vmem:[#allocation7 + $0x820] sm:$0xff]  ;;  %18486 = vst [vmem:[#allocation146_spill] sm:$0xff] %v16267_v36  ;;  %v16289_v25 = vpack.c.bf16 %v6315_v18, %v6313_v32  ;;  %v16291_v44 = vpack.c.bf16 %v6314_v54, %v6312_v0  ;;  %v11130_v0 = vld [vmem:[%s17792_s7 + $0x18] sm:$0xff] }
0x1331   : > { %v16213_v22 = vpack.c.bf16 %v6262_v37, %v6260_v42  ;;  %v16223_v42 = vpack.c.bf16 %v6271_v55, %v6269_v40  ;;  %v6268_v37 = vld [vmem:[#allocation7 + $0x860] sm:$0xff]  ;;  %v6277_v40 = vld [vmem:[#allocation7 + $0x8a8] sm:$0xff]  ;;  %v6279_v55 = vld [vmem:[#allocation7 + $0x8b8] sm:$0xff]  ;;  %18489 = vst [vmem:[#allocation149_spill] sm:$0xff] %v16277_v46 }
0x1332   : > { %v16225_v24 = vpack.c.bf16 %v6270_v17, %v6268_v37  ;;  %v16235_v17 = vpack.c.bf16 %v6279_v55, %v6277_v40  ;;  %v6276_v37 = vld [vmem:[#allocation7 + $0x8a0] sm:$0xff]  ;;  %v6285_v40 = vld [vmem:[#allocation7 + $0x8e8] sm:$0xff]  ;;  %v6287_v55 = vld [vmem:[#allocation7 + $0x8f8] sm:$0xff]  ;;  %18490 = vst [vmem:[#allocation150_spill] sm:$0xff] %v16279_v21 }
0x1333   : > { %6085 = vmatmul.mubr.f32.vlgmr.msra.gmra.mrb[38].mxu0 %v15757_v2  ;;  %18468 = vst [vmem:[#allocation128_spill] sm:$0xff] %v16213_v22  ;;  %12760 = vmatpush1.bf16.msra.mxu1 %v16213_v22  ;;  %18471 = vst [vmem:[#allocation131_spill] sm:$0xff] %v16223_v42  ;;  %v16237_v1 = vpack.c.bf16 %v6278_v30, %v6276_v37  ;;  %v16247_v30 = vpack.c.bf16 %v6287_v55, %v6285_v40  ;;  %v6284_v37 = vld [vmem:[#allocation7 + $0x8e0] sm:$0xff]  ;;  %v6293_v40 = vld [vmem:[#allocation7 + $0x928] sm:$0xff] }
0x1334   : > { %6166 = vmatprep.mubr.f32.mxu0 %v18400_v60  ;;  %12762 = vmatprep.subr.bf16.mxu1 %v16217_v20  ;;  %18472 = vst [vmem:[#allocation132_spill] sm:$0xff] %v16225_v24  ;;  %18475 = vst [vmem:[#allocation135_spill] sm:$0xff] %v16235_v17  ;;  %v16249_v12 = vpack.c.bf16 %v6286_v11, %v6284_v37  ;;  %v6295_v55 = vld [vmem:[#allocation7 + $0x938] sm:$0xff]  ;;  %v6292_v37 = vld [vmem:[#allocation7 + $0x920] sm:$0xff] }
0x1335   : > { %18476 = vst [vmem:[#allocation136_spill] sm:$0xff] %v16237_v1  ;;  %18479 = vst [vmem:[#allocation139_spill] sm:$0xff] %v16247_v30  ;;  %v16259_v11 = vpack.c.bf16 %v6295_v55, %v6293_v40  ;;  %v16261_v23 = vpack.c.bf16 %v6294_v19, %v6292_v37  ;;  %v6301_v40 = vld [vmem:[#allocation7 + $0x968] sm:$0xff]  ;;  %v6303_v55 = vld [vmem:[#allocation7 + $0x978] sm:$0xff] }
0x1336   : > { %18480 = vst [vmem:[#allocation140_spill] sm:$0xff] %v16249_v12  ;;  %v16271_v19 = vpack.c.bf16 %v6303_v55, %v6301_v40  ;;  %v6300_v37 = vld [vmem:[#allocation7 + $0x960] sm:$0xff]  ;;  %v6309_v40 = vld [vmem:[#allocation7 + $0x9a8] sm:$0xff]  ;;  %v6311_v55 = vld [vmem:[#allocation7 + $0x9b8] sm:$0xff] }
0x1337   : > { %12764 = vmatpush1.bf16.msra.mxu1 %v16219_v51  ;;  %18483 = vst [vmem:[#allocation143_spill] sm:$0xff] %v16259_v11  ;;  %18484 = vst [vmem:[#allocation144_spill] sm:$0xff] %v16261_v23  ;;  %v16273_v8 = vpack.c.bf16 %v6302_v62, %v6300_v37  ;;  %v16283_v62 = vpack.c.bf16 %v6311_v55, %v6309_v40  ;;  %v6308_v37 = vld [vmem:[#allocation7 + $0x9a0] sm:$0xff]  ;;  %v6317_v40 = vld [vmem:[#allocation7 + $0x9e8] sm:$0xff] }
0x1338   : > { %12766 = vmatprep.subr.bf16.mxu1 %v16223_v42  ;;  %18487 = vst [vmem:[#allocation147_spill] sm:$0xff] %v16271_v19  ;;  %v16285_v31 = vpack.c.bf16 %v6310_v28, %v6308_v37  ;;  %18493 = vst [vmem:[#allocation153_spill] sm:$0xff] %v16289_v25  ;;  %v6319_v55 = vld [vmem:[#allocation7 + $0x9f8] sm:$0xff]  ;;  %v6316_v37 = vld [vmem:[#allocation7 + $0x9e0] sm:$0xff] }
0x1339   : > { %18488 = vst [vmem:[#allocation148_spill] sm:$0xff] %v16273_v8  ;;  %18491 = vst [vmem:[#allocation151_spill] sm:$0xff] %v16283_v62  ;;  %v16295_v28 = vpack.c.bf16 %v6319_v55, %v6317_v40  ;;  %v16297_v41 = vpack.c.bf16 %v6318_v3, %v6316_v37  ;;  %v16302_v32 = vld [vmem:[%s15734_s23] sm:$0xff]  ;;  %v11129_v3 = vld [vmem:[%s17791_s6 + $0x18] sm:$0xff] }
0x133a   : > { %18492 = vst [vmem:[#allocation152_spill] sm:$0xff] %v16285_v31  ;;  %18494 = vst [vmem:[#allocation154_spill] sm:$0xff] %v16291_v44  ;;  %v6630_v40 = vld [vmem:[#allocation7 + $0xa08] sm:$0xff]  ;;  %v6632_v55 = vld [vmem:[#allocation7 + $0xa18] sm:$0xff] }
0x133b   : > { %12768 = vmatpush1.bf16.msra.mxu1 %v16225_v24  ;;  %18495 = vst [vmem:[#allocation155_spill] sm:$0xff] %v16295_v28  ;;  %18496 = vst [vmem:[#allocation156_spill] sm:$0xff] %v16297_v41  ;;  %v16360_v37 = vpack.c.bf16 %v6632_v55, %v6630_v40  ;;  %v6638_v40 = vld [vmem:[#allocation7 + $0xa48] sm:$0xff]  ;;  %v6640_v55 = vld [vmem:[#allocation7 + $0xa58] sm:$0xff] }
0x133c   : > { %12770 = vmatprep.subr.bf16.mxu1 %v16229_v48 }
0x133d   : > { %18497 = vst [vmem:[#allocation157_spill] sm:$0xff] %v16360_v37 }
0x133f   : > { %12772 = vmatpush1.bf16.msra.mxu1 %v16231_v34 }
0x1340   : > { %12774 = vmatprep.subr.bf16.mxu1 %v16235_v17 }
0x1343   : > { %12776 = vmatpush1.bf16.msra.mxu1 %v16237_v1 }
0x1344   : > { %12778 = vmatprep.subr.bf16.mxu1 %v16241_v27 }
0x1347   : > { %12780 = vmatpush1.bf16.msra.mxu1 %v16243_v29 }
0x1348   : > { %12782 = vmatprep.subr.bf16.mxu1 %v16247_v30 }
0x134b   : > { %12784 = vmatpush1.bf16.msra.mxu1 %v16249_v12 }
0x134c   : > { %12786 = vmatprep.subr.bf16.mxu1 %v16253_v15 }
0x134f   : > { %12788 = vmatpush1.bf16.msra.mxu1 %v16255_v6 }
0x1350   : > { %12790 = vmatprep.subr.bf16.mxu1 %v16259_v11 }
0x1353   : > { %12792 = vmatpush1.bf16.msra.mxu1 %v16261_v23 }
0x1354   : > { %12794 = vmatprep.subr.bf16.mxu1 %v16265_v43 }
0x1357   : > { %12796 = vmatpush1.bf16.msra.mxu1 %v16267_v36 }
0x1358   : > { %12798 = vmatprep.subr.bf16.mxu1 %v16271_v19 }
0x135b   : > { %12800 = vmatpush1.bf16.msra.mxu1 %v16273_v8 }
0x135c   : > { %12802 = vmatprep.subr.bf16.mxu1 %v16277_v46 }
0x135f   : > { %12804 = vmatpush1.bf16.msra.mxu1 %v16279_v21 }
0x1360   : > { %12806 = vmatprep.subr.bf16.mxu1 %v16283_v62 }
0x1363   : > { %12808 = vmatpush1.bf16.msra.mxu1 %v16285_v31 }
0x1364   : > { %12810 = vmatprep.subr.bf16.mxu1 %v16289_v25 }
0x1367   : > { %12812 = vmatpush1.bf16.msra.mxu1 %v16291_v44 }
0x1368   : > { %12814 = vmatprep.subr.bf16.mxu1 %v16295_v28 }
0x136b   : > { %12816 = vmatpush1.bf16.msra.mxu1 %v16297_v41 }
0x136c   : > { %12882 = vmatprep.subr.bf16.mxu1 %v16360_v37 }
0x136e   : > { %6385 = vmatmul.mubr.f32.vlgmr.msra.gmra.mrb[42].mxu1 %v16302_v32 }
0x136f   : > { %6757 = vmatprep.mubr.f32.mxu1 %v15748_v39 }
0x1406   : > { %v6086_v54 = vpop.f32.mrb[38].mxu0 }
0x1407   : > { %v6088_v18 = vpop.f32.mrb[39].mxu0 }
0x1408   : > { %11131 = vmatprep.subr.msk.mxu0 %vm4976_vm3, %v6088_v18  ;;  %v6631_v18 = vld [vmem:[#allocation7 + $0xa10] sm:$0xff] }
0x1409   : > { %11132 = vmatpush1.msk.msra.mxu0 %vm4976_vm3, %v6086_v54  ;;  %v6629_v54 = vld [vmem:[#allocation7 + $0xa00] sm:$0xff] }
0x140a   : > { %11133 = vmatmul.mubr.msk.f32.vlgmr.msra.gmra.mrb[32].mxu0 %vm4972_vm4, %v11130_v0  ;;  %11134 = vmatprep.subr.msk.mxu0 %vm4976_vm3, %v16203_v52  ;;  %v16363_v0 = vpack.c.bf16 %v6631_v18, %v6629_v54  ;;  %v6637_v54 = vld [vmem:[#allocation7 + $0xa40] sm:$0xff]  ;;  %v6639_v18 = vld [vmem:[#allocation7 + $0xa50] sm:$0xff] }
0x140b   : > { %11135 = vmatpush1.msk.msra.mxu0 %vm4976_vm3, %v16201_v57  ;;  %6246 = vmatprep.mubr.f32.mxu0 %v18400_v60 }
0x140c   : > { %12818 = vmatprep.subr.bf16.mxu0 %v16205_v45  ;;  %18498 = vst [vmem:[#allocation158_spill] sm:$0xff] %v16363_v0  ;;  %12884 = vmatpush1.bf16.msra.mxu1 %v16363_v0  ;;  %v6691_v45 = vld [vmem:[#allocation7 + $0xbf0] sm:$0xff] }
0x1412   : > { %11136 = vmatmul.mubr.msk.f32.vlgmr.msra.gmra.mrb[32].mxu0 %vm4972_vm4, %v11129_v3  ;;  %v6634_v3 = vld [vmem:[#allocation7 + $0xa28] sm:$0xff] }
0x1413   : > { %12820 = vmatpush1.bf16.msra.mxu0 %v16208_v56  ;;  %6457 = vmatprep.mubr.f32.mxu0 %v15753_v50 }
0x1414   : > { %12822 = vmatprep.subr.bf16.mxu0 %v16211_v9  ;;  %v6687_v9 = vld [vmem:[#allocation7 + $0xbd0] sm:$0xff] }
0x1417   : > { %12824 = vmatpush1.bf16.msra.mxu0 %v16213_v22 }
0x1418   : > { %12826 = vmatprep.subr.bf16.mxu0 %v16217_v20  ;;  %v6683_v20 = vld [vmem:[#allocation7 + $0xbb0] sm:$0xff] }
0x141b   : > { %12828 = vmatpush1.bf16.msra.mxu0 %v16219_v51 }
0x141c   : > { %12830 = vmatprep.subr.bf16.mxu0 %v16223_v42  ;;  %v6679_v42 = vld [vmem:[#allocation7 + $0xb90] sm:$0xff] }
0x141f   : > { %12832 = vmatpush1.bf16.msra.mxu0 %v16225_v24 }
0x1420   : > { %12834 = vmatprep.subr.bf16.mxu0 %v16229_v48  ;;  %v6675_v48 = vld [vmem:[#allocation7 + $0xb70] sm:$0xff] }
0x1423   : > { %12836 = vmatpush1.bf16.msra.mxu0 %v16231_v34 }
0x1424   : > { %12838 = vmatprep.subr.bf16.mxu0 %v16235_v17  ;;  %v6671_v17 = vld [vmem:[#allocation7 + $0xb50] sm:$0xff] }
0x1427   : > { %12840 = vmatpush1.bf16.msra.mxu0 %v16237_v1 }
0x1428   : > { %12842 = vmatprep.subr.bf16.mxu0 %v16241_v27  ;;  %v6667_v27 = vld [vmem:[#allocation7 + $0xb30] sm:$0xff] }
0x142b   : > { %12844 = vmatpush1.bf16.msra.mxu0 %v16243_v29 }
0x142c   : > { %12846 = vmatprep.subr.bf16.mxu0 %v16247_v30  ;;  %v6663_v30 = vld [vmem:[#allocation7 + $0xb10] sm:$0xff] }
0x142f   : > { %12848 = vmatpush1.bf16.msra.mxu0 %v16249_v12 }
0x1430   : > { %12850 = vmatprep.subr.bf16.mxu0 %v16253_v15  ;;  %v6659_v15 = vld [vmem:[#allocation7 + $0xaf0] sm:$0xff] }
0x1433   : > { %12852 = vmatpush1.bf16.msra.mxu0 %v16255_v6 }
0x1434   : > { %12854 = vmatprep.subr.bf16.mxu0 %v16259_v11  ;;  %v6655_v11 = vld [vmem:[#allocation7 + $0xad0] sm:$0xff] }
0x1437   : > { %12856 = vmatpush1.bf16.msra.mxu0 %v16261_v23 }
0x1438   : > { %12858 = vmatprep.subr.bf16.mxu0 %v16265_v43  ;;  %v6651_v43 = vld [vmem:[#allocation7 + $0xab0] sm:$0xff] }
0x143b   : > { %12860 = vmatpush1.bf16.msra.mxu0 %v16267_v36 }
0x143c   : > { %12862 = vmatprep.subr.bf16.mxu0 %v16271_v19  ;;  %v6647_v19 = vld [vmem:[#allocation7 + $0xa90] sm:$0xff] }
0x143f   : > { %12864 = vmatpush1.bf16.msra.mxu0 %v16273_v8 }
0x1440   : > { %12866 = vmatprep.subr.bf16.mxu0 %v16277_v46  ;;  %v6643_v46 = vld [vmem:[#allocation7 + $0xa70] sm:$0xff] }
0x1441   : > { %v16356_v57 = vpop.f32.mrb[42].mxu1 }
0x1442   : > { %v16358_v52 = vpop.f32.mrb[43].mxu1 }
0x1443   : > { %12868 = vmatpush1.bf16.msra.mxu0 %v16279_v21  ;;  %v16374_v21 = vpack.c.bf16 %v6639_v18, %v6637_v54  ;;  %v6645_v18 = vld [vmem:[#allocation7 + $0xa80] sm:$0xff] }
0x1444   : > { %12870 = vmatprep.subr.bf16.mxu0 %v16283_v62  ;;  %v16372_v62 = vpack.c.bf16 %v6640_v55, %v6638_v40  ;;  %v6646_v40 = vld [vmem:[#allocation7 + $0xa88] sm:$0xff]  ;;  %v6648_v55 = vld [vmem:[#allocation7 + $0xa98] sm:$0xff]  ;;  %v16386_v36 = vpack.c.bf16 %v6647_v19, %v6645_v18  ;;  %v6653_v18 = vld [vmem:[#allocation7 + $0xac0] sm:$0xff] }
0x1445   : > { %18502 = vst [vmem:[#allocation162_spill] sm:$0xff] %v16374_v21  ;;  %v16384_v54 = vpack.c.bf16 %v6648_v55, %v6646_v40  ;;  %v6654_v40 = vld [vmem:[#allocation7 + $0xac8] sm:$0xff]  ;;  %v6656_v55 = vld [vmem:[#allocation7 + $0xad8] sm:$0xff]  ;;  %v16398_v6 = vpack.c.bf16 %v6655_v11, %v6653_v18  ;;  %v6661_v18 = vld [vmem:[#allocation7 + $0xb00] sm:$0xff] }
0x1446   : > { %18501 = vst [vmem:[#allocation161_spill] sm:$0xff] %v16372_v62  ;;  %18506 = vst [vmem:[#allocation166_spill] sm:$0xff] %v16386_v36  ;;  %v16396_v19 = vpack.c.bf16 %v6656_v55, %v6654_v40  ;;  %v6662_v40 = vld [vmem:[#allocation7 + $0xb08] sm:$0xff]  ;;  %v6664_v55 = vld [vmem:[#allocation7 + $0xb18] sm:$0xff]  ;;  %v16410_v29 = vpack.c.bf16 %v6663_v30, %v6661_v18 }
0x1447   : > { %12872 = vmatpush1.bf16.msra.mxu0 %v16285_v31  ;;  %18505 = vst [vmem:[#allocation165_spill] sm:$0xff] %v16384_v54  ;;  %18510 = vst [vmem:[#allocation170_spill] sm:$0xff] %v16398_v6  ;;  %v16408_v11 = vpack.c.bf16 %v6664_v55, %v6662_v40  ;;  %v6670_v40 = vld [vmem:[#allocation7 + $0xb48] sm:$0xff]  ;;  %v6672_v55 = vld [vmem:[#allocation7 + $0xb58] sm:$0xff] }
0x1448   : > { %12874 = vmatprep.subr.bf16.mxu0 %v16289_v25  ;;  %v6635_v25 = vld [vmem:[#allocation7 + $0xa30] sm:$0xff]  ;;  %18509 = vst [vmem:[#allocation169_spill] sm:$0xff] %v16396_v19  ;;  %18514 = vst [vmem:[#allocation174_spill] sm:$0xff] %v16410_v29  ;;  %v16420_v30 = vpack.c.bf16 %v6672_v55, %v6670_v40  ;;  %v6669_v18 = vld [vmem:[#allocation7 + $0xb40] sm:$0xff] }
0x1449   : > { %18513 = vst [vmem:[#allocation173_spill] sm:$0xff] %v16408_v11  ;;  %v16422_v34 = vpack.c.bf16 %v6671_v17, %v6669_v18  ;;  %v6678_v40 = vld [vmem:[#allocation7 + $0xb88] sm:$0xff]  ;;  %v6680_v55 = vld [vmem:[#allocation7 + $0xb98] sm:$0xff]  ;;  %v6677_v18 = vld [vmem:[#allocation7 + $0xb80] sm:$0xff] }
0x144a   : > { %18517 = vst [vmem:[#allocation177_spill] sm:$0xff] %v16420_v30  ;;  %v16432_v17 = vpack.c.bf16 %v6680_v55, %v6678_v40  ;;  %v16434_v51 = vpack.c.bf16 %v6679_v42, %v6677_v18  ;;  %v6686_v40 = vld [vmem:[#allocation7 + $0xbc8] sm:$0xff]  ;;  %v6688_v55 = vld [vmem:[#allocation7 + $0xbd8] sm:$0xff]  ;;  %v6685_v18 = vld [vmem:[#allocation7 + $0xbc0] sm:$0xff] }
0x144b   : > { %12876 = vmatpush1.bf16.msra.mxu0 %v16291_v44  ;;  %v6633_v44 = vld [vmem:[#allocation7 + $0xa20] sm:$0xff]  ;;  %18518 = vst [vmem:[#allocation178_spill] sm:$0xff] %v16422_v34  ;;  %v16444_v42 = vpack.c.bf16 %v6688_v55, %v6686_v40  ;;  %v16446_v56 = vpack.c.bf16 %v6687_v9, %v6685_v18  ;;  %v7003_v18 = vld [vmem:[#allocation7 + $0xc08] sm:$0xff] }
0x144c   : > { %12878 = vmatprep.subr.bf16.mxu0 %v16295_v28  ;;  %v16368_v31 = vpack.c.bf16 %v6635_v25, %v6633_v44  ;;  %v6641_v25 = vld [vmem:[#allocation7 + $0xa60] sm:$0xff]  ;;  %18521 = vst [vmem:[#allocation181_spill] sm:$0xff] %v16432_v17  ;;  %18522 = vst [vmem:[#allocation182_spill] sm:$0xff] %v16434_v51 }
0x144d   : > { %v16380_v8 = vpack.c.bf16 %v6643_v46, %v6641_v25  ;;  %v6649_v25 = vld [vmem:[#allocation7 + $0xaa0] sm:$0xff]  ;;  %18525 = vst [vmem:[#allocation185_spill] sm:$0xff] %v16444_v42  ;;  %18526 = vst [vmem:[#allocation186_spill] sm:$0xff] %v16446_v56 }
0x144e   : > { %18500 = vst [vmem:[#allocation160_spill] sm:$0xff] %v16368_v31  ;;  %v16392_v23 = vpack.c.bf16 %v6651_v43, %v6649_v25  ;;  %v6657_v25 = vld [vmem:[#allocation7 + $0xae0] sm:$0xff] }
0x144f   : > { %12880 = vmatpush1.bf16.msra.mxu0 %v16297_v41  ;;  %v6636_v41 = vld [vmem:[#allocation7 + $0xa38] sm:$0xff]  ;;  %18504 = vst [vmem:[#allocation164_spill] sm:$0xff] %v16380_v8  ;;  %v16404_v12 = vpack.c.bf16 %v6659_v15, %v6657_v25  ;;  %v6665_v25 = vld [vmem:[#allocation7 + $0xb20] sm:$0xff] }
0x1450   : > { %v16366_v28 = vpack.c.bf16 %v6636_v41, %v6634_v3  ;;  %v6642_v41 = vld [vmem:[#allocation7 + $0xa68] sm:$0xff]  ;;  %v6644_v3 = vld [vmem:[#allocation7 + $0xa78] sm:$0xff]  ;;  %18508 = vst [vmem:[#allocation168_spill] sm:$0xff] %v16392_v23  ;;  %v16416_v1 = vpack.c.bf16 %v6667_v27, %v6665_v25  ;;  %v6673_v25 = vld [vmem:[#allocation7 + $0xb60] sm:$0xff] }
0x1451   : > { %v16378_v44 = vpack.c.bf16 %v6644_v3, %v6642_v41  ;;  %v6650_v41 = vld [vmem:[#allocation7 + $0xaa8] sm:$0xff]  ;;  %v6652_v3 = vld [vmem:[#allocation7 + $0xab8] sm:$0xff]  ;;  %18512 = vst [vmem:[#allocation172_spill] sm:$0xff] %v16404_v12  ;;  %v16428_v24 = vpack.c.bf16 %v6675_v48, %v6673_v25  ;;  %v6681_v25 = vld [vmem:[#allocation7 + $0xba0] sm:$0xff] }
0x1452   : > { %6458 = vmatmul.mubr.f32.vlgmr.msra.gmra.mrb[40].mxu0 %v15757_v2  ;;  %18499 = vst [vmem:[#allocation159_spill] sm:$0xff] %v16366_v28  ;;  %12886 = vmatprep.subr.bf16.mxu1 %v16366_v28  ;;  %v16390_v46 = vpack.c.bf16 %v6652_v3, %v6650_v41  ;;  %v6658_v41 = vld [vmem:[#allocation7 + $0xae8] sm:$0xff]  ;;  %v6660_v3 = vld [vmem:[#allocation7 + $0xaf8] sm:$0xff]  ;;  %18516 = vst [vmem:[#allocation176_spill] sm:$0xff] %v16416_v1  ;;  %v16440_v22 = vpack.c.bf16 %v6683_v20, %v6681_v25 }
0x1453   : > { %6539 = vmatprep.mubr.f32.mxu0 %v18400_v60  ;;  %12888 = vmatpush1.bf16.msra.mxu1 %v16368_v31  ;;  %18503 = vst [vmem:[#allocation163_spill] sm:$0xff] %v16378_v44  ;;  %v16402_v43 = vpack.c.bf16 %v6660_v3, %v6658_v41  ;;  %v6666_v41 = vld [vmem:[#allocation7 + $0xb28] sm:$0xff]  ;;  %v6668_v3 = vld [vmem:[#allocation7 + $0xb38] sm:$0xff]  ;;  %18520 = vst [vmem:[#allocation180_spill] sm:$0xff] %v16428_v24 }
0x1454   : > { %12890 = vmatprep.subr.bf16.mxu1 %v16372_v62  ;;  %18507 = vst [vmem:[#allocation167_spill] sm:$0xff] %v16390_v46  ;;  %v16414_v15 = vpack.c.bf16 %v6668_v3, %v6666_v41  ;;  %v6674_v41 = vld [vmem:[#allocation7 + $0xb68] sm:$0xff]  ;;  %v6676_v3 = vld [vmem:[#allocation7 + $0xb78] sm:$0xff]  ;;  %18524 = vst [vmem:[#allocation184_spill] sm:$0xff] %v16440_v22 }
0x1455   : > { %18511 = vst [vmem:[#allocation171_spill] sm:$0xff] %v16402_v43  ;;  %v16426_v27 = vpack.c.bf16 %v6676_v3, %v6674_v41  ;;  %v6682_v41 = vld [vmem:[#allocation7 + $0xba8] sm:$0xff]  ;;  %v6684_v3 = vld [vmem:[#allocation7 + $0xbb8] sm:$0xff]  ;;  %v6689_v25 = vld [vmem:[#allocation7 + $0xbe0] sm:$0xff] }
0x1456   : > { %18515 = vst [vmem:[#allocation175_spill] sm:$0xff] %v16414_v15  ;;  %v16438_v48 = vpack.c.bf16 %v6684_v3, %v6682_v41  ;;  %v6690_v41 = vld [vmem:[#allocation7 + $0xbe8] sm:$0xff]  ;;  %v6692_v3 = vld [vmem:[#allocation7 + $0xbf8] sm:$0xff]  ;;  %v16452_v4 = vpack.c.bf16 %v6691_v45, %v6689_v25  ;;  %v7002_v25 = vld [vmem:[#allocation7 + $0xc00] sm:$0xff] }
0x1457   : > { %12892 = vmatpush1.bf16.msra.mxu1 %v16374_v21  ;;  %18519 = vst [vmem:[#allocation179_spill] sm:$0xff] %v16426_v27  ;;  %v16450_v20 = vpack.c.bf16 %v6692_v3, %v6690_v41  ;;  %v11138_v55 = vld [vmem:[%s17792_s7 + $0x20] sm:$0xff] }
0x1458   : > { %12894 = vmatprep.subr.bf16.mxu1 %v16378_v44  ;;  %18523 = vst [vmem:[#allocation183_spill] sm:$0xff] %v16438_v48  ;;  %18528 = vst [vmem:[#allocation188_spill] sm:$0xff] %v16452_v4  ;;  %v11137_v45 = vld [vmem:[%s17791_s6 + $0x20] sm:$0xff] }
0x1459   : > { %18527 = vst [vmem:[#allocation187_spill] sm:$0xff] %v16450_v20  ;;  %v7005_v41 = vld [vmem:[#allocation7 + $0xc18] sm:$0xff] }
0x145a   : > { %v16512_v3 = vpack.c.bf16 %v7005_v41, %v7003_v18  ;;  %v7011_v18 = vld [vmem:[#allocation7 + $0xc48] sm:$0xff]  ;;  %v7013_v41 = vld [vmem:[#allocation7 + $0xc58] sm:$0xff] }
0x145b   : > { %12896 = vmatpush1.bf16.msra.mxu1 %v16380_v8 }
0x145c   : > { %12898 = vmatprep.subr.bf16.mxu1 %v16384_v54  ;;  %18529 = vst [vmem:[#allocation189_spill] sm:$0xff] %v16512_v3 }
0x145f   : > { %12900 = vmatpush1.bf16.msra.mxu1 %v16386_v36 }
0x1460   : > { %12902 = vmatprep.subr.bf16.mxu1 %v16390_v46 }
0x1463   : > { %12904 = vmatpush1.bf16.msra.mxu1 %v16392_v23 }
0x1464   : > { %12906 = vmatprep.subr.bf16.mxu1 %v16396_v19 }
0x1467   : > { %12908 = vmatpush1.bf16.msra.mxu1 %v16398_v6 }
0x1468   : > { %12910 = vmatprep.subr.bf16.mxu1 %v16402_v43 }
0x146b   : > { %12912 = vmatpush1.bf16.msra.mxu1 %v16404_v12 }
0x146c   : > { %12914 = vmatprep.subr.bf16.mxu1 %v16408_v11 }
0x146f   : > { %12916 = vmatpush1.bf16.msra.mxu1 %v16410_v29 }
0x1470   : > { %12918 = vmatprep.subr.bf16.mxu1 %v16414_v15 }
0x1473   : > { %12920 = vmatpush1.bf16.msra.mxu1 %v16416_v1 }
0x1474   : > { %12922 = vmatprep.subr.bf16.mxu1 %v16420_v30 }
0x1477   : > { %12924 = vmatpush1.bf16.msra.mxu1 %v16422_v34 }
0x1478   : > { %12926 = vmatprep.subr.bf16.mxu1 %v16426_v27 }
0x147b   : > { %12928 = vmatpush1.bf16.msra.mxu1 %v16428_v24 }
0x147c   : > { %12930 = vmatprep.subr.bf16.mxu1 %v16432_v17 }
0x147f   : > { %12932 = vmatpush1.bf16.msra.mxu1 %v16434_v51 }
0x1480   : > { %12934 = vmatprep.subr.bf16.mxu1 %v16438_v48 }
0x1483   : > { %12936 = vmatpush1.bf16.msra.mxu1 %v16440_v22 }
0x1484   : > { %12938 = vmatprep.subr.bf16.mxu1 %v16444_v42 }
0x1487   : > { %12940 = vmatpush1.bf16.msra.mxu1 %v16446_v56 }
0x1488   : > { %12942 = vmatprep.subr.bf16.mxu1 %v16450_v20 }
0x148b   : > { %12944 = vmatpush1.bf16.msra.mxu1 %v16452_v4 }
0x148c   : > { %13010 = vmatprep.subr.bf16.mxu1 %v16512_v3 }
0x148e   : > { %6758 = vmatmul.mubr.f32.vlgmr.msra.gmra.mrb[44].mxu1 %v16302_v32 }
0x148f   : > { %7130 = vmatprep.mubr.f32.mxu1 %v15748_v39 }
0x1525   : > { %v6459_v9 = vpop.f32.mrb[40].mxu0 }
0x1526   : > { %v6461_v40 = vpop.f32.mrb[41].mxu0 }
0x1527   : > { %11139 = vmatprep.subr.msk.mxu0 %vm4976_vm3, %v6461_v40 }
0x1528   : > { %11140 = vmatpush1.msk.msra.mxu0 %vm4976_vm3, %v6459_v9  ;;  %v7004_v9 = vld [vmem:[#allocation7 + $0xc10] sm:$0xff] }
0x1529   : > { %11141 = vmatmul.mubr.msk.f32.vlgmr.msra.gmra.mrb[32].mxu0 %vm4972_vm4, %v11138_v55  ;;  %11142 = vmatprep.subr.msk.mxu0 %vm4976_vm3, %v16358_v52  ;;  %v16515_v40 = vpack.c.bf16 %v7004_v9, %v7002_v25  ;;  %v7007_v55 = vld [vmem:[#allocation7 + $0xc28] sm:$0xff]  ;;  %v7010_v25 = vld [vmem:[#allocation7 + $0xc40] sm:$0xff]  ;;  %v7012_v9 = vld [vmem:[#allocation7 + $0xc50] sm:$0xff] }
0x152a   : > { %11143 = vmatpush1.msk.msra.mxu0 %vm4976_vm3, %v16356_v57  ;;  %6619 = vmatprep.mubr.f32.mxu0 %v18400_v60 }
0x152b   : > { %12946 = vmatprep.subr.bf16.mxu0 %v16360_v37  ;;  %18530 = vst [vmem:[#allocation190_spill] sm:$0xff] %v16515_v40  ;;  %13012 = vmatpush1.bf16.msra.mxu1 %v16515_v40 }
0x1531   : > { %11144 = vmatmul.mubr.msk.f32.vlgmr.msra.gmra.mrb[32].mxu0 %vm4972_vm4, %v11137_v45  ;;  %v7009_v45 = vld [vmem:[#allocation7 + $0xc38] sm:$0xff] }
0x1532   : > { %12948 = vmatpush1.bf16.msra.mxu0 %v16363_v0  ;;  %6830 = vmatprep.mubr.f32.mxu0 %v15753_v50  ;;  %v7064_v0 = vld [vmem:[#allocation7 + $0xdf0] sm:$0xff] }
0x1533   : > { %12950 = vmatprep.subr.bf16.mxu0 %v16366_v28 }
0x1536   : > { %12952 = vmatpush1.bf16.msra.mxu0 %v16368_v31  ;;  %v7060_v31 = vld [vmem:[#allocation7 + $0xdd0] sm:$0xff] }
0x1537   : > { %12954 = vmatprep.subr.bf16.mxu0 %v16372_v62 }
0x153a   : > { %12956 = vmatpush1.bf16.msra.mxu0 %v16374_v21  ;;  %v7056_v21 = vld [vmem:[#allocation7 + $0xdb0] sm:$0xff] }
0x153b   : > { %12958 = vmatprep.subr.bf16.mxu0 %v16378_v44 }
0x153e   : > { %12960 = vmatpush1.bf16.msra.mxu0 %v16380_v8  ;;  %v7052_v8 = vld [vmem:[#allocation7 + $0xd90] sm:$0xff] }
0x153f   : > { %12962 = vmatprep.subr.bf16.mxu0 %v16384_v54 }
0x1542   : > { %12964 = vmatpush1.bf16.msra.mxu0 %v16386_v36  ;;  %v7048_v36 = vld [vmem:[#allocation7 + $0xd70] sm:$0xff] }
0x1543   : > { %12966 = vmatprep.subr.bf16.mxu0 %v16390_v46 }
0x1546   : > { %12968 = vmatpush1.bf16.msra.mxu0 %v16392_v23  ;;  %v7044_v23 = vld [vmem:[#allocation7 + $0xd50] sm:$0xff] }
0x1547   : > { %12970 = vmatprep.subr.bf16.mxu0 %v16396_v19 }
0x154a   : > { %12972 = vmatpush1.bf16.msra.mxu0 %v16398_v6  ;;  %v7040_v6 = vld [vmem:[#allocation7 + $0xd30] sm:$0xff] }
0x154b   : > { %12974 = vmatprep.subr.bf16.mxu0 %v16402_v43 }
0x154e   : > { %12976 = vmatpush1.bf16.msra.mxu0 %v16404_v12  ;;  %v7036_v12 = vld [vmem:[#allocation7 + $0xd10] sm:$0xff] }
0x154f   : > { %12978 = vmatprep.subr.bf16.mxu0 %v16408_v11 }
0x1552   : > { %12980 = vmatpush1.bf16.msra.mxu0 %v16410_v29  ;;  %v7032_v29 = vld [vmem:[#allocation7 + $0xcf0] sm:$0xff] }
0x1553   : > { %12982 = vmatprep.subr.bf16.mxu0 %v16414_v15 }
0x1556   : > { %12984 = vmatpush1.bf16.msra.mxu0 %v16416_v1  ;;  %v7028_v1 = vld [vmem:[#allocation7 + $0xcd0] sm:$0xff] }
0x1557   : > { %12986 = vmatprep.subr.bf16.mxu0 %v16420_v30 }
0x155a   : > { %12988 = vmatpush1.bf16.msra.mxu0 %v16422_v34  ;;  %v7024_v34 = vld [vmem:[#allocation7 + $0xcb0] sm:$0xff] }
0x155b   : > { %12990 = vmatprep.subr.bf16.mxu0 %v16426_v27 }
0x155e   : > { %12992 = vmatpush1.bf16.msra.mxu0 %v16428_v24  ;;  %v7020_v24 = vld [vmem:[#allocation7 + $0xc90] sm:$0xff] }
0x155f   : > { %12994 = vmatprep.subr.bf16.mxu0 %v16432_v17 }
0x1561   : > { %v16508_v57 = vpop.f32.mrb[44].mxu1 }
0x1562   : > { %12996 = vmatpush1.bf16.msra.mxu0 %v16434_v51  ;;  %v16510_v52 = vpop.f32.mrb[45].mxu1  ;;  %v7016_v51 = vld [vmem:[#allocation7 + $0xc70] sm:$0xff] }
0x1563   : > { %12998 = vmatprep.subr.bf16.mxu0 %v16438_v48  ;;  %v16526_v48 = vpack.c.bf16 %v7012_v9, %v7010_v25  ;;  %v7018_v9 = vld [vmem:[#allocation7 + $0xc80] sm:$0xff] }
0x1564   : > { %v16538_v27 = vpack.c.bf16 %v7020_v24, %v7018_v9  ;;  %v7026_v9 = vld [vmem:[#allocation7 + $0xcc0] sm:$0xff] }
0x1565   : > { %18534 = vst [vmem:[#allocation194_spill] sm:$0xff] %v16526_v48  ;;  %v16550_v15 = vpack.c.bf16 %v7028_v1, %v7026_v9  ;;  %v7034_v9 = vld [vmem:[#allocation7 + $0xd00] sm:$0xff] }
0x1566   : > { %13000 = vmatpush1.bf16.msra.mxu0 %v16440_v22  ;;  %v16524_v22 = vpack.c.bf16 %v7013_v41, %v7011_v18  ;;  %v7019_v18 = vld [vmem:[#allocation7 + $0xc88] sm:$0xff]  ;;  %v7021_v41 = vld [vmem:[#allocation7 + $0xc98] sm:$0xff]  ;;  %18538 = vst [vmem:[#allocation198_spill] sm:$0xff] %v16538_v27  ;;  %v16562_v43 = vpack.c.bf16 %v7036_v12, %v7034_v9  ;;  %v7042_v9 = vld [vmem:[#allocation7 + $0xd40] sm:$0xff] }
0x1567   : > { %13002 = vmatprep.subr.bf16.mxu0 %v16444_v42  ;;  %v16536_v25 = vpack.c.bf16 %v7021_v41, %v7019_v18  ;;  %v7027_v18 = vld [vmem:[#allocation7 + $0xcc8] sm:$0xff]  ;;  %v7029_v41 = vld [vmem:[#allocation7 + $0xcd8] sm:$0xff]  ;;  %18542 = vst [vmem:[#allocation202_spill] sm:$0xff] %v16550_v15  ;;  %v16574_v46 = vpack.c.bf16 %v7044_v23, %v7042_v9  ;;  %v7050_v9 = vld [vmem:[#allocation7 + $0xd80] sm:$0xff] }
0x1568   : > { %18533 = vst [vmem:[#allocation193_spill] sm:$0xff] %v16524_v22  ;;  %v16548_v24 = vpack.c.bf16 %v7029_v41, %v7027_v18  ;;  %v7035_v18 = vld [vmem:[#allocation7 + $0xd08] sm:$0xff]  ;;  %v7037_v41 = vld [vmem:[#allocation7 + $0xd18] sm:$0xff]  ;;  %18546 = vst [vmem:[#allocation206_spill] sm:$0xff] %v16562_v43  ;;  %v16586_v44 = vpack.c.bf16 %v7052_v8, %v7050_v9 }
0x1569   : > { %18537 = vst [vmem:[#allocation197_spill] sm:$0xff] %v16536_v25  ;;  %v16560_v1 = vpack.c.bf16 %v7037_v41, %v7035_v18  ;;  %v7043_v18 = vld [vmem:[#allocation7 + $0xd48] sm:$0xff]  ;;  %v7045_v41 = vld [vmem:[#allocation7 + $0xd58] sm:$0xff]  ;;  %18550 = vst [vmem:[#allocation210_spill] sm:$0xff] %v16574_v46 }
0x156a   : > { %13004 = vmatpush1.bf16.msra.mxu0 %v16446_v56  ;;  %v7008_v56 = vld [vmem:[#allocation7 + $0xc30] sm:$0xff]  ;;  %18541 = vst [vmem:[#allocation201_spill] sm:$0xff] %v16548_v24  ;;  %v16572_v12 = vpack.c.bf16 %v7045_v41, %v7043_v18  ;;  %v7051_v18 = vld [vmem:[#allocation7 + $0xd88] sm:$0xff]  ;;  %v7053_v41 = vld [vmem:[#allocation7 + $0xd98] sm:$0xff] }
0x156b   : > { %13006 = vmatprep.subr.bf16.mxu0 %v16450_v20  ;;  %v7006_v20 = vld [vmem:[#allocation7 + $0xc20] sm:$0xff]  ;;  %18545 = vst [vmem:[#allocation205_spill] sm:$0xff] %v16560_v1  ;;  %v16584_v23 = vpack.c.bf16 %v7053_v41, %v7051_v18  ;;  %18554 = vst [vmem:[#allocation214_spill] sm:$0xff] %v16586_v44  ;;  %v7059_v18 = vld [vmem:[#allocation7 + $0xdc8] sm:$0xff] }
0x156c   : > { %v16520_v42 = vpack.c.bf16 %v7008_v56, %v7006_v20  ;;  %v7014_v20 = vld [vmem:[#allocation7 + $0xc60] sm:$0xff]  ;;  %18549 = vst [vmem:[#allocation209_spill] sm:$0xff] %v16572_v12  ;;  %v7061_v41 = vld [vmem:[#allocation7 + $0xdd8] sm:$0xff] }
0x156d   : > { %v16532_v17 = vpack.c.bf16 %v7016_v51, %v7014_v20  ;;  %v7022_v20 = vld [vmem:[#allocation7 + $0xca0] sm:$0xff]  ;;  %18553 = vst [vmem:[#allocation213_spill] sm:$0xff] %v16584_v23  ;;  %v16596_v8 = vpack.c.bf16 %v7061_v41, %v7059_v18 }
0x156e   : > { %13008 = vmatpush1.bf16.msra.mxu0 %v16452_v4  ;;  %v16518_v4 = vpack.c.bf16 %v7009_v45, %v7007_v55  ;;  %18532 = vst [vmem:[#allocation192_spill] sm:$0xff] %v16520_v42  ;;  %v7015_v55 = vld [vmem:[#allocation7 + $0xc68] sm:$0xff]  ;;  %v7017_v45 = vld [vmem:[#allocation7 + $0xc78] sm:$0xff]  ;;  %v16544_v30 = vpack.c.bf16 %v7024_v34, %v7022_v20  ;;  %v7030_v20 = vld [vmem:[#allocation7 + $0xce0] sm:$0xff] }
0x156f   : > { %v16530_v56 = vpack.c.bf16 %v7017_v45, %v7015_v55  ;;  %18536 = vst [vmem:[#allocation196_spill] sm:$0xff] %v16532_v17  ;;  %v7023_v55 = vld [vmem:[#allocation7 + $0xca8] sm:$0xff]  ;;  %v7025_v45 = vld [vmem:[#allocation7 + $0xcb8] sm:$0xff]  ;;  %v16556_v11 = vpack.c.bf16 %v7032_v29, %v7030_v20  ;;  %v7038_v20 = vld [vmem:[#allocation7 + $0xd20] sm:$0xff] }
0x1570   : > { %18531 = vst [vmem:[#allocation191_spill] sm:$0xff] %v16518_v4  ;;  %13014 = vmatprep.subr.bf16.mxu1 %v16518_v4  ;;  %v16542_v51 = vpack.c.bf16 %v7025_v45, %v7023_v55  ;;  %18540 = vst [vmem:[#allocation200_spill] sm:$0xff] %v16544_v30  ;;  %v7031_v55 = vld [vmem:[#allocation7 + $0xce8] sm:$0xff]  ;;  %v7033_v45 = vld [vmem:[#allocation7 + $0xcf8] sm:$0xff]  ;;  %v16568_v19 = vpack.c.bf16 %v7040_v6, %v7038_v20 }
0x1571   : > { %6831 = vmatmul.mubr.f32.vlgmr.msra.gmra.mrb[42].mxu0 %v15757_v2  ;;  %13016 = vmatpush1.bf16.msra.mxu1 %v16520_v42  ;;  %18535 = vst [vmem:[#allocation195_spill] sm:$0xff] %v16530_v56  ;;  %v16554_v34 = vpack.c.bf16 %v7033_v45, %v7031_v55  ;;  %18544 = vst [vmem:[#allocation204_spill] sm:$0xff] %v16556_v11  ;;  %v7039_v55 = vld [vmem:[#allocation7 + $0xd28] sm:$0xff]  ;;  %v7041_v45 = vld [vmem:[#allocation7 + $0xd38] sm:$0xff] }
0x1572   : > { %6912 = vmatprep.mubr.f32.mxu0 %v18400_v60  ;;  %13018 = vmatprep.subr.bf16.mxu1 %v16524_v22  ;;  %18539 = vst [vmem:[#allocation199_spill] sm:$0xff] %v16542_v51  ;;  %v16566_v29 = vpack.c.bf16 %v7041_v45, %v7039_v55  ;;  %18548 = vst [vmem:[#allocation208_spill] sm:$0xff] %v16568_v19  ;;  %v7047_v55 = vld [vmem:[#allocation7 + $0xd68] sm:$0xff]  ;;  %v7049_v45 = vld [vmem:[#allocation7 + $0xd78] sm:$0xff] }
0x1573   : > { %18543 = vst [vmem:[#allocation203_spill] sm:$0xff] %v16554_v34  ;;  %v16578_v6 = vpack.c.bf16 %v7049_v45, %v7047_v55  ;;  %v7046_v20 = vld [vmem:[#allocation7 + $0xd60] sm:$0xff]  ;;  %v7055_v55 = vld [vmem:[#allocation7 + $0xda8] sm:$0xff]  ;;  %v7057_v45 = vld [vmem:[#allocation7 + $0xdb8] sm:$0xff] }
0x1574   : > { %18547 = vst [vmem:[#allocation207_spill] sm:$0xff] %v16566_v29  ;;  %v16580_v54 = vpack.c.bf16 %v7048_v36, %v7046_v20  ;;  %v16590_v36 = vpack.c.bf16 %v7057_v45, %v7055_v55  ;;  %v7054_v20 = vld [vmem:[#allocation7 + $0xda0] sm:$0xff]  ;;  %18557 = vst [vmem:[#allocation217_spill] sm:$0xff] %v16596_v8  ;;  %v7063_v55 = vld [vmem:[#allocation7 + $0xde8] sm:$0xff] }
0x1575   : > { %13020 = vmatpush1.bf16.msra.mxu1 %v16526_v48  ;;  %18551 = vst [vmem:[#allocation211_spill] sm:$0xff] %v16578_v6  ;;  %v16592_v62 = vpack.c.bf16 %v7056_v21, %v7054_v20  ;;  %v7058_v9 = vld [vmem:[#allocation7 + $0xdc0] sm:$0xff]  ;;  %v7065_v45 = vld [vmem:[#allocation7 + $0xdf8] sm:$0xff] }
0x1576   : > { %13022 = vmatprep.subr.bf16.mxu1 %v16530_v56  ;;  %18552 = vst [vmem:[#allocation212_spill] sm:$0xff] %v16580_v54  ;;  %18555 = vst [vmem:[#allocation215_spill] sm:$0xff] %v16590_v36  ;;  %v16598_v28 = vpack.c.bf16 %v7060_v31, %v7058_v9  ;;  %v16602_v21 = vpack.c.bf16 %v7065_v45, %v7063_v55  ;;  %v7062_v20 = vld [vmem:[#allocation7 + $0xde0] sm:$0xff]  ;;  %v7378_v9 = vld [vmem:[#allocation7 + $0xe18] sm:$0xff] }
0x1577   : > { %18556 = vst [vmem:[#allocation216_spill] sm:$0xff] %v16592_v62  ;;  %v16604_v37 = vpack.c.bf16 %v7064_v0, %v7062_v20  ;;  %v11146_v41 = vld [vmem:[%s17792_s7 + $0x28] sm:$0xff]  ;;  %v7377_v20 = vld [vmem:[#allocation7 + $0xe10] sm:$0xff] }
0x1578   : > { %18558 = vst [vmem:[#allocation218_spill] sm:$0xff] %v16598_v28  ;;  %18559 = vst [vmem:[#allocation219_spill] sm:$0xff] %v16602_v21  ;;  %v7375_v45 = vld [vmem:[#allocation7 + $0xe00] sm:$0xff] }
0x1579   : > { %13024 = vmatpush1.bf16.msra.mxu1 %v16532_v17  ;;  %18560 = vst [vmem:[#allocation220_spill] sm:$0xff] %v16604_v37 }
0x157a   : > { %13026 = vmatprep.subr.bf16.mxu1 %v16536_v25 }
0x157d   : > { %13028 = vmatpush1.bf16.msra.mxu1 %v16538_v27 }
0x157e   : > { %13030 = vmatprep.subr.bf16.mxu1 %v16542_v51 }
0x1581   : > { %13032 = vmatpush1.bf16.msra.mxu1 %v16544_v30 }
0x1582   : > { %13034 = vmatprep.subr.bf16.mxu1 %v16548_v24 }
0x1585   : > { %13036 = vmatpush1.bf16.msra.mxu1 %v16550_v15 }
0x1586   : > { %13038 = vmatprep.subr.bf16.mxu1 %v16554_v34 }
0x1589   : > { %13040 = vmatpush1.bf16.msra.mxu1 %v16556_v11 }
0x158a   : > { %13042 = vmatprep.subr.bf16.mxu1 %v16560_v1 }
0x158d   : > { %13044 = vmatpush1.bf16.msra.mxu1 %v16562_v43 }
0x158e   : > { %13046 = vmatprep.subr.bf16.mxu1 %v16566_v29 }
0x1591   : > { %13048 = vmatpush1.bf16.msra.mxu1 %v16568_v19 }
0x1592   : > { %13050 = vmatprep.subr.bf16.mxu1 %v16572_v12 }
0x1595   : > { %13052 = vmatpush1.bf16.msra.mxu1 %v16574_v46 }
0x1596   : > { %13054 = vmatprep.subr.bf16.mxu1 %v16578_v6 }
0x1599   : > { %13056 = vmatpush1.bf16.msra.mxu1 %v16580_v54 }
0x159a   : > { %13058 = vmatprep.subr.bf16.mxu1 %v16584_v23 }
0x159d   : > { %13060 = vmatpush1.bf16.msra.mxu1 %v16586_v44 }
0x159e   : > { %13062 = vmatprep.subr.bf16.mxu1 %v16590_v36 }
0x15a1   : > { %13064 = vmatpush1.bf16.msra.mxu1 %v16592_v62 }
0x15a2   : > { %13066 = vmatprep.subr.bf16.mxu1 %v16596_v8 }
0x15a5   : > { %13068 = vmatpush1.bf16.msra.mxu1 %v16598_v28 }
0x15a6   : > { %13070 = vmatprep.subr.bf16.mxu1 %v16602_v21 }
0x15a9   : > { %13072 = vmatpush1.bf16.msra.mxu1 %v16604_v37 }
0x15ac   : > { %7131 = vmatmul.mubr.f32.vlgmr.msra.gmra.mrb[46].mxu1 %v16302_v32  ;;  %v11145_v32 = vld [vmem:[%s17791_s6 + $0x28] sm:$0xff] }
0x15ad   : > { %7503 = vmatprep.mubr.f32.mxu1 %v15748_v39 }
0x1644   : > { %v6832_v31 = vpop.f32.mrb[42].mxu0 }
0x1645   : > { %v6834_v18 = vpop.f32.mrb[43].mxu0 }
0x1646   : > { %11147 = vmatprep.subr.msk.mxu0 %vm4976_vm3, %v6834_v18  ;;  %v7380_v18 = vld [vmem:[#allocation7 + $0xe28] sm:$0xff] }
0x1647   : > { %11148 = vmatpush1.msk.msra.mxu0 %vm4976_vm3, %v6832_v31  ;;  %v16667_v31 = vpack.c.bf16 %v7377_v20, %v7375_v45  ;;  %v7383_v45 = vld [vmem:[#allocation7 + $0xe40] sm:$0xff]  ;;  %v7385_v20 = vld [vmem:[#allocation7 + $0xe50] sm:$0xff] }
0x1648   : > { %11149 = vmatmul.mubr.msk.f32.vlgmr.msra.gmra.mrb[32].mxu0 %vm4972_vm4, %v11146_v41  ;;  %11150 = vmatprep.subr.msk.mxu0 %vm4976_vm3, %v16510_v52  ;;  %v7376_v52 = vld [vmem:[#allocation7 + $0xe08] sm:$0xff]  ;;  %v7382_v41 = vld [vmem:[#allocation7 + $0xe38] sm:$0xff] }
0x1649   : > { %11151 = vmatpush1.msk.msra.mxu0 %vm4976_vm3, %v16508_v57  ;;  %6992 = vmatprep.mubr.f32.mxu0 %v18400_v60  ;;  %v16664_v55 = vpack.c.bf16 %v7378_v9, %v7376_v52  ;;  %18562 = vst [vmem:[#allocation222_spill] sm:$0xff] %v16667_v31  ;;  %v7384_v52 = vld [vmem:[#allocation7 + $0xe48] sm:$0xff]  ;;  %v7386_v9 = vld [vmem:[#allocation7 + $0xe58] sm:$0xff] }
0x164a   : > { %13074 = vmatprep.subr.bf16.mxu0 %v16512_v3  ;;  %v18634_v3 = vld [vmem:[#allocation22_spill] sm:$0xff] }
0x164b   : > { %18561 = vst [vmem:[#allocation221_spill] sm:$0xff] %v16664_v55  ;;  %13138 = vmatprep.subr.bf16.mxu1 %v16664_v55 }
0x164c   : > { %13140 = vmatpush1.bf16.msra.mxu1 %v16667_v31 }
0x1650   : > { %11152 = vmatmul.mubr.msk.f32.vlgmr.msra.gmra.mrb[32].mxu0 %vm4972_vm4, %v11145_v32  ;;  %v16670_v32 = vpack.c.bf16 %v7382_v41, %v7380_v18  ;;  %v7388_v18 = vld [vmem:[#allocation7 + $0xe68] sm:$0xff]  ;;  %v7390_v41 = vld [vmem:[#allocation7 + $0xe78] sm:$0xff] }
0x1651   : > { %13076 = vmatpush1.bf16.msra.mxu0 %v16515_v40  ;;  %7203 = vmatprep.mubr.f32.mxu0 %v15753_v50 }
0x1652   : > { %13078 = vmatprep.subr.bf16.mxu0 %v16518_v4  ;;  %18563 = vst [vmem:[#allocation223_spill] sm:$0xff] %v16670_v32  ;;  %13142 = vmatprep.subr.bf16.mxu1 %v16670_v32  ;;  %v7437_v4 = vld [vmem:[#allocation7 + $0xff0] sm:$0xff] }
0x1655   : > { %13080 = vmatpush1.bf16.msra.mxu0 %v16520_v42 }
0x1656   : > { %13082 = vmatprep.subr.bf16.mxu0 %v16524_v22  ;;  %v7433_v22 = vld [vmem:[#allocation7 + $0xfd0] sm:$0xff] }
0x1659   : > { %13084 = vmatpush1.bf16.msra.mxu0 %v16526_v48 }
0x165a   : > { %13086 = vmatprep.subr.bf16.mxu0 %v16530_v56  ;;  %v7429_v56 = vld [vmem:[#allocation7 + $0xfb0] sm:$0xff] }
0x165d   : > { %13088 = vmatpush1.bf16.msra.mxu0 %v16532_v17 }
0x165e   : > { %13090 = vmatprep.subr.bf16.mxu0 %v16536_v25  ;;  %v7425_v25 = vld [vmem:[#allocation7 + $0xf90] sm:$0xff] }
0x1661   : > { %13092 = vmatpush1.bf16.msra.mxu0 %v16538_v27 }
0x1662   : > { %13094 = vmatprep.subr.bf16.mxu0 %v16542_v51  ;;  %v7421_v51 = vld [vmem:[#allocation7 + $0xf70] sm:$0xff] }
0x1665   : > { %13096 = vmatpush1.bf16.msra.mxu0 %v16544_v30 }
0x1666   : > { %13098 = vmatprep.subr.bf16.mxu0 %v16548_v24  ;;  %v7417_v24 = vld [vmem:[#allocation7 + $0xf50] sm:$0xff] }
0x1669   : > { %13100 = vmatpush1.bf16.msra.mxu0 %v16550_v15 }
0x166a   : > { %13102 = vmatprep.subr.bf16.mxu0 %v16554_v34  ;;  %v7413_v34 = vld [vmem:[#allocation7 + $0xf30] sm:$0xff] }
0x166d   : > { %13104 = vmatpush1.bf16.msra.mxu0 %v16556_v11 }
0x166e   : > { %13106 = vmatprep.subr.bf16.mxu0 %v16560_v1  ;;  %v7409_v1 = vld [vmem:[#allocation7 + $0xf10] sm:$0xff] }
0x1671   : > { %13108 = vmatpush1.bf16.msra.mxu0 %v16562_v43 }
0x1672   : > { %13110 = vmatprep.subr.bf16.mxu0 %v16566_v29  ;;  %v7405_v29 = vld [vmem:[#allocation7 + $0xef0] sm:$0xff] }
0x1675   : > { %13112 = vmatpush1.bf16.msra.mxu0 %v16568_v19 }
0x1676   : > { %13114 = vmatprep.subr.bf16.mxu0 %v16572_v12  ;;  %v7401_v12 = vld [vmem:[#allocation7 + $0xed0] sm:$0xff] }
0x1679   : > { %13116 = vmatpush1.bf16.msra.mxu0 %v16574_v46 }
0x167a   : > { %13118 = vmatprep.subr.bf16.mxu0 %v16578_v6  ;;  %v7397_v6 = vld [vmem:[#allocation7 + $0xeb0] sm:$0xff] }
0x167d   : > { %13120 = vmatpush1.bf16.msra.mxu0 %v16580_v54 }
0x167e   : > { %13122 = vmatprep.subr.bf16.mxu0 %v16584_v23  ;;  %v7393_v23 = vld [vmem:[#allocation7 + $0xe90] sm:$0xff] }
0x167f   : > { %v16660_v0 = vpop.f32.mrb[46].mxu1 }
0x1680   : > { %v16662_v57 = vpop.f32.mrb[47].mxu1 }
0x1681   : > { %13124 = vmatpush1.bf16.msra.mxu0 %v16586_v44 }
0x1682   : > { %13126 = vmatprep.subr.bf16.mxu0 %v16590_v36  ;;  %v7389_v36 = vld [vmem:[#allocation7 + $0xe70] sm:$0xff] }
0x1685   : > { %13128 = vmatpush1.bf16.msra.mxu0 %v16592_v62  ;;  %v16678_v62 = vpack.c.bf16 %v7385_v20, %v7383_v45  ;;  %v7391_v20 = vld [vmem:[#allocation7 + $0xe80] sm:$0xff] }
0x1686   : > { %13130 = vmatprep.subr.bf16.mxu0 %v16596_v8  ;;  %v16676_v8 = vpack.c.bf16 %v7386_v9, %v7384_v52  ;;  %v7392_v52 = vld [vmem:[#allocation7 + $0xe88] sm:$0xff]  ;;  %v7394_v9 = vld [vmem:[#allocation7 + $0xe98] sm:$0xff]  ;;  %v16690_v54 = vpack.c.bf16 %v7393_v23, %v7391_v20  ;;  %v7399_v20 = vld [vmem:[#allocation7 + $0xec0] sm:$0xff] }
0x1687   : > { %18566 = vst [vmem:[#allocation226_spill] sm:$0xff] %v16678_v62  ;;  %v16688_v45 = vpack.c.bf16 %v7394_v9, %v7392_v52  ;;  %v7400_v52 = vld [vmem:[#allocation7 + $0xec8] sm:$0xff]  ;;  %v7402_v9 = vld [vmem:[#allocation7 + $0xed8] sm:$0xff]  ;;  %v16702_v19 = vpack.c.bf16 %v7401_v12, %v7399_v20  ;;  %v7407_v20 = vld [vmem:[#allocation7 + $0xf00] sm:$0xff] }
0x1688   : > { %18565 = vst [vmem:[#allocation225_spill] sm:$0xff] %v16676_v8  ;;  %18570 = vst [vmem:[#allocation230_spill] sm:$0xff] %v16690_v54  ;;  %v16700_v23 = vpack.c.bf16 %v7402_v9, %v7400_v52  ;;  %v7408_v52 = vld [vmem:[#allocation7 + $0xf08] sm:$0xff]  ;;  %v7410_v9 = vld [vmem:[#allocation7 + $0xf18] sm:$0xff]  ;;  %v16714_v11 = vpack.c.bf16 %v7409_v1, %v7407_v20 }
0x1689   : > { %13132 = vmatpush1.bf16.msra.mxu0 %v16598_v28  ;;  %18569 = vst [vmem:[#allocation229_spill] sm:$0xff] %v16688_v45  ;;  %18574 = vst [vmem:[#allocation234_spill] sm:$0xff] %v16702_v19  ;;  %v16712_v12 = vpack.c.bf16 %v7410_v9, %v7408_v52  ;;  %v7416_v52 = vld [vmem:[#allocation7 + $0xf48] sm:$0xff]  ;;  %v7418_v9 = vld [vmem:[#allocation7 + $0xf58] sm:$0xff] }
0x168a   : > { %13134 = vmatprep.subr.bf16.mxu0 %v16602_v21  ;;  %v7381_v21 = vld [vmem:[#allocation7 + $0xe30] sm:$0xff]  ;;  %18573 = vst [vmem:[#allocation233_spill] sm:$0xff] %v16700_v23  ;;  %18578 = vst [vmem:[#allocation238_spill] sm:$0xff] %v16714_v11  ;;  %v16724_v1 = vpack.c.bf16 %v7418_v9, %v7416_v52  ;;  %v7415_v20 = vld [vmem:[#allocation7 + $0xf40] sm:$0xff] }
0x168b   : > { %18577 = vst [vmem:[#allocation237_spill] sm:$0xff] %v16712_v12  ;;  %v16726_v30 = vpack.c.bf16 %v7417_v24, %v7415_v20  ;;  %v7424_v52 = vld [vmem:[#allocation7 + $0xf88] sm:$0xff]  ;;  %v7426_v9 = vld [vmem:[#allocation7 + $0xf98] sm:$0xff]  ;;  %v7423_v20 = vld [vmem:[#allocation7 + $0xf80] sm:$0xff] }
0x168c   : > { %18581 = vst [vmem:[#allocation241_spill] sm:$0xff] %v16724_v1  ;;  %v16736_v24 = vpack.c.bf16 %v7426_v9, %v7424_v52  ;;  %v16738_v17 = vpack.c.bf16 %v7425_v25, %v7423_v20  ;;  %v7432_v52 = vld [vmem:[#allocation7 + $0xfc8] sm:$0xff]  ;;  %v7434_v9 = vld [vmem:[#allocation7 + $0xfd8] sm:$0xff]  ;;  %v7431_v20 = vld [vmem:[#allocation7 + $0xfc0] sm:$0xff] }
0x168d   : > { %13136 = vmatpush1.bf16.msra.mxu0 %v16604_v37  ;;  %v7379_v37 = vld [vmem:[#allocation7 + $0xe20] sm:$0xff]  ;;  %18582 = vst [vmem:[#allocation242_spill] sm:$0xff] %v16726_v30  ;;  %v16748_v25 = vpack.c.bf16 %v7434_v9, %v7432_v52  ;;  %v16750_v42 = vpack.c.bf16 %v7433_v22, %v7431_v20  ;;  %v11154_v20 = vld [vmem:[%s17792_s7 + $0x30] sm:$0xff] }
0x168e   : > { %v16672_v28 = vpack.c.bf16 %v7381_v21, %v7379_v37  ;;  %v16682_v37 = vpack.c.bf16 %v7390_v41, %v7388_v18  ;;  %v7387_v21 = vld [vmem:[#allocation7 + $0xe60] sm:$0xff]  ;;  %v7396_v18 = vld [vmem:[#allocation7 + $0xea8] sm:$0xff]  ;;  %v7398_v41 = vld [vmem:[#allocation7 + $0xeb8] sm:$0xff]  ;;  %18585 = vst [vmem:[#allocation245_spill] sm:$0xff] %v16736_v24 }
0x168f   : > { %v16684_v44 = vpack.c.bf16 %v7389_v36, %v7387_v21  ;;  %v16694_v36 = vpack.c.bf16 %v7398_v41, %v7396_v18  ;;  %v7395_v21 = vld [vmem:[#allocation7 + $0xea0] sm:$0xff]  ;;  %v7404_v18 = vld [vmem:[#allocation7 + $0xee8] sm:$0xff]  ;;  %v7406_v41 = vld [vmem:[#allocation7 + $0xef8] sm:$0xff]  ;;  %18586 = vst [vmem:[#allocation246_spill] sm:$0xff] %v16738_v17 }
0x1690   : > { %7204 = vmatmul.mubr.f32.vlgmr.msra.gmra.mrb[44].mxu0 %v15757_v2  ;;  %18564 = vst [vmem:[#allocation224_spill] sm:$0xff] %v16672_v28  ;;  %13144 = vmatpush1.bf16.msra.mxu1 %v16672_v28  ;;  %18567 = vst [vmem:[#allocation227_spill] sm:$0xff] %v16682_v37  ;;  %v16696_v46 = vpack.c.bf16 %v7397_v6, %v7395_v21  ;;  %v16706_v6 = vpack.c.bf16 %v7406_v41, %v7404_v18  ;;  %v7403_v21 = vld [vmem:[#allocation7 + $0xee0] sm:$0xff]  ;;  %v7412_v18 = vld [vmem:[#allocation7 + $0xf28] sm:$0xff] }
0x1691   : > { %7285 = vmatprep.mubr.f32.mxu0 %v18400_v60  ;;  %13146 = vmatprep.subr.bf16.mxu1 %v16676_v8  ;;  %18568 = vst [vmem:[#allocation228_spill] sm:$0xff] %v16684_v44  ;;  %18571 = vst [vmem:[#allocation231_spill] sm:$0xff] %v16694_v36  ;;  %v16708_v43 = vpack.c.bf16 %v7405_v29, %v7403_v21  ;;  %v7414_v41 = vld [vmem:[#allocation7 + $0xf38] sm:$0xff]  ;;  %v7411_v21 = vld [vmem:[#allocation7 + $0xf20] sm:$0xff] }
0x1692   : > { %18572 = vst [vmem:[#allocation232_spill] sm:$0xff] %v16696_v46  ;;  %18575 = vst [vmem:[#allocation235_spill] sm:$0xff] %v16706_v6  ;;  %v16718_v29 = vpack.c.bf16 %v7414_v41, %v7412_v18  ;;  %v16720_v15 = vpack.c.bf16 %v7413_v34, %v7411_v21  ;;  %v7420_v18 = vld [vmem:[#allocation7 + $0xf68] sm:$0xff]  ;;  %v7422_v41 = vld [vmem:[#allocation7 + $0xf78] sm:$0xff] }
0x1693   : > { %18576 = vst [vmem:[#allocation236_spill] sm:$0xff] %v16708_v43  ;;  %v16730_v34 = vpack.c.bf16 %v7422_v41, %v7420_v18  ;;  %v7419_v21 = vld [vmem:[#allocation7 + $0xf60] sm:$0xff]  ;;  %v7428_v18 = vld [vmem:[#allocation7 + $0xfa8] sm:$0xff]  ;;  %v7430_v41 = vld [vmem:[#allocation7 + $0xfb8] sm:$0xff] }
0x1694   : > { %13148 = vmatpush1.bf16.msra.mxu1 %v16678_v62  ;;  %18579 = vst [vmem:[#allocation239_spill] sm:$0xff] %v16718_v29  ;;  %18580 = vst [vmem:[#allocation240_spill] sm:$0xff] %v16720_v15  ;;  %v16732_v27 = vpack.c.bf16 %v7421_v51, %v7419_v21  ;;  %v16742_v51 = vpack.c.bf16 %v7430_v41, %v7428_v18  ;;  %v7427_v21 = vld [vmem:[#allocation7 + $0xfa0] sm:$0xff]  ;;  %v7436_v18 = vld [vmem:[#allocation7 + $0xfe8] sm:$0xff] }
0x1695   : > { %13150 = vmatprep.subr.bf16.mxu1 %v16682_v37  ;;  %18583 = vst [vmem:[#allocation243_spill] sm:$0xff] %v16730_v34  ;;  %v16744_v48 = vpack.c.bf16 %v7429_v56, %v7427_v21  ;;  %18589 = vst [vmem:[#allocation249_spill] sm:$0xff] %v16748_v25  ;;  %v7438_v41 = vld [vmem:[#allocation7 + $0xff8] sm:$0xff]  ;;  %v7435_v21 = vld [vmem:[#allocation7 + $0xfe0] sm:$0xff] }
0x1696   : > { %18584 = vst [vmem:[#allocation244_spill] sm:$0xff] %v16732_v27  ;;  %18587 = vst [vmem:[#allocation247_spill] sm:$0xff] %v16742_v51  ;;  %v16754_v56 = vpack.c.bf16 %v7438_v41, %v7436_v18  ;;  %v16756_v40 = vpack.c.bf16 %v7437_v4, %v7435_v21  ;;  %v16761_v52 = vld [vmem:[%s15734_s23] sm:$0xff] }
0x1697   : > { %18588 = vst [vmem:[#allocation248_spill] sm:$0xff] %v16744_v48  ;;  %18590 = vst [vmem:[#allocation250_spill] sm:$0xff] %v16750_v42  ;;  %v7751_v18 = vld [vmem:[#allocation7 + $0x1018] sm:$0xff]  ;;  %v7748_v21 = vld [vmem:[#allocation7 + $0x1000] sm:$0xff] }
0x1698   : > { %13152 = vmatpush1.bf16.msra.mxu1 %v16684_v44  ;;  %18591 = vst [vmem:[#allocation251_spill] sm:$0xff] %v16754_v56  ;;  %18592 = vst [vmem:[#allocation252_spill] sm:$0xff] %v16756_v40 }
0x1699   : > { %13154 = vmatprep.subr.bf16.mxu1 %v16688_v45  ;;  %18593 = vst [vmem:[#allocation253_spill] sm:$0xff] %v16761_v52 }
0x169c   : > { %13156 = vmatpush1.bf16.msra.mxu1 %v16690_v54 }
0x169d   : > { %13158 = vmatprep.subr.bf16.mxu1 %v16694_v36 }
0x16a0   : > { %13160 = vmatpush1.bf16.msra.mxu1 %v16696_v46 }
0x16a1   : > { %13162 = vmatprep.subr.bf16.mxu1 %v16700_v23 }
0x16a4   : > { %13164 = vmatpush1.bf16.msra.mxu1 %v16702_v19 }
0x16a5   : > { %13166 = vmatprep.subr.bf16.mxu1 %v16706_v6 }
0x16a8   : > { %13168 = vmatpush1.bf16.msra.mxu1 %v16708_v43 }
0x16a9   : > { %13170 = vmatprep.subr.bf16.mxu1 %v16712_v12 }
0x16ac   : > { %13172 = vmatpush1.bf16.msra.mxu1 %v16714_v11 }
0x16ad   : > { %13174 = vmatprep.subr.bf16.mxu1 %v16718_v29 }
0x16b0   : > { %13176 = vmatpush1.bf16.msra.mxu1 %v16720_v15 }
0x16b1   : > { %13178 = vmatprep.subr.bf16.mxu1 %v16724_v1 }
0x16b4   : > { %13180 = vmatpush1.bf16.msra.mxu1 %v16726_v30 }
0x16b5   : > { %13182 = vmatprep.subr.bf16.mxu1 %v16730_v34 }
0x16b8   : > { %13184 = vmatpush1.bf16.msra.mxu1 %v16732_v27 }
0x16b9   : > { %13186 = vmatprep.subr.bf16.mxu1 %v16736_v24 }
0x16bc   : > { %13188 = vmatpush1.bf16.msra.mxu1 %v16738_v17 }
0x16bd   : > { %13190 = vmatprep.subr.bf16.mxu1 %v16742_v51 }
0x16c0   : > { %13192 = vmatpush1.bf16.msra.mxu1 %v16744_v48 }
0x16c1   : > { %13194 = vmatprep.subr.bf16.mxu1 %v16748_v25 }
0x16c4   : > { %13196 = vmatpush1.bf16.msra.mxu1 %v16750_v42 }
0x16c5   : > { %13198 = vmatprep.subr.bf16.mxu1 %v16754_v56 }
0x16c8   : > { %13200 = vmatpush1.bf16.msra.mxu1 %v16756_v40 }
0x16cb   : > { %7504 = vmatmul.mubr.f32.vlgmr.msra.gmra.mrb[48].mxu1 %v16761_v52 }
0x16cc   : > { %7876 = vmatprep.mubr.f32.mxu1 %v15748_v39  ;;  %v11153_v39 = vld [vmem:[%s17791_s6 + $0x30] sm:$0xff] }
0x1763   : > { %v7205_v22 = vpop.f32.mrb[44].mxu0 }
0x1764   : > { %v7207_v9 = vpop.f32.mrb[45].mxu0 }
0x1765   : > { %11155 = vmatprep.subr.msk.mxu0 %vm4976_vm3, %v7207_v9 }
0x1766   : > { %11156 = vmatpush1.msk.msra.mxu0 %vm4976_vm3, %v7205_v22  ;;  %v7750_v22 = vld [vmem:[#allocation7 + $0x1010] sm:$0xff] }
0x1767   : > { %11157 = vmatmul.mubr.msk.f32.vlgmr.msra.gmra.mrb[32].mxu0 %vm4972_vm4, %v11154_v20  ;;  %11158 = vmatprep.subr.msk.mxu0 %vm4976_vm3, %v16662_v57  ;;  %v7749_v57 = vld [vmem:[#allocation7 + $0x1008] sm:$0xff]  ;;  %v16822_v9 = vpack.c.bf16 %v7750_v22, %v7748_v21  ;;  %v7756_v21 = vld [vmem:[#allocation7 + $0x1040] sm:$0xff]  ;;  %v7758_v22 = vld [vmem:[#allocation7 + $0x1050] sm:$0xff] }
0x1768   : > { %11159 = vmatpush1.msk.msra.mxu0 %vm4976_vm3, %v16660_v0  ;;  %7365 = vmatprep.mubr.f32.mxu0 %v18400_v60  ;;  %v16819_v41 = vpack.c.bf16 %v7751_v18, %v7749_v57  ;;  %v7753_v20 = vld [vmem:[#allocation7 + $0x1028] sm:$0xff]  ;;  %v7759_v18 = vld [vmem:[#allocation7 + $0x1058] sm:$0xff] }
0x1769   : > { %13202 = vmatprep.subr.bf16.mxu0 %v16664_v55  ;;  %18595 = vst [vmem:[#allocation255_spill] sm:$0xff] %v16822_v9  ;;  %v7757_v57 = vld [vmem:[#allocation7 + $0x1048] sm:$0xff] }
0x176a   : > { %18594 = vst [vmem:[#allocation254_spill] sm:$0xff] %v16819_v41  ;;  %13266 = vmatprep.subr.bf16.mxu1 %v16819_v41 }
0x176b   : > { %13268 = vmatpush1.bf16.msra.mxu1 %v16822_v9 }
0x176f   : > { %11160 = vmatmul.mubr.msk.f32.vlgmr.msra.gmra.mrb[32].mxu0 %vm4972_vm4, %v11153_v39  ;;  %v7755_v39 = vld [vmem:[#allocation7 + $0x1038] sm:$0xff] }
0x1770   : > { %13204 = vmatpush1.bf16.msra.mxu0 %v16667_v31  ;;  %7576 = vmatprep.mubr.f32.mxu0 %v15753_v50  ;;  %v7810_v31 = vld [vmem:[#allocation7 + $0x11f0] sm:$0xff] }
0x1771   : > { %13206 = vmatprep.subr.bf16.mxu0 %v16670_v32 }
0x1774   : > { %13208 = vmatpush1.bf16.msra.mxu0 %v16672_v28  ;;  %v7806_v28 = vld [vmem:[#allocation7 + $0x11d0] sm:$0xff] }
0x1775   : > { %13210 = vmatprep.subr.bf16.mxu0 %v16676_v8 }
0x1778   : > { %13212 = vmatpush1.bf16.msra.mxu0 %v16678_v62  ;;  %v7802_v62 = vld [vmem:[#allocation7 + $0x11b0] sm:$0xff] }
0x1779   : > { %13214 = vmatprep.subr.bf16.mxu0 %v16682_v37 }
0x177c   : > { %13216 = vmatpush1.bf16.msra.mxu0 %v16684_v44  ;;  %v7798_v44 = vld [vmem:[#allocation7 + $0x1190] sm:$0xff] }
0x177d   : > { %13218 = vmatprep.subr.bf16.mxu0 %v16688_v45 }
0x1780   : > { %13220 = vmatpush1.bf16.msra.mxu0 %v16690_v54  ;;  %v7794_v54 = vld [vmem:[#allocation7 + $0x1170] sm:$0xff] }
0x1781   : > { %13222 = vmatprep.subr.bf16.mxu0 %v16694_v36 }
0x1784   : > { %13224 = vmatpush1.bf16.msra.mxu0 %v16696_v46  ;;  %v7790_v46 = vld [vmem:[#allocation7 + $0x1150] sm:$0xff] }
0x1785   : > { %13226 = vmatprep.subr.bf16.mxu0 %v16700_v23 }
0x1788   : > { %13228 = vmatpush1.bf16.msra.mxu0 %v16702_v19  ;;  %v7786_v19 = vld [vmem:[#allocation7 + $0x1130] sm:$0xff] }
0x1789   : > { %13230 = vmatprep.subr.bf16.mxu0 %v16706_v6 }
0x178c   : > { %13232 = vmatpush1.bf16.msra.mxu0 %v16708_v43  ;;  %v7782_v43 = vld [vmem:[#allocation7 + $0x1110] sm:$0xff] }
0x178d   : > { %13234 = vmatprep.subr.bf16.mxu0 %v16712_v12 }
0x1790   : > { %13236 = vmatpush1.bf16.msra.mxu0 %v16714_v11  ;;  %v7778_v11 = vld [vmem:[#allocation7 + $0x10f0] sm:$0xff] }
0x1791   : > { %13238 = vmatprep.subr.bf16.mxu0 %v16718_v29 }
0x1794   : > { %13240 = vmatpush1.bf16.msra.mxu0 %v16720_v15  ;;  %v7774_v15 = vld [vmem:[#allocation7 + $0x10d0] sm:$0xff] }
0x1795   : > { %13242 = vmatprep.subr.bf16.mxu0 %v16724_v1 }
0x1798   : > { %13244 = vmatpush1.bf16.msra.mxu0 %v16726_v30  ;;  %v7770_v30 = vld [vmem:[#allocation7 + $0x10b0] sm:$0xff] }
0x1799   : > { %13246 = vmatprep.subr.bf16.mxu0 %v16730_v34 }
0x179c   : > { %13248 = vmatpush1.bf16.msra.mxu0 %v16732_v27  ;;  %v7766_v27 = vld [vmem:[#allocation7 + $0x1090] sm:$0xff] }
0x179d   : > { %13250 = vmatprep.subr.bf16.mxu0 %v16736_v24 }
0x179e   : > { %v16815_v4 = vpop.f32.mrb[48].mxu1 }
0x179f   : > { %v16817_v0 = vpop.f32.mrb[49].mxu1 }
0x17a0   : > { %13252 = vmatpush1.bf16.msra.mxu0 %v16738_v17  ;;  %v7762_v17 = vld [vmem:[#allocation7 + $0x1070] sm:$0xff] }
0x17a1   : > { %13254 = vmatprep.subr.bf16.mxu0 %v16742_v51  ;;  %v16833_v51 = vpack.c.bf16 %v7758_v22, %v7756_v21  ;;  %v7764_v22 = vld [vmem:[#allocation7 + $0x1080] sm:$0xff] }
0x17a2   : > { %v16845_v34 = vpack.c.bf16 %v7766_v27, %v7764_v22  ;;  %v7772_v22 = vld [vmem:[#allocation7 + $0x10c0] sm:$0xff] }
0x17a3   : > { %18599 = vst [vmem:[#allocation259_spill] sm:$0xff] %v16833_v51  ;;  %v16857_v29 = vpack.c.bf16 %v7774_v15, %v7772_v22  ;;  %v7780_v22 = vld [vmem:[#allocation7 + $0x1100] sm:$0xff] }
0x17a4   : > { %13256 = vmatpush1.bf16.msra.mxu0 %v16744_v48  ;;  %v16831_v48 = vpack.c.bf16 %v7759_v18, %v7757_v57  ;;  %v7765_v57 = vld [vmem:[#allocation7 + $0x1088] sm:$0xff]  ;;  %v7767_v18 = vld [vmem:[#allocation7 + $0x1098] sm:$0xff]  ;;  %18603 = vst [vmem:[#allocation263_spill] sm:$0xff] %v16845_v34  ;;  %v16869_v6 = vpack.c.bf16 %v7782_v43, %v7780_v22  ;;  %v7788_v22 = vld [vmem:[#allocation7 + $0x1140] sm:$0xff] }
0x17a5   : > { %13258 = vmatprep.subr.bf16.mxu0 %v16748_v25  ;;  %v16843_v21 = vpack.c.bf16 %v7767_v18, %v7765_v57  ;;  %v7773_v57 = vld [vmem:[#allocation7 + $0x10c8] sm:$0xff]  ;;  %v7775_v18 = vld [vmem:[#allocation7 + $0x10d8] sm:$0xff]  ;;  %18607 = vst [vmem:[#allocation267_spill] sm:$0xff] %v16857_v29  ;;  %v16881_v36 = vpack.c.bf16 %v7790_v46, %v7788_v22  ;;  %v7796_v22 = vld [vmem:[#allocation7 + $0x1180] sm:$0xff] }
0x17a6   : > { %18598 = vst [vmem:[#allocation258_spill] sm:$0xff] %v16831_v48  ;;  %v16855_v27 = vpack.c.bf16 %v7775_v18, %v7773_v57  ;;  %v7781_v57 = vld [vmem:[#allocation7 + $0x1108] sm:$0xff]  ;;  %v7783_v18 = vld [vmem:[#allocation7 + $0x1118] sm:$0xff]  ;;  %18611 = vst [vmem:[#allocation271_spill] sm:$0xff] %v16869_v6  ;;  %v16893_v37 = vpack.c.bf16 %v7798_v44, %v7796_v22 }
0x17a7   : > { %18602 = vst [vmem:[#allocation262_spill] sm:$0xff] %v16843_v21  ;;  %v16867_v15 = vpack.c.bf16 %v7783_v18, %v7781_v57  ;;  %v7789_v57 = vld [vmem:[#allocation7 + $0x1148] sm:$0xff]  ;;  %v7791_v18 = vld [vmem:[#allocation7 + $0x1158] sm:$0xff]  ;;  %18615 = vst [vmem:[#allocation275_spill] sm:$0xff] %v16881_v36 }
0x17a8   : > { %13260 = vmatpush1.bf16.msra.mxu0 %v16750_v42  ;;  %v7754_v42 = vld [vmem:[#allocation7 + $0x1030] sm:$0xff]  ;;  %18606 = vst [vmem:[#allocation266_spill] sm:$0xff] %v16855_v27  ;;  %v16879_v43 = vpack.c.bf16 %v7791_v18, %v7789_v57  ;;  %v7797_v57 = vld [vmem:[#allocation7 + $0x1188] sm:$0xff]  ;;  %v7799_v18 = vld [vmem:[#allocation7 + $0x1198] sm:$0xff] }
0x17a9   : > { %13262 = vmatprep.subr.bf16.mxu0 %v16754_v56  ;;  %v7752_v56 = vld [vmem:[#allocation7 + $0x1020] sm:$0xff]  ;;  %18610 = vst [vmem:[#allocation270_spill] sm:$0xff] %v16867_v15  ;;  %v16891_v46 = vpack.c.bf16 %v7799_v18, %v7797_v57  ;;  %18619 = vst [vmem:[#allocation279_spill] sm:$0xff] %v16893_v37  ;;  %v7805_v57 = vld [vmem:[#allocation7 + $0x11c8] sm:$0xff] }
0x17aa   : > { %v16827_v25 = vpack.c.bf16 %v7754_v42, %v7752_v56  ;;  %v7760_v56 = vld [vmem:[#allocation7 + $0x1060] sm:$0xff]  ;;  %18614 = vst [vmem:[#allocation274_spill] sm:$0xff] %v16879_v43  ;;  %v7807_v18 = vld [vmem:[#allocation7 + $0x11d8] sm:$0xff] }
0x17ab   : > { %v16839_v24 = vpack.c.bf16 %v7762_v17, %v7760_v56  ;;  %v7768_v56 = vld [vmem:[#allocation7 + $0x10a0] sm:$0xff]  ;;  %18618 = vst [vmem:[#allocation278_spill] sm:$0xff] %v16891_v46  ;;  %v16903_v44 = vpack.c.bf16 %v7807_v18, %v7805_v57  ;;  %v18628_v57 = vld [vmem:[#allocation16_spill] sm:$0xff] }
0x17ac   : > { %13264 = vmatpush1.bf16.msra.mxu0 %v16756_v40  ;;  %v16825_v40 = vpack.c.bf16 %v7755_v39, %v7753_v20  ;;  %18597 = vst [vmem:[#allocation257_spill] sm:$0xff] %v16827_v25  ;;  %v7761_v20 = vld [vmem:[#allocation7 + $0x1068] sm:$0xff]  ;;  %v7763_v39 = vld [vmem:[#allocation7 + $0x1078] sm:$0xff]  ;;  %v16851_v1 = vpack.c.bf16 %v7770_v30, %v7768_v56  ;;  %v7776_v56 = vld [vmem:[#allocation7 + $0x10e0] sm:$0xff] }
0x17ad   : > { %v16837_v42 = vpack.c.bf16 %v7763_v39, %v7761_v20  ;;  %18601 = vst [vmem:[#allocation261_spill] sm:$0xff] %v16839_v24  ;;  %v7769_v20 = vld [vmem:[#allocation7 + $0x10a8] sm:$0xff]  ;;  %v7771_v39 = vld [vmem:[#allocation7 + $0x10b8] sm:$0xff]  ;;  %v16863_v12 = vpack.c.bf16 %v7778_v11, %v7776_v56  ;;  %v7784_v56 = vld [vmem:[#allocation7 + $0x1120] sm:$0xff] }
0x17ae   : > { %18596 = vst [vmem:[#allocation256_spill] sm:$0xff] %v16825_v40  ;;  %13270 = vmatprep.subr.bf16.mxu1 %v16825_v40  ;;  %v16849_v17 = vpack.c.bf16 %v7771_v39, %v7769_v20  ;;  %18605 = vst [vmem:[#allocation265_spill] sm:$0xff] %v16851_v1  ;;  %v7777_v20 = vld [vmem:[#allocation7 + $0x10e8] sm:$0xff]  ;;  %v7779_v39 = vld [vmem:[#allocation7 + $0x10f8] sm:$0xff]  ;;  %v16875_v23 = vpack.c.bf16 %v7786_v19, %v7784_v56 }
0x17af   : > { %7577 = vmatmul.mubr.f32.vlgmr.msra.gmra.mrb[46].mxu0 %v15757_v2  ;;  %13272 = vmatpush1.bf16.msra.mxu1 %v16827_v25  ;;  %18600 = vst [vmem:[#allocation260_spill] sm:$0xff] %v16837_v42  ;;  %v16861_v30 = vpack.c.bf16 %v7779_v39, %v7777_v20  ;;  %18609 = vst [vmem:[#allocation269_spill] sm:$0xff] %v16863_v12  ;;  %v7785_v20 = vld [vmem:[#allocation7 + $0x1128] sm:$0xff]  ;;  %v7787_v39 = vld [vmem:[#allocation7 + $0x1138] sm:$0xff] }
0x17b0   : > { %7658 = vmatprep.mubr.f32.mxu0 %v18400_v60  ;;  %13274 = vmatprep.subr.bf16.mxu1 %v16831_v48  ;;  %18604 = vst [vmem:[#allocation264_spill] sm:$0xff] %v16849_v17  ;;  %v16873_v11 = vpack.c.bf16 %v7787_v39, %v7785_v20  ;;  %18613 = vst [vmem:[#allocation273_spill] sm:$0xff] %v16875_v23  ;;  %v7793_v20 = vld [vmem:[#allocation7 + $0x1168] sm:$0xff]  ;;  %v7795_v39 = vld [vmem:[#allocation7 + $0x1178] sm:$0xff] }
0x17b1   : > { %18608 = vst [vmem:[#allocation268_spill] sm:$0xff] %v16861_v30  ;;  %v16885_v19 = vpack.c.bf16 %v7795_v39, %v7793_v20  ;;  %v7792_v56 = vld [vmem:[#allocation7 + $0x1160] sm:$0xff]  ;;  %v7801_v20 = vld [vmem:[#allocation7 + $0x11a8] sm:$0xff]  ;;  %v7803_v39 = vld [vmem:[#allocation7 + $0x11b8] sm:$0xff] }
0x17b2   : > { %18612 = vst [vmem:[#allocation272_spill] sm:$0xff] %v16873_v11  ;;  %v16887_v45 = vpack.c.bf16 %v7794_v54, %v7792_v56  ;;  %v16897_v54 = vpack.c.bf16 %v7803_v39, %v7801_v20  ;;  %v7800_v56 = vld [vmem:[#allocation7 + $0x11a0] sm:$0xff]  ;;  %18622 = vst [vmem:[#allocation282_spill] sm:$0xff] %v16903_v44  ;;  %v7809_v20 = vld [vmem:[#allocation7 + $0x11e8] sm:$0xff] }
0x17b3   : > { %13276 = vmatpush1.bf16.msra.mxu1 %v16833_v51  ;;  %18616 = vst [vmem:[#allocation276_spill] sm:$0xff] %v16885_v19  ;;  %v16899_v8 = vpack.c.bf16 %v7802_v62, %v7800_v56  ;;  %v7804_v22 = vld [vmem:[#allocation7 + $0x11c0] sm:$0xff]  ;;  %v7811_v39 = vld [vmem:[#allocation7 + $0x11f8] sm:$0xff] }
0x17b4   : > { %13278 = vmatprep.subr.bf16.mxu1 %v16837_v42  ;;  %18617 = vst [vmem:[#allocation277_spill] sm:$0xff] %v16887_v45  ;;  %18620 = vst [vmem:[#allocation280_spill] sm:$0xff] %v16897_v54  ;;  %v16905_v32 = vpack.c.bf16 %v7806_v28, %v7804_v22  ;;  %v16909_v62 = vpack.c.bf16 %v7811_v39, %v7809_v20  ;;  %v7808_v56 = vld [vmem:[#allocation7 + $0x11e0] sm:$0xff]  ;;  %v18626_v28 = vld [vmem:[#allocation14_spill] sm:$0xff] }
0x17b5   : > { %18621 = vst [vmem:[#allocation281_spill] sm:$0xff] %v16899_v8  ;;  %v16911_v55 = vpack.c.bf16 %v7810_v31, %v7808_v56  ;;  %v18627_v31 = vld [vmem:[#allocation15_spill] sm:$0xff]  ;;  %v18629_v18 = vld [vmem:[#allocation17_spill] sm:$0xff]  ;;  %v18630_v22 = vld [vmem:[#allocation18_spill] sm:$0xff] }
0x17b6   : > { %18623 = vst [vmem:[#allocation283_spill] sm:$0xff] %v16905_v32  ;;  %18624 = vst [vmem:[#allocation284_spill] sm:$0xff] %v16909_v62  ;;  %v18631_v20 = vld [vmem:[#allocation19_spill] sm:$0xff]  ;;  %v18632_v39 = vld [vmem:[#allocation20_spill] sm:$0xff] }
0x17b7   : > { %13280 = vmatpush1.bf16.msra.mxu1 %v16839_v24  ;;  %18625 = vst [vmem:[#allocation285_spill] sm:$0xff] %v16911_v55  ;;  %v18633_v56 = vld [vmem:[#allocation21_spill] sm:$0xff] }
0x17b8   : > { %13282 = vmatprep.subr.bf16.mxu1 %v16843_v21 }
0x17bb   : > { %13284 = vmatpush1.bf16.msra.mxu1 %v16845_v34 }
0x17bc   : > { %13286 = vmatprep.subr.bf16.mxu1 %v16849_v17 }
0x17bf   : > { %13288 = vmatpush1.bf16.msra.mxu1 %v16851_v1 }
0x17c0   : > { %13290 = vmatprep.subr.bf16.mxu1 %v16855_v27 }
0x17c3   : > { %13292 = vmatpush1.bf16.msra.mxu1 %v16857_v29 }
0x17c4   : > { %13294 = vmatprep.subr.bf16.mxu1 %v16861_v30 }
0x17c7   : > { %13296 = vmatpush1.bf16.msra.mxu1 %v16863_v12 }
0x17c8   : > { %13298 = vmatprep.subr.bf16.mxu1 %v16867_v15 }
0x17cb   : > { %13300 = vmatpush1.bf16.msra.mxu1 %v16869_v6 }
0x17cc   : > { %13302 = vmatprep.subr.bf16.mxu1 %v16873_v11 }
0x17cf   : > { %13304 = vmatpush1.bf16.msra.mxu1 %v16875_v23 }
0x17d0   : > { %13306 = vmatprep.subr.bf16.mxu1 %v16879_v43 }
0x17d3   : > { %13308 = vmatpush1.bf16.msra.mxu1 %v16881_v36 }
0x17d4   : > { %13310 = vmatprep.subr.bf16.mxu1 %v16885_v19 }
0x17d7   : > { %13312 = vmatpush1.bf16.msra.mxu1 %v16887_v45 }
0x17d8   : > { %13314 = vmatprep.subr.bf16.mxu1 %v16891_v46 }
0x17db   : > { %13316 = vmatpush1.bf16.msra.mxu1 %v16893_v37 }
0x17dc   : > { %13318 = vmatprep.subr.bf16.mxu1 %v16897_v54 }
0x17df   : > { %13320 = vmatpush1.bf16.msra.mxu1 %v16899_v8 }
0x17e0   : > { %13322 = vmatprep.subr.bf16.mxu1 %v16903_v44 }
0x17e3   : > { %13324 = vmatpush1.bf16.msra.mxu1 %v16905_v32 }
0x17e4   : > { %13326 = vmatprep.subr.bf16.mxu1 %v16909_v62 }
0x17e7   : > { %13328 = vmatpush1.bf16.msra.mxu1 %v16911_v55 }
0x17e8   : > { %13394 = vmatprep.subr.bf16.mxu1 %v15597_v26 }
0x17ea   : > { %7877 = vmatmul.mubr.f32.vlgmr.msra.gmra.mrb[50].mxu1 %v16761_v52  ;;  %v18635_v52 = vld [vmem:[#allocation23_spill] sm:$0xff] }
0x17eb   : > { %13396 = vmatpush1.bf16.msra.mxu1 %v15599_v53 }
0x17ec   : > { %13398 = vmatprep.subr.bf16.mxu1 %v15601_v58 }
0x17ef   : > { %13400 = vmatpush1.bf16.msra.mxu1 %v15605_v5 }
0x17f0   : > { %13402 = vmatprep.subr.bf16.mxu1 %v15608_v7 }
0x17f3   : > { %13404 = vmatpush1.bf16.msra.mxu1 %v15611_v35 }
0x17f4   : > { %13406 = vmatprep.subr.bf16.mxu1 %v15614_v38 }
0x17f7   : > { %13408 = vmatpush1.bf16.msra.mxu1 %v15617_v47 }
0x17f8   : > { %13410 = vmatprep.subr.bf16.mxu1 %v15620_v49 }
0x17fb   : > { %13412 = vmatpush1.bf16.msra.mxu1 %v15623_v59 }
0x17fc   : > { %13414 = vmatprep.subr.bf16.mxu1 %v15626_v61 }
0x17ff   : > { %13416 = vmatpush1.bf16.msra.mxu1 %v15629_v10 }
0x1800   : > { %13418 = vmatprep.subr.bf16.mxu1 %v15632_v13 }
0x1803   : > { %13420 = vmatpush1.bf16.msra.mxu1 %v15635_v33 }
0x1804   : > { %13422 = vmatprep.subr.bf16.mxu1 %v15638_v16 }
0x1807   : > { %13424 = vmatpush1.bf16.msra.mxu1 %v15641_v63 }
0x1808   : > { %13426 = vmatprep.subr.bf16.mxu1 %v15644_v14 }
0x180b   : > { %13428 = vmatpush1.bf16.msra.mxu1 %v18626_v28 }
0x180c   : > { %13430 = vmatprep.subr.bf16.mxu1 %v18627_v31  ;;  %v18636_v31 = vld [vmem:[#allocation24_spill] sm:$0xff] }
0x180f   : > { %13432 = vmatpush1.bf16.msra.mxu1 %v18628_v57  ;;  %v11162_v57 = vld [vmem:[%s17792_s7 + $0x38] sm:$0xff] }
0x1810   : > { %13434 = vmatprep.subr.bf16.mxu1 %v18629_v18 }
0x1813   : > { %13436 = vmatpush1.bf16.msra.mxu1 %v18630_v22  ;;  %v18637_v22 = vld [vmem:[#allocation25_spill] sm:$0xff] }
0x1814   : > { %13438 = vmatprep.subr.bf16.mxu1 %v18631_v20 }
0x1817   : > { %13440 = vmatpush1.bf16.msra.mxu1 %v18632_v39 }
0x1818   : > { %13442 = vmatprep.subr.bf16.mxu1 %v18633_v56 }
0x181b   : > { %13444 = vmatpush1.bf16.msra.mxu1 %v18634_v3 }
0x181c   : > { %13446 = vmatprep.subr.bf16.mxu1 %v18635_v52  ;;  %v18638_v52 = vld [vmem:[#allocation26_spill] sm:$0xff] }
0x181f   : > { %13448 = vmatpush1.bf16.msra.mxu1 %v18636_v31  ;;  %v18639_v31 = vld [vmem:[#allocation27_spill] sm:$0xff] }
0x1820   : > { %13450 = vmatprep.subr.bf16.mxu1 %v18637_v22 }
0x1823   : > { %13452 = vmatpush1.bf16.msra.mxu1 %v18638_v52 }
0x1824   : > { %13454 = vmatprep.subr.bf16.mxu1 %v18639_v31 }
0x1882   : > { %v7578_v14 = vpop.f32.mrb[46].mxu0 }
0x1883   : > { %v7580_v28 = vpop.f32.mrb[47].mxu0 }
0x1884   : > { %11163 = vmatprep.subr.msk.mxu0 %vm4976_vm3, %v7580_v28  ;;  %v18640_v28 = vld [vmem:[#allocation28_spill] sm:$0xff] }
0x1885   : > { %11164 = vmatpush1.msk.msra.mxu0 %vm4976_vm3, %v7578_v14  ;;  %v11161_v14 = vld [vmem:[%s17791_s6 + $0x38] sm:$0xff]  ;;  %13456 = vmatpush1.bf16.msra.mxu1 %v18640_v28 }
0x1886   : > { %11165 = vmatmul.mubr.msk.f32.vlgmr.msra.gmra.mrb[32].mxu0 %vm4972_vm4, %v11162_v57  ;;  %11166 = vmatprep.subr.msk.mxu0 %vm4976_vm3, %v16817_v0  ;;  %v4755_v57 = vld [vmem:[%s17793_s8] sm:$0xff] }
0x1887   : > { %11167 = vmatpush1.msk.msra.mxu0 %vm4976_vm3, %v16815_v4  ;;  %7738 = vmatprep.mubr.f32.mxu0 %v18400_v60 }
0x1888   : > { %13330 = vmatprep.subr.bf16.mxu0 %v16819_v41  ;;  %4758 = vperm.xlu1 %14727, %v4755_v57   ;;  %v11169_v57 = vld [vmem:[%s17791_s6 + $0x40] sm:$0xff] }
0x188e   : > { %11168 = vmatmul.mubr.msk.f32.vlgmr.msra.gmra.mrb[32].mxu0 %vm4972_vm4, %v11161_v14  ;;  %v8133_v14 = vld [vmem:[%s17796_s11] sm:$0xf] }
0x188f   : > { %13332 = vmatpush1.bf16.msra.mxu0 %v16822_v9  ;;  %7949 = vmatprep.mubr.f32.mxu0 %v15753_v50 }
0x1890   : > { %13334 = vmatprep.subr.bf16.mxu0 %v16825_v40  ;;  %8136 = vperm.xlu1 %14727, %v8133_v14   ;;  %v18661_v14 = vld [vmem:[#allocation39_spill] sm:$0xff] }
0x1893   : > { %13336 = vmatpush1.bf16.msra.mxu0 %v16827_v25 }
0x1894   : > { %13338 = vmatprep.subr.bf16.mxu0 %v16831_v48 }
0x1897   : > { %13340 = vmatpush1.bf16.msra.mxu0 %v16833_v51 }
0x1898   : > { %13342 = vmatprep.subr.bf16.mxu0 %v16837_v42 }
0x189b   : > { %13344 = vmatpush1.bf16.msra.mxu0 %v16839_v24 }
0x189c   : > { %13346 = vmatprep.subr.bf16.mxu0 %v16843_v21 }
0x189f   : > { %13348 = vmatpush1.bf16.msra.mxu0 %v16845_v34 }
0x18a0   : > { %13350 = vmatprep.subr.bf16.mxu0 %v16849_v17 }
0x18a3   : > { %13352 = vmatpush1.bf16.msra.mxu0 %v16851_v1 }
0x18a4   : > { %13354 = vmatprep.subr.bf16.mxu0 %v16855_v27 }
0x18a7   : > { %13356 = vmatpush1.bf16.msra.mxu0 %v16857_v29 }
0x18a8   : > { %13358 = vmatprep.subr.bf16.mxu0 %v16861_v30 }
0x18ab   : > { %13360 = vmatpush1.bf16.msra.mxu0 %v16863_v12 }
0x18ac   : > { %13362 = vmatprep.subr.bf16.mxu0 %v16867_v15  ;;  %v18695_v15 = vld [vmem:[#allocation73_spill] sm:$0xff] }
0x18af   : > { %13364 = vmatpush1.bf16.msra.mxu0 %v16869_v6  ;;  %v18693_v6 = vld [vmem:[#allocation71_spill] sm:$0xff] }
0x18b0   : > { %13366 = vmatprep.subr.bf16.mxu0 %v16873_v11  ;;  %v18691_v11 = vld [vmem:[#allocation69_spill] sm:$0xff] }
0x18b3   : > { %13368 = vmatpush1.bf16.msra.mxu0 %v16875_v23  ;;  %v18690_v23 = vld [vmem:[#allocation68_spill] sm:$0xff] }
0x18b4   : > { %13370 = vmatprep.subr.bf16.mxu0 %v16879_v43  ;;  %v18689_v43 = vld [vmem:[#allocation67_spill] sm:$0xff] }
0x18b7   : > { %13372 = vmatpush1.bf16.msra.mxu0 %v16881_v36  ;;  %v18688_v36 = vld [vmem:[#allocation66_spill] sm:$0xff] }
0x18b8   : > { %13374 = vmatprep.subr.bf16.mxu0 %v16885_v19  ;;  %v18687_v19 = vld [vmem:[#allocation65_spill] sm:$0xff] }
0x18bb   : > { %13376 = vmatpush1.bf16.msra.mxu0 %v16887_v45  ;;  %v18686_v45 = vld [vmem:[#allocation64_spill] sm:$0xff] }
0x18bc   : > { %13378 = vmatprep.subr.bf16.mxu0 %v16891_v46  ;;  %v18685_v46 = vld [vmem:[#allocation63_spill] sm:$0xff] }
0x18bd   : > { %v7878_v4 = vpop.f32.mrb[50].mxu1 }
0x18be   : > { %v7880_v0 = vpop.f32.mrb[51].mxu1 }
0x18bf   : > { %13380 = vmatpush1.bf16.msra.mxu0 %v16893_v37  ;;  %v18684_v37 = vld [vmem:[#allocation62_spill] sm:$0xff] }
0x18c0   : > { %13382 = vmatprep.subr.bf16.mxu0 %v16897_v54  ;;  %v18683_v54 = vld [vmem:[#allocation61_spill] sm:$0xff] }
0x18c3   : > { %13384 = vmatpush1.bf16.msra.mxu0 %v16899_v8  ;;  %v18682_v8 = vld [vmem:[#allocation60_spill] sm:$0xff] }
0x18c4   : > { %13386 = vmatprep.subr.bf16.mxu0 %v16903_v44  ;;  %v18681_v44 = vld [vmem:[#allocation59_spill] sm:$0xff] }
0x18c7   : > { %13388 = vmatpush1.bf16.msra.mxu0 %v16905_v32 }
0x18c8   : > { %13390 = vmatprep.subr.bf16.mxu0 %v16909_v62 }
0x18cb   : > { %13392 = vmatpush1.bf16.msra.mxu0 %v16911_v55  ;;  %v11170_v55 = vld [vmem:[%s17792_s7 + $0x40] sm:$0xff] }
0x18ce   : > { %7950 = vmatmul.mubr.f32.vlgmr.msra.gmra.mrb[48].mxu0 %v15757_v2 }
0x18cf   : > { %8031 = vmatprep.mubr.f32.mxu0 %v18400_v60 }
0x19a1   : > { %v7951_v32 = vpop.f32.mrb[48].mxu0 }
0x19a2   : > { %v7953_v62 = vpop.f32.mrb[49].mxu0 }
0x19a3   : > { %11171 = vmatprep.subr.msk.mxu0 %vm4976_vm3, %v7953_v62 }
0x19a4   : > { %11172 = vmatpush1.msk.msra.mxu0 %vm4976_vm3, %v7951_v32  ;;  %v18649_v32 = vld [vmem:[#allocation253_spill] sm:$0xff] }
0x19a5   : > { %11173 = vmatmul.mubr.msk.f32.vlgmr.msra.gmra.mrb[32].mxu0 %vm4972_vm4, %v11170_v55  ;;  %11174 = vmatprep.subr.msk.mxu0 %vm4976_vm3, %v7880_v0  ;;  %v18660_v0 = vld [vmem:[#allocation38_spill] sm:$0xff] }
0x19a6   : > { %11175 = vmatpush1.msk.msra.mxu0 %vm4976_vm3, %v7878_v4  ;;  %8111 = vmatprep.mubr.f32.mxu0 %v18400_v60  ;;  %v18659_v4 = vld [vmem:[#allocation37_spill] sm:$0xff] }
0x19a7   : > { %13458 = vmatprep.subr.bf16.mxu0 %v15597_v26  ;;  %v18641_v26 = vld [vmem:[#allocation13_spill] sm:$0xff] }
0x19ad   : > { %11176 = vmatmul.mubr.msk.f32.vlgmr.msra.gmra.mrb[32].mxu0 %vm4972_vm4, %v11169_v57  ;;  %v18662_v57 = vld [vmem:[#allocation40_spill] sm:$0xff] }
0x19ae   : > { %13460 = vmatpush1.bf16.msra.mxu0 %v15599_v53  ;;  %v18642_v53 = vld [vmem:[#allocation14_spill] sm:$0xff] }
0x19af   : > { %13462 = vmatprep.subr.bf16.mxu0 %v15601_v58  ;;  %v18643_v58 = vld [vmem:[#allocation15_spill] sm:$0xff] }
0x19b2   : > { %13464 = vmatpush1.bf16.msra.mxu0 %v15605_v5  ;;  %v18644_v5 = vld [vmem:[#allocation16_spill] sm:$0xff] }
0x19b3   : > { %13466 = vmatprep.subr.bf16.mxu0 %v15608_v7  ;;  %v18645_v7 = vld [vmem:[#allocation18_spill] sm:$0xff] }
0x19b6   : > { %13468 = vmatpush1.bf16.msra.mxu0 %v15611_v35  ;;  %v18646_v35 = vld [vmem:[#allocation23_spill] sm:$0xff] }
0x19b7   : > { %13470 = vmatprep.subr.bf16.mxu0 %v15614_v38  ;;  %v18647_v38 = vld [vmem:[#allocation24_spill] sm:$0xff] }
0x19ba   : > { %13472 = vmatpush1.bf16.msra.mxu0 %v15617_v47  ;;  %v18648_v47 = vld [vmem:[#allocation29_spill] sm:$0xff] }
0x19bb   : > { %13474 = vmatprep.subr.bf16.mxu0 %v15620_v49  ;;  %v4759_v49 = vpop.permute.xlu1 %4758 }
0x19be   : > { %13476 = vmatpush1.bf16.msra.mxu0 %v15623_v59 }
0x19bf   : > { %13478 = vmatprep.subr.bf16.mxu0 %v15626_v61 }
0x19c2   : > { %13480 = vmatpush1.bf16.msra.mxu0 %v15629_v10 }
0x19c3   : > { %13482 = vmatprep.subr.bf16.mxu0 %v15632_v13 }
0x19c6   : > { %13484 = vmatpush1.bf16.msra.mxu0 %v15635_v33 }
0x19c7   : > { %13486 = vmatprep.subr.bf16.mxu0 %v15638_v16 }
0x19ca   : > { %13488 = vmatpush1.bf16.msra.mxu0 %v15641_v63 }
0x19cb   : > { %13490 = vmatprep.subr.bf16.mxu0 %v18641_v26  ;;  %v18663_v26 = vld [vmem:[#allocation41_spill] sm:$0xff] }
0x19ce   : > { %13492 = vmatpush1.bf16.msra.mxu0 %v18642_v53  ;;  %v18664_v53 = vld [vmem:[#allocation42_spill] sm:$0xff] }
0x19cf   : > { %13494 = vmatprep.subr.bf16.mxu0 %v18643_v58  ;;  %v18665_v58 = vld [vmem:[#allocation43_spill] sm:$0xff] }
0x19d2   : > { %13496 = vmatpush1.bf16.msra.mxu0 %v18644_v5  ;;  %v18666_v5 = vld [vmem:[#allocation44_spill] sm:$0xff] }
0x19d3   : > { %13498 = vmatprep.subr.bf16.mxu0 %v18629_v18 }
0x19d6   : > { %13500 = vmatpush1.bf16.msra.mxu0 %v18645_v7  ;;  %v18667_v7 = vld [vmem:[#allocation45_spill] sm:$0xff] }
0x19d7   : > { %13502 = vmatprep.subr.bf16.mxu0 %v18631_v20  ;;  %v18655_v20 = vld [vmem:[#allocation33_spill] sm:$0xff] }
0x19da   : > { %13504 = vmatpush1.bf16.msra.mxu0 %v18632_v39  ;;  %v18656_v39 = vld [vmem:[#allocation34_spill] sm:$0xff] }
0x19db   : > { %13506 = vmatprep.subr.bf16.mxu0 %v18633_v56  ;;  %v18657_v56 = vld [vmem:[#allocation35_spill] sm:$0xff] }
0x19de   : > { %13508 = vmatpush1.bf16.msra.mxu0 %v18634_v3 }
0x19df   : > { %13510 = vmatprep.subr.bf16.mxu0 %v18646_v35  ;;  %v18668_v35 = vld [vmem:[#allocation46_spill] sm:$0xff] }
0x19e2   : > { %13512 = vmatpush1.bf16.msra.mxu0 %v18647_v38  ;;  %v18669_v38 = vld [vmem:[#allocation47_spill] sm:$0xff] }
0x19e3   : > { %13514 = vmatprep.subr.bf16.mxu0 %v18637_v22  ;;  %v18652_v22 = vld [vmem:[#allocation30_spill] sm:$0xff] }
0x19e6   : > { %13516 = vmatpush1.bf16.msra.mxu0 %v18638_v52 }
0x19e7   : > { %13518 = vmatprep.subr.bf16.mxu0 %v18639_v31 }
0x19ea   : > { %13520 = vmatpush1.bf16.msra.mxu0 %v18640_v28  ;;  %v18658_v28 = vld [vmem:[#allocation36_spill] sm:$0xff] }
0x19eb   : > { %13586 = vmatprep.subr.bf16.mxu0 %v18648_v47 }
0x1a80   : > { %v8113_v59 = vpop.f32.mrb[32].mxu0 }
0x1a81   : > { %v14551_v61 = vadd.f32 %v8113_v59, %v4759_v49  ;;  %v8115_v10 = vpop.f32.mrb[33].mxu0  ;;  %v18671_v59 = vld [vmem:[#allocation49_spill] sm:$0xff] }
0x1a82   : > { %v14552_v13 = vadd.f32 %v8115_v10, %v4759_v49  ;;  %v18670_v49 = vld [vmem:[#allocation48_spill] sm:$0xff]  ;;  %v18673_v10 = vld [vmem:[#allocation51_spill] sm:$0xff] }
0x1a83   : > { %v8120_v33 = vmax.f32 %v14551_v61, 0.0  ;;  %v18672_v61 = vld [vmem:[#allocation50_spill] sm:$0xff] }
0x1a84   : > { %v8121_v16 = vmax.f32 %v14552_v13, 0.0  ;;  %v18674_v13 = vld [vmem:[#allocation52_spill] sm:$0xff] }
0x1a85   : > { %v8127_v63 = vrot.slane %v8120_v33, 4 }
0x1a86   : > { %v8124_v3 = vcombine.low %v8120_v33, %v8121_v16  ;;  %v8128_v55 = vrot.slane %v8121_v16, 4  ;;  %v18675_v33 = vld [vmem:[#allocation53_spill] sm:$0xff]  ;;  %v18676_v16 = vld [vmem:[#allocation54_spill] sm:$0xff] }
0x1a87   : > { %v17057_v31 = vadd.f32 %v8127_v63, %v15757_v2  ;;  %v18654_v2 = vld [vmem:[#allocation32_spill] sm:$0xff]  ;;  %v18677_v63 = vld [vmem:[#allocation55_spill] sm:$0xff] }
0x1a88   : > { %v17051_v62 = vadd.f32 %v18649_v32, %v8124_v3  ;;  %v17054_v52 = vadd.f32 %v8128_v55, %v15753_v50  ;;  %v18653_v50 = vld [vmem:[#allocation31_spill] sm:$0xff]  ;;  %v18678_v3 = vld [vmem:[#allocation56_spill] sm:$0xff]  ;;  %v18679_v55 = vld [vmem:[#allocation57_spill] sm:$0xff] }
0x1a89   : > { %18651 = vst [vmem:[#allocation19_spill] sm:$0xff] %v17057_v31  ;;  %v18680_v32 = vld [vmem:[#allocation58_spill] sm:$0xff] }
0x1a8a   : > { %18650 = vst [vmem:[#allocation17_spill] sm:$0xff] %v17054_v52  ;;  %8278 = vmatprep.mubr.f32.mxu0 %v17054_v52  ;;  %v17062_v18 = vcombine.high %v17051_v62, %v17051_v62 }
0x1a8b   : > { %8279 = vmatmul.mubr.f32.vlgmr.msra.gmra.mrb[50].mxu0 %v17057_v31 }
0x1a8c   : > { %13588 = vmatpush1.bf16.msra.mxu0 %v18652_v22  ;;  %8206 = vmatprep.mubr.f32.mxu1 %v17062_v18 }
0x1a8d   : > { %8585 = vmatprep.mubr.f32.mxu0 %v17054_v52  ;;  %8207 = vmatmul.mubr.f32.vlgmr.msra.gmra.mrb[52].mxu1 %v17051_v62 }
0x1a8e   : > { %13590 = vmatprep.subr.bf16.mxu0 %v18653_v50  ;;  %8359 = vmatprep.mubr.f32.mxu1 %v18400_v60 }
0x1a90   : > { %13592 = vmatpush1.bf16.msra.mxu0 %v18654_v2 }
0x1a91   : > { %13594 = vmatprep.subr.bf16.mxu0 %v18655_v20 }
0x1a94   : > { %13596 = vmatpush1.bf16.msra.mxu0 %v18656_v39 }
0x1a95   : > { %13598 = vmatprep.subr.bf16.mxu0 %v18657_v56 }
0x1a98   : > { %13600 = vmatpush1.bf16.msra.mxu0 %v18658_v28 }
0x1a99   : > { %13602 = vmatprep.subr.bf16.mxu0 %v18659_v4 }
0x1a9c   : > { %13604 = vmatpush1.bf16.msra.mxu0 %v18660_v0 }
0x1a9d   : > { %13606 = vmatprep.subr.bf16.mxu0 %v18661_v14 }
0x1aa0   : > { %13608 = vmatpush1.bf16.msra.mxu0 %v18662_v57 }
0x1aa1   : > { %13610 = vmatprep.subr.bf16.mxu0 %v18663_v26 }
0x1aa4   : > { %13612 = vmatpush1.bf16.msra.mxu0 %v18664_v53 }
0x1aa5   : > { %13614 = vmatprep.subr.bf16.mxu0 %v18665_v58 }
0x1aa8   : > { %13616 = vmatpush1.bf16.msra.mxu0 %v18666_v5 }
0x1aa9   : > { %13618 = vmatprep.subr.bf16.mxu0 %v18667_v7 }
0x1aac   : > { %13620 = vmatpush1.bf16.msra.mxu0 %v18668_v35 }
0x1aad   : > { %13622 = vmatprep.subr.bf16.mxu0 %v18669_v38 }
0x1ab0   : > { %13624 = vmatpush1.bf16.msra.mxu0 %v18670_v49 }
0x1ab1   : > { %13626 = vmatprep.subr.bf16.mxu0 %v18671_v59 }
0x1ab4   : > { %13628 = vmatpush1.bf16.msra.mxu0 %v18672_v61 }
0x1ab5   : > { %13630 = vmatprep.subr.bf16.mxu0 %v18673_v10 }
0x1ab8   : > { %13632 = vmatpush1.bf16.msra.mxu0 %v18674_v13 }
0x1ab9   : > { %13634 = vmatprep.subr.bf16.mxu0 %v18675_v33 }
0x1abc   : > { %13636 = vmatpush1.bf16.msra.mxu0 %v18676_v16 }
0x1abd   : > { %13638 = vmatprep.subr.bf16.mxu0 %v18677_v63 }
0x1ac0   : > { %13640 = vmatpush1.bf16.msra.mxu0 %v18678_v3 }
0x1ac1   : > { %13642 = vmatprep.subr.bf16.mxu0 %v18679_v55 }
0x1ac4   : > { %13644 = vmatpush1.bf16.msra.mxu0 %v18680_v32 }
0x1ac5   : > { %13646 = vmatprep.subr.bf16.mxu0 %v18681_v44 }
0x1ac8   : > { %13648 = vmatpush1.bf16.msra.mxu0 %v18682_v8 }
0x1ac9   : > { %13714 = vmatprep.subr.bf16.mxu0 %v18683_v54  ;;  %v18692_v54 = vld [vmem:[#allocation70_spill] sm:$0xff] }
0x1acb   : > { %8586 = vmatmul.mubr.f32.vlgmr.msra.gmra.mrb[52].mxu0 %v17057_v31 }
0x1acc   : > { %13716 = vmatpush1.bf16.msra.mxu0 %v18684_v37  ;;  %8893 = vmatprep.mubr.f32.mxu0 %v17054_v52  ;;  %v18694_v37 = vld [vmem:[#allocation72_spill] sm:$0xff] }
0x1acd   : > { %13718 = vmatprep.subr.bf16.mxu0 %v18685_v46  ;;  %v18696_v46 = vld [vmem:[#allocation74_spill] sm:$0xff] }
0x1ad0   : > { %13720 = vmatpush1.bf16.msra.mxu0 %v18686_v45  ;;  %v18697_v45 = vld [vmem:[#allocation75_spill] sm:$0xff] }
0x1ad1   : > { %13722 = vmatprep.subr.bf16.mxu0 %v18687_v19  ;;  %v18698_v19 = vld [vmem:[#allocation76_spill] sm:$0xff] }
0x1ad4   : > { %13724 = vmatpush1.bf16.msra.mxu0 %v18688_v36  ;;  %v18699_v36 = vld [vmem:[#allocation77_spill] sm:$0xff] }
0x1ad5   : > { %13726 = vmatprep.subr.bf16.mxu0 %v18689_v43  ;;  %v18700_v43 = vld [vmem:[#allocation78_spill] sm:$0xff] }
0x1ad8   : > { %13728 = vmatpush1.bf16.msra.mxu0 %v18690_v23  ;;  %v18701_v23 = vld [vmem:[#allocation79_spill] sm:$0xff] }
0x1ad9   : > { %13730 = vmatprep.subr.bf16.mxu0 %v18691_v11  ;;  %v18702_v11 = vld [vmem:[#allocation80_spill] sm:$0xff] }
0x1adc   : > { %13732 = vmatpush1.bf16.msra.mxu0 %v18692_v54  ;;  %v18703_v54 = vld [vmem:[#allocation81_spill] sm:$0xff] }
0x1add   : > { %13734 = vmatprep.subr.bf16.mxu0 %v18693_v6  ;;  %v18704_v6 = vld [vmem:[#allocation82_spill] sm:$0xff] }
0x1ae0   : > { %13736 = vmatpush1.bf16.msra.mxu0 %v18694_v37  ;;  %v18705_v37 = vld [vmem:[#allocation83_spill] sm:$0xff] }
0x1ae1   : > { %13738 = vmatprep.subr.bf16.mxu0 %v18695_v15  ;;  %v18706_v15 = vld [vmem:[#allocation84_spill] sm:$0xff] }
0x1ae4   : > { %13740 = vmatpush1.bf16.msra.mxu0 %v18696_v46  ;;  %v18707_v46 = vld [vmem:[#allocation85_spill] sm:$0xff] }
0x1ae5   : > { %13742 = vmatprep.subr.bf16.mxu0 %v18697_v45  ;;  %v18708_v45 = vld [vmem:[#allocation86_spill] sm:$0xff] }
0x1ae8   : > { %13744 = vmatpush1.bf16.msra.mxu0 %v18698_v19  ;;  %v18709_v19 = vld [vmem:[#allocation87_spill] sm:$0xff] }
0x1ae9   : > { %13746 = vmatprep.subr.bf16.mxu0 %v18699_v36  ;;  %v18710_v36 = vld [vmem:[#allocation88_spill] sm:$0xff] }
0x1aec   : > { %13748 = vmatpush1.bf16.msra.mxu0 %v18700_v43  ;;  %v18711_v43 = vld [vmem:[#allocation89_spill] sm:$0xff] }
0x1aed   : > { %13750 = vmatprep.subr.bf16.mxu0 %v18701_v23  ;;  %v18712_v23 = vld [vmem:[#allocation90_spill] sm:$0xff] }
0x1af0   : > { %13752 = vmatpush1.bf16.msra.mxu0 %v18702_v11  ;;  %v18713_v11 = vld [vmem:[#allocation91_spill] sm:$0xff] }
0x1af1   : > { %13754 = vmatprep.subr.bf16.mxu0 %v18703_v54  ;;  %v18714_v54 = vld [vmem:[#allocation92_spill] sm:$0xff] }
0x1af4   : > { %13756 = vmatpush1.bf16.msra.mxu0 %v18704_v6  ;;  %v18715_v6 = vld [vmem:[#allocation93_spill] sm:$0xff] }
0x1af5   : > { %13758 = vmatprep.subr.bf16.mxu0 %v18705_v37  ;;  %v18727_v37 = vld [vmem:[#allocation105_spill] sm:$0xff] }
0x1af8   : > { %13760 = vmatpush1.bf16.msra.mxu0 %v18706_v15  ;;  %v18716_v15 = vld [vmem:[#allocation94_spill] sm:$0xff] }
0x1af9   : > { %13762 = vmatprep.subr.bf16.mxu0 %v18707_v46  ;;  %v18725_v46 = vld [vmem:[#allocation103_spill] sm:$0xff] }
0x1afc   : > { %13764 = vmatpush1.bf16.msra.mxu0 %v18708_v45  ;;  %v18717_v45 = vld [vmem:[#allocation95_spill] sm:$0xff] }
0x1afd   : > { %13766 = vmatprep.subr.bf16.mxu0 %v18709_v19  ;;  %v18718_v19 = vld [vmem:[#allocation96_spill] sm:$0xff] }
0x1b00   : > { %13768 = vmatpush1.bf16.msra.mxu0 %v18710_v36  ;;  %v18719_v36 = vld [vmem:[#allocation97_spill] sm:$0xff] }
0x1b01   : > { %13770 = vmatprep.subr.bf16.mxu0 %v18711_v43  ;;  %v18720_v43 = vld [vmem:[#allocation98_spill] sm:$0xff] }
0x1b04   : > { %13772 = vmatpush1.bf16.msra.mxu0 %v18712_v23  ;;  %v18721_v23 = vld [vmem:[#allocation99_spill] sm:$0xff] }
0x1b05   : > { %13774 = vmatprep.subr.bf16.mxu0 %v18713_v11  ;;  %v18722_v11 = vld [vmem:[#allocation100_spill] sm:$0xff] }
0x1b08   : > { %13776 = vmatpush1.bf16.msra.mxu0 %v18714_v54  ;;  %v18723_v54 = vld [vmem:[#allocation101_spill] sm:$0xff] }
0x1b09   : > { %13842 = vmatprep.subr.bf16.mxu0 %v18715_v6  ;;  %v18724_v6 = vld [vmem:[#allocation102_spill] sm:$0xff] }
0x1b0b   : > { %8894 = vmatmul.mubr.f32.vlgmr.msra.gmra.mrb[54].mxu0 %v17057_v31 }
0x1b0c   : > { %13844 = vmatpush1.bf16.msra.mxu0 %v18716_v15  ;;  %9201 = vmatprep.mubr.f32.mxu0 %v17054_v52  ;;  %v18726_v15 = vld [vmem:[#allocation104_spill] sm:$0xff] }
0x1b0d   : > { %13846 = vmatprep.subr.bf16.mxu0 %v18717_v45  ;;  %v18728_v45 = vld [vmem:[#allocation106_spill] sm:$0xff] }
0x1b10   : > { %13848 = vmatpush1.bf16.msra.mxu0 %v18718_v19  ;;  %v18729_v19 = vld [vmem:[#allocation107_spill] sm:$0xff] }
0x1b11   : > { %13850 = vmatprep.subr.bf16.mxu0 %v18719_v36  ;;  %v18730_v36 = vld [vmem:[#allocation108_spill] sm:$0xff] }
0x1b14   : > { %13852 = vmatpush1.bf16.msra.mxu0 %v18720_v43  ;;  %v18731_v43 = vld [vmem:[#allocation109_spill] sm:$0xff] }
0x1b15   : > { %13854 = vmatprep.subr.bf16.mxu0 %v18721_v23  ;;  %v18732_v23 = vld [vmem:[#allocation110_spill] sm:$0xff] }
0x1b18   : > { %13856 = vmatpush1.bf16.msra.mxu0 %v18722_v11  ;;  %v18733_v11 = vld [vmem:[#allocation111_spill] sm:$0xff] }
0x1b19   : > { %13858 = vmatprep.subr.bf16.mxu0 %v18723_v54  ;;  %v18734_v54 = vld [vmem:[#allocation112_spill] sm:$0xff] }
0x1b1c   : > { %13860 = vmatpush1.bf16.msra.mxu0 %v18724_v6  ;;  %v18735_v6 = vld [vmem:[#allocation113_spill] sm:$0xff] }
0x1b1d   : > { %13862 = vmatprep.subr.bf16.mxu0 %v18725_v46  ;;  %v18736_v46 = vld [vmem:[#allocation114_spill] sm:$0xff] }
0x1b20   : > { %13864 = vmatpush1.bf16.msra.mxu0 %v18726_v15  ;;  %v18737_v15 = vld [vmem:[#allocation115_spill] sm:$0xff] }
0x1b21   : > { %13866 = vmatprep.subr.bf16.mxu0 %v18727_v37  ;;  %v18738_v37 = vld [vmem:[#allocation116_spill] sm:$0xff] }
0x1b24   : > { %13868 = vmatpush1.bf16.msra.mxu0 %v18728_v45  ;;  %v18739_v45 = vld [vmem:[#allocation117_spill] sm:$0xff] }
0x1b25   : > { %13870 = vmatprep.subr.bf16.mxu0 %v18729_v19  ;;  %v18740_v19 = vld [vmem:[#allocation118_spill] sm:$0xff] }
0x1b28   : > { %13872 = vmatpush1.bf16.msra.mxu0 %v18730_v36  ;;  %v18741_v36 = vld [vmem:[#allocation119_spill] sm:$0xff] }
0x1b29   : > { %13874 = vmatprep.subr.bf16.mxu0 %v18731_v43  ;;  %v18742_v43 = vld [vmem:[#allocation120_spill] sm:$0xff] }
0x1b2c   : > { %13876 = vmatpush1.bf16.msra.mxu0 %v18732_v23  ;;  %v18743_v23 = vld [vmem:[#allocation121_spill] sm:$0xff] }
0x1b2d   : > { %13878 = vmatprep.subr.bf16.mxu0 %v18733_v11  ;;  %v18744_v11 = vld [vmem:[#allocation122_spill] sm:$0xff] }
0x1b30   : > { %13880 = vmatpush1.bf16.msra.mxu0 %v18734_v54  ;;  %v18745_v54 = vld [vmem:[#allocation123_spill] sm:$0xff] }
0x1b31   : > { %13882 = vmatprep.subr.bf16.mxu0 %v18735_v6  ;;  %v18746_v6 = vld [vmem:[#allocation124_spill] sm:$0xff] }
0x1b34   : > { %13884 = vmatpush1.bf16.msra.mxu0 %v18736_v46  ;;  %v18747_v46 = vld [vmem:[#allocation125_spill] sm:$0xff] }
0x1b35   : > { %13886 = vmatprep.subr.bf16.mxu0 %v18737_v15 }
0x1b38   : > { %13888 = vmatpush1.bf16.msra.mxu0 %v18738_v37  ;;  %v18748_v37 = vld [vmem:[#allocation126_spill] sm:$0xff] }
0x1b39   : > { %13890 = vmatprep.subr.bf16.mxu0 %v18739_v45  ;;  %v18757_v45 = vld [vmem:[#allocation135_spill] sm:$0xff] }
0x1b3c   : > { %13892 = vmatpush1.bf16.msra.mxu0 %v18740_v19  ;;  %v18749_v19 = vld [vmem:[#allocation127_spill] sm:$0xff] }
0x1b3d   : > { %13894 = vmatprep.subr.bf16.mxu0 %v18741_v36  ;;  %v18750_v36 = vld [vmem:[#allocation128_spill] sm:$0xff] }
0x1b40   : > { %13896 = vmatpush1.bf16.msra.mxu0 %v18742_v43  ;;  %v18751_v43 = vld [vmem:[#allocation129_spill] sm:$0xff] }
0x1b41   : > { %13898 = vmatprep.subr.bf16.mxu0 %v18743_v23  ;;  %v18752_v23 = vld [vmem:[#allocation130_spill] sm:$0xff] }
0x1b44   : > { %13900 = vmatpush1.bf16.msra.mxu0 %v18744_v11  ;;  %v18753_v11 = vld [vmem:[#allocation131_spill] sm:$0xff] }
0x1b45   : > { %13902 = vmatprep.subr.bf16.mxu0 %v18745_v54  ;;  %v18754_v54 = vld [vmem:[#allocation132_spill] sm:$0xff] }
0x1b48   : > { %13904 = vmatpush1.bf16.msra.mxu0 %v18746_v6  ;;  %v18755_v6 = vld [vmem:[#allocation133_spill] sm:$0xff] }
0x1b49   : > { %13970 = vmatprep.subr.bf16.mxu0 %v18747_v46  ;;  %v18756_v46 = vld [vmem:[#allocation134_spill] sm:$0xff] }
0x1b4b   : > { %9202 = vmatmul.mubr.f32.vlgmr.msra.gmra.mrb[56].mxu0 %v17057_v31 }
0x1b4c   : > { %13972 = vmatpush1.bf16.msra.mxu0 %v18748_v37  ;;  %9509 = vmatprep.mubr.f32.mxu0 %v17054_v52 }
0x1b4d   : > { %13974 = vmatprep.subr.bf16.mxu0 %v18749_v19  ;;  %v18759_v19 = vld [vmem:[#allocation136_spill] sm:$0xff] }
0x1b50   : > { %13976 = vmatpush1.bf16.msra.mxu0 %v18750_v36  ;;  %v8285_v36 = vld [vmem:[%s18758_s21] sm:$0xf] }
0x1b51   : > { %13978 = vmatprep.subr.bf16.mxu0 %v18751_v43 }
0x1b54   : > { %13980 = vmatpush1.bf16.msra.mxu0 %v18752_v23 }
0x1b55   : > { %13982 = vmatprep.subr.bf16.mxu0 %v18753_v11 }
0x1b58   : > { %13984 = vmatpush1.bf16.msra.mxu0 %v18754_v54  ;;  %v18760_v54 = vld [vmem:[#allocation137_spill] sm:$0xff] }
0x1b59   : > { %13986 = vmatprep.subr.bf16.mxu0 %v18755_v6 }
0x1b5c   : > { %13988 = vmatpush1.bf16.msra.mxu0 %v18756_v46 }
0x1b5d   : > { %13990 = vmatprep.subr.bf16.mxu0 %v18757_v45  ;;  %v18761_v45 = vld [vmem:[#allocation138_spill] sm:$0xff] }
0x1b5e   : > { %v8280_v37 = vpop.f32.mrb[50].mxu0 }
0x1b5f   : > { %v8282_v15 = vpop.f32.mrb[51].mxu0 }
0x1b60   : > { %13992 = vmatpush1.bf16.msra.mxu0 %v18759_v19  ;;  %v8208_v43 = vpop.f32.mrb[52].mxu1  ;;  %11177 = vmatprep.subr.msk.mxu1 %vm4976_vm3, %v8282_v15  ;;  %v18762_v19 = vld [vmem:[#allocation139_spill] sm:$0xff]  ;;  %v18765_v15 = vld [vmem:[#allocation140_spill] sm:$0xff] }
0x1b61   : > { %v8210_v11 = vpop.f32.mrb[53].mxu1  ;;  %11178 = vmatpush1.msk.msra.mxu1 %vm4976_vm3, %v8280_v37  ;;  %13994 = vmatprep.subr.bf16.mxu0 %v18760_v54  ;;  %v8213_v37 = vld [vmem:[%s18763_s18] sm:$0xf]  ;;  %v18766_v54 = vld [vmem:[#allocation141_spill] sm:$0xff] }
0x1b62   : > { %11179 = vmatmul.mubr.msk.f32.vlgmr.msra.gmra.mrb[54].mxu1 %vm4972_vm4, %v8285_v36  ;;  %11180 = vmatprep.subr.msk.mxu1 %vm4976_vm3, %v8210_v11  ;;  %v18767_v36 = vld [vmem:[#allocation142_spill] sm:$0xff]  ;;  %v18768_v11 = vld [vmem:[#allocation143_spill] sm:$0xff] }
0x1b63   : > { %11181 = vmatpush1.msk.msra.mxu1 %vm4976_vm3, %v8208_v43  ;;  %8439 = vmatprep.mubr.f32.mxu1 %v18400_v60  ;;  %v18769_v43 = vld [vmem:[#allocation144_spill] sm:$0xff] }
0x1b64   : > { %13996 = vmatpush1.bf16.msra.mxu0 %v18761_v45  ;;  %13522 = vmatprep.subr.bf16.mxu1 %v18648_v47  ;;  %v18770_v47 = vld [vmem:[#allocation145_spill] sm:$0xff] }
0x1b65   : > { %13998 = vmatprep.subr.bf16.mxu0 %v18762_v19 }
0x1b68   : > { %14000 = vmatpush1.bf16.msra.mxu0 %v18765_v15 }
0x1b69   : > { %14002 = vmatprep.subr.bf16.mxu0 %v18766_v54 }
0x1b6a   : > { %11182 = vmatmul.mubr.msk.f32.vlgmr.msra.gmra.mrb[54].mxu1 %vm4972_vm4, %v8213_v37  ;;  %v18771_v37 = vld [vmem:[#allocation146_spill] sm:$0xff] }
0x1b6b   : > { %13524 = vmatpush1.bf16.msra.mxu1 %v18652_v22  ;;  %8512 = vmatprep.mubr.f32.mxu1 %v17062_v18  ;;  %v18772_v22 = vld [vmem:[#allocation147_spill] sm:$0xff] }
0x1b6c   : > { %14004 = vmatpush1.bf16.msra.mxu0 %v18767_v36  ;;  %13526 = vmatprep.subr.bf16.mxu1 %v18653_v50  ;;  %v18773_v50 = vld [vmem:[#allocation148_spill] sm:$0xff] }
0x1b6d   : > { %14006 = vmatprep.subr.bf16.mxu0 %v18768_v11 }
0x1b6f   : > { %13528 = vmatpush1.bf16.msra.mxu1 %v18654_v2  ;;  %v18774_v2 = vld [vmem:[#allocation149_spill] sm:$0xff] }
0x1b70   : > { %14008 = vmatpush1.bf16.msra.mxu0 %v18769_v43  ;;  %13530 = vmatprep.subr.bf16.mxu1 %v18655_v20  ;;  %v18775_v20 = vld [vmem:[#allocation150_spill] sm:$0xff] }
0x1b71   : > { %14010 = vmatprep.subr.bf16.mxu0 %v18770_v47 }
0x1b73   : > { %13532 = vmatpush1.bf16.msra.mxu1 %v18656_v39  ;;  %v18776_v39 = vld [vmem:[#allocation151_spill] sm:$0xff] }
0x1b74   : > { %14012 = vmatpush1.bf16.msra.mxu0 %v18771_v37  ;;  %13534 = vmatprep.subr.bf16.mxu1 %v18657_v56  ;;  %v18777_v56 = vld [vmem:[#allocation152_spill] sm:$0xff] }
0x1b75   : > { %14014 = vmatprep.subr.bf16.mxu0 %v18772_v22 }
0x1b77   : > { %13536 = vmatpush1.bf16.msra.mxu1 %v18658_v28  ;;  %v18778_v28 = vld [vmem:[#allocation153_spill] sm:$0xff] }
0x1b78   : > { %14016 = vmatpush1.bf16.msra.mxu0 %v18773_v50  ;;  %13538 = vmatprep.subr.bf16.mxu1 %v18659_v4  ;;  %v18779_v4 = vld [vmem:[#allocation154_spill] sm:$0xff] }
0x1b79   : > { %14018 = vmatprep.subr.bf16.mxu0 %v18774_v2 }
0x1b7b   : > { %13540 = vmatpush1.bf16.msra.mxu1 %v18660_v0  ;;  %v18780_v0 = vld [vmem:[#allocation155_spill] sm:$0xff] }
0x1b7c   : > { %14020 = vmatpush1.bf16.msra.mxu0 %v18775_v20  ;;  %13542 = vmatprep.subr.bf16.mxu1 %v18661_v14  ;;  %v18781_v14 = vld [vmem:[#allocation156_spill] sm:$0xff] }
0x1b7d   : > { %14022 = vmatprep.subr.bf16.mxu0 %v18776_v39 }
0x1b7f   : > { %13544 = vmatpush1.bf16.msra.mxu1 %v18662_v57  ;;  %v18782_v57 = vld [vmem:[#allocation157_spill] sm:$0xff] }
0x1b80   : > { %14024 = vmatpush1.bf16.msra.mxu0 %v18777_v56  ;;  %13546 = vmatprep.subr.bf16.mxu1 %v18663_v26  ;;  %v18783_v26 = vld [vmem:[#allocation158_spill] sm:$0xff] }
0x1b81   : > { %14026 = vmatprep.subr.bf16.mxu0 %v18778_v28 }
0x1b83   : > { %13548 = vmatpush1.bf16.msra.mxu1 %v18664_v53  ;;  %v18784_v53 = vld [vmem:[#allocation159_spill] sm:$0xff] }
0x1b84   : > { %14028 = vmatpush1.bf16.msra.mxu0 %v18779_v4  ;;  %13550 = vmatprep.subr.bf16.mxu1 %v18665_v58  ;;  %v18785_v58 = vld [vmem:[#allocation160_spill] sm:$0xff] }
0x1b85   : > { %14030 = vmatprep.subr.bf16.mxu0 %v18780_v0 }
0x1b87   : > { %13552 = vmatpush1.bf16.msra.mxu1 %v18666_v5  ;;  %v18786_v5 = vld [vmem:[#allocation161_spill] sm:$0xff] }
0x1b88   : > { %14032 = vmatpush1.bf16.msra.mxu0 %v18781_v14  ;;  %13554 = vmatprep.subr.bf16.mxu1 %v18667_v7  ;;  %v18787_v7 = vld [vmem:[#allocation162_spill] sm:$0xff] }
0x1b89   : > { %14098 = vmatprep.subr.bf16.mxu0 %v18782_v57 }
0x1b8b   : > { %13556 = vmatpush1.bf16.msra.mxu1 %v18668_v35  ;;  %9510 = vmatmul.mubr.f32.vlgmr.msra.gmra.mrb[58].mxu0 %v17057_v31  ;;  %v18788_v35 = vld [vmem:[#allocation163_spill] sm:$0xff] }
0x1b8c   : > { %14100 = vmatpush1.bf16.msra.mxu0 %v18783_v26  ;;  %9817 = vmatprep.mubr.f32.mxu0 %v17054_v52 }
0x1b8d   : > { %13558 = vmatprep.subr.bf16.mxu1 %v18669_v38  ;;  %14102 = vmatprep.subr.bf16.mxu0 %v18784_v53  ;;  %v18789_v38 = vld [vmem:[#allocation164_spill] sm:$0xff] }
0x1b8f   : > { %13560 = vmatpush1.bf16.msra.mxu1 %v18670_v49  ;;  %v18790_v49 = vld [vmem:[#allocation165_spill] sm:$0xff] }
0x1b90   : > { %14104 = vmatpush1.bf16.msra.mxu0 %v18785_v58  ;;  %13562 = vmatprep.subr.bf16.mxu1 %v18671_v59  ;;  %v18791_v59 = vld [vmem:[#allocation166_spill] sm:$0xff] }
0x1b91   : > { %14106 = vmatprep.subr.bf16.mxu0 %v18786_v5 }
0x1b93   : > { %13564 = vmatpush1.bf16.msra.mxu1 %v18672_v61  ;;  %v18792_v61 = vld [vmem:[#allocation167_spill] sm:$0xff] }
0x1b94   : > { %14108 = vmatpush1.bf16.msra.mxu0 %v18787_v7  ;;  %13566 = vmatprep.subr.bf16.mxu1 %v18673_v10 }
0x1b95   : > { %14110 = vmatprep.subr.bf16.mxu0 %v18788_v35  ;;  %v18793_v35 = vld [vmem:[#allocation168_spill] sm:$0xff] }
0x1b97   : > { %13568 = vmatpush1.bf16.msra.mxu1 %v18674_v13  ;;  %v18794_v13 = vld [vmem:[#allocation169_spill] sm:$0xff] }
0x1b98   : > { %14112 = vmatpush1.bf16.msra.mxu0 %v18789_v38  ;;  %13570 = vmatprep.subr.bf16.mxu1 %v18675_v33  ;;  %v18795_v33 = vld [vmem:[#allocation170_spill] sm:$0xff] }
0x1b99   : > { %14114 = vmatprep.subr.bf16.mxu0 %v18790_v49 }
0x1b9b   : > { %13572 = vmatpush1.bf16.msra.mxu1 %v18676_v16  ;;  %v18796_v16 = vld [vmem:[#allocation171_spill] sm:$0xff] }
0x1b9c   : > { %14116 = vmatpush1.bf16.msra.mxu0 %v18791_v59  ;;  %13574 = vmatprep.subr.bf16.mxu1 %v18677_v63  ;;  %v18797_v63 = vld [vmem:[#allocation172_spill] sm:$0xff]  ;;  %v18867_v59 = vld [vmem:[#allocation242_spill] sm:$0xff] }
0x1b9d   : > { %14118 = vmatprep.subr.bf16.mxu0 %v18792_v61  ;;  %v18835_v61 = vld [vmem:[#allocation210_spill] sm:$0xff] }
0x1b9e   : > { %v8587_v7 = vpop.f32.mrb[52].mxu0 }
0x1b9f   : > { %13576 = vmatpush1.bf16.msra.mxu1 %v18678_v3  ;;  %v8589_v10 = vpop.f32.mrb[53].mxu0  ;;  %v18798_v3 = vld [vmem:[#allocation173_spill] sm:$0xff] }
0x1ba0   : > { %14120 = vmatpush1.bf16.msra.mxu0 %v18793_v35  ;;  %13578 = vmatprep.subr.bf16.mxu1 %v18679_v55  ;;  %v18799_v55 = vld [vmem:[#allocation174_spill] sm:$0xff]  ;;  %v18834_v35 = vld [vmem:[#allocation209_spill] sm:$0xff] }
0x1ba1   : > { %14122 = vmatprep.subr.bf16.mxu0 %v18794_v13  ;;  %v18809_v13 = vld [vmem:[#allocation184_spill] sm:$0xff] }
0x1ba3   : > { %13580 = vmatpush1.bf16.msra.mxu1 %v18680_v32  ;;  %v18800_v32 = vld [vmem:[#allocation175_spill] sm:$0xff] }
0x1ba4   : > { %14124 = vmatpush1.bf16.msra.mxu0 %v18795_v33  ;;  %13582 = vmatprep.subr.bf16.mxu1 %v18681_v44  ;;  %v18801_v44 = vld [vmem:[#allocation176_spill] sm:$0xff]  ;;  %v18807_v33 = vld [vmem:[#allocation182_spill] sm:$0xff] }
0x1ba5   : > { %14126 = vmatprep.subr.bf16.mxu0 %v18796_v16  ;;  %v18802_v16 = vld [vmem:[#allocation177_spill] sm:$0xff] }
0x1ba7   : > { %13584 = vmatpush1.bf16.msra.mxu1 %v18682_v8  ;;  %v18803_v8 = vld [vmem:[#allocation178_spill] sm:$0xff] }
0x1ba8   : > { %11185 = vmatprep.subr.msk.mxu1 %vm4976_vm3, %v8589_v10  ;;  %14128 = vmatpush1.bf16.msra.mxu0 %v18797_v63  ;;  %v18804_v10 = vld [vmem:[#allocation179_spill] sm:$0xff]  ;;  %v18805_v63 = vld [vmem:[#allocation180_spill] sm:$0xff] }
0x1ba9   : > { %14130 = vmatprep.subr.bf16.mxu0 %v18798_v3  ;;  %v18806_v3 = vld [vmem:[#allocation181_spill] sm:$0xff] }
0x1baa   : > { %8513 = vmatmul.mubr.f32.vlgmr.msra.gmra.mrb[56].mxu1 %v17051_v62 }
0x1bab   : > { %11186 = vmatpush1.msk.msra.mxu1 %vm4976_vm3, %v8587_v7  ;;  %8667 = vmatprep.mubr.f32.mxu1 %v18400_v60  ;;  %v18808_v7 = vld [vmem:[#allocation183_spill] sm:$0xff] }
0x1bac   : > { %14132 = vmatpush1.bf16.msra.mxu0 %v18799_v55  ;;  %v18810_v55 = vld [vmem:[#allocation185_spill] sm:$0xff] }
0x1bad   : > { %14134 = vmatprep.subr.bf16.mxu0 %v18800_v32  ;;  %v18811_v32 = vld [vmem:[#allocation186_spill] sm:$0xff] }
0x1bb0   : > { %14136 = vmatpush1.bf16.msra.mxu0 %v18801_v44  ;;  %v18812_v44 = vld [vmem:[#allocation187_spill] sm:$0xff] }
0x1bb1   : > { %14138 = vmatprep.subr.bf16.mxu0 %v18802_v16  ;;  %v18813_v16 = vld [vmem:[#allocation188_spill] sm:$0xff] }
0x1bb4   : > { %14140 = vmatpush1.bf16.msra.mxu0 %v18803_v8  ;;  %v18814_v8 = vld [vmem:[#allocation189_spill] sm:$0xff] }
0x1bb5   : > { %14142 = vmatprep.subr.bf16.mxu0 %v18804_v10 }
0x1bb8   : > { %14144 = vmatpush1.bf16.msra.mxu0 %v18805_v63  ;;  %v18815_v63 = vld [vmem:[#allocation190_spill] sm:$0xff] }
0x1bb9   : > { %14146 = vmatprep.subr.bf16.mxu0 %v18806_v3  ;;  %v18824_v3 = vld [vmem:[#allocation199_spill] sm:$0xff] }
0x1bbc   : > { %14148 = vmatpush1.bf16.msra.mxu0 %v18807_v33  ;;  %v18816_v33 = vld [vmem:[#allocation191_spill] sm:$0xff] }
0x1bbd   : > { %14150 = vmatprep.subr.bf16.mxu0 %v18808_v7  ;;  %v18817_v7 = vld [vmem:[#allocation192_spill] sm:$0xff] }
0x1bc0   : > { %14152 = vmatpush1.bf16.msra.mxu0 %v18809_v13  ;;  %v18818_v13 = vld [vmem:[#allocation193_spill] sm:$0xff] }
0x1bc1   : > { %14154 = vmatprep.subr.bf16.mxu0 %v18810_v55  ;;  %v18819_v55 = vld [vmem:[#allocation194_spill] sm:$0xff] }
0x1bc4   : > { %14156 = vmatpush1.bf16.msra.mxu0 %v18811_v32  ;;  %v18820_v32 = vld [vmem:[#allocation195_spill] sm:$0xff] }
0x1bc5   : > { %14158 = vmatprep.subr.bf16.mxu0 %v18812_v44  ;;  %v18821_v44 = vld [vmem:[#allocation196_spill] sm:$0xff] }
0x1bc8   : > { %14160 = vmatpush1.bf16.msra.mxu0 %v18813_v16  ;;  %v18822_v16 = vld [vmem:[#allocation197_spill] sm:$0xff] }
0x1bc9   : > { %14226 = vmatprep.subr.bf16.mxu0 %v18814_v8  ;;  %v18823_v8 = vld [vmem:[#allocation198_spill] sm:$0xff] }
0x1bcb   : > { %9818 = vmatmul.mubr.f32.vlgmr.msra.gmra.mrb[60].mxu0 %v17057_v31 }
0x1bcc   : > { %14228 = vmatpush1.bf16.msra.mxu0 %v18815_v63  ;;  %10125 = vmatprep.mubr.f32.mxu0 %v17054_v52 }
0x1bcd   : > { %14230 = vmatprep.subr.bf16.mxu0 %v18816_v33  ;;  %v18825_v33 = vld [vmem:[#allocation200_spill] sm:$0xff] }
0x1bd0   : > { %14232 = vmatpush1.bf16.msra.mxu0 %v18817_v7  ;;  %v18826_v7 = vld [vmem:[#allocation201_spill] sm:$0xff] }
0x1bd1   : > { %14234 = vmatprep.subr.bf16.mxu0 %v18818_v13  ;;  %v18827_v13 = vld [vmem:[#allocation202_spill] sm:$0xff] }
0x1bd4   : > { %14236 = vmatpush1.bf16.msra.mxu0 %v18819_v55  ;;  %v18828_v55 = vld [vmem:[#allocation203_spill] sm:$0xff] }
0x1bd5   : > { %14238 = vmatprep.subr.bf16.mxu0 %v18820_v32  ;;  %v18829_v32 = vld [vmem:[#allocation204_spill] sm:$0xff] }
0x1bd8   : > { %14240 = vmatpush1.bf16.msra.mxu0 %v18821_v44  ;;  %v18830_v44 = vld [vmem:[#allocation205_spill] sm:$0xff] }
0x1bd9   : > { %14242 = vmatprep.subr.bf16.mxu0 %v18822_v16  ;;  %v18831_v16 = vld [vmem:[#allocation206_spill] sm:$0xff] }
0x1bdc   : > { %14244 = vmatpush1.bf16.msra.mxu0 %v18823_v8  ;;  %v18832_v8 = vld [vmem:[#allocation207_spill] sm:$0xff] }
0x1bdd   : > { %14246 = vmatprep.subr.bf16.mxu0 %v18824_v3  ;;  %v18833_v3 = vld [vmem:[#allocation208_spill] sm:$0xff] }
0x1bde   : > { %v17299_v63 = vpop.f32.mrb[54].mxu0 }
0x1bdf   : > { %v17301_v10 = vpop.f32.mrb[55].mxu0 }
0x1be0   : > { %14248 = vmatpush1.bf16.msra.mxu0 %v18825_v33  ;;  %v18836_v33 = vld [vmem:[#allocation211_spill] sm:$0xff] }
0x1be1   : > { %14250 = vmatprep.subr.bf16.mxu0 %v18826_v7  ;;  %v18837_v7 = vld [vmem:[#allocation212_spill] sm:$0xff] }
0x1be4   : > { %14252 = vmatpush1.bf16.msra.mxu0 %v18827_v13  ;;  %v18866_v13 = vld [vmem:[#allocation241_spill] sm:$0xff] }
0x1be5   : > { %14254 = vmatprep.subr.bf16.mxu0 %v18828_v55  ;;  %v18838_v55 = vld [vmem:[#allocation213_spill] sm:$0xff] }
0x1be8   : > { %14256 = vmatpush1.bf16.msra.mxu0 %v18829_v32  ;;  %v11184_v32 = vld [vmem:[%s18758_s21 + $0x4] sm:$0xf] }
0x1be9   : > { %14258 = vmatprep.subr.bf16.mxu0 %v18830_v44  ;;  %11187 = vmatmul.mubr.msk.f32.vlgmr.msra.gmra.mrb[54].mxu1 %vm4972_vm4, %v11184_v32  ;;  %v18846_v44 = vld [vmem:[#allocation221_spill] sm:$0xff]  ;;  %v18847_v32 = vld [vmem:[#allocation222_spill] sm:$0xff] }
0x1bea   : > { %8747 = vmatprep.mubr.f32.mxu1 %v18400_v60 }
0x1bec   : > { %14260 = vmatpush1.bf16.msra.mxu0 %v18831_v16  ;;  %v18845_v16 = vld [vmem:[#allocation220_spill] sm:$0xff] }
0x1bed   : > { %14262 = vmatprep.subr.bf16.mxu0 %v18832_v8  ;;  %v18839_v8 = vld [vmem:[#allocation214_spill] sm:$0xff] }
0x1bf0   : > { %14264 = vmatpush1.bf16.msra.mxu0 %v18833_v3  ;;  %v18840_v3 = vld [vmem:[#allocation215_spill] sm:$0xff] }
0x1bf1   : > { %14266 = vmatprep.subr.bf16.mxu0 %v18834_v35  ;;  %v18841_v35 = vld [vmem:[#allocation216_spill] sm:$0xff] }
0x1bf4   : > { %14268 = vmatpush1.bf16.msra.mxu0 %v18835_v61  ;;  %v18842_v61 = vld [vmem:[#allocation217_spill] sm:$0xff] }
0x1bf5   : > { %14270 = vmatprep.subr.bf16.mxu0 %v18836_v33  ;;  %v18843_v33 = vld [vmem:[#allocation218_spill] sm:$0xff] }
0x1bf8   : > { %14272 = vmatpush1.bf16.msra.mxu0 %v18837_v7  ;;  %v18844_v7 = vld [vmem:[#allocation219_spill] sm:$0xff] }
0x1bf9   : > { %14274 = vmatprep.subr.bf16.mxu0 %v18838_v55  ;;  %v18856_v55 = vld [vmem:[#allocation231_spill] sm:$0xff] }
0x1bfc   : > { %14276 = vmatpush1.bf16.msra.mxu0 %v18839_v8  ;;  %v18848_v8 = vld [vmem:[#allocation223_spill] sm:$0xff] }
0x1bfd   : > { %14278 = vmatprep.subr.bf16.mxu0 %v18840_v3  ;;  %v18849_v3 = vld [vmem:[#allocation224_spill] sm:$0xff] }
0x1c00   : > { %14280 = vmatpush1.bf16.msra.mxu0 %v18841_v35  ;;  %v18850_v35 = vld [vmem:[#allocation225_spill] sm:$0xff] }
0x1c01   : > { %14282 = vmatprep.subr.bf16.mxu0 %v18842_v61  ;;  %v18851_v61 = vld [vmem:[#allocation226_spill] sm:$0xff] }
0x1c04   : > { %14284 = vmatpush1.bf16.msra.mxu0 %v18843_v33  ;;  %v18852_v33 = vld [vmem:[#allocation227_spill] sm:$0xff] }
0x1c05   : > { %14286 = vmatprep.subr.bf16.mxu0 %v18844_v7  ;;  %v18853_v7 = vld [vmem:[#allocation228_spill] sm:$0xff] }
0x1c08   : > { %14288 = vmatpush1.bf16.msra.mxu0 %v18845_v16  ;;  %v18854_v16 = vld [vmem:[#allocation229_spill] sm:$0xff] }
0x1c09   : > { %14354 = vmatprep.subr.bf16.mxu0 %v18846_v44  ;;  %v18855_v44 = vld [vmem:[#allocation230_spill] sm:$0xff] }
0x1c0b   : > { %10126 = vmatmul.mubr.f32.vlgmr.msra.gmra.mrb[62].mxu0 %v17057_v31 }
0x1c0c   : > { %14356 = vmatpush1.bf16.msra.mxu0 %v18847_v32  ;;  %10433 = vmatprep.mubr.f32.mxu0 %v17054_v52 }
0x1c0d   : > { %14358 = vmatprep.subr.bf16.mxu0 %v18848_v8  ;;  %v18857_v8 = vld [vmem:[#allocation232_spill] sm:$0xff] }
0x1c10   : > { %14360 = vmatpush1.bf16.msra.mxu0 %v18849_v3  ;;  %v18858_v3 = vld [vmem:[#allocation233_spill] sm:$0xff] }
0x1c11   : > { %14362 = vmatprep.subr.bf16.mxu0 %v18850_v35  ;;  %v18859_v35 = vld [vmem:[#allocation234_spill] sm:$0xff] }
0x1c14   : > { %14364 = vmatpush1.bf16.msra.mxu0 %v18851_v61  ;;  %v18860_v61 = vld [vmem:[#allocation235_spill] sm:$0xff] }
0x1c15   : > { %14366 = vmatprep.subr.bf16.mxu0 %v18852_v33  ;;  %v18861_v33 = vld [vmem:[#allocation236_spill] sm:$0xff] }
0x1c18   : > { %14368 = vmatpush1.bf16.msra.mxu0 %v18853_v7  ;;  %v18862_v7 = vld [vmem:[#allocation237_spill] sm:$0xff] }
0x1c19   : > { %14370 = vmatprep.subr.bf16.mxu0 %v18854_v16  ;;  %v18863_v16 = vld [vmem:[#allocation238_spill] sm:$0xff] }
0x1c1c   : > { %14372 = vmatpush1.bf16.msra.mxu0 %v18855_v44  ;;  %v18864_v44 = vld [vmem:[#allocation239_spill] sm:$0xff] }
0x1c1d   : > { %14374 = vmatprep.subr.bf16.mxu0 %v18856_v55  ;;  %v18865_v55 = vld [vmem:[#allocation240_spill] sm:$0xff] }
0x1c1e   : > { %v17342_v32 = vpop.f32.mrb[56].mxu0 }
0x1c1f   : > { %v17344_v52 = vpop.f32.mrb[57].mxu0 }
0x1c20   : > { %14376 = vmatpush1.bf16.msra.mxu0 %v18857_v8  ;;  %v18868_v8 = vld [vmem:[#allocation243_spill] sm:$0xff] }
0x1c21   : > { %14378 = vmatprep.subr.bf16.mxu0 %v18858_v3  ;;  %v18869_v3 = vld [vmem:[#allocation244_spill] sm:$0xff] }
0x1c24   : > { %14380 = vmatpush1.bf16.msra.mxu0 %v18859_v35  ;;  %v18870_v35 = vld [vmem:[#allocation245_spill] sm:$0xff] }
0x1c25   : > { %14382 = vmatprep.subr.bf16.mxu0 %v18860_v61  ;;  %v18871_v61 = vld [vmem:[#allocation246_spill] sm:$0xff] }
0x1c28   : > { %14384 = vmatpush1.bf16.msra.mxu0 %v18861_v33  ;;  %v18872_v33 = vld [vmem:[#allocation247_spill] sm:$0xff] }
0x1c29   : > { %14386 = vmatprep.subr.bf16.mxu0 %v18862_v7  ;;  %v18873_v7 = vld [vmem:[#allocation248_spill] sm:$0xff] }
0x1c2c   : > { %14388 = vmatpush1.bf16.msra.mxu0 %v18863_v16  ;;  %v18874_v16 = vld [vmem:[#allocation249_spill] sm:$0xff] }
0x1c2d   : > { %14390 = vmatprep.subr.bf16.mxu0 %v18864_v44  ;;  %v18875_v44 = vld [vmem:[#allocation250_spill] sm:$0xff] }
0x1c30   : > { %14392 = vmatpush1.bf16.msra.mxu0 %v18865_v55  ;;  %v18876_v55 = vld [vmem:[#allocation251_spill] sm:$0xff] }
0x1c31   : > { %14394 = vmatprep.subr.bf16.mxu0 %v18866_v13  ;;  %v18877_v13 = vld [vmem:[#allocation252_spill] sm:$0xff] }
0x1c34   : > { %14396 = vmatpush1.bf16.msra.mxu0 %v18867_v59 }
0x1c35   : > { %14398 = vmatprep.subr.bf16.mxu0 %v18868_v8 }
0x1c38   : > { %14400 = vmatpush1.bf16.msra.mxu0 %v18869_v3 }
0x1c39   : > { %14402 = vmatprep.subr.bf16.mxu0 %v18870_v35 }
0x1c3c   : > { %14404 = vmatpush1.bf16.msra.mxu0 %v18871_v61 }
0x1c3d   : > { %14406 = vmatprep.subr.bf16.mxu0 %v18872_v33 }
0x1c40   : > { %14408 = vmatpush1.bf16.msra.mxu0 %v18873_v7 }
0x1c41   : > { %14410 = vmatprep.subr.bf16.mxu0 %v18874_v16 }
0x1c44   : > { %14412 = vmatpush1.bf16.msra.mxu0 %v18875_v44 }
0x1c45   : > { %14414 = vmatprep.subr.bf16.mxu0 %v18876_v55 }
0x1c48   : > { %14416 = vmatpush1.bf16.msra.mxu0 %v18877_v13 }
0x1c49   : > { %14418 = vmatprep.subr.bf16.mxu0 %v16819_v41  ;;  %v18940_v41 = vld [vmem:[#allocation105_spill] sm:$0xff] }
0x1c4b   : > { %10434 = vmatmul.mubr.f32.vlgmr.msra.gmra.mrb[64].mxu0 %v17057_v31 }
0x1c4c   : > { %14420 = vmatpush1.bf16.msra.mxu0 %v16822_v9  ;;  %10668 = vmatprep.mubr.f32.mxu0 %v17062_v18 }
0x1c4d   : > { %14422 = vmatprep.subr.bf16.mxu0 %v16825_v40  ;;  %v18934_v40 = vld [vmem:[#allocation99_spill] sm:$0xff] }
0x1c50   : > { %14424 = vmatpush1.bf16.msra.mxu0 %v16827_v25  ;;  %v18920_v25 = vld [vmem:[#allocation87_spill] sm:$0xff] }
0x1c51   : > { %14426 = vmatprep.subr.bf16.mxu0 %v16831_v48  ;;  %v18919_v48 = vld [vmem:[#allocation86_spill] sm:$0xff] }
0x1c54   : > { %14428 = vmatpush1.bf16.msra.mxu0 %v16833_v51  ;;  %v18883_v51 = vld [vmem:[#allocation275_spill] sm:$0xff] }
0x1c55   : > { %14430 = vmatprep.subr.bf16.mxu0 %v16837_v42  ;;  %v18882_v42 = vld [vmem:[#allocation274_spill] sm:$0xff] }
0x1c58   : > { %14432 = vmatpush1.bf16.msra.mxu0 %v16839_v24  ;;  %v18878_v24 = vld [vmem:[#allocation270_spill] sm:$0xff] }
0x1c59   : > { %14434 = vmatprep.subr.bf16.mxu0 %v16843_v21  ;;  %v18879_v21 = vld [vmem:[#allocation271_spill] sm:$0xff] }
0x1c5c   : > { %14436 = vmatpush1.bf16.msra.mxu0 %v16845_v34  ;;  %v18880_v34 = vld [vmem:[#allocation272_spill] sm:$0xff] }
0x1c5d   : > { %14438 = vmatprep.subr.bf16.mxu0 %v16849_v17  ;;  %v18881_v17 = vld [vmem:[#allocation273_spill] sm:$0xff] }
0x1c5e   : > { %v17380_v31 = vpop.f32.mrb[58].mxu0 }
0x1c5f   : > { %v17382_v9 = vpop.f32.mrb[59].mxu0 }
0x1c60   : > { %14440 = vmatpush1.bf16.msra.mxu0 %v16851_v1  ;;  %v18884_v1 = vld [vmem:[#allocation276_spill] sm:$0xff] }
0x1c61   : > { %14442 = vmatprep.subr.bf16.mxu0 %v16855_v27  ;;  %v18885_v27 = vld [vmem:[#allocation277_spill] sm:$0xff] }
0x1c64   : > { %14444 = vmatpush1.bf16.msra.mxu0 %v16857_v29  ;;  %v18886_v29 = vld [vmem:[#allocation278_spill] sm:$0xff] }
0x1c65   : > { %14446 = vmatprep.subr.bf16.mxu0 %v16861_v30  ;;  %v18887_v30 = vld [vmem:[#allocation279_spill] sm:$0xff] }
0x1c68   : > { %14448 = vmatpush1.bf16.msra.mxu0 %v16863_v12 }
0x1c69   : > { %14450 = vmatprep.subr.bf16.mxu0 %v18878_v24  ;;  %v18888_v24 = vld [vmem:[#allocation280_spill] sm:$0xff] }
0x1c6c   : > { %14452 = vmatpush1.bf16.msra.mxu0 %v18879_v21 }
0x1c6d   : > { %14454 = vmatprep.subr.bf16.mxu0 %v18880_v34 }
0x1c70   : > { %14456 = vmatpush1.bf16.msra.mxu0 %v18881_v17  ;;  %v11183_v17 = vld [vmem:[%s18764_s29 + $0x4] sm:$0xf] }
0x1c71   : > { %14458 = vmatprep.subr.bf16.mxu0 %v18882_v42  ;;  %v18895_v42 = vld [vmem:[#allocation284_spill] sm:$0xff] }
0x1c74   : > { %14460 = vmatpush1.bf16.msra.mxu0 %v18883_v51  ;;  %v18889_v51 = vld [vmem:[#allocation281_spill] sm:$0xff] }
0x1c75   : > { %14462 = vmatprep.subr.bf16.mxu0 %v18884_v1  ;;  %v18894_v1 = vld [vmem:[#allocation283_spill] sm:$0xff] }
0x1c78   : > { %14464 = vmatpush1.bf16.msra.mxu0 %v18885_v27  ;;  %v18890_v27 = vld [vmem:[#allocation61_spill] sm:$0xff] }
0x1c79   : > { %14466 = vmatprep.subr.bf16.mxu0 %v18886_v29  ;;  %v18891_v29 = vld [vmem:[#allocation62_spill] sm:$0xff] }
0x1c7c   : > { %14468 = vmatpush1.bf16.msra.mxu0 %v18887_v30  ;;  %v18893_v30 = vld [vmem:[#allocation63_spill] sm:$0xff] }
0x1c7d   : > { %v8514_v12 = vpop.f32.mrb[56].mxu1  ;;  %14470 = vmatprep.subr.bf16.mxu0 %v18888_v24  ;;  %v18892_v24 = vld [vmem:[#allocation282_spill] sm:$0xff] }
0x1c7e   : > { %v8516_v21 = vpop.f32.mrb[57].mxu1 }
0x1c7f   : > { %11188 = vmatprep.subr.msk.mxu1 %vm4976_vm3, %v8516_v21  ;;  %v18896_v21 = vld [vmem:[#allocation64_spill] sm:$0xff] }
0x1c80   : > { %11189 = vmatpush1.msk.msra.mxu1 %vm4976_vm3, %v8514_v12  ;;  %14472 = vmatpush1.bf16.msra.mxu0 %v18889_v51  ;;  %v18897_v12 = vld [vmem:[#allocation65_spill] sm:$0xff] }
0x1c81   : > { %11190 = vmatmul.mubr.msk.f32.vlgmr.msra.gmra.mrb[54].mxu1 %vm4972_vm4, %v11183_v17  ;;  %13650 = vmatprep.subr.bf16.mxu1 %v18890_v27  ;;  %v18898_v51 = vld [vmem:[#allocation285_spill] sm:$0xff]  ;;  %v18899_v17 = vld [vmem:[#allocation66_spill] sm:$0xff]  ;;  %v18901_v27 = vld [vmem:[#allocation68_spill] sm:$0xff] }
0x1c82   : > { %13652 = vmatpush1.bf16.msra.mxu1 %v18891_v29  ;;  %8820 = vmatprep.mubr.f32.mxu1 %v17062_v18  ;;  %v18900_v29 = vld [vmem:[#allocation67_spill] sm:$0xff] }
0x1c83   : > { %14474 = vmatprep.subr.bf16.mxu0 %v18892_v24  ;;  %13654 = vmatprep.subr.bf16.mxu1 %v18893_v30  ;;  %v18902_v24 = vld [vmem:[#allocation69_spill] sm:$0xff]  ;;  %v18903_v30 = vld [vmem:[#allocation70_spill] sm:$0xff] }
0x1c84   : > { %14476 = vmatpush1.bf16.msra.mxu0 %v18894_v1  ;;  %v18904_v1 = vld [vmem:[#allocation71_spill] sm:$0xff] }
0x1c85   : > { %14478 = vmatprep.subr.bf16.mxu0 %v18895_v42  ;;  %v18905_v42 = vld [vmem:[#allocation72_spill] sm:$0xff] }
0x1c86   : > { %13656 = vmatpush1.bf16.msra.mxu1 %v18896_v21  ;;  %v18906_v21 = vld [vmem:[#allocation73_spill] sm:$0xff] }
0x1c87   : > { %13658 = vmatprep.subr.bf16.mxu1 %v18897_v12  ;;  %v18907_v12 = vld [vmem:[#allocation74_spill] sm:$0xff] }
0x1c88   : > { %14480 = vmatpush1.bf16.msra.mxu0 %v18898_v51  ;;  %v18908_v51 = vld [vmem:[#allocation75_spill] sm:$0xff] }
0x1c8a   : > { %13660 = vmatpush1.bf16.msra.mxu1 %v18899_v17  ;;  %v18909_v17 = vld [vmem:[#allocation76_spill] sm:$0xff] }
0x1c8b   : > { %10669 = vmatmul.mubr.f32.vlgmr.msra.gmra.mrb[66].mxu0 %v17051_v62  ;;  %13662 = vmatprep.subr.bf16.mxu1 %v18900_v29 }
0x1c8e   : > { %13664 = vmatpush1.bf16.msra.mxu1 %v18901_v27  ;;  %v18910_v27 = vld [vmem:[#allocation77_spill] sm:$0xff] }
0x1c8f   : > { %13666 = vmatprep.subr.bf16.mxu1 %v18902_v24  ;;  %v18911_v24 = vld [vmem:[#allocation78_spill] sm:$0xff] }
0x1c92   : > { %13668 = vmatpush1.bf16.msra.mxu1 %v18903_v30  ;;  %v18912_v30 = vld [vmem:[#allocation79_spill] sm:$0xff] }
0x1c93   : > { %13670 = vmatprep.subr.bf16.mxu1 %v18904_v1  ;;  %v18913_v1 = vld [vmem:[#allocation80_spill] sm:$0xff] }
0x1c96   : > { %13672 = vmatpush1.bf16.msra.mxu1 %v18905_v42  ;;  %v18914_v42 = vld [vmem:[#allocation81_spill] sm:$0xff] }
0x1c97   : > { %13674 = vmatprep.subr.bf16.mxu1 %v18906_v21  ;;  %v18915_v21 = vld [vmem:[#allocation82_spill] sm:$0xff] }
0x1c9a   : > { %13676 = vmatpush1.bf16.msra.mxu1 %v18907_v12  ;;  %v18916_v12 = vld [vmem:[#allocation83_spill] sm:$0xff] }
0x1c9b   : > { %13678 = vmatprep.subr.bf16.mxu1 %v18908_v51  ;;  %v18917_v51 = vld [vmem:[#allocation84_spill] sm:$0xff] }
0x1c9e   : > { %13680 = vmatpush1.bf16.msra.mxu1 %v18909_v17  ;;  %v17429_v34 = vpop.f32.mrb[60].mxu0  ;;  %v18918_v17 = vld [vmem:[#allocation85_spill] sm:$0xff] }
0x1c9f   : > { %v17431_v29 = vpop.f32.mrb[61].mxu0  ;;  %13682 = vmatprep.subr.bf16.mxu1 %v18910_v27  ;;  %v18921_v27 = vld [vmem:[#allocation88_spill] sm:$0xff] }
0x1ca2   : > { %13684 = vmatpush1.bf16.msra.mxu1 %v18911_v24  ;;  %v18922_v24 = vld [vmem:[#allocation89_spill] sm:$0xff] }
0x1ca3   : > { %13686 = vmatprep.subr.bf16.mxu1 %v18912_v30  ;;  %v18923_v30 = vld [vmem:[#allocation90_spill] sm:$0xff] }
0x1ca6   : > { %13688 = vmatpush1.bf16.msra.mxu1 %v18913_v1  ;;  %v18924_v1 = vld [vmem:[#allocation91_spill] sm:$0xff] }
0x1ca7   : > { %13690 = vmatprep.subr.bf16.mxu1 %v18914_v42  ;;  %v18925_v42 = vld [vmem:[#allocation92_spill] sm:$0xff] }
0x1caa   : > { %13692 = vmatpush1.bf16.msra.mxu1 %v18915_v21  ;;  %v11192_v21 = vld [vmem:[%s18758_s21 + $0x8] sm:$0xf] }
0x1cab   : > { %13694 = vmatprep.subr.bf16.mxu1 %v18916_v12 }
0x1cae   : > { %13696 = vmatpush1.bf16.msra.mxu1 %v18917_v51 }
0x1caf   : > { %13698 = vmatprep.subr.bf16.mxu1 %v18918_v17 }
0x1cb2   : > { %13700 = vmatpush1.bf16.msra.mxu1 %v18919_v48 }
0x1cb3   : > { %13702 = vmatprep.subr.bf16.mxu1 %v18920_v25 }
0x1cb6   : > { %13704 = vmatpush1.bf16.msra.mxu1 %v18921_v27 }
0x1cb7   : > { %13706 = vmatprep.subr.bf16.mxu1 %v18922_v24  ;;  %v11191_v24 = vld [vmem:[%s18764_s29 + $0x8] sm:$0xf] }
0x1cba   : > { %13708 = vmatpush1.bf16.msra.mxu1 %v18923_v30  ;;  %v18928_v30 = vld [vmem:[#allocation93_spill] sm:$0xff] }
0x1cbb   : > { %13710 = vmatprep.subr.bf16.mxu1 %v18924_v1  ;;  %v18929_v1 = vld [vmem:[#allocation94_spill] sm:$0xff] }
0x1cbe   : > { %13712 = vmatpush1.bf16.msra.mxu1 %v18925_v42  ;;  %v18930_v42 = vld [vmem:[#allocation95_spill] sm:$0xff] }
0x1cbf   : > { %11193 = vmatprep.subr.msk.mxu1 %vm4976_vm3, %v17301_v10 }
0x1cc1   : > { %8821 = vmatmul.mubr.f32.vlgmr.msra.gmra.mrb[58].mxu1 %v17051_v62 }
0x1cc2   : > { %11194 = vmatpush1.msk.msra.mxu1 %vm4976_vm3, %v17299_v63  ;;  %8975 = vmatprep.mubr.f32.mxu1 %v18400_v60 }
0x1cc5   : > { %11195 = vmatmul.mubr.msk.f32.vlgmr.msra.gmra.mrb[54].mxu1 %vm4972_vm4, %v11192_v21  ;;  %v18931_v21 = vld [vmem:[#allocation96_spill] sm:$0xff] }
0x1cc6   : > { %9055 = vmatprep.mubr.f32.mxu1 %v18400_v60 }
0x1cde   : > { %v17455_v48 = vpop.f32.mrb[62].mxu0 }
0x1cdf   : > { %v17457_v25 = vpop.f32.mrb[63].mxu0 }
0x1d1e   : > { %v17464_v10 = vpop.f32.mrb[64].mxu0 }
0x1d1f   : > { %v17466_v12 = vpop.f32.mrb[65].mxu0 }
0x1d5e   : > { %v17468_v51 = vpop.f32.mrb[66].mxu0 }
0x1d5f   : > { %18926 = vst [vmem:[#allocation20_spill] sm:$0xff] %v17468_v51  ;;  %v17470_v63 = vpop.f32.mrb[67].mxu0  ;;  %v18932_v51 = vld [vmem:[#allocation97_spill] sm:$0xff] }
0x1d60   : > { %18927 = vst [vmem:[#allocation21_spill] sm:$0xff] %v17470_v63  ;;  %v18933_v63 = vld [vmem:[#allocation98_spill] sm:$0xff] }
0x1d94   : > { %v8822_v17 = vpop.f32.mrb[58].mxu1 }
0x1d95   : > { %v8824_v27 = vpop.f32.mrb[59].mxu1 }
0x1d96   : > { %11196 = vmatprep.subr.msk.mxu1 %vm4976_vm3, %v8824_v27  ;;  %v18935_v27 = vld [vmem:[#allocation100_spill] sm:$0xff] }
0x1d97   : > { %11197 = vmatpush1.msk.msra.mxu1 %vm4976_vm3, %v8822_v17  ;;  %v18936_v17 = vld [vmem:[#allocation101_spill] sm:$0xff] }
0x1d98   : > { %11198 = vmatmul.mubr.msk.f32.vlgmr.msra.gmra.mrb[54].mxu1 %vm4972_vm4, %v11191_v24  ;;  %13778 = vmatprep.subr.bf16.mxu1 %v18928_v30  ;;  %v18937_v24 = vld [vmem:[#allocation102_spill] sm:$0xff]  ;;  %v18938_v30 = vld [vmem:[#allocation103_spill] sm:$0xff] }
0x1d99   : > { %13780 = vmatpush1.bf16.msra.mxu1 %v18929_v1  ;;  %9128 = vmatprep.mubr.f32.mxu1 %v17062_v18  ;;  %v18939_v1 = vld [vmem:[#allocation104_spill] sm:$0xff] }
0x1d9a   : > { %13782 = vmatprep.subr.bf16.mxu1 %v18930_v42  ;;  %v18941_v42 = vld [vmem:[#allocation106_spill] sm:$0xff] }
0x1d9d   : > { %13784 = vmatpush1.bf16.msra.mxu1 %v18931_v21  ;;  %v18942_v21 = vld [vmem:[#allocation107_spill] sm:$0xff] }
0x1d9e   : > { %13786 = vmatprep.subr.bf16.mxu1 %v18932_v51  ;;  %v18943_v51 = vld [vmem:[#allocation108_spill] sm:$0xff] }
0x1da1   : > { %13788 = vmatpush1.bf16.msra.mxu1 %v18933_v63  ;;  %v18944_v63 = vld [vmem:[#allocation109_spill] sm:$0xff] }
0x1da2   : > { %13790 = vmatprep.subr.bf16.mxu1 %v18934_v40  ;;  %v18945_v40 = vld [vmem:[#allocation110_spill] sm:$0xff] }
0x1da5   : > { %13792 = vmatpush1.bf16.msra.mxu1 %v18935_v27  ;;  %v18946_v27 = vld [vmem:[#allocation111_spill] sm:$0xff] }
0x1da6   : > { %13794 = vmatprep.subr.bf16.mxu1 %v18936_v17  ;;  %v18947_v17 = vld [vmem:[#allocation112_spill] sm:$0xff] }
0x1da9   : > { %13796 = vmatpush1.bf16.msra.mxu1 %v18937_v24  ;;  %v18948_v24 = vld [vmem:[#allocation113_spill] sm:$0xff] }
0x1daa   : > { %13798 = vmatprep.subr.bf16.mxu1 %v18938_v30  ;;  %v18949_v30 = vld [vmem:[#allocation114_spill] sm:$0xff] }
0x1dad   : > { %13800 = vmatpush1.bf16.msra.mxu1 %v18939_v1  ;;  %v18950_v1 = vld [vmem:[#allocation115_spill] sm:$0xff] }
0x1dae   : > { %13802 = vmatprep.subr.bf16.mxu1 %v18940_v41  ;;  %v18951_v41 = vld [vmem:[#allocation116_spill] sm:$0xff] }
0x1db1   : > { %13804 = vmatpush1.bf16.msra.mxu1 %v18941_v42  ;;  %v18952_v42 = vld [vmem:[#allocation117_spill] sm:$0xff] }
0x1db2   : > { %13806 = vmatprep.subr.bf16.mxu1 %v18942_v21  ;;  %v18953_v21 = vld [vmem:[#allocation118_spill] sm:$0xff] }
0x1db5   : > { %13808 = vmatpush1.bf16.msra.mxu1 %v18943_v51  ;;  %v18954_v51 = vld [vmem:[#allocation119_spill] sm:$0xff] }
0x1db6   : > { %13810 = vmatprep.subr.bf16.mxu1 %v18944_v63  ;;  %v18955_v63 = vld [vmem:[#allocation120_spill] sm:$0xff] }
0x1db9   : > { %13812 = vmatpush1.bf16.msra.mxu1 %v18945_v40  ;;  %v18956_v40 = vld [vmem:[#allocation121_spill] sm:$0xff] }
0x1dba   : > { %13814 = vmatprep.subr.bf16.mxu1 %v18946_v27  ;;  %v18957_v27 = vld [vmem:[#allocation122_spill] sm:$0xff] }
0x1dbd   : > { %13816 = vmatpush1.bf16.msra.mxu1 %v18947_v17  ;;  %v18958_v17 = vld [vmem:[#allocation123_spill] sm:$0xff] }
0x1dbe   : > { %13818 = vmatprep.subr.bf16.mxu1 %v18948_v24  ;;  %v18959_v24 = vld [vmem:[#allocation124_spill] sm:$0xff] }
0x1dc1   : > { %13820 = vmatpush1.bf16.msra.mxu1 %v18949_v30  ;;  %v11200_v30 = vld [vmem:[%s18758_s21 + $0xc] sm:$0xf] }
0x1dc2   : > { %13822 = vmatprep.subr.bf16.mxu1 %v18950_v1 }
0x1dc5   : > { %13824 = vmatpush1.bf16.msra.mxu1 %v18951_v41 }
0x1dc6   : > { %13826 = vmatprep.subr.bf16.mxu1 %v18952_v42  ;;  %v18961_v42 = vld [vmem:[#allocation126_spill] sm:$0xff] }
0x1dc9   : > { %13828 = vmatpush1.bf16.msra.mxu1 %v18953_v21  ;;  %v18962_v21 = vld [vmem:[#allocation127_spill] sm:$0xff] }
0x1dca   : > { %13830 = vmatprep.subr.bf16.mxu1 %v18954_v51  ;;  %v18963_v51 = vld [vmem:[#allocation128_spill] sm:$0xff] }
0x1dcd   : > { %13832 = vmatpush1.bf16.msra.mxu1 %v18955_v63  ;;  %v18964_v63 = vld [vmem:[#allocation129_spill] sm:$0xff] }
0x1dce   : > { %13834 = vmatprep.subr.bf16.mxu1 %v18956_v40  ;;  %v18965_v40 = vld [vmem:[#allocation131_spill] sm:$0xff] }
0x1dd1   : > { %13836 = vmatpush1.bf16.msra.mxu1 %v18957_v27  ;;  %v18966_v27 = vld [vmem:[#allocation132_spill] sm:$0xff] }
0x1dd2   : > { %13838 = vmatprep.subr.bf16.mxu1 %v18958_v17  ;;  %v18967_v17 = vld [vmem:[#allocation135_spill] sm:$0xff] }
0x1dd5   : > { %13840 = vmatpush1.bf16.msra.mxu1 %v18959_v24  ;;  %v18968_v24 = vld [vmem:[#allocation136_spill] sm:$0xff] }
0x1dd6   : > { %11201 = vmatprep.subr.msk.mxu1 %vm4976_vm3, %v17344_v52  ;;  %v11199_v52 = vld [vmem:[%s18764_s29 + $0xc] sm:$0xf] }
0x1dd8   : > { %9129 = vmatmul.mubr.f32.vlgmr.msra.gmra.mrb[60].mxu1 %v17051_v62 }
0x1dd9   : > { %11202 = vmatpush1.msk.msra.mxu1 %vm4976_vm3, %v17342_v32  ;;  %9283 = vmatprep.mubr.f32.mxu1 %v18400_v60  ;;  %v18960_v32 = vld [vmem:[#allocation125_spill] sm:$0xff] }
0x1ddc   : > { %11203 = vmatmul.mubr.msk.f32.vlgmr.msra.gmra.mrb[54].mxu1 %vm4972_vm4, %v11200_v30  ;;  %v18969_v30 = vld [vmem:[#allocation137_spill] sm:$0xff] }
0x1ddd   : > { %9363 = vmatprep.mubr.f32.mxu1 %v18400_v60 }
0x1eab   : > { %v9130_v1 = vpop.f32.mrb[60].mxu1 }
0x1eac   : > { %v9132_v41 = vpop.f32.mrb[61].mxu1 }
0x1ead   : > { %11204 = vmatprep.subr.msk.mxu1 %vm4976_vm3, %v9132_v41  ;;  %v18996_v41 = vld [vmem:[#allocation190_spill] sm:$0xff] }
0x1eae   : > { %11205 = vmatpush1.msk.msra.mxu1 %vm4976_vm3, %v9130_v1 }
0x1eaf   : > { %11206 = vmatmul.mubr.msk.f32.vlgmr.msra.gmra.mrb[54].mxu1 %vm4972_vm4, %v11199_v52  ;;  %13906 = vmatprep.subr.bf16.mxu1 %v18960_v32  ;;  %v18997_v52 = vld [vmem:[#allocation191_spill] sm:$0xff]  ;;  %v18998_v32 = vld [vmem:[#allocation192_spill] sm:$0xff] }
0x1eb0   : > { %13908 = vmatpush1.bf16.msra.mxu1 %v18961_v42  ;;  %9436 = vmatprep.mubr.f32.mxu1 %v17062_v18  ;;  %v18999_v42 = vld [vmem:[#allocation193_spill] sm:$0xff] }
0x1eb1   : > { %13910 = vmatprep.subr.bf16.mxu1 %v18962_v21  ;;  %v19000_v21 = vld [vmem:[#allocation194_spill] sm:$0xff] }
0x1eb4   : > { %13912 = vmatpush1.bf16.msra.mxu1 %v18963_v51  ;;  %v19001_v51 = vld [vmem:[#allocation195_spill] sm:$0xff] }
0x1eb5   : > { %13914 = vmatprep.subr.bf16.mxu1 %v18964_v63  ;;  %v19002_v63 = vld [vmem:[#allocation196_spill] sm:$0xff] }
0x1eb8   : > { %13916 = vmatpush1.bf16.msra.mxu1 %v18752_v23 }
0x1eb9   : > { %13918 = vmatprep.subr.bf16.mxu1 %v18965_v40  ;;  %v19003_v40 = vld [vmem:[#allocation197_spill] sm:$0xff] }
0x1ebc   : > { %13920 = vmatpush1.bf16.msra.mxu1 %v18966_v27  ;;  %v19004_v27 = vld [vmem:[#allocation198_spill] sm:$0xff] }
0x1ebd   : > { %13922 = vmatprep.subr.bf16.mxu1 %v18755_v6 }
0x1ec0   : > { %13924 = vmatpush1.bf16.msra.mxu1 %v18756_v46  ;;  %v18971_v46 = vld [vmem:[#allocation163_spill] sm:$0xff] }
0x1ec1   : > { %13926 = vmatprep.subr.bf16.mxu1 %v18967_v17  ;;  %v19005_v17 = vld [vmem:[#allocation199_spill] sm:$0xff] }
0x1ec4   : > { %13928 = vmatpush1.bf16.msra.mxu1 %v18968_v24  ;;  %v19006_v24 = vld [vmem:[#allocation200_spill] sm:$0xff] }
0x1ec5   : > { %13930 = vmatprep.subr.bf16.mxu1 %v18969_v30  ;;  %v19007_v30 = vld [vmem:[#allocation201_spill] sm:$0xff] }
0x1ec8   : > { %13932 = vmatpush1.bf16.msra.mxu1 %v18761_v45  ;;  %v11208_v45 = vld [vmem:[%s18758_s21 + $0x10] sm:$0xf] }
0x1ec9   : > { %13934 = vmatprep.subr.bf16.mxu1 %v18762_v19  ;;  %v18970_v19 = vld [vmem:[#allocation162_spill] sm:$0xff] }
0x1ecc   : > { %13936 = vmatpush1.bf16.msra.mxu1 %v18765_v15  ;;  %v18974_v15 = vld [vmem:[#allocation168_spill] sm:$0xff] }
0x1ecd   : > { %13938 = vmatprep.subr.bf16.mxu1 %v18766_v54  ;;  %v18972_v54 = vld [vmem:[#allocation166_spill] sm:$0xff] }
0x1ed0   : > { %13940 = vmatpush1.bf16.msra.mxu1 %v18767_v36  ;;  %v18975_v36 = vld [vmem:[#allocation169_spill] sm:$0xff] }
0x1ed1   : > { %13942 = vmatprep.subr.bf16.mxu1 %v18768_v11  ;;  %v18976_v11 = vld [vmem:[#allocation170_spill] sm:$0xff] }
0x1ed4   : > { %13944 = vmatpush1.bf16.msra.mxu1 %v18769_v43  ;;  %v18977_v43 = vld [vmem:[#allocation171_spill] sm:$0xff] }
0x1ed5   : > { %13946 = vmatprep.subr.bf16.mxu1 %v18770_v47  ;;  %v18978_v47 = vld [vmem:[#allocation172_spill] sm:$0xff] }
0x1ed8   : > { %13948 = vmatpush1.bf16.msra.mxu1 %v18771_v37  ;;  %v18979_v37 = vld [vmem:[#allocation173_spill] sm:$0xff] }
0x1ed9   : > { %13950 = vmatprep.subr.bf16.mxu1 %v18772_v22  ;;  %v18980_v22 = vld [vmem:[#allocation174_spill] sm:$0xff] }
0x1edc   : > { %13952 = vmatpush1.bf16.msra.mxu1 %v18773_v50  ;;  %v18981_v50 = vld [vmem:[#allocation175_spill] sm:$0xff] }
0x1edd   : > { %13954 = vmatprep.subr.bf16.mxu1 %v18774_v2  ;;  %v18982_v2 = vld [vmem:[#allocation176_spill] sm:$0xff] }
0x1ee0   : > { %13956 = vmatpush1.bf16.msra.mxu1 %v18775_v20  ;;  %v18983_v20 = vld [vmem:[#allocation177_spill] sm:$0xff] }
0x1ee1   : > { %13958 = vmatprep.subr.bf16.mxu1 %v18776_v39  ;;  %v18984_v39 = vld [vmem:[#allocation178_spill] sm:$0xff] }
0x1ee4   : > { %13960 = vmatpush1.bf16.msra.mxu1 %v18777_v56  ;;  %v18985_v56 = vld [vmem:[#allocation179_spill] sm:$0xff] }
0x1ee5   : > { %13962 = vmatprep.subr.bf16.mxu1 %v18778_v28  ;;  %v18986_v28 = vld [vmem:[#allocation180_spill] sm:$0xff] }
0x1ee8   : > { %13964 = vmatpush1.bf16.msra.mxu1 %v18779_v4  ;;  %v18987_v4 = vld [vmem:[#allocation181_spill] sm:$0xff] }
0x1ee9   : > { %13966 = vmatprep.subr.bf16.mxu1 %v18780_v0  ;;  %v18988_v0 = vld [vmem:[#allocation182_spill] sm:$0xff] }
0x1eec   : > { %13968 = vmatpush1.bf16.msra.mxu1 %v18781_v14  ;;  %v18989_v14 = vld [vmem:[#allocation183_spill] sm:$0xff] }
0x1eed   : > { %11209 = vmatprep.subr.msk.mxu1 %vm4976_vm3, %v17382_v9  ;;  %v11207_v9 = vld [vmem:[%s18764_s29 + $0x10] sm:$0xf] }
0x1eef   : > { %9437 = vmatmul.mubr.f32.vlgmr.msra.gmra.mrb[62].mxu1 %v17051_v62 }
0x1ef0   : > { %11210 = vmatpush1.msk.msra.mxu1 %vm4976_vm3, %v17380_v31  ;;  %9591 = vmatprep.mubr.f32.mxu1 %v18400_v60  ;;  %v18973_v31 = vld [vmem:[#allocation167_spill] sm:$0xff] }
0x1ef3   : > { %11211 = vmatmul.mubr.msk.f32.vlgmr.msra.gmra.mrb[54].mxu1 %vm4972_vm4, %v11208_v45  ;;  %v19008_v45 = vld [vmem:[#allocation202_spill] sm:$0xff] }
0x1ef4   : > { %9671 = vmatprep.mubr.f32.mxu1 %v18400_v60 }
0x1fc2   : > { %v9438_v23 = vpop.f32.mrb[62].mxu1 }
0x1fc3   : > { %v9440_v6 = vpop.f32.mrb[63].mxu1 }
0x1fc4   : > { %11212 = vmatprep.subr.msk.mxu1 %vm4976_vm3, %v9440_v6  ;;  %v19010_v6 = vld [vmem:[#allocation204_spill] sm:$0xff] }
0x1fc5   : > { %11213 = vmatpush1.msk.msra.mxu1 %vm4976_vm3, %v9438_v23  ;;  %v19009_v23 = vld [vmem:[#allocation203_spill] sm:$0xff] }
0x1fc6   : > { %11214 = vmatmul.mubr.msk.f32.vlgmr.msra.gmra.mrb[54].mxu1 %vm4972_vm4, %v11207_v9  ;;  %14034 = vmatprep.subr.bf16.mxu1 %v18782_v57  ;;  %v18990_v57 = vld [vmem:[#allocation184_spill] sm:$0xff]  ;;  %v19011_v9 = vld [vmem:[#allocation205_spill] sm:$0xff] }
0x1fc7   : > { %14036 = vmatpush1.bf16.msra.mxu1 %v18783_v26  ;;  %9744 = vmatprep.mubr.f32.mxu1 %v17062_v18  ;;  %v18991_v26 = vld [vmem:[#allocation185_spill] sm:$0xff] }
0x1fc8   : > { %14038 = vmatprep.subr.bf16.mxu1 %v18784_v53  ;;  %v18992_v53 = vld [vmem:[#allocation186_spill] sm:$0xff] }
0x1fcb   : > { %14040 = vmatpush1.bf16.msra.mxu1 %v18785_v58  ;;  %v18993_v58 = vld [vmem:[#allocation187_spill] sm:$0xff] }
0x1fcc   : > { %14042 = vmatprep.subr.bf16.mxu1 %v18786_v5  ;;  %v18994_v5 = vld [vmem:[#allocation188_spill] sm:$0xff] }
0x1fcf   : > { %14044 = vmatpush1.bf16.msra.mxu1 %v18970_v19  ;;  %v19012_v19 = vld [vmem:[#allocation206_spill] sm:$0xff] }
0x1fd0   : > { %14046 = vmatprep.subr.bf16.mxu1 %v18971_v46  ;;  %v19013_v46 = vld [vmem:[#allocation207_spill] sm:$0xff] }
0x1fd3   : > { %14048 = vmatpush1.bf16.msra.mxu1 %v18789_v38  ;;  %v11216_v38 = vld [vmem:[%s18758_s21 + $0x14] sm:$0xf] }
0x1fd4   : > { %14050 = vmatprep.subr.bf16.mxu1 %v18790_v49 }
0x1fd7   : > { %14052 = vmatpush1.bf16.msra.mxu1 %v18972_v54  ;;  %v19014_v54 = vld [vmem:[#allocation208_spill] sm:$0xff] }
0x1fd8   : > { %14054 = vmatprep.subr.bf16.mxu1 %v18973_v31  ;;  %v19015_v31 = vld [vmem:[#allocation209_spill] sm:$0xff] }
0x1fdb   : > { %14056 = vmatpush1.bf16.msra.mxu1 %v18974_v15  ;;  %v19016_v15 = vld [vmem:[#allocation210_spill] sm:$0xff] }
0x1fdc   : > { %14058 = vmatprep.subr.bf16.mxu1 %v18975_v36  ;;  %v19017_v36 = vld [vmem:[#allocation211_spill] sm:$0xff] }
0x1fdf   : > { %14060 = vmatpush1.bf16.msra.mxu1 %v18976_v11  ;;  %v19018_v11 = vld [vmem:[#allocation212_spill] sm:$0xff] }
0x1fe0   : > { %14062 = vmatprep.subr.bf16.mxu1 %v18977_v43  ;;  %v19019_v43 = vld [vmem:[#allocation213_spill] sm:$0xff] }
0x1fe3   : > { %14064 = vmatpush1.bf16.msra.mxu1 %v18978_v47  ;;  %v19020_v47 = vld [vmem:[#allocation214_spill] sm:$0xff] }
0x1fe4   : > { %14066 = vmatprep.subr.bf16.mxu1 %v18979_v37  ;;  %v19021_v37 = vld [vmem:[#allocation215_spill] sm:$0xff] }
0x1fe7   : > { %14068 = vmatpush1.bf16.msra.mxu1 %v18980_v22  ;;  %v19022_v22 = vld [vmem:[#allocation216_spill] sm:$0xff] }
0x1fe8   : > { %14070 = vmatprep.subr.bf16.mxu1 %v18981_v50  ;;  %v19023_v50 = vld [vmem:[#allocation217_spill] sm:$0xff] }
0x1feb   : > { %14072 = vmatpush1.bf16.msra.mxu1 %v18982_v2  ;;  %v19024_v2 = vld [vmem:[#allocation218_spill] sm:$0xff] }
0x1fec   : > { %14074 = vmatprep.subr.bf16.mxu1 %v18983_v20  ;;  %v19025_v20 = vld [vmem:[#allocation219_spill] sm:$0xff] }
0x1fef   : > { %14076 = vmatpush1.bf16.msra.mxu1 %v18984_v39  ;;  %v19026_v39 = vld [vmem:[#allocation220_spill] sm:$0xff] }
0x1ff0   : > { %14078 = vmatprep.subr.bf16.mxu1 %v18985_v56  ;;  %v11224_v56 = vld [vmem:[%s18758_s21 + $0x18] sm:$0xf] }
0x1ff3   : > { %14080 = vmatpush1.bf16.msra.mxu1 %v18986_v28 }
0x1ff4   : > { %14082 = vmatprep.subr.bf16.mxu1 %v18987_v4 }
0x1ff7   : > { %14084 = vmatpush1.bf16.msra.mxu1 %v18988_v0  ;;  %v19028_v0 = vld [vmem:[#allocation222_spill] sm:$0xff] }
0x1ff8   : > { %14086 = vmatprep.subr.bf16.mxu1 %v18989_v14  ;;  %v19029_v14 = vld [vmem:[#allocation223_spill] sm:$0xff] }
0x1ffb   : > { %14088 = vmatpush1.bf16.msra.mxu1 %v18990_v57  ;;  %v19030_v57 = vld [vmem:[#allocation224_spill] sm:$0xff] }
0x1ffc   : > { %14090 = vmatprep.subr.bf16.mxu1 %v18991_v26  ;;  %v19031_v26 = vld [vmem:[#allocation225_spill] sm:$0xff] }
0x1fff   : > { %14092 = vmatpush1.bf16.msra.mxu1 %v18992_v53  ;;  %v19032_v53 = vld [vmem:[#allocation226_spill] sm:$0xff] }
0x2000   : > { %14094 = vmatprep.subr.bf16.mxu1 %v18993_v58  ;;  %v19033_v58 = vld [vmem:[#allocation227_spill] sm:$0xff] }
0x2003   : > { %14096 = vmatpush1.bf16.msra.mxu1 %v18994_v5  ;;  %v19034_v5 = vld [vmem:[#allocation228_spill] sm:$0xff] }
0x2004   : > { %11217 = vmatprep.subr.msk.mxu1 %vm4976_vm3, %v17431_v29  ;;  %v11215_v29 = vld [vmem:[%s18764_s29 + $0x14] sm:$0xf] }
0x2006   : > { %9745 = vmatmul.mubr.f32.vlgmr.msra.gmra.mrb[64].mxu1 %v17051_v62 }
0x2007   : > { %11218 = vmatpush1.msk.msra.mxu1 %vm4976_vm3, %v17429_v34  ;;  %9899 = vmatprep.mubr.f32.mxu1 %v18400_v60  ;;  %v18995_v34 = vld [vmem:[#allocation189_spill] sm:$0xff] }
0x200a   : > { %11219 = vmatmul.mubr.msk.f32.vlgmr.msra.gmra.mrb[54].mxu1 %vm4972_vm4, %v11216_v38  ;;  %v19035_v38 = vld [vmem:[#allocation229_spill] sm:$0xff] }
0x200b   : > { %9979 = vmatprep.mubr.f32.mxu1 %v18400_v60 }
0x20d9   : > { %v9746_v49 = vpop.f32.mrb[64].mxu1 }
0x20da   : > { %v9748_v1 = vpop.f32.mrb[65].mxu1 }
0x20db   : > { %11220 = vmatprep.subr.msk.mxu1 %vm4976_vm3, %v9748_v1  ;;  %v19037_v1 = vld [vmem:[#allocation231_spill] sm:$0xff] }
0x20dc   : > { %11221 = vmatpush1.msk.msra.mxu1 %vm4976_vm3, %v9746_v49  ;;  %v19036_v49 = vld [vmem:[#allocation230_spill] sm:$0xff] }
0x20dd   : > { %11222 = vmatmul.mubr.msk.f32.vlgmr.msra.gmra.mrb[54].mxu1 %vm4972_vm4, %v11215_v29  ;;  %14162 = vmatprep.subr.bf16.mxu1 %v18995_v34  ;;  %v19038_v29 = vld [vmem:[#allocation232_spill] sm:$0xff]  ;;  %v19040_v34 = vld [vmem:[#allocation234_spill] sm:$0xff] }
0x20de   : > { %14164 = vmatpush1.bf16.msra.mxu1 %v18996_v41  ;;  %10052 = vmatprep.mubr.f32.mxu1 %v17062_v18  ;;  %v19041_v41 = vld [vmem:[#allocation235_spill] sm:$0xff] }
0x20df   : > { %14166 = vmatprep.subr.bf16.mxu1 %v18997_v52  ;;  %v19042_v52 = vld [vmem:[#allocation236_spill] sm:$0xff] }
0x20e2   : > { %14168 = vmatpush1.bf16.msra.mxu1 %v18998_v32  ;;  %v19043_v32 = vld [vmem:[#allocation237_spill] sm:$0xff] }
0x20e3   : > { %14170 = vmatprep.subr.bf16.mxu1 %v18999_v42  ;;  %v19044_v42 = vld [vmem:[#allocation238_spill] sm:$0xff] }
0x20e6   : > { %14172 = vmatpush1.bf16.msra.mxu1 %v19000_v21  ;;  %v19045_v21 = vld [vmem:[#allocation239_spill] sm:$0xff] }
0x20e7   : > { %14174 = vmatprep.subr.bf16.mxu1 %v19001_v51  ;;  %v19046_v51 = vld [vmem:[#allocation240_spill] sm:$0xff] }
0x20ea   : > { %14176 = vmatpush1.bf16.msra.mxu1 %v19002_v63  ;;  %v19047_v63 = vld [vmem:[#allocation241_spill] sm:$0xff] }
0x20eb   : > { %14178 = vmatprep.subr.bf16.mxu1 %v19003_v40  ;;  %v19058_v40 = vld [vmem:[#allocation263_spill] sm:$0xff] }
0x20ee   : > { %14180 = vmatpush1.bf16.msra.mxu1 %v19004_v27  ;;  %v19059_v27 = vld [vmem:[#allocation264_spill] sm:$0xff] }
0x20ef   : > { %14182 = vmatprep.subr.bf16.mxu1 %v19005_v17  ;;  %v19060_v17 = vld [vmem:[#allocation265_spill] sm:$0xff] }
0x20f2   : > { %14184 = vmatpush1.bf16.msra.mxu1 %v19006_v24  ;;  %v19061_v24 = vld [vmem:[#allocation266_spill] sm:$0xff] }
0x20f3   : > { %14186 = vmatprep.subr.bf16.mxu1 %v19007_v30  ;;  %v19062_v30 = vld [vmem:[#allocation267_spill] sm:$0xff] }
0x20f6   : > { %14188 = vmatpush1.bf16.msra.mxu1 %v19008_v45  ;;  %v19063_v45 = vld [vmem:[#allocation268_spill] sm:$0xff] }
0x20f7   : > { %14190 = vmatprep.subr.bf16.mxu1 %v19009_v23  ;;  %v19064_v23 = vld [vmem:[#allocation269_spill] sm:$0xff] }
0x20fa   : > { %14192 = vmatpush1.bf16.msra.mxu1 %v19010_v6  ;;  %v19065_v6 = vld [vmem:[#allocation270_spill] sm:$0xff] }
0x20fb   : > { %14194 = vmatprep.subr.bf16.mxu1 %v19011_v9  ;;  %v19066_v9 = vld [vmem:[#allocation271_spill] sm:$0xff] }
0x20fe   : > { %14196 = vmatpush1.bf16.msra.mxu1 %v19012_v19  ;;  %v19067_v19 = vld [vmem:[#allocation272_spill] sm:$0xff] }
0x20ff   : > { %14198 = vmatprep.subr.bf16.mxu1 %v19013_v46  ;;  %v19068_v46 = vld [vmem:[#allocation273_spill] sm:$0xff] }
0x2102   : > { %14200 = vmatpush1.bf16.msra.mxu1 %v19014_v54  ;;  %v19069_v54 = vld [vmem:[#allocation274_spill] sm:$0xff] }
0x2103   : > { %14202 = vmatprep.subr.bf16.mxu1 %v19015_v31  ;;  %v19070_v31 = vld [vmem:[#allocation275_spill] sm:$0xff] }
0x2106   : > { %14204 = vmatpush1.bf16.msra.mxu1 %v19016_v15  ;;  %v19071_v15 = vld [vmem:[#allocation276_spill] sm:$0xff] }
0x2107   : > { %14206 = vmatprep.subr.bf16.mxu1 %v19017_v36  ;;  %v19072_v36 = vld [vmem:[#allocation277_spill] sm:$0xff] }
0x210a   : > { %14208 = vmatpush1.bf16.msra.mxu1 %v19018_v11  ;;  %v19073_v11 = vld [vmem:[#allocation278_spill] sm:$0xff] }
0x210b   : > { %14210 = vmatprep.subr.bf16.mxu1 %v19019_v43  ;;  %v19074_v43 = vld [vmem:[#allocation279_spill] sm:$0xff] }
0x210e   : > { %14212 = vmatpush1.bf16.msra.mxu1 %v19020_v47  ;;  %v19075_v47 = vld [vmem:[#allocation280_spill] sm:$0xff] }
0x210f   : > { %14214 = vmatprep.subr.bf16.mxu1 %v19021_v37  ;;  %v19076_v37 = vld [vmem:[#allocation281_spill] sm:$0xff] }
0x2112   : > { %14216 = vmatpush1.bf16.msra.mxu1 %v19022_v22  ;;  %v19077_v22 = vld [vmem:[#allocation282_spill] sm:$0xff] }
0x2113   : > { %14218 = vmatprep.subr.bf16.mxu1 %v19023_v50  ;;  %v19078_v50 = vld [vmem:[#allocation283_spill] sm:$0xff] }
0x2116   : > { %14220 = vmatpush1.bf16.msra.mxu1 %v19024_v2  ;;  %v19079_v2 = vld [vmem:[#allocation284_spill] sm:$0xff] }
0x2117   : > { %14222 = vmatprep.subr.bf16.mxu1 %v19025_v20  ;;  %v19080_v20 = vld [vmem:[#allocation285_spill] sm:$0xff] }
0x211a   : > { %14224 = vmatpush1.bf16.msra.mxu1 %v19026_v39  ;;  %v19081_v39 = vld [vmem:[#allocation19_spill] sm:$0xff] }
0x211b   : > { %11225 = vmatprep.subr.msk.mxu1 %vm4976_vm3, %v17457_v25  ;;  %v11223_v25 = vld [vmem:[%s18764_s29 + $0x18] sm:$0xf] }
0x211d   : > { %10053 = vmatmul.mubr.f32.vlgmr.msra.gmra.mrb[66].mxu1 %v17051_v62 }
0x211e   : > { %11226 = vmatpush1.msk.msra.mxu1 %vm4976_vm3, %v17455_v48  ;;  %10207 = vmatprep.mubr.f32.mxu1 %v18400_v60  ;;  %v19027_v48 = vld [vmem:[#allocation221_spill] sm:$0xff] }
0x2121   : > { %11227 = vmatmul.mubr.msk.f32.vlgmr.msra.gmra.mrb[54].mxu1 %vm4972_vm4, %v11224_v56 }
0x2122   : > { %10287 = vmatprep.mubr.f32.mxu1 %v18400_v60 }
0x21f0   : > { %v10054_v28 = vpop.f32.mrb[66].mxu1 }
0x21f1   : > { %v10056_v4 = vpop.f32.mrb[67].mxu1 }
0x21f2   : > { %11228 = vmatprep.subr.msk.mxu1 %vm4976_vm3, %v10056_v4  ;;  %v11240_v4 = vld [vmem:[%s18758_s21 + $0x20] sm:$0xf] }
0x21f3   : > { %11229 = vmatpush1.msk.msra.mxu1 %vm4976_vm3, %v10054_v28 }
0x21f4   : > { %11230 = vmatmul.mubr.msk.f32.vlgmr.msra.gmra.mrb[54].mxu1 %vm4972_vm4, %v11223_v25  ;;  %14290 = vmatprep.subr.bf16.mxu1 %v19027_v48  ;;  %v19082_v25 = vld [vmem:[#allocation21_spill] sm:$0xff]  ;;  %v19083_v48 = vld [vmem:[#allocation20_spill] sm:$0xff] }
0x21f5   : > { %14292 = vmatpush1.bf16.msra.mxu1 %v19028_v0  ;;  %10360 = vmatprep.mubr.f32.mxu1 %v17062_v18  ;;  %v19039_v18 = vld [vmem:[#allocation233_spill] sm:$0xff]  ;;  %v11239_v0 = vld [vmem:[%s18764_s29 + $0x20] sm:$0xf] }
0x21f6   : > { %14294 = vmatprep.subr.bf16.mxu1 %v19029_v14  ;;  %v8137_v14 = vpop.permute.xlu1 %8136 }
0x21f9   : > { %14296 = vmatpush1.bf16.msra.mxu1 %v19030_v57 }
0x21fa   : > { %14298 = vmatprep.subr.bf16.mxu1 %v19031_v26 }
0x21fd   : > { %14300 = vmatpush1.bf16.msra.mxu1 %v19032_v53 }
0x21fe   : > { %14302 = vmatprep.subr.bf16.mxu1 %v19033_v58 }
0x2201   : > { %14304 = vmatpush1.bf16.msra.mxu1 %v19034_v5 }
0x2202   : > { %14306 = vmatprep.subr.bf16.mxu1 %v19035_v38 }
0x2205   : > { %14308 = vmatpush1.bf16.msra.mxu1 %v19036_v49 }
0x2206   : > { %14310 = vmatprep.subr.bf16.mxu1 %v19037_v1 }
0x2209   : > { %14312 = vmatpush1.bf16.msra.mxu1 %v19038_v29 }
0x220a   : > { %14314 = vmatprep.subr.bf16.mxu1 %v19039_v18 }
0x220d   : > { %14316 = vmatpush1.bf16.msra.mxu1 %v19040_v34 }
0x220e   : > { %14318 = vmatprep.subr.bf16.mxu1 %v19041_v41 }
0x2211   : > { %14320 = vmatpush1.bf16.msra.mxu1 %v19042_v52 }
0x2212   : > { %14322 = vmatprep.subr.bf16.mxu1 %v19043_v32 }
0x2215   : > { %14324 = vmatpush1.bf16.msra.mxu1 %v19044_v42 }
0x2216   : > { %14326 = vmatprep.subr.bf16.mxu1 %v19045_v21 }
0x2219   : > { %14328 = vmatpush1.bf16.msra.mxu1 %v19046_v51 }
0x221a   : > { %14330 = vmatprep.subr.bf16.mxu1 %v19047_v63 }
0x221d   : > { %14332 = vmatpush1.bf16.msra.mxu1 %v18867_v59 }
0x221e   : > { %14334 = vmatprep.subr.bf16.mxu1 %v18868_v8  ;;  %v19054_v8 = vld [vmem:[#allocation259_spill] sm:$0xff] }
0x2221   : > { %14336 = vmatpush1.bf16.msra.mxu1 %v18869_v3  ;;  %v19051_v3 = vld [vmem:[#allocation256_spill] sm:$0xff] }
0x2222   : > { %14338 = vmatprep.subr.bf16.mxu1 %v18870_v35  ;;  %v11232_v35 = vld [vmem:[%s18758_s21 + $0x1c] sm:$0xf] }
0x2225   : > { %14340 = vmatpush1.bf16.msra.mxu1 %v18871_v61 }
0x2226   : > { %14342 = vmatprep.subr.bf16.mxu1 %v18872_v33  ;;  %v19049_v33 = vld [vmem:[#allocation255_spill] sm:$0xff] }
0x2229   : > { %14344 = vmatpush1.bf16.msra.mxu1 %v18873_v7  ;;  %v19055_v7 = vld [vmem:[#allocation260_spill] sm:$0xff] }
0x222a   : > { %14346 = vmatprep.subr.bf16.mxu1 %v18874_v16  ;;  %v19050_v16 = vld [vmem:[#allocation17_spill] sm:$0xff] }
0x222d   : > { %14348 = vmatpush1.bf16.msra.mxu1 %v18875_v44  ;;  %v19053_v44 = vld [vmem:[#allocation258_spill] sm:$0xff] }
0x222e   : > { %14350 = vmatprep.subr.bf16.mxu1 %v18876_v55  ;;  %v19052_v55 = vld [vmem:[#allocation257_spill] sm:$0xff] }
0x2231   : > { %14352 = vmatpush1.bf16.msra.mxu1 %v18877_v13  ;;  %v11231_v13 = vld [vmem:[%s18764_s29 + $0x1c] sm:$0xf] }
0x2232   : > { %11233 = vmatprep.subr.msk.mxu1 %vm4976_vm3, %v17466_v12  ;;  %v19057_v12 = vld [vmem:[#allocation262_spill] sm:$0xff] }
0x2234   : > { %10361 = vmatmul.mubr.f32.vlgmr.msra.gmra.mrb[68].mxu1 %v17051_v62  ;;  %v19048_v62 = vld [vmem:[#allocation254_spill] sm:$0xff] }
0x2235   : > { %11234 = vmatpush1.msk.msra.mxu1 %vm4976_vm3, %v17464_v10  ;;  %10515 = vmatprep.mubr.f32.mxu1 %v18400_v60  ;;  %v19056_v10 = vld [vmem:[#allocation261_spill] sm:$0xff] }
0x2238   : > { %11235 = vmatmul.mubr.msk.f32.vlgmr.msra.gmra.mrb[54].mxu1 %vm4972_vm4, %v11232_v35 }
0x2239   : > { %10595 = vmatprep.mubr.f32.mxu1 %v18400_v60 }
0x2307   : > { %v10362_v59 = vpop.f32.mrb[68].mxu1 }
0x2308   : > { %v10364_v61 = vpop.f32.mrb[69].mxu1 }
0x2309   : > { %11236 = vmatprep.subr.msk.mxu1 %vm4976_vm3, %v10364_v61 }
0x230a   : > { %11237 = vmatpush1.msk.msra.mxu1 %vm4976_vm3, %v10362_v59 }
0x230b   : > { %11238 = vmatmul.mubr.msk.f32.vlgmr.msra.gmra.mrb[54].mxu1 %vm4972_vm4, %v11231_v13  ;;  %14482 = vmatprep.subr.bf16.mxu1 %v19048_v62 }
0x230c   : > { %14484 = vmatpush1.bf16.msra.mxu1 %v19049_v33  ;;  %10741 = vmatprep.mubr.f32.mxu1 %v19050_v16 }
0x230d   : > { %14486 = vmatprep.subr.bf16.mxu1 %v19051_v3 }
0x2310   : > { %14488 = vmatpush1.bf16.msra.mxu1 %v19052_v55 }
0x2311   : > { %14490 = vmatprep.subr.bf16.mxu1 %v19053_v44 }
0x2314   : > { %14492 = vmatpush1.bf16.msra.mxu1 %v19054_v8 }
0x2315   : > { %14494 = vmatprep.subr.bf16.mxu1 %v19055_v7 }
0x2318   : > { %14496 = vmatpush1.bf16.msra.mxu1 %v19056_v10 }
0x2319   : > { %14498 = vmatprep.subr.bf16.mxu1 %v19057_v12 }
0x231c   : > { %14500 = vmatpush1.bf16.msra.mxu1 %v19058_v40 }
0x231d   : > { %14502 = vmatprep.subr.bf16.mxu1 %v19059_v27 }
0x2320   : > { %14504 = vmatpush1.bf16.msra.mxu1 %v19060_v17 }
0x2321   : > { %14506 = vmatprep.subr.bf16.mxu1 %v19061_v24 }
0x2324   : > { %14508 = vmatpush1.bf16.msra.mxu1 %v19062_v30 }
0x2325   : > { %14510 = vmatprep.subr.bf16.mxu1 %v19063_v45 }
0x2328   : > { %14512 = vmatpush1.bf16.msra.mxu1 %v19064_v23 }
0x2329   : > { %14514 = vmatprep.subr.bf16.mxu1 %v19065_v6 }
0x232c   : > { %14516 = vmatpush1.bf16.msra.mxu1 %v19066_v9 }
0x232d   : > { %14518 = vmatprep.subr.bf16.mxu1 %v19067_v19 }
0x2330   : > { %14520 = vmatpush1.bf16.msra.mxu1 %v19068_v46 }
0x2331   : > { %14522 = vmatprep.subr.bf16.mxu1 %v19069_v54 }
0x2334   : > { %14524 = vmatpush1.bf16.msra.mxu1 %v19070_v31 }
0x2335   : > { %14526 = vmatprep.subr.bf16.mxu1 %v19071_v15 }
0x2338   : > { %14528 = vmatpush1.bf16.msra.mxu1 %v19072_v36 }
0x2339   : > { %14530 = vmatprep.subr.bf16.mxu1 %v19073_v11 }
0x233c   : > { %14532 = vmatpush1.bf16.msra.mxu1 %v19074_v43 }
0x233d   : > { %14534 = vmatprep.subr.bf16.mxu1 %v19075_v47 }
0x2340   : > { %14536 = vmatpush1.bf16.msra.mxu1 %v19076_v37 }
0x2341   : > { %14538 = vmatprep.subr.bf16.mxu1 %v19077_v22 }
0x2344   : > { %14540 = vmatpush1.bf16.msra.mxu1 %v19078_v50 }
0x2345   : > { %14542 = vmatprep.subr.bf16.mxu1 %v19079_v2 }
0x2348   : > { %14544 = vmatpush1.bf16.msra.mxu1 %v19080_v20 }
0x234b   : > { %10742 = vmatmul.mubr.f32.vlgmr.msra.gmra.mrb[70].mxu1 %v19081_v39 }
0x234c   : > { %10823 = vmatprep.mubr.f32.mxu1 %v18400_v60 }
0x241e   : > { %v10743_v56 = vpop.f32.mrb[70].mxu1 }
0x241f   : > { %v10745_v28 = vpop.f32.mrb[71].mxu1 }
0x2420   : > { %11241 = vmatprep.subr.msk.mxu1 %vm4976_vm3, %v10745_v28 }
0x2421   : > { %11242 = vmatpush1.msk.msra.mxu1 %vm4976_vm3, %v10743_v56 }
0x2422   : > { %11243 = vmatmul.mubr.msk.f32.vlgmr.msra.gmra.mrb[54].mxu1 %vm4972_vm4, %v11240_v4  ;;  %11244 = vmatprep.subr.msk.mxu1 %vm4976_vm3, %v19082_v25 }
0x2423   : > { %11245 = vmatpush1.msk.msra.mxu1 %vm4976_vm3, %v19083_v48  ;;  %10903 = vmatprep.mubr.f32.mxu1 %v18400_v60 }
0x242a   : > { %11246 = vmatmul.mubr.msk.f32.vlgmr.msra.gmra.mrb[54].mxu1 %vm4972_vm4, %v11239_v0 }
0x24fd   : > { %v10905_v57 = vpop.f32.mrb[54].mxu1 }
0x24fe   : > { %v14553_v26 = vadd.f32 %v10905_v57, %v8137_v14  ;;  %v10907_v53 = vpop.f32.mrb[55].mxu1 }
0x24ff   : > { %v14554_v58 = vadd.f32 %v10907_v53, %v8137_v14 }
0x2500   : > { %v10912_v5 = vmax.f32 %v14553_v26, 0.0 }
0x2501   : > { %v10913_v38 = vmax.f32 %v14554_v58, 0.0 }
0x2503   : > { %v10916_v49 = vcombine.low %v10912_v5, %v10913_v38 }
0x2505   : > { %10918 = vst [vmem:[%s570_s20] sm:$0xff] %v10916_v49 }
0x2506 PF: > { %s19085_s27 = sld [smem:[#allocation12_spill]] }
0x250c   : > { %s28_s18 = sadd.s32 1, %s19085_s27  }
0x250d   : > { %p25_p1 = scmp.ge.s32.totalorder %s28_s18, 4  }
0x250f   :  { %27 = sbr.rel (!%p25_p1) target bundleno = 7 (0x7), region = 202 }
0x2516   :  { %10940 = vsyncpa [#allocation3], 1 }
0x2517   :  { %10942 = vsyncpa [#allocation3 + $0x1], 1 }
0x2518   :  { %10943 = vsyncpa [#allocation5], 1 }
0x2519   :  { %10944 = vsyncpa [#allocation8], 1 }

</bundles_post_ra>
